<compile_context>
chip_gen: v6e
topology: v6e:2x2x1
jax: 0.10.0
libtpu: 0.0.40
codegen_flags: <defaults>
</compile_context>

<pallas_src>
import functools

import jax
import jax.numpy as jnp
import numpy as np
from jax import lax
from jax.experimental import pallas as pl
from jax.experimental.pallas import tpu as pltpu


# ----------------------------- small helpers ---------------------------------

def _rot_up(x, k):
    """out[..., j] = x[..., (j + k) % N]  (lane rotation via slice + concat)."""
    return jnp.concatenate([x[..., k:], x[..., :k]], axis=-1)


def _rot_down(x, k):
    """out[..., j] = x[..., (j - k) % N]."""
    return jnp.concatenate([x[..., -k:], x[..., :-k]], axis=-1)


# ----------------------------- Pallas kernels --------------------------------

def _conv_relu_pool_kernel(x_ref, w_ref, b_ref, s_ref, o_ref, m_ref, *, group_rows):
    """Fused 3x3 conv (pad=1) + bias + ReLU + 2x2/2 maxpool for one image.

    x_ref : (H, Cin, W)        bf16  unpadded input rows (channels on sublanes)
    w_ref : (Cout, 9*Cin)      bf16  weights, contraction ordered (kw, kh, cin)
    b_ref : (Cout, 1)          f32   bias
    s_ref : (W, W//2)          bf16  even-column 0/1 selection matrix
    o_ref : (H//2*Cout, W//2)  bf16  pooled output, rows ordered (ph, cout)
    m_ref : (H//2*Cout, W)     bf16  scratch: H-pooled conv rows
    """
    H, cin, W = x_ref.shape
    cout = w_ref.shape[0]
    G = group_rows
    n_groups = H // G

    wmat = w_ref[...]                                   # (Cout, 9Cin) bf16
    bias = b_ref[...]                                   # (Cout, 1)    f32

    # Lane masks implementing the zero column padding of the +/-1 column shifts
    # (also kill the cross-row leaks at group-internal row boundaries).
    col = jax.lax.broadcasted_iota(jnp.int32, (1, G * W), 1) % W
    mask_l = (col != 0).astype(jnp.bfloat16)            # zero where w == 0
    mask_r = (col != W - 1).astype(jnp.bfloat16)        # zero where w == W-1

    def in_row(r):
        """Input row r as (Cin, W); rows -1 and H read back as zeros (pad folded in)."""
        rc = jnp.clip(r, 0, H - 1)
        valid = jnp.logical_and(r >= 0, r < H)
        row = x_ref[rc]
        return jnp.where(valid, row, jnp.zeros_like(row))

    def group_body(g, carry):
        r0 = g * G
        rows = [in_row(r0 + i - 1) for i in range(G + 2)]        # G+2 halo rows (Cin, W)
        # Per-kh slabs: the G group rows concatenated along lanes -> (3Cin, G*W),
        # ordered (kh, cin) on sublanes, (g, w) on lanes.
        center = jnp.concatenate(
            [jnp.concatenate(rows[kh:kh + G], axis=-1) for kh in range(3)],
            axis=0)
        left = _rot_down(center, 1) * mask_l                     # x[.., w-1]
        right = _rot_up(center, 1) * mask_r                      # x[.., w+1]
        patches = jnp.concatenate([left, center, right], axis=0)  # (9Cin, G*W) (kw,kh,cin)

        y = jnp.dot(wmat, patches, preferred_element_type=jnp.float32)  # (Cout, G*W)
        y = jnp.maximum(y + bias, 0.0)
        # H-pool: max of row pairs (2p, 2p+1); valid at even row blocks.
        hm = jnp.maximum(y, _rot_up(y, W)).astype(jnp.bfloat16)
        for p in range(G // 2):                                  # static, tiny
            dst = pl.multiple_of((g * (G // 2) + p) * cout, cout)
            m_ref[pl.ds(dst, cout), :] = hm[:, 2 * p * W:(2 * p + 1) * W]
        return carry

    lax.fori_loop(0, n_groups, group_body, 0)

    # W-pool over the whole image: shift+max, then one exact 0/1 selection
    # matmul gathering the even columns; single full-block store.
    mall = m_ref[...]                                            # (PH*Cout, W) bf16
    pm = jnp.maximum(mall, _rot_up(mall, 1))
    o_ref[...] = jnp.dot(pm, s_ref[...],
                         preferred_element_type=jnp.float32).astype(o_ref.dtype)


def _mlp_kernel(x_ref, w1_ref, b1_ref, w2_ref, b2_ref, o_ref, acc_ref):
    """K-tiled fc1 (+bias+ReLU) with fc2 fused into the final grid step."""
    k = pl.program_id(0)

    @pl.when(k == 0)
    def _():
        acc_ref[...] = jnp.zeros_like(acc_ref)

    acc_ref[...] += jnp.dot(x_ref[...], w1_ref[...],
                            preferred_element_type=jnp.float32)

    @pl.when(k == pl.num_programs(0) - 1)
    def _():
        h = jnp.maximum(acc_ref[...] + b1_ref[...], 0.0)
        o_ref[...] = (jnp.dot(h.astype(jnp.bfloat16), w2_ref[...],
                              preferred_element_type=jnp.float32) + b2_ref[...])


# ------------------------------ wrappers --------------------------------------

def conv3x3_relu_pool(x, wmat, b, sel, *, group_rows=4):
    """x: (B, H, Cin, W) bf16 -> (B, (H//2)*Cout, W//2) bf16 ; conv3x3(pad1)+ReLU+maxpool2x2."""
    B, H, Cin, W = x.shape
    Cout = wmat.shape[0]
    assert wmat.shape[1] == 9 * Cin
    assert H % 2 == 0 and W % 2 == 0
    assert group_rows % 2 == 0 and H % group_rows == 0
    PH, PW = H // 2, W // 2

    kernel = functools.partial(_conv_relu_pool_kernel, group_rows=group_rows)
    return pl.pallas_call(
        kernel,
        out_shape=jax.ShapeDtypeStruct((B, PH * Cout, PW), jnp.bfloat16),
        grid_spec=pltpu.PrefetchScalarGridSpec(
            num_scalar_prefetch=0,
            grid=(B,),
            in_specs=[
                pl.BlockSpec((None, H, Cin, W), lambda b_: (b_, 0, 0, 0)),
                pl.BlockSpec((Cout, 9 * Cin), lambda b_: (0, 0)),
                pl.BlockSpec((Cout, 1), lambda b_: (0, 0)),
                pl.BlockSpec((W, PW), lambda b_: (0, 0)),
            ],
            out_specs=pl.BlockSpec((None, PH * Cout, PW), lambda b_: (b_, 0, 0)),
            scratch_shapes=[pltpu.VMEM((PH * Cout, W), jnp.bfloat16)],
        ),
        compiler_params=pltpu.CompilerParams(
            dimension_semantics=("parallel",),
            vmem_limit_bytes=32 * 1024 * 1024),
    )(x, wmat, b.reshape(Cout, 1), sel)


def mlp_head(x, w1, b1, w2, b2, *, tk=7680):
    """relu(x @ w1 + b1) @ w2 + b2 in one kernel; fc1 contraction tiled by tk."""
    B, K = x.shape
    N1 = w1.shape[1]
    N2 = w2.shape[1]
    assert K % tk == 0
    return pl.pallas_call(
        _mlp_kernel,
        out_shape=jax.ShapeDtypeStruct((B, N2), jnp.float32),
        grid_spec=pltpu.PrefetchScalarGridSpec(
            num_scalar_prefetch=0,
            grid=(K // tk,),
            in_specs=[
                pl.BlockSpec((B, tk), lambda k: (0, k)),
                pl.BlockSpec((tk, N1), lambda k: (k, 0)),
                pl.BlockSpec((1, N1), lambda k: (0, 0)),
                pl.BlockSpec((N1, N2), lambda k: (0, 0)),
                pl.BlockSpec((1, N2), lambda k: (0, 0)),
            ],
            out_specs=pl.BlockSpec((B, N2), lambda k: (0, 0)),
            scratch_shapes=[pltpu.VMEM((B, N1), jnp.float32)],
        ),
        compiler_params=pltpu.CompilerParams(
            dimension_semantics=("arbitrary",),
            vmem_limit_bytes=32 * 1024 * 1024),
    )(x, w1, b1.reshape(1, N1), w2, b2.reshape(1, N2))


# --------------------------- full forward pass --------------------------------

@jax.jit
def plate_reader_forward(x_nchw, prepared):
    B = x_nchw.shape[0]
    # Single input prep op: NCHW -> (B, H, C, W), pad Cin 3 -> 8 (sublane
    # alignment; padded channels and weights are zero), cast to bf16.
    x = jnp.transpose(x_nchw, (0, 2, 1, 3))
    x = jnp.pad(x, ((0, 0), (0, 0), (0, 8 - x.shape[2]), (0, 0))).astype(jnp.bfloat16)

    y = conv3x3_relu_pool(x, prepared["conv1_w"], prepared["conv1_b"],
                          prepared["sel1"])                      # (B, 24*32, 100) bf16
    y = y.reshape(B, 24, 32, 100)                                # free reshape
    y = conv3x3_relu_pool(y, prepared["conv2_w"], prepared["conv2_b"],
                          prepared["sel2"])                      # (B, 12*64, 50) bf16
    y = y.reshape(B, 12 * 64 * 50)                               # (ph, c, pw) flatten
    return mlp_head(y, prepared["fc1_w"], prepared["fc1_b"],
                    prepared["fc2_w"], prepared["fc2_b"], tk=7680)


# ------------------------------ reference (pure JAX) --------------------------

def reference_forward(x_nchw, params):
    hp = jax.lax.Precision.HIGHEST

    def conv(x, w_hwio, b):
        y = jax.lax.conv_general_dilated(
            x, w_hwio, window_strides=(1, 1), padding="SAME",
            dimension_numbers=("NCHW", "HWIO", "NCHW"), precision=hp)
        return jnp.maximum(y + b[None, :, None, None], 0.0)

    def pool(x):
        B, C, H, W = x.shape
        return x.reshape(B, C, H // 2, 2, W // 2, 2).max(axis=(3, 5))

    y = pool(conv(x_nchw, params["conv1_w"], params["conv1_b"]))
    y = pool(conv(y, params["conv2_w"], params["conv2_b"]))
    y = y.reshape(y.shape[0], -1)
    y = jnp.maximum(jnp.dot(y, params["fc1_w"], precision=hp) + params["fc1_b"], 0.0)
    y = jnp.dot(y, params["fc2_w"], precision=hp) + params["fc2_b"]
    return y


# ------------------------------ params ---------------------------------------

def init_params(key):
    ks = jax.random.split(key, 8)

    def uni(k, shape, fan_in):
        bound = 1.0 / np.sqrt(fan_in)
        return jax.random.uniform(k, shape, jnp.float32, -bound, bound)

    return {
        "conv1_w": uni(ks[0], (3, 3, 3, 32), 3 * 9),      # HWIO
        "conv1_b": uni(ks[1], (32,), 3 * 9),
        "conv2_w": uni(ks[2], (3, 3, 32, 64), 32 * 9),    # HWIO
        "conv2_b": uni(ks[3], (64,), 32 * 9),
        "fc1_w": uni(ks[4], (64 * 12 * 50, 128), 64 * 12 * 50),  # (K, N) = W.T
        "fc1_b": uni(ks[5], (128,), 64 * 12 * 50),
        "fc2_w": uni(ks[6], (128, 36), 128),
        "fc2_b": uni(ks[7], (36,), 128),
    }


def prepare_params(params):
    """One-time host-side repack of canonical params for the Pallas forward."""
    def conv_wmat(w_hwio, cin_pad):
        # (kh, kw, cin, cout) -> (cout, kw, kh, cin_pad) -> (cout, 9*cin_pad) bf16
        kh, kw, cin, cout = w_hwio.shape
        if cin_pad > cin:
            w_hwio = jnp.pad(w_hwio, ((0, 0), (0, 0), (0, cin_pad - cin), (0, 0)))
        return (jnp.transpose(w_hwio, (3, 1, 0, 2))
                .reshape(cout, kh * kw * cin_pad).astype(jnp.bfloat16))

    def even_sel(w):
        s = np.zeros((w, w // 2), np.float32)
        s[2 * np.arange(w // 2), np.arange(w // 2)] = 1.0
        return jnp.asarray(s, dtype=jnp.bfloat16)

    # fc1 rows permuted from NCHW flatten order (c, ph, pw) to the (ph, c, pw)
    # layout the conv kernels produce -> no activation transpose before fc1.
    c, ph, pw, n1 = 64, 12, 50, 128
    fc1 = (params["fc1_w"].reshape(c, ph, pw, n1)
           .transpose(1, 0, 2, 3).reshape(c * ph * pw, n1))
    return {
        "conv1_w": conv_wmat(params["conv1_w"], 8),
        "conv1_b": params["conv1_b"],
        "conv2_w": conv_wmat(params["conv2_w"], 32),
        "conv2_b": params["conv2_b"],
        "sel1": even_sel(200),
        "sel2": even_sel(100),
        # TODO(synk): optionally quantize fc1_w per generation (int8 on v5e/v6e,
        # fp8 on v7x) to halve the HBM-bound weight stream; kept bf16 here for
        # cross-generation portability.
        "fc1_w": fc1.astype(jnp.bfloat16),       # bf16 stream: fc1 is HBM-bound
        "fc1_b": params["fc1_b"],
        "fc2_w": params["fc2_w"].astype(jnp.bfloat16),
        "fc2_b": params["fc2_b"],
    }


# -------------------------------- main ----------------------------------------

if __name__ == "__main__":
    key = jax.random.PRNGKey(0)
    k_x, k_p = jax.random.split(key)
    # smallest shape consistent with the module: fc1 expects 64*12*50 => H=48, W=200
    x = jax.random.normal(k_x, (2, 3, 48, 200), jnp.float32)
    params = init_params(k_p)
    prepared = prepare_params(params)

    out = plate_reader_forward(x, prepared)
    out = jax.block_until_ready(out)
    assert out.shape == (2, 36) and out.dtype == jnp.float32

    ref = reference_forward(x, params)
    np.testing.assert_allclose(np.asarray(out), np.asarray(ref), rtol=2e-2, atol=2e-2)

    print("KERNEL_OK")
</pallas_src>

<mosaic_0001>
module attributes {stable_mosaic.version = 11 : i64} {
  func.func @_conv_relu_pool_kernel(%arg0: i32, %arg1: memref<1x24x32x100xbf16, #tpu.memory_space<vmem>>, %arg2: memref<64x288xbf16, #tpu.memory_space<vmem>>, %arg3: memref<64x1xf32, #tpu.memory_space<vmem>>, %arg4: memref<100x50xbf16, #tpu.memory_space<vmem>>, %arg5: memref<1x768x50xbf16, #tpu.memory_space<vmem>>, %arg6: memref<768x100xbf16, #tpu.memory_space<vmem>>) attributes {dimension_semantics = [#tpu.dimension_semantics<parallel>], iteration_bounds = array<i64: 2>, scalar_prefetch = 0 : i64, scratch_operands = 1 : i64, tpu.core_type = #tpu.core_type<tc>, window_params = [{transform_indices = @transform_0, window_bounds = array<i64: 1, 24, 32, 100>}, {pipeline_mode = #tpu.pipeline_mode<synchronous>, transform_indices = @transform_1, window_bounds = array<i64: 64, 288>}, {pipeline_mode = #tpu.pipeline_mode<synchronous>, transform_indices = @transform_2, window_bounds = array<i64: 64, 1>}, {pipeline_mode = #tpu.pipeline_mode<synchronous>, transform_indices = @transform_3, window_bounds = array<i64: 100, 50>}, {transform_indices = @transform_4, window_bounds = array<i64: 1, 768, 50>}]} {
    %c0 = arith.constant 0 : index
    %c0_0 = arith.constant 0 : index
    %0 = vector.load %arg2[%c0, %c0_0] : memref<64x288xbf16, #tpu.memory_space<vmem>>, vector<64x288xbf16>
    %c0_1 = arith.constant 0 : index
    %c0_2 = arith.constant 0 : index
    %1 = vector.load %arg3[%c0_1, %c0_2] : memref<64x1xf32, #tpu.memory_space<vmem>>, vector<64x1xf32>
    %2 = tpu.iota {dimensions = array<i32: 1>} : vector<1x400xi32>
    %c100_i32 = arith.constant 100 : i32
    %c0_i32 = arith.constant 0 : i32
    %3 = arith.cmpi eq, %c100_i32, %c0_i32 : i32
    %c1_i32 = arith.constant 1 : i32
    %4 = arith.select %3, %c1_i32, %c100_i32 : i32
    %5 = vector.broadcast %4 : i32 to vector<1x400xi32>
    %6 = arith.remsi %2, %5 : vector<1x400xi32>
    %c0_i32_3 = arith.constant 0 : i32
    %7 = vector.broadcast %c0_i32_3 : i32 to vector<1x400xi32>
    %8 = arith.cmpi ne, %6, %7 : vector<1x400xi32>
    %c0_i32_4 = arith.constant 0 : i32
    %9 = vector.broadcast %c0_i32_4 : i32 to vector<1x400xi32>
    %10 = arith.cmpi slt, %6, %9 : vector<1x400xi32>
    %c0_i32_5 = arith.constant 0 : i32
    %11 = arith.cmpi slt, %4, %c0_i32_5 : i32
    %12 = vector.broadcast %11 : i1 to vector<1x400xi1>
    %13 = vector.broadcast %12 : vector<1x400xi1> to vector<1x400xi1>
    %14 = arith.xori %10, %13 : vector<1x400xi1>
    %15 = arith.andi %14, %8 : vector<1x400xi1>
    %16 = vector.broadcast %4 : i32 to vector<1x400xi32>
    %17 = arith.addi %6, %16 : vector<1x400xi32>
    %18 = arith.select %15, %17, %6 : vector<1x400xi1>, vector<1x400xi32>
    %c0_i32_6 = arith.constant 0 : i32
    %19 = vector.broadcast %c0_i32_6 : i32 to vector<1x400xi32>
    %20 = arith.cmpi ne, %18, %19 : vector<1x400xi32>
    %21 = arith.extui %20 : vector<1x400xi1> to vector<1x400xi32>
    %22 = arith.sitofp %21 : vector<1x400xi32> to vector<1x400xf32>
    %23 = arith.truncf %22 : vector<1x400xf32> to vector<1x400xbf16>
    %c99_i32 = arith.constant 99 : i32
    %24 = vector.broadcast %c99_i32 : i32 to vector<1x400xi32>
    %25 = arith.cmpi ne, %18, %24 : vector<1x400xi32>
    %26 = arith.extui %25 : vector<1x400xi1> to vector<1x400xi32>
    %27 = arith.sitofp %26 : vector<1x400xi32> to vector<1x400xf32>
    %28 = arith.truncf %27 : vector<1x400xf32> to vector<1x400xbf16>
    %c0_i32_7 = arith.constant 0 : i32
    %c6_i32 = arith.constant 6 : i32
    %29 = arith.addi %c0_i32_7, %c6_i32 : i32
    %c1_i32_8 = arith.constant 1 : i32
    scf.for %arg7 = %c0_i32_7 to %29 step %c1_i32_8  : i32 {
      %c4_i32 = arith.constant 4 : i32
      %41 = arith.muli %arg7, %c4_i32 : i32
      %c0_i32_17 = arith.constant 0 : i32
      %42 = arith.addi %41, %c0_i32_17 : i32
      %c1_i32_18 = arith.constant 1 : i32
      %43 = arith.subi %42, %c1_i32_18 : i32
      %c0_i32_19 = arith.constant 0 : i32
      %c23_i32 = arith.constant 23 : i32
      %44 = arith.maxsi %c0_i32_19, %43 : i32
      %45 = arith.minsi %c23_i32, %44 : i32
      %c0_i32_20 = arith.constant 0 : i32
      %46 = arith.cmpi sge, %43, %c0_i32_20 : i32
      %c24_i32 = arith.constant 24 : i32
      %47 = arith.cmpi slt, %43, %c24_i32 : i32
      %48 = arith.andi %46, %47 : i1
      %c0_21 = arith.constant 0 : index
      %49 = arith.index_cast %45 : i32 to index
      %c0_22 = arith.constant 0 : index
      %c0_23 = arith.constant 0 : index
      %50 = vector.load %arg1[%c0_21, %49, %c0_22, %c0_23] : memref<1x24x32x100xbf16, #tpu.memory_space<vmem>>, vector<1x1x32x100xbf16>
      %51 = vector.shape_cast %50 : vector<1x1x32x100xbf16> to vector<32x100xbf16>
      %cst_24 = arith.constant 0.000000e+00 : bf16
      %52 = vector.broadcast %cst_24 : bf16 to vector<32x100xbf16>
      %53 = arith.select %48, %51, %52 : vector<32x100xbf16>
      %c1_i32_25 = arith.constant 1 : i32
      %54 = arith.addi %41, %c1_i32_25 : i32
      %c1_i32_26 = arith.constant 1 : i32
      %55 = arith.subi %54, %c1_i32_26 : i32
      %c0_i32_27 = arith.constant 0 : i32
      %c23_i32_28 = arith.constant 23 : i32
      %56 = arith.maxsi %c0_i32_27, %55 : i32
      %57 = arith.minsi %c23_i32_28, %56 : i32
      %c0_i32_29 = arith.constant 0 : i32
      %58 = arith.cmpi sge, %55, %c0_i32_29 : i32
      %c24_i32_30 = arith.constant 24 : i32
      %59 = arith.cmpi slt, %55, %c24_i32_30 : i32
      %60 = arith.andi %58, %59 : i1
      %c0_31 = arith.constant 0 : index
      %61 = arith.index_cast %57 : i32 to index
      %c0_32 = arith.constant 0 : index
      %c0_33 = arith.constant 0 : index
      %62 = vector.load %arg1[%c0_31, %61, %c0_32, %c0_33] : memref<1x24x32x100xbf16, #tpu.memory_space<vmem>>, vector<1x1x32x100xbf16>
      %63 = vector.shape_cast %62 : vector<1x1x32x100xbf16> to vector<32x100xbf16>
      %cst_34 = arith.constant 0.000000e+00 : bf16
      %64 = vector.broadcast %cst_34 : bf16 to vector<32x100xbf16>
      %65 = arith.select %60, %63, %64 : vector<32x100xbf16>
      %c2_i32 = arith.constant 2 : i32
      %66 = arith.addi %41, %c2_i32 : i32
      %c1_i32_35 = arith.constant 1 : i32
      %67 = arith.subi %66, %c1_i32_35 : i32
      %c0_i32_36 = arith.constant 0 : i32
      %c23_i32_37 = arith.constant 23 : i32
      %68 = arith.maxsi %c0_i32_36, %67 : i32
      %69 = arith.minsi %c23_i32_37, %68 : i32
      %c0_i32_38 = arith.constant 0 : i32
      %70 = arith.cmpi sge, %67, %c0_i32_38 : i32
      %c24_i32_39 = arith.constant 24 : i32
      %71 = arith.cmpi slt, %67, %c24_i32_39 : i32
      %72 = arith.andi %70, %71 : i1
      %c0_40 = arith.constant 0 : index
      %73 = arith.index_cast %69 : i32 to index
      %c0_41 = arith.constant 0 : index
      %c0_42 = arith.constant 0 : index
      %74 = vector.load %arg1[%c0_40, %73, %c0_41, %c0_42] : memref<1x24x32x100xbf16, #tpu.memory_space<vmem>>, vector<1x1x32x100xbf16>
      %75 = vector.shape_cast %74 : vector<1x1x32x100xbf16> to vector<32x100xbf16>
      %cst_43 = arith.constant 0.000000e+00 : bf16
      %76 = vector.broadcast %cst_43 : bf16 to vector<32x100xbf16>
      %77 = arith.select %72, %75, %76 : vector<32x100xbf16>
      %c3_i32 = arith.constant 3 : i32
      %78 = arith.addi %41, %c3_i32 : i32
      %c1_i32_44 = arith.constant 1 : i32
      %79 = arith.subi %78, %c1_i32_44 : i32
      %c0_i32_45 = arith.constant 0 : i32
      %c23_i32_46 = arith.constant 23 : i32
      %80 = arith.maxsi %c0_i32_45, %79 : i32
      %81 = arith.minsi %c23_i32_46, %80 : i32
      %c0_i32_47 = arith.constant 0 : i32
      %82 = arith.cmpi sge, %79, %c0_i32_47 : i32
      %c24_i32_48 = arith.constant 24 : i32
      %83 = arith.cmpi slt, %79, %c24_i32_48 : i32
      %84 = arith.andi %82, %83 : i1
      %c0_49 = arith.constant 0 : index
      %85 = arith.index_cast %81 : i32 to index
      %c0_50 = arith.constant 0 : index
      %c0_51 = arith.constant 0 : index
      %86 = vector.load %arg1[%c0_49, %85, %c0_50, %c0_51] : memref<1x24x32x100xbf16, #tpu.memory_space<vmem>>, vector<1x1x32x100xbf16>
      %87 = vector.shape_cast %86 : vector<1x1x32x100xbf16> to vector<32x100xbf16>
      %cst_52 = arith.constant 0.000000e+00 : bf16
      %88 = vector.broadcast %cst_52 : bf16 to vector<32x100xbf16>
      %89 = arith.select %84, %87, %88 : vector<32x100xbf16>
      %c4_i32_53 = arith.constant 4 : i32
      %90 = arith.addi %41, %c4_i32_53 : i32
      %c1_i32_54 = arith.constant 1 : i32
      %91 = arith.subi %90, %c1_i32_54 : i32
      %c0_i32_55 = arith.constant 0 : i32
      %c23_i32_56 = arith.constant 23 : i32
      %92 = arith.maxsi %c0_i32_55, %91 : i32
      %93 = arith.minsi %c23_i32_56, %92 : i32
      %c0_i32_57 = arith.constant 0 : i32
      %94 = arith.cmpi sge, %91, %c0_i32_57 : i32
      %c24_i32_58 = arith.constant 24 : i32
      %95 = arith.cmpi slt, %91, %c24_i32_58 : i32
      %96 = arith.andi %94, %95 : i1
      %c0_59 = arith.constant 0 : index
      %97 = arith.index_cast %93 : i32 to index
      %c0_60 = arith.constant 0 : index
      %c0_61 = arith.constant 0 : index
      %98 = vector.load %arg1[%c0_59, %97, %c0_60, %c0_61] : memref<1x24x32x100xbf16, #tpu.memory_space<vmem>>, vector<1x1x32x100xbf16>
      %99 = vector.shape_cast %98 : vector<1x1x32x100xbf16> to vector<32x100xbf16>
      %cst_62 = arith.constant 0.000000e+00 : bf16
      %100 = vector.broadcast %cst_62 : bf16 to vector<32x100xbf16>
      %101 = arith.select %96, %99, %100 : vector<32x100xbf16>
      %c5_i32 = arith.constant 5 : i32
      %102 = arith.addi %41, %c5_i32 : i32
      %c1_i32_63 = arith.constant 1 : i32
      %103 = arith.subi %102, %c1_i32_63 : i32
      %c0_i32_64 = arith.constant 0 : i32
      %c23_i32_65 = arith.constant 23 : i32
      %104 = arith.maxsi %c0_i32_64, %103 : i32
      %105 = arith.minsi %c23_i32_65, %104 : i32
      %c0_i32_66 = arith.constant 0 : i32
      %106 = arith.cmpi sge, %103, %c0_i32_66 : i32
      %c24_i32_67 = arith.constant 24 : i32
      %107 = arith.cmpi slt, %103, %c24_i32_67 : i32
      %108 = arith.andi %106, %107 : i1
      %c0_68 = arith.constant 0 : index
      %109 = arith.index_cast %105 : i32 to index
      %c0_69 = arith.constant 0 : index
      %c0_70 = arith.constant 0 : index
      %110 = vector.load %arg1[%c0_68, %109, %c0_69, %c0_70] : memref<1x24x32x100xbf16, #tpu.memory_space<vmem>>, vector<1x1x32x100xbf16>
      %111 = vector.shape_cast %110 : vector<1x1x32x100xbf16> to vector<32x100xbf16>
      %cst_71 = arith.constant 0.000000e+00 : bf16
      %112 = vector.broadcast %cst_71 : bf16 to vector<32x100xbf16>
      %113 = arith.select %108, %111, %112 : vector<32x100xbf16>
      %114 = tpu.concatenate %53, %65, %77, %89 in 1 : vector<32x100xbf16>, vector<32x100xbf16>, vector<32x100xbf16>, vector<32x100xbf16> -> vector<32x400xbf16>
      %115 = tpu.concatenate %65, %77, %89, %101 in 1 : vector<32x100xbf16>, vector<32x100xbf16>, vector<32x100xbf16>, vector<32x100xbf16> -> vector<32x400xbf16>
      %116 = tpu.concatenate %77, %89, %101, %113 in 1 : vector<32x100xbf16>, vector<32x100xbf16>, vector<32x100xbf16>, vector<32x100xbf16> -> vector<32x400xbf16>
      %117 = tpu.concatenate %114, %115, %116 in 0 : vector<32x400xbf16>, vector<32x400xbf16>, vector<32x400xbf16> -> vector<96x400xbf16>
      %118 = vector.extract_strided_slice %117 {offsets = [0, 399], sizes = [96, 1], strides = [1, 1]} : vector<96x400xbf16> to vector<96x1xbf16>
      %119 = vector.extract_strided_slice %117 {offsets = [0, 0], sizes = [96, 399], strides = [1, 1]} : vector<96x400xbf16> to vector<96x399xbf16>
      %120 = tpu.concatenate %118, %119 in 1 : vector<96x1xbf16>, vector<96x399xbf16> -> vector<96x400xbf16>
      %121 = vector.broadcast %23 : vector<1x400xbf16> to vector<96x400xbf16>
      %122 = arith.mulf %120, %121 : vector<96x400xbf16>
      %123 = vector.extract_strided_slice %117 {offsets = [0, 1], sizes = [96, 399], strides = [1, 1]} : vector<96x400xbf16> to vector<96x399xbf16>
      %124 = vector.extract_strided_slice %117 {offsets = [0, 0], sizes = [96, 1], strides = [1, 1]} : vector<96x400xbf16> to vector<96x1xbf16>
      %125 = tpu.concatenate %123, %124 in 1 : vector<96x399xbf16>, vector<96x1xbf16> -> vector<96x400xbf16>
      %126 = vector.broadcast %28 : vector<1x400xbf16> to vector<96x400xbf16>
      %127 = arith.mulf %125, %126 : vector<96x400xbf16>
      %128 = tpu.concatenate %122, %117, %127 in 0 : vector<96x400xbf16>, vector<96x400xbf16>, vector<96x400xbf16> -> vector<288x400xbf16>
      %cst_72 = arith.constant dense<0.000000e+00> : vector<64x400xf32>
      %129 = tpu.matmul %0, %128, %cst_72 {dimension_numbers = #tpu.dot_dimension_numbers<[1], [0], [0], [1], [0, 0, 1, 1], [], []>} : vector<64x288xbf16>, vector<288x400xbf16>, vector<64x400xf32> -> vector<64x400xf32>
      %130 = vector.broadcast %1 : vector<64x1xf32> to vector<64x400xf32>
      %131 = arith.addf %129, %130 : vector<64x400xf32>
      %cst_73 = arith.constant 0.000000e+00 : f32
      %132 = vector.broadcast %cst_73 : f32 to vector<64x400xf32>
      %133 = arith.maximumf %131, %132 : vector<64x400xf32>
      %134 = vector.extract_strided_slice %133 {offsets = [0, 100], sizes = [64, 300], strides = [1, 1]} : vector<64x400xf32> to vector<64x300xf32>
      %135 = vector.extract_strided_slice %133 {offsets = [0, 0], sizes = [64, 100], strides = [1, 1]} : vector<64x400xf32> to vector<64x100xf32>
      %136 = tpu.concatenate %134, %135 in 1 : vector<64x300xf32>, vector<64x100xf32> -> vector<64x400xf32>
      %137 = arith.maximumf %133, %136 : vector<64x400xf32>
      %138 = arith.truncf %137 : vector<64x400xf32> to vector<64x400xbf16>
      %c2_i32_74 = arith.constant 2 : i32
      %139 = arith.muli %arg7, %c2_i32_74 : i32
      %c0_i32_75 = arith.constant 0 : i32
      %140 = arith.addi %139, %c0_i32_75 : i32
      %c64_i32 = arith.constant 64 : i32
      %141 = arith.muli %140, %c64_i32 : i32
      %142 = tpu.assume_multiple %141, 64 : i32
      %143 = vector.extract_strided_slice %138 {offsets = [0, 0], sizes = [64, 100], strides = [1, 1]} : vector<64x400xbf16> to vector<64x100xbf16>
      %144 = arith.index_cast %142 : i32 to index
      %c0_76 = arith.constant 0 : index
      %145 = vector.load %arg6[%144, %c0_76] : memref<768x100xbf16, #tpu.memory_space<vmem>>, vector<64x100xbf16>
      tpu.vector_store %arg6[%144, %c0_76], %143 {strides = array<i32>} : memref<768x100xbf16, #tpu.memory_space<vmem>>, vector<64x100xbf16>,
      %c2_i32_77 = arith.constant 2 : i32
      %146 = arith.muli %arg7, %c2_i32_77 : i32
      %c1_i32_78 = arith.constant 1 : i32
      %147 = arith.addi %146, %c1_i32_78 : i32
      %c64_i32_79 = arith.constant 64 : i32
      %148 = arith.muli %147, %c64_i32_79 : i32
      %149 = tpu.assume_multiple %148, 64 : i32
      %150 = vector.extract_strided_slice %138 {offsets = [0, 200], sizes = [64, 100], strides = [1, 1]} : vector<64x400xbf16> to vector<64x100xbf16>
      %151 = arith.index_cast %149 : i32 to index
      %c0_80 = arith.constant 0 : index
      %152 = vector.load %arg6[%151, %c0_80] : memref<768x100xbf16, #tpu.memory_space<vmem>>, vector<64x100xbf16>
      tpu.vector_store %arg6[%151, %c0_80], %150 {strides = array<i32>} : memref<768x100xbf16, #tpu.memory_space<vmem>>, vector<64x100xbf16>,
    }
    %c6_i32_9 = arith.constant 6 : i32
    %c0_10 = arith.constant 0 : index
    %c0_11 = arith.constant 0 : index
    %30 = vector.load %arg6[%c0_10, %c0_11] : memref<768x100xbf16, #tpu.memory_space<vmem>>, vector<768x100xbf16>
    %31 = vector.extract_strided_slice %30 {offsets = [0, 1], sizes = [768, 99], strides = [1, 1]} : vector<768x100xbf16> to vector<768x99xbf16>
    %32 = vector.extract_strided_slice %30 {offsets = [0, 0], sizes = [768, 1], strides = [1, 1]} : vector<768x100xbf16> to vector<768x1xbf16>
    %33 = tpu.concatenate %31, %32 in 1 : vector<768x99xbf16>, vector<768x1xbf16> -> vector<768x100xbf16>
    %34 = arith.maximumf %30, %33 : vector<768x100xbf16>
    %c0_12 = arith.constant 0 : index
    %c0_13 = arith.constant 0 : index
    %35 = vector.load %arg4[%c0_12, %c0_13] : memref<100x50xbf16, #tpu.memory_space<vmem>>, vector<100x50xbf16>
    %cst = arith.constant dense<0.000000e+00> : vector<768x50xf32>
    %36 = tpu.matmul %34, %35, %cst {dimension_numbers = #tpu.dot_dimension_numbers<[1], [0], [0], [1], [0, 0, 1, 1], [], []>} : vector<768x100xbf16>, vector<100x50xbf16>, vector<768x50xf32> -> vector<768x50xf32>
    %37 = arith.truncf %36 : vector<768x50xf32> to vector<768x50xbf16>
    %c0_14 = arith.constant 0 : index
    %c0_15 = arith.constant 0 : index
    %c0_16 = arith.constant 0 : index
    %38 = vector.load %arg5[%c0_14, %c0_15, %c0_16] : memref<1x768x50xbf16, #tpu.memory_space<vmem>>, vector<1x768x50xbf16>
    %39 = vector.shape_cast %38 : vector<1x768x50xbf16> to vector<768x50xbf16>
    %40 = vector.shape_cast %37 : vector<768x50xbf16> to vector<1x768x50xbf16>
    tpu.vector_store %arg5[%c0_14, %c0_15, %c0_16], %40 {strides = array<i32>} : memref<1x768x50xbf16, #tpu.memory_space<vmem>>, vector<1x768x50xbf16>,
    return
  }
  func.func @transform_0(%arg0: i32) -> (i32, i32, i32, i32) {
    %c0_i32 = arith.constant 0 : i32
    %c0_i32_0 = arith.constant 0 : i32
    %c0_i32_1 = arith.constant 0 : i32
    %c0_i32_2 = arith.constant 0 : i32
    return %arg0, %c0_i32, %c0_i32_0, %c0_i32_1 : i32, i32, i32, i32
  }
  func.func @transform_1(%arg0: i32) -> (i32, i32) {
    %c0_i32 = arith.constant 0 : i32
    %c0_i32_0 = arith.constant 0 : i32
    %c0_i32_1 = arith.constant 0 : i32
    return %c0_i32, %c0_i32_0 : i32, i32
  }
  func.func @transform_2(%arg0: i32) -> (i32, i32) {
    %c0_i32 = arith.constant 0 : i32
    %c0_i32_0 = arith.constant 0 : i32
    %c0_i32_1 = arith.constant 0 : i32
    return %c0_i32, %c0_i32_0 : i32, i32
  }
  func.func @transform_3(%arg0: i32) -> (i32, i32) {
    %c0_i32 = arith.constant 0 : i32
    %c0_i32_0 = arith.constant 0 : i32
    %c0_i32_1 = arith.constant 0 : i32
    return %c0_i32, %c0_i32_0 : i32, i32
  }
  func.func @transform_4(%arg0: i32) -> (i32, i32, i32) {
    %c0_i32 = arith.constant 0 : i32
    %c0_i32_0 = arith.constant 0 : i32
    %c0_i32_1 = arith.constant 0 : i32
    return %arg0, %c0_i32, %c0_i32_0 : i32, i32, i32
  }
}

module attributes {stable_mosaic.version = 11 : i64} {
  func.func @_conv_relu_pool_kernel(%arg0: i32, %arg1: memref<1x48x8x200xbf16, #tpu.memory_space<vmem>>, %arg2: memref<32x72xbf16, #tpu.memory_space<vmem>>, %arg3: memref<32x1xf32, #tpu.memory_space<vmem>>, %arg4: memref<200x100xbf16, #tpu.memory_space<vmem>>, %arg5: memref<1x768x100xbf16, #tpu.memory_space<vmem>>, %arg6: memref<768x200xbf16, #tpu.memory_space<vmem>>) attributes {dimension_semantics = [#tpu.dimension_semantics<parallel>], iteration_bounds = array<i64: 2>, scalar_prefetch = 0 : i64, scratch_operands = 1 : i64, tpu.core_type = #tpu.core_type<tc>, window_params = [{transform_indices = @transform_0, window_bounds = array<i64: 1, 48, 8, 200>}, {pipeline_mode = #tpu.pipeline_mode<synchronous>, transform_indices = @transform_1, window_bounds = array<i64: 32, 72>}, {pipeline_mode = #tpu.pipeline_mode<synchronous>, transform_indices = @transform_2, window_bounds = array<i64: 32, 1>}, {pipeline_mode = #tpu.pipeline_mode<synchronous>, transform_indices = @transform_3, window_bounds = array<i64: 200, 100>}, {transform_indices = @transform_4, window_bounds = array<i64: 1, 768, 100>}]} {
    %c0 = arith.constant 0 : index
    %c0_0 = arith.constant 0 : index
    %0 = vector.load %arg2[%c0, %c0_0] : memref<32x72xbf16, #tpu.memory_space<vmem>>, vector<32x72xbf16>
    %c0_1 = arith.constant 0 : index
    %c0_2 = arith.constant 0 : index
    %1 = vector.load %arg3[%c0_1, %c0_2] : memref<32x1xf32, #tpu.memory_space<vmem>>, vector<32x1xf32>
    %2 = tpu.iota {dimensions = array<i32: 1>} : vector<1x800xi32>
    %c200_i32 = arith.constant 200 : i32
    %c0_i32 = arith.constant 0 : i32
    %3 = arith.cmpi eq, %c200_i32, %c0_i32 : i32
    %c1_i32 = arith.constant 1 : i32
    %4 = arith.select %3, %c1_i32, %c200_i32 : i32
    %5 = vector.broadcast %4 : i32 to vector<1x800xi32>
    %6 = arith.remsi %2, %5 : vector<1x800xi32>
    %c0_i32_3 = arith.constant 0 : i32
    %7 = vector.broadcast %c0_i32_3 : i32 to vector<1x800xi32>
    %8 = arith.cmpi ne, %6, %7 : vector<1x800xi32>
    %c0_i32_4 = arith.constant 0 : i32
    %9 = vector.broadcast %c0_i32_4 : i32 to vector<1x800xi32>
    %10 = arith.cmpi slt, %6, %9 : vector<1x800xi32>
    %c0_i32_5 = arith.constant 0 : i32
    %11 = arith.cmpi slt, %4, %c0_i32_5 : i32
    %12 = vector.broadcast %11 : i1 to vector<1x800xi1>
    %13 = vector.broadcast %12 : vector<1x800xi1> to vector<1x800xi1>
    %14 = arith.xori %10, %13 : vector<1x800xi1>
    %15 = arith.andi %14, %8 : vector<1x800xi1>
    %16 = vector.broadcast %4 : i32 to vector<1x800xi32>
    %17 = arith.addi %6, %16 : vector<1x800xi32>
    %18 = arith.select %15, %17, %6 : vector<1x800xi1>, vector<1x800xi32>
    %c0_i32_6 = arith.constant 0 : i32
    %19 = vector.broadcast %c0_i32_6 : i32 to vector<1x800xi32>
    %20 = arith.cmpi ne, %18, %19 : vector<1x800xi32>
    %21 = arith.extui %20 : vector<1x800xi1> to vector<1x800xi32>
    %22 = arith.sitofp %21 : vector<1x800xi32> to vector<1x800xf32>
    %23 = arith.truncf %22 : vector<1x800xf32> to vector<1x800xbf16>
    %c199_i32 = arith.constant 199 : i32
    %24 = vector.broadcast %c199_i32 : i32 to vector<1x800xi32>
    %25 = arith.cmpi ne, %18, %24 : vector<1x800xi32>
    %26 = arith.extui %25 : vector<1x800xi1> to vector<1x800xi32>
    %27 = arith.sitofp %26 : vector<1x800xi32> to vector<1x800xf32>
    %28 = arith.truncf %27 : vector<1x800xf32> to vector<1x800xbf16>
    %c0_i32_7 = arith.constant 0 : i32
    %c12_i32 = arith.constant 12 : i32
    %29 = arith.addi %c0_i32_7, %c12_i32 : i32
    %c1_i32_8 = arith.constant 1 : i32
    scf.for %arg7 = %c0_i32_7 to %29 step %c1_i32_8  : i32 {
      %c4_i32 = arith.constant 4 : i32
      %41 = arith.muli %arg7, %c4_i32 : i32
      %c0_i32_17 = arith.constant 0 : i32
      %42 = arith.addi %41, %c0_i32_17 : i32
      %c1_i32_18 = arith.constant 1 : i32
      %43 = arith.subi %42, %c1_i32_18 : i32
      %c0_i32_19 = arith.constant 0 : i32
      %c47_i32 = arith.constant 47 : i32
      %44 = arith.maxsi %c0_i32_19, %43 : i32
      %45 = arith.minsi %c47_i32, %44 : i32
      %c0_i32_20 = arith.constant 0 : i32
      %46 = arith.cmpi sge, %43, %c0_i32_20 : i32
      %c48_i32 = arith.constant 48 : i32
      %47 = arith.cmpi slt, %43, %c48_i32 : i32
      %48 = arith.andi %46, %47 : i1
      %c0_21 = arith.constant 0 : index
      %49 = arith.index_cast %45 : i32 to index
      %c0_22 = arith.constant 0 : index
      %c0_23 = arith.constant 0 : index
      %50 = vector.load %arg1[%c0_21, %49, %c0_22, %c0_23] : memref<1x48x8x200xbf16, #tpu.memory_space<vmem>>, vector<1x1x8x200xbf16>
      %51 = vector.shape_cast %50 : vector<1x1x8x200xbf16> to vector<8x200xbf16>
      %cst_24 = arith.constant 0.000000e+00 : bf16
      %52 = vector.broadcast %cst_24 : bf16 to vector<8x200xbf16>
      %53 = arith.select %48, %51, %52 : vector<8x200xbf16>
      %c1_i32_25 = arith.constant 1 : i32
      %54 = arith.addi %41, %c1_i32_25 : i32
      %c1_i32_26 = arith.constant 1 : i32
      %55 = arith.subi %54, %c1_i32_26 : i32
      %c0_i32_27 = arith.constant 0 : i32
      %c47_i32_28 = arith.constant 47 : i32
      %56 = arith.maxsi %c0_i32_27, %55 : i32
      %57 = arith.minsi %c47_i32_28, %56 : i32
      %c0_i32_29 = arith.constant 0 : i32
      %58 = arith.cmpi sge, %55, %c0_i32_29 : i32
      %c48_i32_30 = arith.constant 48 : i32
      %59 = arith.cmpi slt, %55, %c48_i32_30 : i32
      %60 = arith.andi %58, %59 : i1
      %c0_31 = arith.constant 0 : index
      %61 = arith.index_cast %57 : i32 to index
      %c0_32 = arith.constant 0 : index
      %c0_33 = arith.constant 0 : index
      %62 = vector.load %arg1[%c0_31, %61, %c0_32, %c0_33] : memref<1x48x8x200xbf16, #tpu.memory_space<vmem>>, vector<1x1x8x200xbf16>
      %63 = vector.shape_cast %62 : vector<1x1x8x200xbf16> to vector<8x200xbf16>
      %cst_34 = arith.constant 0.000000e+00 : bf16
      %64 = vector.broadcast %cst_34 : bf16 to vector<8x200xbf16>
      %65 = arith.select %60, %63, %64 : vector<8x200xbf16>
      %c2_i32 = arith.constant 2 : i32
      %66 = arith.addi %41, %c2_i32 : i32
      %c1_i32_35 = arith.constant 1 : i32
      %67 = arith.subi %66, %c1_i32_35 : i32
      %c0_i32_36 = arith.constant 0 : i32
      %c47_i32_37 = arith.constant 47 : i32
      %68 = arith.maxsi %c0_i32_36, %67 : i32
      %69 = arith.minsi %c47_i32_37, %68 : i32
      %c0_i32_38 = arith.constant 0 : i32
      %70 = arith.cmpi sge, %67, %c0_i32_38 : i32
      %c48_i32_39 = arith.constant 48 : i32
      %71 = arith.cmpi slt, %67, %c48_i32_39 : i32
      %72 = arith.andi %70, %71 : i1
      %c0_40 = arith.constant 0 : index
      %73 = arith.index_cast %69 : i32 to index
      %c0_41 = arith.constant 0 : index
      %c0_42 = arith.constant 0 : index
      %74 = vector.load %arg1[%c0_40, %73, %c0_41, %c0_42] : memref<1x48x8x200xbf16, #tpu.memory_space<vmem>>, vector<1x1x8x200xbf16>
      %75 = vector.shape_cast %74 : vector<1x1x8x200xbf16> to vector<8x200xbf16>
      %cst_43 = arith.constant 0.000000e+00 : bf16
      %76 = vector.broadcast %cst_43 : bf16 to vector<8x200xbf16>
      %77 = arith.select %72, %75, %76 : vector<8x200xbf16>
      %c3_i32 = arith.constant 3 : i32
      %78 = arith.addi %41, %c3_i32 : i32
      %c1_i32_44 = arith.constant 1 : i32
      %79 = arith.subi %78, %c1_i32_44 : i32
      %c0_i32_45 = arith.constant 0 : i32
      %c47_i32_46 = arith.constant 47 : i32
      %80 = arith.maxsi %c0_i32_45, %79 : i32
      %81 = arith.minsi %c47_i32_46, %80 : i32
      %c0_i32_47 = arith.constant 0 : i32
      %82 = arith.cmpi sge, %79, %c0_i32_47 : i32
      %c48_i32_48 = arith.constant 48 : i32
      %83 = arith.cmpi slt, %79, %c48_i32_48 : i32
      %84 = arith.andi %82, %83 : i1
      %c0_49 = arith.constant 0 : index
      %85 = arith.index_cast %81 : i32 to index
      %c0_50 = arith.constant 0 : index
      %c0_51 = arith.constant 0 : index
      %86 = vector.load %arg1[%c0_49, %85, %c0_50, %c0_51] : memref<1x48x8x200xbf16, #tpu.memory_space<vmem>>, vector<1x1x8x200xbf16>
      %87 = vector.shape_cast %86 : vector<1x1x8x200xbf16> to vector<8x200xbf16>
      %cst_52 = arith.constant 0.000000e+00 : bf16
      %88 = vector.broadcast %cst_52 : bf16 to vector<8x200xbf16>
      %89 = arith.select %84, %87, %88 : vector<8x200xbf16>
      %c4_i32_53 = arith.constant 4 : i32
      %90 = arith.addi %41, %c4_i32_53 : i32
      %c1_i32_54 = arith.constant 1 : i32
      %91 = arith.subi %90, %c1_i32_54 : i32
      %c0_i32_55 = arith.constant 0 : i32
      %c47_i32_56 = arith.constant 47 : i32
      %92 = arith.maxsi %c0_i32_55, %91 : i32
      %93 = arith.minsi %c47_i32_56, %92 : i32
      %c0_i32_57 = arith.constant 0 : i32
      %94 = arith.cmpi sge, %91, %c0_i32_57 : i32
      %c48_i32_58 = arith.constant 48 : i32
      %95 = arith.cmpi slt, %91, %c48_i32_58 : i32
      %96 = arith.andi %94, %95 : i1
      %c0_59 = arith.constant 0 : index
      %97 = arith.index_cast %93 : i32 to index
      %c0_60 = arith.constant 0 : index
      %c0_61 = arith.constant 0 : index
      %98 = vector.load %arg1[%c0_59, %97, %c0_60, %c0_61] : memref<1x48x8x200xbf16, #tpu.memory_space<vmem>>, vector<1x1x8x200xbf16>
      %99 = vector.shape_cast %98 : vector<1x1x8x200xbf16> to vector<8x200xbf16>
      %cst_62 = arith.constant 0.000000e+00 : bf16
      %100 = vector.broadcast %cst_62 : bf16 to vector<8x200xbf16>
      %101 = arith.select %96, %99, %100 : vector<8x200xbf16>
      %c5_i32 = arith.constant 5 : i32
      %102 = arith.addi %41, %c5_i32 : i32
      %c1_i32_63 = arith.constant 1 : i32
      %103 = arith.subi %102, %c1_i32_63 : i32
      %c0_i32_64 = arith.constant 0 : i32
      %c47_i32_65 = arith.constant 47 : i32
      %104 = arith.maxsi %c0_i32_64, %103 : i32
      %105 = arith.minsi %c47_i32_65, %104 : i32
      %c0_i32_66 = arith.constant 0 : i32
      %106 = arith.cmpi sge, %103, %c0_i32_66 : i32
      %c48_i32_67 = arith.constant 48 : i32
      %107 = arith.cmpi slt, %103, %c48_i32_67 : i32
      %108 = arith.andi %106, %107 : i1
      %c0_68 = arith.constant 0 : index
      %109 = arith.index_cast %105 : i32 to index
      %c0_69 = arith.constant 0 : index
      %c0_70 = arith.constant 0 : index
      %110 = vector.load %arg1[%c0_68, %109, %c0_69, %c0_70] : memref<1x48x8x200xbf16, #tpu.memory_space<vmem>>, vector<1x1x8x200xbf16>
      %111 = vector.shape_cast %110 : vector<1x1x8x200xbf16> to vector<8x200xbf16>
      %cst_71 = arith.constant 0.000000e+00 : bf16
      %112 = vector.broadcast %cst_71 : bf16 to vector<8x200xbf16>
      %113 = arith.select %108, %111, %112 : vector<8x200xbf16>
      %114 = tpu.concatenate %53, %65, %77, %89 in 1 : vector<8x200xbf16>, vector<8x200xbf16>, vector<8x200xbf16>, vector<8x200xbf16> -> vector<8x800xbf16>
      %115 = tpu.concatenate %65, %77, %89, %101 in 1 : vector<8x200xbf16>, vector<8x200xbf16>, vector<8x200xbf16>, vector<8x200xbf16> -> vector<8x800xbf16>
      %116 = tpu.concatenate %77, %89, %101, %113 in 1 : vector<8x200xbf16>, vector<8x200xbf16>, vector<8x200xbf16>, vector<8x200xbf16> -> vector<8x800xbf16>
      %117 = tpu.concatenate %114, %115, %116 in 0 : vector<8x800xbf16>, vector<8x800xbf16>, vector<8x800xbf16> -> vector<24x800xbf16>
      %118 = vector.extract_strided_slice %117 {offsets = [0, 799], sizes = [24, 1], strides = [1, 1]} : vector<24x800xbf16> to vector<24x1xbf16>
      %119 = vector.extract_strided_slice %117 {offsets = [0, 0], sizes = [24, 799], strides = [1, 1]} : vector<24x800xbf16> to vector<24x799xbf16>
      %120 = tpu.concatenate %118, %119 in 1 : vector<24x1xbf16>, vector<24x799xbf16> -> vector<24x800xbf16>
      %121 = vector.broadcast %23 : vector<1x800xbf16> to vector<24x800xbf16>
      %122 = arith.mulf %120, %121 : vector<24x800xbf16>
      %123 = vector.extract_strided_slice %117 {offsets = [0, 1], sizes = [24, 799], strides = [1, 1]} : vector<24x800xbf16> to vector<24x799xbf16>
      %124 = vector.extract_strided_slice %117 {offsets = [0, 0], sizes = [24, 1], strides = [1, 1]} : vector<24x800xbf16> to vector<24x1xbf16>
      %125 = tpu.concatenate %123, %124 in 1 : vector<24x799xbf16>, vector<24x1xbf16> -> vector<24x800xbf16>
      %126 = vector.broadcast %28 : vector<1x800xbf16> to vector<24x800xbf16>
      %127 = arith.mulf %125, %126 : vector<24x800xbf16>
      %128 = tpu.concatenate %122, %117, %127 in 0 : vector<24x800xbf16>, vector<24x800xbf16>, vector<24x800xbf16> -> vector<72x800xbf16>
      %cst_72 = arith.constant dense<0.000000e+00> : vector<32x800xf32>
      %129 = tpu.matmul %0, %128, %cst_72 {dimension_numbers = #tpu.dot_dimension_numbers<[1], [0], [0], [1], [0, 0, 1, 1], [], []>} : vector<32x72xbf16>, vector<72x800xbf16>, vector<32x800xf32> -> vector<32x800xf32>
      %130 = vector.broadcast %1 : vector<32x1xf32> to vector<32x800xf32>
      %131 = arith.addf %129, %130 : vector<32x800xf32>
      %cst_73 = arith.constant 0.000000e+00 : f32
      %132 = vector.broadcast %cst_73 : f32 to vector<32x800xf32>
      %133 = arith.maximumf %131, %132 : vector<32x800xf32>
      %134 = vector.extract_strided_slice %133 {offsets = [0, 200], sizes = [32, 600], strides = [1, 1]} : vector<32x800xf32> to vector<32x600xf32>
      %135 = vector.extract_strided_slice %133 {offsets = [0, 0], sizes = [32, 200], strides = [1, 1]} : vector<32x800xf32> to vector<32x200xf32>
      %136 = tpu.concatenate %134, %135 in 1 : vector<32x600xf32>, vector<32x200xf32> -> vector<32x800xf32>
      %137 = arith.maximumf %133, %136 : vector<32x800xf32>
      %138 = arith.truncf %137 : vector<32x800xf32> to vector<32x800xbf16>
      %c2_i32_74 = arith.constant 2 : i32
      %139 = arith.muli %arg7, %c2_i32_74 : i32
      %c0_i32_75 = arith.constant 0 : i32
      %140 = arith.addi %139, %c0_i32_75 : i32
      %c32_i32 = arith.constant 32 : i32
      %141 = arith.muli %140, %c32_i32 : i32
      %142 = tpu.assume_multiple %141, 32 : i32
      %143 = vector.extract_strided_slice %138 {offsets = [0, 0], sizes = [32, 200], strides = [1, 1]} : vector<32x800xbf16> to vector<32x200xbf16>
      %144 = arith.index_cast %142 : i32 to index
      %c0_76 = arith.constant 0 : index
      %145 = vector.load %arg6[%144, %c0_76] : memref<768x200xbf16, #tpu.memory_space<vmem>>, vector<32x200xbf16>
      tpu.vector_store %arg6[%144, %c0_76], %143 {strides = array<i32>} : memref<768x200xbf16, #tpu.memory_space<vmem>>, vector<32x200xbf16>,
      %c2_i32_77 = arith.constant 2 : i32
      %146 = arith.muli %arg7, %c2_i32_77 : i32
      %c1_i32_78 = arith.constant 1 : i32
      %147 = arith.addi %146, %c1_i32_78 : i32
      %c32_i32_79 = arith.constant 32 : i32
      %148 = arith.muli %147, %c32_i32_79 : i32
      %149 = tpu.assume_multiple %148, 32 : i32
      %150 = vector.extract_strided_slice %138 {offsets = [0, 400], sizes = [32, 200], strides = [1, 1]} : vector<32x800xbf16> to vector<32x200xbf16>
      %151 = arith.index_cast %149 : i32 to index
      %c0_80 = arith.constant 0 : index
      %152 = vector.load %arg6[%151, %c0_80] : memref<768x200xbf16, #tpu.memory_space<vmem>>, vector<32x200xbf16>
      tpu.vector_store %arg6[%151, %c0_80], %150 {strides = array<i32>} : memref<768x200xbf16, #tpu.memory_space<vmem>>, vector<32x200xbf16>,
    }
    %c12_i32_9 = arith.constant 12 : i32
    %c0_10 = arith.constant 0 : index
    %c0_11 = arith.constant 0 : index
    %30 = vector.load %arg6[%c0_10, %c0_11] : memref<768x200xbf16, #tpu.memory_space<vmem>>, vector<768x200xbf16>
    %31 = vector.extract_strided_slice %30 {offsets = [0, 1], sizes = [768, 199], strides = [1, 1]} : vector<768x200xbf16> to vector<768x199xbf16>
    %32 = vector.extract_strided_slice %30 {offsets = [0, 0], sizes = [768, 1], strides = [1, 1]} : vector<768x200xbf16> to vector<768x1xbf16>
    %33 = tpu.concatenate %31, %32 in 1 : vector<768x199xbf16>, vector<768x1xbf16> -> vector<768x200xbf16>
    %34 = arith.maximumf %30, %33 : vector<768x200xbf16>
    %c0_12 = arith.constant 0 : index
    %c0_13 = arith.constant 0 : index
    %35 = vector.load %arg4[%c0_12, %c0_13] : memref<200x100xbf16, #tpu.memory_space<vmem>>, vector<200x100xbf16>
    %cst = arith.constant dense<0.000000e+00> : vector<768x100xf32>
    %36 = tpu.matmul %34, %35, %cst {dimension_numbers = #tpu.dot_dimension_numbers<[1], [0], [0], [1], [0, 0, 1, 1], [], []>} : vector<768x200xbf16>, vector<200x100xbf16>, vector<768x100xf32> -> vector<768x100xf32>
    %37 = arith.truncf %36 : vector<768x100xf32> to vector<768x100xbf16>
    %c0_14 = arith.constant 0 : index
    %c0_15 = arith.constant 0 : index
    %c0_16 = arith.constant 0 : index
    %38 = vector.load %arg5[%c0_14, %c0_15, %c0_16] : memref<1x768x100xbf16, #tpu.memory_space<vmem>>, vector<1x768x100xbf16>
    %39 = vector.shape_cast %38 : vector<1x768x100xbf16> to vector<768x100xbf16>
    %40 = vector.shape_cast %37 : vector<768x100xbf16> to vector<1x768x100xbf16>
    tpu.vector_store %arg5[%c0_14, %c0_15, %c0_16], %40 {strides = array<i32>} : memref<1x768x100xbf16, #tpu.memory_space<vmem>>, vector<1x768x100xbf16>,
    return
  }
  func.func @transform_0(%arg0: i32) -> (i32, i32, i32, i32) {
    %c0_i32 = arith.constant 0 : i32
    %c0_i32_0 = arith.constant 0 : i32
    %c0_i32_1 = arith.constant 0 : i32
    %c0_i32_2 = arith.constant 0 : i32
    return %arg0, %c0_i32, %c0_i32_0, %c0_i32_1 : i32, i32, i32, i32
  }
  func.func @transform_1(%arg0: i32) -> (i32, i32) {
    %c0_i32 = arith.constant 0 : i32
    %c0_i32_0 = arith.constant 0 : i32
    %c0_i32_1 = arith.constant 0 : i32
    return %c0_i32, %c0_i32_0 : i32, i32
  }
  func.func @transform_2(%arg0: i32) -> (i32, i32) {
    %c0_i32 = arith.constant 0 : i32
    %c0_i32_0 = arith.constant 0 : i32
    %c0_i32_1 = arith.constant 0 : i32
    return %c0_i32, %c0_i32_0 : i32, i32
  }
  func.func @transform_3(%arg0: i32) -> (i32, i32) {
    %c0_i32 = arith.constant 0 : i32
    %c0_i32_0 = arith.constant 0 : i32
    %c0_i32_1 = arith.constant 0 : i32
    return %c0_i32, %c0_i32_0 : i32, i32
  }
  func.func @transform_4(%arg0: i32) -> (i32, i32, i32) {
    %c0_i32 = arith.constant 0 : i32
    %c0_i32_0 = arith.constant 0 : i32
    %c0_i32_1 = arith.constant 0 : i32
    return %arg0, %c0_i32, %c0_i32_0 : i32, i32, i32
  }
}

module attributes {stable_mosaic.version = 11 : i64} {
  func.func @_mlp_kernel(%arg0: i32, %arg1: memref<2x7680xbf16, #tpu.memory_space<vmem>>, %arg2: memref<7680x128xbf16, #tpu.memory_space<vmem>>, %arg3: memref<1x128xf32, #tpu.memory_space<vmem>>, %arg4: memref<128x36xbf16, #tpu.memory_space<vmem>>, %arg5: memref<1x36xf32, #tpu.memory_space<vmem>>, %arg6: memref<2x36xf32, #tpu.memory_space<vmem>>, %arg7: memref<2x128xf32, #tpu.memory_space<vmem>>) attributes {dimension_semantics = [#tpu.dimension_semantics<arbitrary>], iteration_bounds = array<i64: 5>, scalar_prefetch = 0 : i64, scratch_operands = 1 : i64, tpu.core_type = #tpu.core_type<tc>, window_params = [{transform_indices = @transform_0, window_bounds = array<i64: 2, 7680>}, {transform_indices = @transform_1, window_bounds = array<i64: 7680, 128>}, {pipeline_mode = #tpu.pipeline_mode<synchronous>, transform_indices = @transform_2, window_bounds = array<i64: 1, 128>}, {pipeline_mode = #tpu.pipeline_mode<synchronous>, transform_indices = @transform_3, window_bounds = array<i64: 128, 36>}, {pipeline_mode = #tpu.pipeline_mode<synchronous>, transform_indices = @transform_4, window_bounds = array<i64: 1, 36>}, {pipeline_mode = #tpu.pipeline_mode<synchronous>, transform_indices = @transform_5, window_bounds = array<i64: 2, 36>}]} {
    %c0_i32 = arith.constant 0 : i32
    %0 = arith.cmpi eq, %arg0, %c0_i32 : i32
    %1 = arith.extui %0 : i1 to i32
    %c0_i32_0 = arith.constant 0 : i32
    %2 = arith.cmpi ne, %1, %c0_i32_0 : i32
    scf.if %2 {
      %cst_9 = arith.constant 0.000000e+00 : f32
      %12 = vector.broadcast %cst_9 : f32 to vector<2x128xf32>
      %c0_10 = arith.constant 0 : index
      %c0_11 = arith.constant 0 : index
      %13 = vector.load %arg7[%c0_10, %c0_11] : memref<2x128xf32, #tpu.memory_space<vmem>>, vector<2x128xf32>
      tpu.vector_store %arg7[%c0_10, %c0_11], %12 {strides = array<i32>} : memref<2x128xf32, #tpu.memory_space<vmem>>, vector<2x128xf32>,
    } else {
    }
    %c0 = arith.constant 0 : index
    %c0_1 = arith.constant 0 : index
    %3 = vector.load %arg7[%c0, %c0_1] : memref<2x128xf32, #tpu.memory_space<vmem>>, vector<2x128xf32>
    %c0_2 = arith.constant 0 : index
    %c0_3 = arith.constant 0 : index
    %4 = vector.load %arg1[%c0_2, %c0_3] : memref<2x7680xbf16, #tpu.memory_space<vmem>>, vector<2x7680xbf16>
    %c0_4 = arith.constant 0 : index
    %c0_5 = arith.constant 0 : index
    %5 = vector.load %arg2[%c0_4, %c0_5] : memref<7680x128xbf16, #tpu.memory_space<vmem>>, vector<7680x128xbf16>
    %cst = arith.constant dense<0.000000e+00> : vector<2x128xf32>
    %6 = tpu.matmul %4, %5, %cst {dimension_numbers = #tpu.dot_dimension_numbers<[1], [0], [0], [1], [0, 0, 1, 1], [], []>} : vector<2x7680xbf16>, vector<7680x128xbf16>, vector<2x128xf32> -> vector<2x128xf32>
    %7 = arith.addf %3, %6 : vector<2x128xf32>
    %c0_6 = arith.constant 0 : index
    %c0_7 = arith.constant 0 : index
    %8 = vector.load %arg7[%c0_6, %c0_7] : memref<2x128xf32, #tpu.memory_space<vmem>>, vector<2x128xf32>
    tpu.vector_store %arg7[%c0_6, %c0_7], %7 {strides = array<i32>} : memref<2x128xf32, #tpu.memory_space<vmem>>, vector<2x128xf32>,
    %c4_i32 = arith.constant 4 : i32
    %9 = arith.cmpi eq, %arg0, %c4_i32 : i32
    %10 = arith.extui %9 : i1 to i32
    %c0_i32_8 = arith.constant 0 : i32
    %11 = arith.cmpi ne, %10, %c0_i32_8 : i32
    scf.if %11 {
      %c0_9 = arith.constant 0 : index
      %c0_10 = arith.constant 0 : index
      %12 = vector.load %arg7[%c0_9, %c0_10] : memref<2x128xf32, #tpu.memory_space<vmem>>, vector<2x128xf32>
      %c0_11 = arith.constant 0 : index
      %c0_12 = arith.constant 0 : index
      %13 = vector.load %arg3[%c0_11, %c0_12] : memref<1x128xf32, #tpu.memory_space<vmem>>, vector<1x128xf32>
      %14 = vector.broadcast %13 : vector<1x128xf32> to vector<2x128xf32>
      %15 = arith.addf %12, %14 : vector<2x128xf32>
      %cst_13 = arith.constant 0.000000e+00 : f32
      %16 = vector.broadcast %cst_13 : f32 to vector<2x128xf32>
      %17 = arith.maximumf %15, %16 : vector<2x128xf32>
      %18 = arith.truncf %17 : vector<2x128xf32> to vector<2x128xbf16>
      %c0_14 = arith.constant 0 : index
      %c0_15 = arith.constant 0 : index
      %19 = vector.load %arg4[%c0_14, %c0_15] : memref<128x36xbf16, #tpu.memory_space<vmem>>, vector<128x36xbf16>
      %cst_16 = arith.constant dense<0.000000e+00> : vector<2x36xf32>
      %20 = tpu.matmul %18, %19, %cst_16 {dimension_numbers = #tpu.dot_dimension_numbers<[1], [0], [0], [1], [0, 0, 1, 1], [], []>} : vector<2x128xbf16>, vector<128x36xbf16>, vector<2x36xf32> -> vector<2x36xf32>
      %c0_17 = arith.constant 0 : index
      %c0_18 = arith.constant 0 : index
      %21 = vector.load %arg5[%c0_17, %c0_18] : memref<1x36xf32, #tpu.memory_space<vmem>>, vector<1x36xf32>
      %22 = vector.broadcast %21 : vector<1x36xf32> to vector<2x36xf32>
      %23 = arith.addf %20, %22 : vector<2x36xf32>
      %c0_19 = arith.constant 0 : index
      %c0_20 = arith.constant 0 : index
      %24 = vector.load %arg6[%c0_19, %c0_20] : memref<2x36xf32, #tpu.memory_space<vmem>>, vector<2x36xf32>
      tpu.vector_store %arg6[%c0_19, %c0_20], %23 {strides = array<i32>} : memref<2x36xf32, #tpu.memory_space<vmem>>, vector<2x36xf32>,
    } else {
    }
    return
  }
  func.func @transform_0(%arg0: i32) -> (i32, i32) {
    %c0_i32 = arith.constant 0 : i32
    %c0_i32_0 = arith.constant 0 : i32
    return %c0_i32, %arg0 : i32, i32
  }
  func.func @transform_1(%arg0: i32) -> (i32, i32) {
    %c0_i32 = arith.constant 0 : i32
    %c0_i32_0 = arith.constant 0 : i32
    return %arg0, %c0_i32 : i32, i32
  }
  func.func @transform_2(%arg0: i32) -> (i32, i32) {
    %c0_i32 = arith.constant 0 : i32
    %c0_i32_0 = arith.constant 0 : i32
    %c0_i32_1 = arith.constant 0 : i32
    return %c0_i32, %c0_i32_0 : i32, i32
  }
  func.func @transform_3(%arg0: i32) -> (i32, i32) {
    %c0_i32 = arith.constant 0 : i32
    %c0_i32_0 = arith.constant 0 : i32
    %c0_i32_1 = arith.constant 0 : i32
    return %c0_i32, %c0_i32_0 : i32, i32
  }
  func.func @transform_4(%arg0: i32) -> (i32, i32) {
    %c0_i32 = arith.constant 0 : i32
    %c0_i32_0 = arith.constant 0 : i32
    %c0_i32_1 = arith.constant 0 : i32
    return %c0_i32, %c0_i32_0 : i32, i32
  }
  func.func @transform_5(%arg0: i32) -> (i32, i32) {
    %c0_i32 = arith.constant 0 : i32
    %c0_i32_0 = arith.constant 0 : i32
    %c0_i32_1 = arith.constant 0 : i32
    return %c0_i32, %c0_i32_0 : i32, i32
  }
}

</mosaic_0001>

<bundles_post_ra>
// kernel: plate_reader_forward.4
= control target key start
LH: loop header
LB: loop body
LE: loop exit
PB: predicated region body
PF: predicated region fallthrough
CT: control target
= control target key end

     0   :  { %9 = vsyncpa [#allocation4], 0  ;;  %s5347_s15 = smov 0   ;;  %s7264_s0 = inlined_call_operand.vmem [shape: bf16[2,24,32,100], index: 0, kind: input, shape index: {}]   ;;  %s7265_s1 = inlined_call_operand.hbm [shape: bf16[64,288], index: 1, kind: input, shape index: {}]   ;;  %s7266_s2 = inlined_call_operand.vmem [shape: f32[64,1], index: 2, kind: input, shape index: {}]   ;;  %s7267_s3 = inlined_call_operand.vmem [shape: bf16[100,50], index: 3, kind: input, shape index: {}]   ;;  %s7268_s4 = inlined_call_operand.vmem [shape: bf16[2,768,50], index: 4, kind: output, shape index: {}]  }
   0x1 LB: > { %s4270_s16 = sadd.s32 4294967295, %s5300_s15   ;;  %p4272_p0 = scmp.ge.s32.totalorder %s5300_s15, 1  ;;  %s5300_s15 = sphi %s5347_s15, %s15_s15  }
   0x2   : > { %p135_p1 = scmp.lt.s32.totalorder %s5300_s15, 3  ;;  %s5306_s17 = smov [#allocation3]  }
   0x3   : > { %s147_s18 = sshll.u32 %s5306_s17, 4  ;;  %p5069_p3 = scmp.eq.s32.totalorder %s4270_s16, 0  ;;  %s148_s18 = int_to_ptr.vmem [resolvable:$true] %s147_s18 }
   0x4   : > { %p5355_p2 = pnand %p4272_p0, %p135_p1  ;;  %s5271_s20 = scalar_lea.vmem %s148_s18, 1536 }
   0x5   : > { %p5272_p7 = scmp.ne.s32.totalorder %s148_s18, %s5271_s20  ;;  %p5279_p10 = scmp.lt.s32.totalorder %s148_s18, %s148_s18 }
   0x6   : > { %p5065_p4 = pneg %p5355_p2  ;;  %p5280_p11 = scmp.lt.s32.totalorder %s5271_s20, %s5271_s20 }
   0x8   : > { %p5066_p5 = pnand %p5069_p3, %p5065_p4  ;;  %p5281_p12 = por %p5280_p11, %p5279_p10 }
   0xa   : > { %p5262_p6 = pneg %p5066_p5 }
   0xc   : > { %p5274_p8 = pnand %p5272_p7, %p5262_p6 }
   0xe   : > { %p5275_p9 = pneg %p5274_p8 }
  0x10   : > { %p5282_p13 = pnand %p5281_p12, %p5275_p9 }
  0x12   : > { %5285 = shalt.err (!%p5282_p13)
}
  0x13   : > { %s5307_s21 = smov 192   ;;  %s5308_s22 = smov 12  }
  0x14   : > { %5068 = dma.hbm_to_vmem [thread:$0]  (!%p5066_p5), %s7265_s1, 1536, %s148_s18, [#allocation4], %s5307_s21, %s5307_s21, %s5308_s22  }
  0x15   : > { %177 = sbr.rel (%p5355_p2) target bundleno = 1464 (0x5b8), region = 36 }
  0x1a   : > { %5295 = dma.done.wait (%p5069_p3), [#allocation4], 1536  }
  0x1b   : > { %5297 = vsyncadd (%p5069_p3), [#allocation4], 4294965760  ;;  %p203_p0 = scmp.lt.s32.totalorder %s4270_s16, 1  ;;  %v238_v0 = vlaneseq  ;;  %v5388_v11 = vld [vmem:[#allocation3] sm:$0xff]  ;;  %v5390_v12 = vld [vmem:[#allocation3 + $0x8] sm:$0xf] }
  0x1c   : > { %7333 = vst [vmem:[#allocation6_spill] sm:$0xff] %v5388_v11  ;;  %7334 = vst [vmem:[#allocation7_spill] sm:$0xff] %v5390_v12  ;;  %v5392_v13 = vld [vmem:[#allocation3 + $0xc] sm:$0xff]  ;;  %v5397_v16 = vld [vmem:[#allocation3 + $0x14] sm:$0xf]  ;;  %v5309_v57 = vmov 0.0  }
  0x1d   : > { %s7460_s16 = smov (!%p203_p0, %s4270_s16), 1  ;;  %v239_v1 = vand.u32 127, %v238_v0  ;;  %7335 = vst [vmem:[#allocation8_spill] sm:$0xff] %v5392_v13  ;;  %7336 = vst [vmem:[#allocation9_spill] sm:$0xff] %v5397_v16  ;;  %v5399_v17 = vld [vmem:[#allocation3 + $0x18] sm:$0xff]  ;;  %v5403_v19 = vld [vmem:[#allocation3 + $0x24] sm:$0xff] }
  0x1e   : > { %s5052_s25 = smul.u32 384, %s7460_s16  ;;  %7337 = vst [vmem:[#allocation10_spill] sm:$0xff] %v5399_v17  ;;  %v5401_v18 = vld [vmem:[#allocation3 + $0x20] sm:$0xf]  ;;  %7339 = vst [vmem:[#allocation12_spill] sm:$0xff] %v5403_v19  ;;  %v5407_v21 = vld [vmem:[#allocation3 + $0x30] sm:$0xff] }
  0x1f   : > { %v240_v2 = vadd.s32 128, %v239_v1  ;;  %v241_v3 = vadd.s32 256, %v239_v1  ;;  %v242_v4 = vadd.s32 384, %v239_v1  ;;  %7338 = vst [vmem:[#allocation11_spill] sm:$0xff] %v5401_v18  ;;  %v5405_v20 = vld [vmem:[#allocation3 + $0x2c] sm:$0xf] }
  0x20   : > { %v5369_v5 = vmul.u32.u64.low 2748779070, %v239_v1  ;;  %v5370_v6 = vmul.u32.u64.high 2748779070, %v239_v1, %v5369_v5  ;;  %s5375_s28 = scalar_lea.vmem %s7264_s0, %s5052_s25  ;;  %s5380_s5 = scalar_lea.vmem %s7268_s4, %s5052_s25  ;;  %7340 = vst [vmem:[#allocation13_spill] sm:$0xff] %v5407_v21  ;;  %v5410_v23 = vld [vmem:[#allocation3 + $0x38] sm:$0xf]  ;;  %v5412_v24 = vld [vmem:[#allocation3 + $0x3c] sm:$0xff] }
  0x21   : > { %v5382_v7 = vmul.u32.u64.low 2748779070, %v240_v2  ;;  %v5383_v8 = vmul.u32.u64.high 2748779070, %v240_v2, %v5382_v7  ;;  %v5385_v9 = vmul.u32.u64.low 2748779070, %v241_v3  ;;  %v5386_v10 = vmul.u32.u64.high 2748779070, %v241_v3, %v5385_v9  ;;  %7341 = vst [vmem:[#allocation14_spill] sm:$0xff] %v5412_v24  ;;  %v5417_v27 = vld [vmem:[#allocation3 + $0x48] sm:$0xff] }
  0x22   : > { %v5394_v14 = vmul.u32.u64.low 2748779070, %v242_v4  ;;  %v5395_v15 = vmul.u32.u64.high 2748779070, %v242_v4, %v5394_v14  ;;  %v249_v22 = vshrl.u32 %v5370_v6, 6  ;;  %v5414_v25 = vld [vmem:[#allocation3 + $0x44] sm:$0xf]  ;;  %7342 = vst [vmem:[#allocation15_spill] sm:$0xff] %v5417_v27 }
  0x23   : > { %v260_v26 = vshrl.u32 %v5383_v8, 6  ;;  %v5419_v28 = vld [vmem:[#allocation3 + $0x50] sm:$0xf]  ;;  %v5421_v29 = vld [vmem:[#allocation3 + $0x54] sm:$0xff]  ;;  %v271_v31 = vshrl.u32 %v5386_v10, 6  ;;  %v5429_v33 = vld [vmem:[%s7266_s2] sm:$0xff] }
  0x24   : > { %7343 = vst [vmem:[#allocation16_spill] sm:$0xff] %v5421_v29  ;;  %v250_v30 = vmul.u32 100, %v249_v22  ;;  %v5424_v32 = vld [vmem:[#allocation3 + $0x5c] sm:$0xf]  ;;  %7344 = vst [vmem:[#allocation17_spill] sm:$0xff] %v5429_v33  ;;  %v5434_v34 = vld [vmem:[%s7266_s2 + $0x8] sm:$0xff] }
  0x25   : > { %7345 = vst [vmem:[#allocation18_spill] sm:$0xff] %v5434_v34  ;;  %v261_v35 = vmul.u32 100, %v260_v26  ;;  %v282_v36 = vshrl.u32 %v5395_v15, 6  ;;  %v5440_v37 = vld [vmem:[%s7266_s2 + $0x10] sm:$0xff]  ;;  %v5445_v38 = vld [vmem:[%s7266_s2 + $0x18] sm:$0xff]  ;;  %v5450_v39 = vld [vmem:[%s7266_s2 + $0x20] sm:$0xff] }
  0x26   : > { %7346 = vst [vmem:[#allocation19_spill] sm:$0xff] %v5440_v37  ;;  %7347 = vst [vmem:[#allocation20_spill] sm:$0xff] %v5445_v38  ;;  %v251_v40 = vsub.s32 %v239_v1, %v250_v30  ;;  %v272_v41 = vmul.u32 100, %v271_v31  ;;  %v5455_v42 = vld [vmem:[%s7266_s2 + $0x28] sm:$0xff]  ;;  %v5460_v43 = vld [vmem:[%s7266_s2 + $0x30] sm:$0xff]  ;;  %s5484_s23 = smov 0  }
  0x27   : > { %7348 = vst [vmem:[#allocation21_spill] sm:$0xff] %v5450_v39  ;;  %7349 = vst [vmem:[#allocation22_spill] sm:$0xff] %v5455_v42  ;;  %v5465_v44 = vld [vmem:[%s7266_s2 + $0x38] sm:$0xff]  ;;  %v262_v45 = vsub.s32 %v240_v2, %v261_v35  ;;  %v283_v46 = vmul.u32 100, %v282_v36 }
  0x28   : > { %7350 = vst [vmem:[#allocation23_spill] sm:$0xff] %v5460_v43  ;;  %7351 = vst [vmem:[#allocation24_spill] sm:$0xff] %v5465_v44  ;;  %v273_v47 = vsub.s32 %v241_v3, %v272_v41  ;;  %vm287_vm0 = vcmp.ne.s32.totalorder %v251_v40, 0  ;;  %vm291_vm1 = vcmp.lt.s32.totalorder %v251_v40, 0  ;;  %v299_v48 = vadd.s32 100, %v251_v40 }
  0x29   : > { %v284_v49 = vsub.s32 %v242_v4, %v283_v46  ;;  %vm288_vm2 = vcmp.ne.s32.totalorder %v262_v45, 0  ;;  %vm292_vm3 = vcmp.lt.s32.totalorder %v262_v45, 0  ;;  %vm295_vm4 = vmand %vm291_vm1, %vm287_vm0  ;;  %v300_v50 = vadd.s32 100, %v262_v45 }
  0x2a   : > { %vm289_vm5 = vcmp.ne.s32.totalorder %v273_v47, 0  ;;  %vm293_vm6 = vcmp.lt.s32.totalorder %v273_v47, 0  ;;  %vm296_vm7 = vmand %vm292_vm3, %vm288_vm2  ;;  %v301_v51 = vadd.s32 100, %v273_v47  ;;  %v303_v52 = vsel %vm295_vm4, %v299_v48, %v251_v40 }
  0x2b   : > { %vm290_vm8 = vcmp.ne.s32.totalorder %v284_v49, 0  ;;  %vm294_vm9 = vcmp.lt.s32.totalorder %v284_v49, 0  ;;  %vm297_vm10 = vmand %vm293_vm6, %vm289_vm5  ;;  %v302_v53 = vadd.s32 100, %v284_v49  ;;  %v304_v54 = vsel %vm296_vm7, %v300_v50, %v262_v45 }
  0x2c   : > { %vm298_vm11 = vmand %vm294_vm9, %vm290_vm8  ;;  %v305_v55 = vsel %vm297_vm10, %v301_v51, %v273_v47  ;;  %vm307_vm12 = vcmp.ne.s32.totalorder %v303_v52, 0  ;;  %vm308_vm13 = vcmp.ne.s32.totalorder %v304_v54, 0  ;;  %vm323_vm14 = vcmp.ne.s32.totalorder %v303_v52, 99 }
  0x2d   : > { %v306_v56 = vsel %vm298_vm11, %v302_v53, %v284_v49  ;;  %vm309_vm15 = vcmp.ne.s32.totalorder %v305_v55, 0  ;;  %v4279_v58 = vsel %vm307_vm12, 1.0, %v5309_v57  ;;  %v4280_v59 = vsel %vm308_vm13, 1.0, %v5309_v57 }
  0x2e   : > { %vm310_vm0 = vcmp.ne.s32.totalorder %v306_v56, 0  ;;  %v4281_v60 = vsel %vm309_vm15, 1.0, %v5309_v57  ;;  %v5467_v61 = vpack.c.bf16 %v4279_v58, %v4279_v58  ;;  %v5469_v62 = vpack.c.bf16 %v4280_v59, %v4280_v59 }
  0x2f   : > { %v4282_v63 = vsel %vm310_vm0, 1.0, %v5309_v57  ;;  %v5471_v0 = vpack.c.bf16 %v4281_v60, %v4281_v60  ;;  %vm324_vm1 = vcmp.ne.s32.totalorder %v304_v54, 99  ;;  %vm325_vm2 = vcmp.ne.s32.totalorder %v305_v55, 99 }
  0x30   : > { %v5473_v1 = vpack.c.bf16 %v4282_v63, %v4282_v63  ;;  %vm326_vm3 = vcmp.ne.s32.totalorder %v306_v56, 99  ;;  %v4283_v2 = vsel %vm323_vm14, 1.0, %v5309_v57  ;;  %v4284_v3 = vsel %vm324_vm1, 1.0, %v5309_v57 }
  0x31   : > { %7352 = vst [vmem:[#allocation25_spill] sm:$0xff] %v5471_v0  ;;  %v4285_v4 = vsel %vm325_vm2, 1.0, %v5309_v57  ;;  %v4286_v5 = vsel %vm326_vm3, 1.0, %v5309_v57  ;;  %v5476_v6 = vpack.c.bf16 %v4283_v2, %v4283_v2  ;;  %v5478_v7 = vpack.c.bf16 %v4284_v3, %v4284_v3 }
  0x32   : > { %7353 = vst [vmem:[#allocation26_spill] sm:$0xff] %v5473_v1  ;;  %v5480_v8 = vpack.c.bf16 %v4285_v4, %v4285_v4  ;;  %v5482_v9 = vpack.c.bf16 %v4286_v5, %v4286_v5 }
  0x33   : > { %7354 = vst [vmem:[#allocation27_spill] sm:$0xff] %v5476_v6  ;;  %7355 = vst [vmem:[#allocation28_spill] sm:$0xff] %v5478_v7 }
  0x34   : > { %7356 = vst [vmem:[#allocation29_spill] sm:$0xff] %v5480_v8  ;;  %7357 = vst [vmem:[#allocation30_spill] sm:$0xff] %v5482_v9 }
  0x35 LB: >> { %v7358_v19 = vld [vmem:[#allocation12_spill] sm:$0xff]  ;;  %v7359_v17 = vld [vmem:[#allocation10_spill] sm:$0xff]  ;;  %s5490_s24 = sshll.u32 %s5304_s23, 2  ;;  %s5310_s9 = smov 44   ;;  %vm537_vm10 = vcmask 818176   ;;  %vm546_vm11 = vcmask 588800   ;;  %s5304_s23 = sphi %s5484_s23, %s344_s23  }
  0x36   : >> { %v7360_v13 = vld [vmem:[#allocation8_spill] sm:$0xff]  ;;  %v7361_v11 = vld [vmem:[#allocation6_spill] sm:$0xff]  ;;  %s460_s25 = sadd.s32 4, %s5490_s24  ;;  %s414_s26 = sadd.s32 2, %s5490_s24  ;;  %vm553_vm12 = vcmask 359424   ;;  %v7379_v33 = vld [vmem:[#allocation17_spill] sm:$0xff] }
  0x37   : >> { %p461_p1 = scmp.gt.s32.totalorder %s460_s25, 0  ;;  %p4328_p2 = scmp.lt.s32.totalorder %s460_s25, 23  ;;  %v7380_v34 = vld [vmem:[#allocation18_spill] sm:$0xff]  ;;  %v7381_v38 = vld [vmem:[#allocation20_spill] sm:$0xff]  ;;  %v7382_v37 = vld [vmem:[#allocation19_spill] sm:$0xff]  ;;  %vm726_vm13 = vcmask 7168  }
  0x38   : >> { %v7367_v0 = vld [vmem:[#allocation25_spill] sm:$0xff]  ;;  %p465_p3 = scmp.ge.s32.totalorder %s460_s25, 0  ;;  %p466_p4 = scmp.lt.s32.totalorder %s460_s25, 24  ;;  %v7383_v42 = vld [vmem:[#allocation22_spill] sm:$0xff]  ;;  %v7385_v44 = vld [vmem:[#allocation24_spill] sm:$0xff]  ;;  %vm860_vm14 = vcmask 1039360  }
  0x39   : >> { %v7366_v1 = vld [vmem:[#allocation26_spill] sm:$0xff]  ;;  %s7462_s25 = smov (!%p461_p1, %s460_s25), 0  ;;  %p415_p6 = scmp.gt.s32.totalorder %s414_s26, 0  ;;  %v7384_v39 = vld [vmem:[#allocation21_spill] sm:$0xff]  ;;  %v7386_v43 = vld [vmem:[#allocation23_spill] sm:$0xff]  ;;  %vm1058_vm15 = vcmask 261120  }
  0x3a   : >> { %v7364_v7 = vld [vmem:[#allocation28_spill] sm:$0xff]  ;;  %v7365_v6 = vld [vmem:[#allocation27_spill] sm:$0xff]  ;;  %p467_p5 = pnand %p466_p4, %p465_p3  ;;  %s7464_s25 = smov (!%p4328_p2, %s7462_s25), 23  ;;  %v7387_v16 = vld [vmem:[#allocation9_spill] sm:$0xff]  ;;  %vm909_vm0 = vcmask 121856   ;;  %vm1491_vm1 = vcmask 228352  }
  0x3b   : >> { %v7362_v9 = vld [vmem:[#allocation30_spill] sm:$0xff]  ;;  %v7363_v8 = vld [vmem:[#allocation29_spill] sm:$0xff]  ;;  %s4751_s29 = sshll.u32 %s7464_s25, 4  ;;  %p4312_p7 = scmp.lt.s32.totalorder %s414_s26, 23  ;;  %v7388_v12 = vld [vmem:[#allocation7_spill] sm:$0xff]  ;;  %vm1641_vm2 = vcmask 814080  }
  0x3c   : >> { %s4335_s27 = scalar_select %p467_p5, 0, 1  ;;  %v7390_v18 = vld [vmem:[#allocation11_spill] sm:$0xff]  ;;  %vm1709_vm3 = vcmask 457728  }
  0x3d   : >> { %s471_s30 = scalar_lea.vmem %s5375_s28, %s4751_s29  ;;  %p419_p8 = scmp.ge.s32.totalorder %s414_s26, 0 }
  0x3e   : >> { %v477_v10 = vstv %s4335_s27  ;;  %v474_v14 = vld [vmem:[%s471_s30 + $0x8] sm:$0xf]  ;;  %v475_v15 = vld [vmem:[%s471_s30 + $0xc] sm:$0xf]  ;;  %s416_s6 = scalar_select %p415_p6, %s414_s26, 0 }
  0x3f   : >> { %vm478_vm4 = vcmp.eq.s32.totalorder %v477_v10, 1  ;;  %p420_p9 = scmp.lt.s32.totalorder %s414_s26, 24  ;;  %s437_s7 = sadd.s32 3, %s5490_s24  ;;  %v472_v31 = vld [vmem:[%s471_s30] sm:$0xf] }
  0x40   : >> { %v481_v22 = vsel %vm478_vm4, %v474_v14, 0  ;;  %v482_v26 = vsel %vm478_vm4, %v475_v15, 0  ;;  %s7466_s6 = smov (!%p4312_p7, %s416_s6), 23  ;;  %p438_p11 = scmp.gt.s32.totalorder %s437_s7, 0  ;;  %v473_v35 = vld [vmem:[%s471_s30 + $0x4] sm:$0xf] }
  0x41   : >> { %v4347_v30 = vcombine.low %v481_v22, %v482_v26  ;;  %p5498_p10 = pnand %p420_p9, %p419_p8  ;;  %s4745_s10 = sshll.u32 %s7466_s6, 4  ;;  %v479_v47 = vsel %vm478_vm4, %v472_v31, 0  ;;  %v480_v48 = vsel %vm478_vm4, %v473_v35, 0 }
  0x42   : >> { %p4320_p12 = scmp.lt.s32.totalorder %s437_s7, 23  ;;  %s425_s11 = scalar_lea.vmem %s5375_s28, %s4745_s10  ;;  %v4346_v57 = vcombine.low %v479_v47, %v480_v48 }
  0x43   : >> { %624 = vrot.lane.b32.xlu1 %v4347_v30, %s5310_s9  ;;  %p442_p13 = scmp.ge.s32.totalorder %s437_s7, 0  ;;  %v428_v36 = vld [vmem:[%s425_s11 + $0x8] sm:$0xf]  ;;  %v429_v40 = vld [vmem:[%s425_s11 + $0xc] sm:$0xf]  ;;  %p443_p0 = scmp.lt.s32.totalorder %s437_s7, 24 }
  0x44   : >> { %s4319_s12 = scalar_select %p5498_p10, 0, 1  ;;  %v426_v41 = vld [vmem:[%s425_s11] sm:$0xf]  ;;  %v427_v45 = vld [vmem:[%s425_s11 + $0x4] sm:$0xf] }
  0x45   : >> { %s439_s13 = scalar_select %p438_p11, %s437_s7, 0 }
  0x46   : >> { %v431_v46 = vstv %s4319_s12  ;;  %s5507_s14 = sadd.s32 1, %s5490_s24  ;;  %p5513_p1 = pnand %p443_p0, %p442_p13 }
  0x47   : >> { %vm432_vm5 = vcmp.eq.s32.totalorder %v431_v46, 1  ;;  %s7468_s13 = smov (!%p4320_p12, %s439_s13), 23  ;;  %p392_p2 = scmp.gt.s32.totalorder %s5507_s14, 0 }
  0x48   : >> { %v435_v49 = vsel %vm432_vm5, %v428_v36, 0  ;;  %v436_v50 = vsel %vm432_vm5, %v429_v40, 0  ;;  %v433_v51 = vsel %vm432_vm5, %v426_v41, 0  ;;  %v434_v52 = vsel %vm432_vm5, %v427_v45, 0  ;;  %s4748_s17 = sshll.u32 %s7468_s13, 4  ;;  %p4304_p3 = scmp.lt.s32.totalorder %s5507_s14, 23 }
  0x49   : >> { %v5518_v53 = vcombine.low %v435_v49, %v436_v50  ;;  %v5520_v54 = vcombine.low %v433_v51, %v434_v52  ;;  %s448_s18 = scalar_lea.vmem %s5375_s28, %s4748_s17  ;;  %p396_p4 = scmp.ge.s32.totalorder %s5507_s14, 0 }
  0x4a   : >> { %s5311_s19 = smov 100   ;;  %v451_v55 = vld [vmem:[%s448_s18 + $0x8] sm:$0xf]  ;;  %v452_v56 = vld [vmem:[%s448_s18 + $0xc] sm:$0xf]  ;;  %p397_p5 = scmp.lt.s32.totalorder %s5507_s14, 24 }
  0x4b   : >> { %606 = vrot.lane.b32.xlu0 %v5518_v53, %s5311_s19  ;;  %s4327_s20 = scalar_select %p5513_p1, 0, 1  ;;  %604 = vrot.lane.b32.xlu1 %v5520_v54, %s5311_s19  ;;  %v449_v58 = vld [vmem:[%s448_s18] sm:$0xf]  ;;  %v450_v59 = vld [vmem:[%s448_s18 + $0x4] sm:$0xf] }
  0x4c   : >> { %s393_s21 = scalar_select %p392_p2, %s5507_s14, 0 }
  0x4d   : >> { %v454_v60 = vstv %s4327_s20  ;;  %p369_p6 = scmp.gt.s32.totalorder %s5490_s24, 0  ;;  %p5541_p7 = pnand %p397_p5, %p396_p4 }
  0x4e   : >> { %vm455_vm6 = vcmp.eq.s32.totalorder %v454_v60, 1  ;;  %s7470_s21 = smov (!%p4304_p3, %s393_s21), 23  ;;  %p4296_p8 = scmp.lt.s32.totalorder %s5490_s24, 23 }
  0x4f   : >> { %v458_v63 = vsel %vm455_vm6, %v451_v55, 0  ;;  %v459_v2 = vsel %vm455_vm6, %v452_v56, 0  ;;  %v456_v3 = vsel %vm455_vm6, %v449_v58, 0  ;;  %v457_v4 = vsel %vm455_vm6, %v450_v59, 0  ;;  %622 = vrot.lane.b32.xlu1 %v4346_v57, %s5310_s9  ;;  %s4742_s25 = sshll.u32 %s7470_s21, 4  ;;  %p373_p9 = scmp.ge.s32.totalorder %s5490_s24, 0 }
  0x50   : >> { %v4345_v5 = vcombine.low %v458_v63, %v459_v2  ;;  %s402_s26 = scalar_lea.vmem %s5375_s28, %s4742_s25  ;;  %p374_p10 = scmp.lt.s32.totalorder %s5490_s24, 24  ;;  %v4344_v10 = vcombine.low %v456_v3, %v457_v4 }
  0x51   : >> { %s5312_s27 = smov 72   ;;  %v405_v14 = vld [vmem:[%s402_s26 + $0x8] sm:$0xf]  ;;  %v406_v15 = vld [vmem:[%s402_s26 + $0xc] sm:$0xf]  ;;  %s5313_s11 = smov 113  }
  0x52   : >> { %610 = vrot.lane.b32.xlu0 %v4345_v5, %s5312_s27  ;;  %s4311_s29 = scalar_select %p5541_p7, 0, 1  ;;  %v403_v22 = vld [vmem:[%s402_s26] sm:$0xf]  ;;  %v404_v26 = vld [vmem:[%s402_s26 + $0x4] sm:$0xf] }
  0x53   : >> { %566 = vrot.lane.b32.xlu1 %v5518_v53, %s5312_s27  ;;  %s370_s30 = scalar_select %p369_p6, %s5490_s24, 0 }
  0x54   : >> { %v408_v30 = vstv %s4311_s29  ;;  %p5559_p11 = pnand %p374_p10, %p373_p9  ;;  %s346_s12 = sadd.s32 4294967295, %s5490_s24 }
  0x55   : >> { %vm409_vm7 = vcmp.eq.s32.totalorder %v408_v30, 1  ;;  %s7472_s30 = smov (!%p4296_p8, %s370_s30), 23  ;;  %p347_p12 = scmp.gt.s32.totalorder %s346_s12, 0 }
  0x56   : >> { %608 = vrot.lane.b32.xlu0 %v4344_v10, %s5312_s27  ;;  %v412_v31 = vsel %vm409_vm7, %v405_v14, 0  ;;  %v413_v35 = vsel %vm409_vm7, %v406_v15, 0  ;;  %v410_v36 = vsel %vm409_vm7, %v403_v22, 0  ;;  %v411_v40 = vsel %vm409_vm7, %v404_v26, 0  ;;  %s4303_s7 = scalar_select %p5559_p11, 0, 1 }
  0x57   : >> { %v5568_v41 = vcombine.low %v412_v31, %v413_v35  ;;  %v5570_v45 = vcombine.low %v410_v36, %v411_v40  ;;  %s4739_s8 = sshll.u32 %s7472_s30, 4  ;;  %p351_p13 = scmp.ge.s32.totalorder %s346_s12, 0 }
  0x58   : >> { %s379_s10 = scalar_lea.vmem %s5375_s28, %s4739_s8  ;;  %v385_v46 = vstv %s4303_s7  ;;  %p352_p0 = scmp.lt.s32.totalorder %s346_s12, 24 }
  0x59   : >> { %560 = vrot.lane.b32.xlu1 %v5570_v45, %s5311_s19  ;;  %v380_v47 = vld [vmem:[%s379_s10] sm:$0xf]  ;;  %v381_v48 = vld [vmem:[%s379_s10 + $0x4] sm:$0xf]  ;;  %v382_v49 = vld [vmem:[%s379_s10 + $0x8] sm:$0xf] }
  0x5a   : >> { %562 = vrot.lane.b32.xlu0 %v5568_v41, %s5311_s19  ;;  %v383_v50 = vld [vmem:[%s379_s10 + $0xc] sm:$0xf]  ;;  %vm386_vm8 = vcmp.eq.s32.totalorder %v385_v46, 1  ;;  %s348_s13 = scalar_select %p347_p12, %s346_s12, 0 }
  0x5b   : >> { %v387_v51 = vsel %vm386_vm8, %v380_v47, 0  ;;  %v388_v52 = vsel %vm386_vm8, %v381_v48, 0  ;;  %v389_v55 = vsel %vm386_vm8, %v382_v49, 0  ;;  %v390_v56 = vsel %vm386_vm8, %v383_v50, 0  ;;  %p4288_p1 = scmp.lt.s32.totalorder %s346_s12, 23  ;;  %p353_p2 = pnand %p352_p0, %p351_p13 }
  0x5c   : >> { %v5581_v57 = vcombine.low %v387_v51, %v388_v52  ;;  %v5585_v58 = vcombine.low %v389_v55, %v390_v56  ;;  %s5314_s17 = smov 1   ;;  %s5315_s18 = smov 127  }
  0x5d   : >> { %578 = vrot.lane.b32.xlu1 %v4344_v10, %s5310_s9  ;;  %s7474_s13 = smov (!%p4288_p1, %s348_s13), 23  ;;  %s5318_s20 = smov 28  }
  0x5e   : >> { %580 = vrot.lane.b32.xlu0 %v4345_v5, %s5310_s9  ;;  %s4295_s24 = scalar_select %p353_p2, 0, 1 }
  0x5f   : >> { %s4736_s14 = sshll.u32 %s7474_s13, 4  ;;  %s4368_s21 = sshll.u32 %s5304_s23, 7 }
  0x60   : >> { %s357_s16 = scalar_lea.vmem %s5375_s28, %s4736_s14  ;;  %v363_v10 = vstv %s4295_s24  ;;  %s6379_s22 = sshra.s32 %s4368_s21, 3 }
  0x61   : >> { %519 = vrot.lane.b32.xlu1 %v5568_v41, %s5312_s27  ;;  %v358_v14 = vld [vmem:[%s357_s16] sm:$0xf]  ;;  %v359_v15 = vld [vmem:[%s357_s16 + $0x4] sm:$0xf]  ;;  %v360_v26 = vld [vmem:[%s357_s16 + $0x8] sm:$0xf] }
  0x62   : >> { %564 = vrot.lane.b32.xlu0 %v5520_v54, %s5312_s27  ;;  %v361_v30 = vld [vmem:[%s357_s16 + $0xc] sm:$0xf]  ;;  %vm364_vm9 = vcmp.eq.s32.totalorder %v363_v10, 1  ;;  %s4377_s25 = sshll.u32 %s6379_s22, 2  ;;  %s344_s23 = sadd.s32 1, %s5304_s23  }
  0x63   : >> { %v365_v35 = vsel %vm364_vm9, %v358_v14, 0  ;;  %v366_v36 = vsel %vm364_vm9, %v359_v15, 0  ;;  %v367_v40 = vsel %vm364_vm9, %v360_v26, 0  ;;  %v368_v46 = vsel %vm364_vm9, %v361_v30, 0  ;;  %s1640_s26 = scalar_lea.vmem [#allocation2], %s4377_s25  ;;  %p341_p3 = scmp.ge.s32.totalorder %s344_s23, 6  }
  0x64   : >> { %v4336_v49 = vcombine.low %v365_v35, %v366_v36  ;;  %v4337_v50 = vcombine.low %v367_v40, %v368_v46  ;;  %v7269_v46 = vmov 0   ;;  %s5320_s7 = smov (%p341_p3), 99   ;;  %s5321_s8 = smov (%p341_p3), 127   ;;  %vm3280_vm4 = vcmask (%p341_p3), 1041408  }
  0x65   : >> { %503 = vrot.lane.b32.xlu1 %v5581_v57, %s5311_s19  ;;  %1176 = vmatprep.mubr.bf16.mxu1 %v7269_v46  ;;  %vm2266_vm5 = vcmask (%p341_p3), 809984   ;;  %vm4085_vm6 = vcmask (%p341_p3), 404480  }
  0x66   : >> { %505 = vrot.lane.b32.xlu0 %v5585_v58, %s5311_s19  ;;  %5104 = vset.pattern.permute.xlu1 %v7269_v46  ;;  %s5317_s19 = smov 15  }
  0x67   : >> { %5103 = vset.pattern.permute.xlu0 %v7269_v46 }
  0x69   : >> { %531 = vrot.lane.b32.xlu1 %v5520_v54, %s5310_s9 }
  0x6a   : >> { %533 = vrot.lane.b32.xlu0 %v5518_v53, %s5310_s9 }
  0x6e   : >> { %517 = vrot.lane.b32.xlu0 %v5570_v45, %s5312_s27  ;;  %s4761_s27 = sadd.s32 64, %s4368_s21 }
  0x6f   : >> { %s1726_s29 = sshra.s32 %s4761_s27, 3 }
  0x70   : >> { %s4388_s30 = sshll.u32 %s1726_s29, 2 }
  0x71   : >> { %s1729_s6 = scalar_lea.vmem [#allocation2], %s4388_s30 }
  0xb5   : >> { %v5597_v59 = vpop.permute.xlu1 %624 }
  0xb6   : >> { %658 = vrot.lane.b32.xlu0 %v5597_v59, %s5313_s11 }
  0xbd   : >> { %v5602_v60 = vpop.permute.xlu1 %604  ;;  %v5604_v63 = vpop.permute.xlu0 %606 }
  0xbe   : >> { %v5686_v40 = vsel %vm537_vm10, %v5568_v41, %v5604_v63  ;;  %v5704_v41 = vsel %vm537_vm10, %v5570_v45, %v5602_v60 }
  0xc1   : >> { %v5606_v53 = vpop.permute.xlu1 %622 }
  0xc2   : >> { %7372 = vst [vmem:[#allocation31_spill] sm:$0xff] %v5606_v53  ;;  %656 = vrot.lane.b32.xlu0 %v5606_v53, %s5313_s11 }
  0xc4   : >> { %v611_v54 = vpop.permute.xlu0 %610 }
  0xc5   : >> { %v5610_v2 = vpop.permute.xlu1 %566  ;;  %v5673_v35 = vsel %vm546_vm11, %v5604_v63, %v611_v54  ;;  %v5681_v36 = vsel %vm553_vm12, %v611_v54, %v5597_v59 }
  0xc6   : >> { %7375 = vst [vmem:[#allocation34_spill] sm:$0xff] %v5681_v36 }
  0xc8   : >> { %v5612_v3 = vpop.permute.xlu0 %608 }
  0xc9   : >> { %v5699_v54 = vsel %vm546_vm11, %v5602_v60, %v5612_v3  ;;  %v5713_v63 = vsel %vm553_vm12, %v5612_v3, %v5606_v53 }
  0xca   : >> { %7376 = vst [vmem:[#allocation35_spill] sm:$0xff] %v5713_v63 }
  0xcb   : >> { %v5614_v4 = vpop.permute.xlu1 %560 }
  0xcc   : >> { %v5616_v5 = vpop.permute.xlu0 %562 }
  0xcd   : >> { %v5725_v45 = vsel %vm537_vm10, %v5585_v58, %v5616_v5  ;;  %v5734_v60 = vsel %vm546_vm11, %v5616_v5, %v5610_v2  ;;  %v5748_v58 = vsel %vm537_vm10, %v5581_v57, %v5614_v4 }
  0xcf   : >> { %v5619_v22 = vpop.permute.xlu1 %578 }
  0xd0   : >> { %7373 = vst [vmem:[#allocation32_spill] sm:$0xff] %v5619_v22  ;;  %v5621_v31 = vpop.permute.xlu0 %580  ;;  %652 = vrot.lane.b32.xlu1 %v5619_v22, %s5313_s11 }
  0xd1   : >> { %7374 = vst [vmem:[#allocation33_spill] sm:$0xff] %v5621_v31  ;;  %654 = vrot.lane.b32.xlu0 %v5621_v31, %s5313_s11  ;;  %v5760_v5 = vsel %vm553_vm12, %v5610_v2, %v5621_v31 }
  0xd2   : >> { %7377 = vst [vmem:[#allocation36_spill] sm:$0xff] %v5760_v5 }
  0xd3   : >> { %v5627_v47 = vpop.permute.xlu1 %519 }
  0xd4   : >> { %v5629_v48 = vpop.permute.xlu0 %564  ;;  %724 = vrot.lane.b32.xlu1 %v5597_v59, %s5314_s17 }
  0xd5   : >> { %v5739_v3 = vsel %vm546_vm11, %v5614_v4, %v5629_v48  ;;  %v5773_v57 = vsel %vm553_vm12, %v5629_v48, %v5619_v22 }
  0xd6   : >> { %7378 = vst [vmem:[#allocation37_spill] sm:$0xff] %v5773_v57 }
  0xd7   : >> { %v504_v51 = vpop.permute.xlu1 %503 }
  0xd8   : >> { %v506_v52 = vpop.permute.xlu0 %505  ;;  %v5634_v55 = vsel %vm537_vm10, %v4336_v49, %v504_v51 }
  0xd9   : >> { %v5638_v56 = vsel %vm546_vm11, %v506_v52, %v5627_v47  ;;  %v5641_v10 = vsel %vm537_vm10, %v4337_v50, %v506_v52  ;;  %678 = vrot.lane.b32.xlu1 %v5634_v55, %s5314_s17 }
  0xda   : >> { %1071 = vmatprep.subr.bf16.mxu0 %v5638_v56  ;;  %686 = vrot.lane.b32.xlu0 %v5641_v10, %s5314_s17 }
  0xdb   : >> { %1072 = vmatpush1.bf16.msra.mxu0 %v5641_v10  ;;  %v5649_v14 = vpop.permute.xlu1 %531 }
  0xdc   : >> { %v5651_v15 = vpop.permute.xlu0 %533 }
  0xdd   : >> { %648 = vrot.lane.b32.xlu1 %v5649_v14, %s5313_s11  ;;  %v5786_v2 = vsel %vm553_vm12, %v5627_v47, %v5651_v15  ;;  %v5815_v47 = vcombine.high %v7361_v11, %v7360_v13 }
  0xde   : >> { %650 = vrot.lane.b32.xlu0 %v5651_v15, %s5313_s11 }
  0xdf   : >> { %1103 = vmatprep.mubr.bf16.mxu0 %v5815_v47 }
  0xe0   : >> { %v518_v26 = vpop.permute.xlu0 %517 }
  0xe1   : >> { %v548_v30 = vsel %vm546_vm11, %v504_v51, %v518_v26  ;;  %708 = vrot.lane.b32.xlu1 %v5621_v31, %s5314_s17  ;;  %v5798_v4 = vsel %vm553_vm12, %v518_v26, %v5649_v14 }
  0xe2   : >> { %716 = vrot.lane.b32.xlu0 %v5606_v53, %s5314_s17  ;;  %1073 = vmatprep.subr.bf16.mxu0 %v548_v30 }
  0xe3   : >> { %1074 = vmatpush1.bf16.msra.mxu0 %v5634_v55 }
  0xe5   : >> { %692 = vrot.lane.b32.xlu1 %v5651_v15, %s5314_s17 }
  0xe6   : >> { %700 = vrot.lane.b32.xlu0 %v5619_v22, %s5314_s17 }
  0xe9   : >> { %812 = vrot.lane.b32.xlu1 %v5634_v55, %s5315_s18 }
  0xea   : >> { %820 = vrot.lane.b32.xlu0 %v5641_v10, %s5315_s18 }
  0xed   : >> { %720 = vrot.lane.b32.xlu1 %v5673_v35, %s5314_s17 }
  0xee   : >> { %684 = vrot.lane.b32.xlu0 %v5649_v14, %s5314_s17 }
  0xf1   : >> { %856 = vrot.lane.b32.xlu1 %v5681_v36, %s5315_s18 }
  0xf2   : >> { %718 = vrot.lane.b32.xlu0 %v5686_v40, %s5314_s17 }
  0xf5   : >> { %852 = vrot.lane.b32.xlu1 %v5686_v40, %s5315_s18 }
  0xf6   : >> { %854 = vrot.lane.b32.xlu0 %v5673_v35, %s5315_s18 }
  0xf9   : >> { %712 = vrot.lane.b32.xlu1 %v5699_v54, %s5314_s17 }
  0xfa   : >> { %710 = vrot.lane.b32.xlu0 %v5704_v41, %s5314_s17 }
  0xfd   : >> { %848 = vrot.lane.b32.xlu1 %v5713_v63, %s5315_s18 }
  0xfe   : >> { %846 = vrot.lane.b32.xlu0 %v5699_v54, %s5315_s18 }
 0x101   : >> { %844 = vrot.lane.b32.xlu1 %v5704_v41, %s5315_s18 }
 0x102   : >> { %702 = vrot.lane.b32.xlu0 %v5725_v45, %s5314_s17 }
 0x105   : >> { %704 = vrot.lane.b32.xlu1 %v5734_v60, %s5314_s17 }
 0x106   : >> { %696 = vrot.lane.b32.xlu0 %v5739_v3, %s5314_s17 }
 0x109   : >> { %694 = vrot.lane.b32.xlu1 %v5748_v58, %s5314_s17 }
 0x10a   : >> { %722 = vrot.lane.b32.xlu0 %v5681_v36, %s5314_s17 }
 0x10d   : >> { %688 = vrot.lane.b32.xlu1 %v5638_v56, %s5314_s17 }
 0x10e   : >> { %680 = vrot.lane.b32.xlu0 %v548_v30, %s5314_s17 }
 0x111   : >> { %714 = vrot.lane.b32.xlu1 %v5713_v63, %s5314_s17 }
 0x112   : >> { %706 = vrot.lane.b32.xlu0 %v5760_v5, %s5314_s17 }
 0x115   : >> { %840 = vrot.lane.b32.xlu1 %v5760_v5, %s5315_s18 }
 0x116   : >> { %838 = vrot.lane.b32.xlu0 %v5734_v60, %s5315_s18 }
 0x119   : >> { %698 = vrot.lane.b32.xlu1 %v5773_v57, %s5314_s17 }
 0x11a   : >> { %836 = vrot.lane.b32.xlu0 %v5725_v45, %s5315_s18 }
 0x11d   : >> { %830 = vrot.lane.b32.xlu1 %v5739_v3, %s5315_s18 }
 0x11e   : >> { %832 = vrot.lane.b32.xlu0 %v5773_v57, %s5315_s18 }
 0x121   : >> { %828 = vrot.lane.b32.xlu1 %v5748_v58, %s5315_s18 }
 0x122   : >> { %690 = vrot.lane.b32.xlu0 %v5786_v2, %s5314_s17 }
 0x125   : >> { %824 = vrot.lane.b32.xlu1 %v5786_v2, %s5315_s18 }
 0x126   : >> { %822 = vrot.lane.b32.xlu0 %v5638_v56, %s5315_s18 }
 0x128   : >> { %v659_v48 = vpop.permute.xlu0 %658 }
 0x129   : >> { %682 = vrot.lane.b32.xlu1 %v5798_v4, %s5314_s17 }
 0x12a   : >> { %816 = vrot.lane.b32.xlu0 %v5798_v4, %s5315_s18 }
 0x12d   : >> { %814 = vrot.lane.b32.xlu1 %v548_v30, %s5315_s18 }
 0x12e   : >> { %842 = vrot.lane.b32.xlu0 %v5621_v31, %s5315_s18 }
 0x131   : >> { %903 = vrot.lane.b32.xlu1 %v5725_v45, %s5317_s19 }
 0x132   : >> { %834 = vrot.lane.b32.xlu0 %v5619_v22, %s5315_s18 }
 0x134   : >> { %v657_v49 = vpop.permute.xlu0 %656 }
 0x135   : >> { %901 = vrot.lane.b32.xlu1 %v5748_v58, %s5317_s19 }
 0x136   : >> { %826 = vrot.lane.b32.xlu0 %v5651_v15, %s5315_s18 }
 0x139   : >> { %899 = vrot.lane.b32.xlu1 %v5641_v10, %s5317_s19 }
 0x13a   : >> { %818 = vrot.lane.b32.xlu0 %v5649_v14, %s5315_s18 }
 0x13d   : >> { %897 = vrot.lane.b32.xlu1 %v5634_v55, %s5317_s19 }
 0x13e   : >> { %858 = vrot.lane.b32.xlu0 %v5597_v59, %s5315_s18 }
 0x141   : >> { %907 = vrot.lane.b32.xlu1 %v5686_v40, %s5317_s19 }
 0x142   : >> { %850 = vrot.lane.b32.xlu0 %v5606_v53, %s5315_s18  ;;  %v5827_v50 = vpop.permute.xlu1 %652 }
 0x143   : >> { %v655_v51 = vpop.permute.xlu0 %654 }
 0x145   : >> { %905 = vrot.lane.b32.xlu1 %v5704_v41, %s5317_s19 }
 0x146   : >> { %v5830_v52 = vpop.permute.xlu1 %724  ;;  %960 = vperm.xlu0 %5103, %v7379_v33  }
 0x149   : >> { %965 = vperm.xlu1 %5104, %v7380_v34  }
 0x14a   : >> { %975 = vperm.xlu0 %5103, %v7381_v38  }
 0x14b   : >> { %v5835_v55 = vpop.permute.xlu1 %678 }
 0x14c   : >> { %v5837_v56 = vpop.permute.xlu0 %686 }
 0x14d   : >> { %970 = vperm.xlu1 %5104, %v7382_v37  }
 0x14e   : >> { %985 = vperm.xlu0 %5103, %v7383_v42  }
 0x14f   : >> { %v5841_v10 = vpop.permute.xlu1 %648 }
 0x150   : >> { %v5843_v26 = vpop.permute.xlu0 %650 }
 0x151   : >> { %980 = vperm.xlu1 %5104, %v7384_v39  }
 0x152   : >> { %995 = vperm.xlu0 %5103, %v7385_v44  }
 0x153   : >> { %v5847_v30 = vpop.permute.xlu1 %708 }
 0x154   : >> { %v5849_v46 = vpop.permute.xlu0 %716 }
 0x155   : >> { %990 = vperm.xlu1 %5104, %v7386_v43  }
 0x157   : >> { %v5852_v33 = vpop.permute.xlu1 %692 }
 0x158   : >> { %v5854_v34 = vpop.permute.xlu0 %700 }
 0x15b   : >> { %v5856_v37 = vpop.permute.xlu1 %812 }
 0x15c   : >> { %v5858_v38 = vpop.permute.xlu0 %820 }
 0x15f   : >> { %v721_v42 = vpop.permute.xlu1 %720 }
 0x160   : >> { %v5860_v27 = vpop.permute.xlu0 %684 }
 0x163   : >> { %v5862_v39 = vpop.permute.xlu1 %856 }
 0x164   : >> { %v719_v44 = vpop.permute.xlu0 %718 }
 0x165   : >> { %v786_v29 = vsel %vm726_vm13, %v659_v48, %v719_v44  ;;  %v742_v57 = vsel %vm726_vm13, %v719_v44, %v721_v42 }
 0x166   : >> { %v808_v43 = vmul.bf16 %v786_v29, %v5467_v61  ;;  %v809_v22 = vmul.bf16 %v742_v57, %v5469_v62 }
 0x167   : >> { %v853_v5 = vpop.permute.xlu1 %852 }
 0x168   : >> { %v855_v31 = vpop.permute.xlu0 %854  ;;  %1075 = vmatprep.subr.bf16.mxu0 %v809_v22 }
 0x169   : >> { %1076 = vmatpush1.bf16.msra.mxu0 %v808_v43  ;;  %v877_v21 = vsel %vm860_vm14, %v855_v31, %v5862_v39  ;;  %v876_v24 = vsel %vm860_vm14, %v853_v5, %v855_v31 }
 0x16a   : >> { %v955_v63 = vmul.bf16 %v877_v21, %v7364_v7  ;;  %v954_v48 = vmul.bf16 %v876_v24, %v7365_v6 }
 0x16b   : >> { %v5873_v53 = vpop.permute.xlu1 %712 }
 0x16c   : >> { %v711_v44 = vpop.permute.xlu0 %710  ;;  %1156 = vmatprep.subr.bf16.mxu1 %v955_v63 }
 0x16d   : >> { %v782_v29 = vsel %vm726_vm13, %v657_v49, %v711_v44  ;;  %1157 = vmatpush1.bf16.msra.mxu1 %v954_v48  ;;  %v739_v22 = vsel %vm726_vm13, %v711_v44, %v5873_v53  ;;  %v5889_v44 = vcombine.low %v7388_v12, %v7387_v16 }
 0x16e   : >> { %v805_v43 = vmul.bf16 %v739_v22, %v5469_v62  ;;  %v804_v57 = vmul.bf16 %v782_v29, %v5467_v61 }
 0x16f   : >> { %v5880_v36 = vpop.permute.xlu1 %848 }
 0x170   : >> { %v847_v31 = vpop.permute.xlu0 %846  ;;  %1077 = vmatprep.subr.bf16.mxu0 %v805_v43 }
 0x171   : >> { %v874_v21 = vsel %vm860_vm14, %v847_v31, %v5880_v36  ;;  %1078 = vmatpush1.bf16.msra.mxu0 %v804_v57 }
 0x172   : >> { %v951_v24 = vmul.bf16 %v874_v21, %v7364_v7 }
 0x173   : >> { %v845_v63 = vpop.permute.xlu1 %844 }
 0x174   : >> { %v703_v5 = vpop.permute.xlu0 %702  ;;  %1158 = vmatprep.subr.bf16.mxu1 %v951_v24  ;;  %v873_v49 = vsel %vm860_vm14, %v845_v63, %v847_v31 }
 0x175   : >> { %v950_v48 = vmul.bf16 %v873_v49, %v7365_v6  ;;  %v778_v29 = vsel %vm726_vm13, %v655_v51, %v703_v5 }
 0x176   : >> { %v800_v31 = vmul.bf16 %v778_v29, %v5467_v61 }
 0x177   : >> { %1159 = vmatpush1.bf16.msra.mxu1 %v950_v48  ;;  %v705_v22 = vpop.permute.xlu1 %704 }
 0x178   : >> { %v5892_v43 = vpop.permute.xlu0 %696  ;;  %v736_v57 = vsel %vm726_vm13, %v703_v5, %v705_v22  ;;  %1217 = vmatprep.subr.bf16.mxu1 %v5651_v15 }
 0x179   : >> { %v801_v21 = vmul.bf16 %v736_v57, %v5469_v62 }
 0x17a   : >> { %4360 = vmatmul.mubr.msk.bf16.vlgmr.msra.gmra.mxu1 %vm1058_vm15, %v5889_v44 }
 0x17b   : >> { %1218 = vmatpush1.bf16.msra.mxu1 %v5786_v2  ;;  %v695_v24 = vpop.permute.xlu1 %694  ;;  %1079 = vmatprep.subr.bf16.mxu0 %v801_v21  ;;  %v7389_v2 = vmov 0   ;;  %v5915_v21 = vcombine.low %v7390_v18, %v5405_v20 }
 0x17c   : >> { %v723_v51 = vpop.permute.xlu0 %722  ;;  %v733_v63 = vsel %vm726_vm13, %v695_v24, %v5892_v43  ;;  %v774_v5 = vsel %vm726_vm13, %v5827_v50, %v695_v24  ;;  %1080 = vmatpush1.bf16.msra.mxu0 %v800_v31  ;;  %1219 = vmatprep.subr.bf16.mxu1 %v5649_v14  ;;  %v770_v14 = vsel %vm726_vm13, %v5843_v26, %v5837_v56 }
 0x17d   : >> { %v744_v15 = vsel %vm726_vm13, %v723_v51, %v5830_v52  ;;  %v796_v49 = vmul.bf16 %v774_v5, %v5467_v61  ;;  %v797_v48 = vmul.bf16 %v733_v63, %v5469_v62  ;;  %1186 = vmatprep.mubr.bf16.mxu1 %v7389_v2  ;;  %v743_v29 = vsel %vm726_vm13, %v721_v42, %v723_v51 }
 0x17e   : >> { %v811_v57 = vmul.bf16 %v744_v15, %v7366_v1  ;;  %v810_v31 = vmul.bf16 %v743_v29, %v7367_v0  ;;  %v766_v51 = vsel %vm726_vm13, %v5841_v10, %v5835_v55 }
 0x17f   : >> { %1220 = vmatpush1.bf16.msra.mxu1 %v5798_v4  ;;  %v5921_v50 = vpop.permute.xlu1 %688  ;;  %1081 = vmatprep.subr.bf16.mxu0 %v797_v48  ;;  %v792_v4 = vmul.bf16 %v770_v14, %v5467_v61  ;;  %v788_v29 = vmul.bf16 %v766_v51, %v5467_v61 }
 0x180   : >> { %v5923_v52 = vpop.permute.xlu0 %680  ;;  %v730_v42 = vsel %vm726_vm13, %v5837_v56, %v5921_v50  ;;  %1082 = vmatpush1.bf16.msra.mxu0 %v796_v49  ;;  %1221 = vmatprep.subr.bf16.mxu1 %v811_v57  ;;  %v5952_v57 = vcombine.low %v5410_v23, %v5414_v25 }
 0x181   : >> { %v727_v24 = vsel %vm726_vm13, %v5835_v55, %v5923_v52  ;;  %v793_v26 = vmul.bf16 %v730_v42, %v5469_v62 }
 0x182   : >> { %4361 = vmatmul.mubr.msk.bf16.gmra.mxu1 %vm1058_vm15, %v5915_v21  ;;  %v789_v56 = vmul.bf16 %v727_v24, %v5469_v62 }
 0x183   : >> { %1222 = vmatpush1.bf16.msra.mxu1 %v810_v31  ;;  %v715_v63 = vpop.permute.xlu1 %714  ;;  %1083 = vmatprep.subr.bf16.mxu0 %v793_v26 }
 0x184   : >> { %v707_v5 = vpop.permute.xlu0 %706  ;;  %v740_v15 = vsel %vm726_vm13, %v5873_v53, %v715_v63  ;;  %v741_v49 = vsel %vm726_vm13, %v715_v63, %v5849_v46  ;;  %1084 = vmatpush1.bf16.msra.mxu0 %v792_v4  ;;  %1196 = vmatprep.mubr.bf16.mxu1 %v7389_v2 }
 0x185   : >> { %v738_v48 = vsel %vm726_vm13, %v707_v5, %v5847_v30  ;;  %v806_v55 = vmul.bf16 %v740_v15, %v7367_v0  ;;  %v807_v10 = vmul.bf16 %v741_v49, %v7366_v1  ;;  %1085 = vmatprep.subr.bf16.mxu0 %v789_v56  ;;  %v737_v53 = vsel %vm726_vm13, %v705_v22, %v707_v5 }
 0x186   : >> { %v803_v46 = vmul.bf16 %v738_v48, %v7366_v1  ;;  %v802_v31 = vmul.bf16 %v737_v53, %v7367_v0  ;;  %v5975_v49 = vcombine.low %v5419_v28, %v5424_v32 }
 0x187   : >> { %1223 = vmatprep.subr.bf16.mxu1 %v807_v10  ;;  %v5956_v14 = vpop.permute.xlu1 %840 }
 0x188   : >> { %v839_v42 = vpop.permute.xlu0 %838  ;;  %1086 = vmatpush1.bf16.msra.mxu0 %v788_v29  ;;  %1224 = vmatpush1.bf16.msra.mxu1 %v806_v55 }
 0x189   : >> { %v871_v30 = vsel %vm860_vm14, %v839_v42, %v5956_v14  ;;  %1225 = vmatprep.subr.bf16.mxu1 %v803_v46 }
 0x18a   : >> { %v947_v24 = vmul.bf16 %v871_v30, %v7364_v7  ;;  %4362 = vmatmul.mubr.msk.bf16.gmra.mxu1 %vm1058_vm15, %v5952_v57 }
 0x18b   : >> { %v699_v22 = vpop.permute.xlu1 %698  ;;  %1206 = vmatprep.mubr.bf16.mxu1 %v7389_v2 }
 0x18c   : >> { %v837_v26 = vpop.permute.xlu0 %836  ;;  %v734_v4 = vsel %vm726_vm13, %v5892_v43, %v699_v22  ;;  %v735_v51 = vsel %vm726_vm13, %v699_v22, %v5854_v34  ;;  %1087 = vmatprep.subr.bf16.mxu0 %v947_v24  ;;  %1226 = vmatpush1.bf16.msra.mxu1 %v802_v31 }
 0x18d   : >> { %v870_v56 = vsel %vm860_vm14, %v837_v26, %v839_v42  ;;  %v798_v63 = vmul.bf16 %v734_v4, %v7367_v0  ;;  %v799_v5 = vmul.bf16 %v735_v51, %v7366_v1 }
 0x18e   : >> { %v946_v15 = vmul.bf16 %v870_v56, %v7365_v6 }
 0x18f   : >> { %1227 = vmatprep.subr.bf16.mxu1 %v799_v5  ;;  %v831_v48 = vpop.permute.xlu1 %830 }
 0x190   : >> { %v833_v43 = vpop.permute.xlu0 %832  ;;  %1088 = vmatpush2.bf16.msra.mxu0 %v946_v15  ;;  %1228 = vmatpush1.bf16.msra.mxu1 %v798_v63 }
 0x191   : >> { %v868_v34 = vsel %vm860_vm14, %v831_v48, %v833_v43 }
 0x192   : >> { %v943_v55 = vmul.bf16 %v868_v34, %v7364_v7  ;;  %4363 = vmatmul.mubr.msk.bf16.gmra.mxu1 %vm1058_vm15, %v5975_v49 }
 0x193   : >> { %v829_v10 = vpop.permute.xlu1 %828  ;;  %1249 = vmatprep.mubr.bf16.mxu1 %v5815_v47 }
 0x194   : >> { %v691_v29 = vpop.permute.xlu0 %690  ;;  %v867_v53 = vsel %vm860_vm14, %v829_v10, %v831_v48  ;;  %1089 = vmatprep.subr.bf16.mxu0 %v943_v55 }
 0x195   : >> { %v731_v46 = vsel %vm726_vm13, %v5921_v50, %v691_v29  ;;  %v732_v42 = vsel %vm726_vm13, %v691_v29, %v5852_v33  ;;  %v942_v30 = vmul.bf16 %v867_v53, %v7365_v6 }
 0x196   : >> { %v794_v31 = vmul.bf16 %v731_v46, %v7367_v0  ;;  %v795_v24 = vmul.bf16 %v732_v42, %v7366_v1 }
 0x197   : >> { %v825_v22 = vpop.permute.xlu1 %824  ;;  %1090 = vmatpush2.bf16.msra.mxu0 %v942_v30 }
 0x198   : >> { %v823_v26 = vpop.permute.xlu0 %822  ;;  %1229 = vmatprep.subr.bf16.mxu1 %v795_v24 }
 0x199   : >> { %v864_v47 = vsel %vm860_vm14, %v5858_v38, %v823_v26  ;;  %1230 = vmatpush1.bf16.msra.mxu1 %v794_v31  ;;  %v865_v4 = vsel %vm860_vm14, %v823_v26, %v825_v22 }
 0x19a   : >> { %v939_v50 = vmul.bf16 %v865_v4, %v7364_v7  ;;  %v938_v33 = vmul.bf16 %v864_v47, %v7365_v6 }
 0x19b   : >> { %v683_v51 = vpop.permute.xlu1 %682 }
 0x19c   : >> { %v817_v56 = vpop.permute.xlu0 %816  ;;  %v728_v63 = vsel %vm726_vm13, %v5923_v52, %v683_v51  ;;  %v729_v5 = vsel %vm726_vm13, %v683_v51, %v5860_v27  ;;  %1091 = vmatprep.subr.bf16.mxu0 %v939_v50 }
 0x19d   : >> { %v790_v15 = vmul.bf16 %v728_v63, %v7367_v0  ;;  %v791_v38 = vmul.bf16 %v729_v5, %v7366_v1  ;;  %1092 = vmatpush2.bf16.msra.mxu0 %v938_v33 }
 0x19f   : >> { %1231 = vmatprep.subr.bf16.mxu1 %v791_v38  ;;  %v815_v48 = vpop.permute.xlu1 %814 }
 0x1a0   : >> { %v843_v34 = vpop.permute.xlu0 %842  ;;  %v861_v55 = vsel %vm860_vm14, %v5856_v37, %v815_v48  ;;  %v862_v10 = vsel %vm860_vm14, %v815_v48, %v817_v56  ;;  %1232 = vmatpush1.bf16.msra.mxu1 %v790_v15 }
 0x1a1   : >> { %v934_v52 = vmul.bf16 %v861_v55, %v7365_v6  ;;  %v935_v29 = vmul.bf16 %v862_v10, %v7364_v7  ;;  %v872_v27 = vsel %vm860_vm14, %v5956_v14, %v843_v34 }
 0x1a2   : >> { %v948_v37 = vmul.bf16 %v872_v27, %v7363_v8  ;;  %v7392_v27 = vld [vmem:[#allocation31_spill] sm:$0xff] }
 0x1a3   : >> { %v904_v53 = vpop.permute.xlu1 %903  ;;  %1093 = vmatprep.subr.bf16.mxu0 %v935_v29  ;;  %v7391_v29 = vld [vmem:[#allocation34_spill] sm:$0xff] }
 0x1a4   : >> { %v835_v46 = vpop.permute.xlu0 %834  ;;  %v924_v42 = vsel %vm909_vm0, %v843_v34, %v904_v53  ;;  %1094 = vmatpush2.bf16.msra.mxu0 %v934_v52  ;;  %v4351_v53 = vcombine.low %v7359_v17, %v7358_v19 }
 0x1a5   : >> { %v949_v30 = vmul.bf16 %v924_v42, %v7362_v9  ;;  %1095 = vmatprep.subr.bf16.mxu0 %v5673_v35  ;;  %v869_v31 = vsel %vm860_vm14, %v833_v43, %v835_v46  ;;  %v7395_v42 = vld [vmem:[#allocation13_spill] sm:$0xff] }
 0x1a6   : >> { %v944_v4 = vmul.bf16 %v869_v31, %v7363_v8  ;;  %v7397_v31 = vld [vmem:[#allocation36_spill] sm:$0xff] }
 0x1a7   : >> { %1233 = vmatprep.subr.bf16.mxu1 %v949_v30  ;;  %v902_v24 = vpop.permute.xlu1 %901 }
 0x1a8   : >> { %v827_v26 = vpop.permute.xlu0 %826  ;;  %v920_v47 = vsel %vm909_vm0, %v835_v46, %v902_v24  ;;  %1096 = vmatpush2.bf16.msra.mxu0 %v5686_v40  ;;  %1234 = vmatpush2.bf16.msra.mxu1 %v948_v37  ;;  %v7394_v46 = vld [vmem:[#allocation14_spill] sm:$0xff]  ;;  %v7396_v37 = vld [vmem:[#allocation33_spill] sm:$0xff]  ;;  %v7398_v24 = vld [vmem:[#allocation32_spill] sm:$0xff] }
 0x1a9   : >> { %v945_v14 = vmul.bf16 %v920_v47, %v7362_v9  ;;  %1097 = vmatprep.subr.bf16.mxu0 %v5699_v54  ;;  %v866_v35 = vsel %vm860_vm14, %v825_v22, %v827_v26  ;;  %v4355_v30 = vcombine.high %v7395_v42, %v7394_v46  ;;  %v7399_v47 = vld [vmem:[#allocation37_spill] sm:$0xff] }
 0x1aa   : >> { %v940_v40 = vmul.bf16 %v866_v35, %v7363_v8 }
 0x1ab   : >> { %1235 = vmatprep.subr.bf16.mxu1 %v945_v14  ;;  %v900_v50 = vpop.permute.xlu1 %899  ;;  %v7400_v14 = vld [vmem:[#allocation16_spill] sm:$0xff] }
 0x1ac   : >> { %v819_v33 = vpop.permute.xlu0 %818  ;;  %v916_v43 = vsel %vm909_vm0, %v827_v26, %v900_v50  ;;  %1098 = vmatpush2.bf16.msra.mxu0 %v5704_v41  ;;  %1236 = vmatpush2.bf16.msra.mxu1 %v944_v4  ;;  %v4354_v26 = vcombine.low %v7395_v42, %v7394_v46  ;;  %v7401_v4 = vld [vmem:[#allocation15_spill] sm:$0xff] }
 0x1ad   : >> { %v941_v51 = vmul.bf16 %v916_v43, %v7362_v9  ;;  %1099 = vmatprep.subr.bf16.mxu0 %v5734_v60  ;;  %v863_v54 = vsel %vm860_vm14, %v817_v56, %v819_v33  ;;  %v4348_v56 = vcombine.low %v7361_v11, %v7360_v13  ;;  %v4358_v35 = vcombine.high %v7401_v4, %v7400_v14 }
 0x1ae   : >> { %v936_v41 = vmul.bf16 %v863_v54, %v7363_v8  ;;  %v4357_v50 = vcombine.low %v7401_v4, %v7400_v14 }
 0x1af   : >> { %1237 = vmatprep.subr.bf16.mxu1 %v941_v51  ;;  %v898_v63 = vpop.permute.xlu1 %897 }
 0x1b0   : >> { %v859_v5 = vpop.permute.xlu0 %858  ;;  %v912_v22 = vsel %vm909_vm0, %v819_v33, %v898_v63  ;;  %1100 = vmatpush2.bf16.msra.mxu0 %v5725_v45  ;;  %1238 = vmatpush2.bf16.msra.mxu1 %v940_v40 }
 0x1b1   : >> { %v937_v15 = vmul.bf16 %v912_v22, %v7362_v9  ;;  %1101 = vmatprep.subr.bf16.mxu0 %v5739_v3  ;;  %v878_v60 = vsel %vm860_vm14, %v5862_v39, %v859_v5  ;;  %v4352_v3 = vcombine.high %v7359_v17, %v7358_v19 }
 0x1b2   : >> { %v956_v39 = vmul.bf16 %v878_v60, %v7363_v8 }
 0x1b3   : >> { %1239 = vmatprep.subr.bf16.mxu1 %v937_v15  ;;  %v908_v38 = vpop.permute.xlu1 %907 }
 0x1b4   : >> { %v851_v48 = vpop.permute.xlu0 %850  ;;  %v932_v34 = vsel %vm909_vm0, %v859_v5, %v908_v38  ;;  %1102 = vmatpush2.bf16.msra.mxu0 %v5748_v58  ;;  %1240 = vmatpush2.bf16.msra.mxu1 %v936_v41 }
 0x1b5   : >> { %v957_v45 = vmul.bf16 %v932_v34, %v7362_v9  ;;  %1241 = vmatprep.subr.bf16.mxu1 %v5597_v59  ;;  %v875_v55 = vsel %vm860_vm14, %v5880_v36, %v851_v48  ;;  %v7393_v36 = vld [vmem:[#allocation35_spill] sm:$0xff] }
 0x1b6   : >> { %v952_v59 = vmul.bf16 %v875_v55, %v7363_v8 }
 0x1b7   : >> { %v906_v10 = vpop.permute.xlu1 %905  ;;  %1104 = vmatmul.mubr.bf16.vlgmr.msra.gmra.mxu0 %v4348_v56  ;;  %1302 = vmatprep.subr.bf16.mxu0 %v957_v45 }
 0x1b8   : >> { %v928_v52 = vsel %vm909_vm0, %v851_v48, %v906_v10  ;;  %1242 = vmatpush2.bf16.msra.mxu1 %v7391_v29  ;;  %1303 = vmatpush1.bf16.msra.mxu0 %v956_v39 }
 0x1b9   : >> { %v953_v58 = vmul.bf16 %v928_v52, %v7362_v9  ;;  %1243 = vmatprep.subr.bf16.mxu1 %v7392_v27  ;;  %1113 = vmatprep.mubr.bf16.mxu0 %v4352_v3 }
 0x1bb   : >> { %1304 = vmatprep.subr.bf16.mxu0 %v953_v58 }
 0x1bc   : >> { %1244 = vmatpush2.bf16.msra.mxu1 %v7393_v36  ;;  %1305 = vmatpush1.bf16.msra.mxu0 %v952_v59 }
 0x1bd   : >> { %1245 = vmatprep.subr.bf16.mxu1 %v7396_v37 }
 0x1bf   : >> { %1114 = vmatmul.mubr.bf16.gmra.mxu0 %v4351_v53 }
 0x1c0   : >> { %1246 = vmatpush2.bf16.msra.mxu1 %v7397_v31  ;;  %1123 = vmatprep.mubr.bf16.mxu0 %v4355_v30 }
 0x1c1   : >> { %1247 = vmatprep.subr.bf16.mxu1 %v7398_v24 }
 0x1c4   : >> { %1248 = vmatpush2.bf16.msra.mxu1 %v7399_v47  ;;  %v6084_v60 = vpop.permute.xlu1 %965 }
 0x1c5   : >> { %5032 = vmatprep.subr.bf16.mxu1 %v957_v45 }
 0x1c7   : >> { %1124 = vmatmul.mubr.bf16.gmra.mxu0 %v4354_v26  ;;  %1250 = vmatmul.mubr.bf16.vlgmr.msra.gmra.mxu1 %v4348_v56 }
 0x1c8   : >> { %5034 = vmatpush1.bf16.msra.mxu1 %v956_v39  ;;  %1133 = vmatprep.mubr.bf16.mxu0 %v4358_v35  ;;  %v6097_v29 = vpop.permute.xlu1 %970 }
 0x1c9   : >> { %5033 = vmatprep.subr.bf16.mxu1 %v953_v58  ;;  %1259 = vmatprep.mubr.bf16.mxu1 %v4352_v3 }
 0x1cc   : >> { %5035 = vmatpush1.bf16.msra.mxu1 %v952_v59 }
 0x1cf   : >> { %1134 = vmatmul.mubr.bf16.gmra.mxu0 %v4357_v50  ;;  %1260 = vmatmul.mubr.bf16.gmra.mxu1 %v4351_v53 }
 0x1d0   : >> { %1269 = vmatprep.mubr.bf16.mxu1 %v4355_v30  ;;  %1322 = vmatprep.mubr.bf16.mxu0 %v7389_v2 }
 0x1d7   : >> { %1270 = vmatmul.mubr.bf16.gmra.mxu1 %v4354_v26  ;;  %4364 = vmatmul.mubr.msk.bf16.vlgmr.msra.gmra.mxu0 %vm1058_vm15, %v5889_v44 }
 0x1d8   : >> { %1279 = vmatprep.mubr.bf16.mxu1 %v4358_v35  ;;  %1332 = vmatprep.mubr.bf16.mxu0 %v7389_v2 }
 0x1df   : >> { %1280 = vmatmul.mubr.bf16.gmra.mxu1 %v4357_v50  ;;  %4365 = vmatmul.mubr.msk.bf16.gmra.mxu0 %vm1058_vm15, %v5915_v21 }
 0x1e0   : >> { %1342 = vmatprep.mubr.bf16.mxu0 %v7389_v2  ;;  %1352 = vmatprep.mubr.bf16.mxu1 %v7389_v2  ;;  %v6079_v2 = vpop.permute.xlu0 %960 }
 0x1e4   : >> { %v6105_v30 = vpop.permute.xlu0 %975 }
 0x1e7   : >> { %4366 = vmatmul.mubr.msk.bf16.gmra.mxu0 %vm1058_vm15, %v5952_v57  ;;  %4367 = vmatmul.mubr.msk.bf16.vlgmr.msra.gmra.mxu1 %vm1058_vm15, %v5975_v49 }
 0x23a   : >> { %v1178_v33 = vpop.f32.mrf.mxu1 }
 0x23c   : >> { %v1180_v43 = vpop.f32.mrf.mxu1 }
 0x23e   : >> { %v1182_v44 = vpop.f32.mrf.mxu1 }
 0x240   : >> { %v1184_v51 = vpop.f32.mrf.mxu1 }
 0x242   : >> { %v1188_v40 = vpop.f32.mrf.mxu1 }
 0x244   : >> { %v1190_v54 = vpop.f32.mrf.mxu1 }
 0x246   : >> { %v1192_v63 = vpop.f32.mrf.mxu1 }
 0x248   : >> { %v1194_v5 = vpop.f32.mrf.mxu1 }
 0x24a   : >> { %v6075_v22 = vpop.f32.mrf.mxu1 }
 0x24c   : >> { %v1200_v21 = vpop.f32.mrf.mxu1 }
 0x24e   : >> { %v6077_v15 = vpop.f32.mrf.mxu1 }
 0x250   : >> { %v6081_v41 = vpop.f32.mrf.mxu1 }
 0x252   : >> { %v6086_v56 = vpop.f32.mrf.mxu1 }
 0x254   : >> { %v6092_v55 = vpop.f32.mrf.mxu1 }
 0x256   : >> { %v6108_v24 = vpop.f32.mrf.mxu1 }
 0x277   : >> { %v1105_v57 = vpop.f32.mrf.mxu0 }
 0x278   : >> { %v1106_v49 = vadd.f32 %v1105_v57, %v6079_v2 }
 0x279   : >> { %v1107_v38 = vpop.f32.mrf.mxu0 }
 0x27a   : >> { %v6088_v34 = vadd.f32 %v1178_v33, %v1106_v49  ;;  %v1108_v45 = vadd.f32 %v1107_v38, %v6079_v2 }
 0x27b   : >> { %v1109_v48 = vpop.f32.mrf.mxu0 }
 0x27c   : >> { %v1110_v3 = vadd.f32 %v1109_v48, %v6084_v60  ;;  %v7283_v27 = vmax.f32 %v6088_v34, 0.0  ;;  %v6100_v59 = vadd.f32 %v1180_v43, %v1108_v45 }
 0x27d   : >> { %v1111_v39 = vpop.f32.mrf.mxu0 }
 0x27e   : >> { %v6094_v10 = vadd.f32 %v1182_v44, %v1110_v3  ;;  %v1112_v52 = vadd.f32 %v1111_v39, %v6084_v60  ;;  %v7285_v50 = vmax.f32 %v6100_v59, 0.0 }
 0x27f   : >> { %v1115_v58 = vpop.f32.mrf.mxu0 }
 0x280   : >> { %v7282_v53 = vmax.f32 %v6094_v10, 0.0  ;;  %v6103_v36 = vadd.f32 %v1184_v51, %v1112_v52  ;;  %v1116_v37 = vadd.f32 %v1115_v58, %v6097_v29  ;;  %v1214_v51 = vpop.f32.mrf.mxu1 }
 0x281   : >> { %v1117_v31 = vpop.f32.mrf.mxu0 }
 0x282   : >> { %v7284_v26 = vmax.f32 %v6103_v36, 0.0  ;;  %v6115_v47 = vpack.i.bf16 %v7282_v53, %v7283_v27  ;;  %v6121_v43 = vadd.f32 %v1188_v40, %v1116_v37  ;;  %v1118_v44 = vadd.f32 %v1117_v31, %v6097_v29  ;;  %v6140_v31 = vpop.permute.xlu1 %980 }
 0x283   : >> { %v1119_v35 = vpop.f32.mrf.mxu0 }
 0x284   : >> { %v1120_v33 = vadd.f32 %v1119_v35, %v6105_v30  ;;  %5106 = vrot.lane.b32.xlu1 %v6115_v47, %s5310_s9  ;;  %v5110_v48 = vpack.i.bf16 %v7284_v26, %v7285_v50  ;;  %v6138_v52 = vadd.f32 %v1190_v54, %v1118_v44 }
 0x285   : >> { %v1121_v57 = vpop.f32.mrf.mxu0 }
 0x286   : >> { %v6124_v49 = vadd.f32 %v1192_v63, %v1120_v33  ;;  %v1122_v38 = vadd.f32 %v1121_v57, %v6105_v30  ;;  %v7287_v63 = vmax.f32 %v6121_v43, 0.0  ;;  %v7295_v54 = vmax.f32 %v6138_v52, 0.0  ;;  %v6169_v0 = vpop.permute.xlu1 %990 }
 0x287   : >> { %v1251_v45 = vpop.f32.mrf.mxu1  ;;  %v6131_v3 = vpop.f32.mrf.mxu0 }
 0x288   : >> { %v7286_v39 = vmax.f32 %v6124_v49, 0.0  ;;  %v6134_v40 = vadd.f32 %v1194_v5, %v1122_v38  ;;  %5111 = vrot.lane.b32.xlu1 %v5110_v48, %s5318_s20  ;;  %v6152_v38 = vpop.permute.xlu0 %985 }
 0x289   : >> { %v1127_v58 = vpop.f32.mrf.mxu0  ;;  %v1253_v37 = vpop.f32.mrf.mxu1 }
 0x28a   : >> { %v7294_v35 = vmax.f32 %v6134_v40, 0.0  ;;  %v1128_v33 = vadd.f32 %v1127_v58, %v6140_v31  ;;  %v6150_v5 = vpack.i.bf16 %v7286_v39, %v7287_v63  ;;  %v1254_v12 = vadd.f32 %v1253_v37, %v6079_v2 }
 0x28b   : >> { %v6144_v57 = vpop.f32.mrf.mxu0  ;;  %v1255_v53 = vpop.f32.mrf.mxu1 }
 0x28c   : >> { %5116 = vrot.lane.b32.xlu0 %v6150_v5, %s5310_s9  ;;  %v6158_v27 = vadd.f32 %v1200_v21, %v1128_v33  ;;  %v5120_v39 = vpack.i.bf16 %v7294_v35, %v7295_v54  ;;  %v6177_v8 = vpop.permute.xlu0 %995 }
 0x28d   : >> { %v1131_v44 = vpop.f32.mrf.mxu0  ;;  %v1257_v48 = vpop.f32.mrf.mxu1 }
 0x28e   : >> { %v1132_v58 = vadd.f32 %v1131_v44, %v6152_v38  ;;  %v7302_v44 = vmax.f32 %v6158_v27, 0.0 }
 0x28f   : >> { %v1261_v26 = vpop.f32.mrf.mxu1  ;;  %v6160_v50 = vpop.f32.mrf.mxu0 }
 0x290   : >> { %v6167_v63 = vadd.f32 %v6081_v41, %v1132_v58  ;;  %5121 = vrot.lane.b32.xlu0 %v5120_v39, %s5318_s20  ;;  %v1252_v58 = vadd.f32 %v1251_v45, %v6079_v2 }
 0x291   : >> { %v1137_v1 = vpop.f32.mrf.mxu0  ;;  %v1263_v4 = vpop.f32.mrf.mxu1 }
 0x292   : >> { %v7301_v21 = vmax.f32 %v6167_v63, 0.0  ;;  %v1138_v33 = vadd.f32 %v1137_v1, %v6169_v0 }
 0x293   : >> { %v6175_v6 = vpop.f32.mrf.mxu0  ;;  %v1265_v7 = vpop.f32.mrf.mxu1 }
 0x294   : >> { %v5125_v39 = vpack.i.bf16 %v7301_v21, %v7302_v44  ;;  %v6185_v54 = vadd.f32 %v6092_v55, %v1138_v33  ;;  %v1256_v21 = vadd.f32 %v1255_v53, %v6084_v60 }
 0x295   : >> { %v1141_v35 = vpop.f32.mrf.mxu0  ;;  %v1267_v41 = vpop.f32.mrf.mxu1 }
 0x296   : >> { %v1142_v1 = vadd.f32 %v1141_v35, %v6177_v8  ;;  %5126 = vrot.lane.b32.xlu1 %v5125_v39, %s5318_s20  ;;  %v7304_v45 = vmax.f32 %v6185_v54, 0.0  ;;  %v1258_v35 = vadd.f32 %v1257_v48, %v6084_v60 }
 0x297   : >> { %v1271_v9 = vpop.f32.mrf.mxu1  ;;  %v1324_v11 = vpop.f32.mrf.mxu0 }
 0x298   : >> { %v6190_v13 = vadd.f32 %v1214_v51, %v1142_v1  ;;  %v6192_v14 = vadd.f32 %v1324_v11, %v1252_v58  ;;  %v1262_v58 = vadd.f32 %v1261_v26, %v6097_v29  ;;  %v1266_v26 = vadd.f32 %v1265_v7, %v6105_v30 }
 0x299   : >> { %v1273_v16 = vpop.f32.mrf.mxu1  ;;  %v1326_v17 = vpop.f32.mrf.mxu0 }
 0x29a   : >> { %v7303_v55 = vmax.f32 %v6190_v13, 0.0  ;;  %v1327_v33 = vadd.f32 %v1326_v17, %v1254_v12  ;;  %v7305_v18 = vmax.f32 %v6192_v14, 0.0 }
 0x29b   : >> { %v1275_v39 = vpop.f32.mrf.mxu1  ;;  %v1328_v44 = vpop.f32.mrf.mxu0 }
 0x29c   : >> { %v1366_v2 = vmax.f32 %v1327_v33, 0.0  ;;  %v6199_v51 = vadd.f32 %v1328_v44, %v1256_v21  ;;  %v5130_v11 = vpack.i.bf16 %v7303_v55, %v7304_v45  ;;  %v1264_v21 = vadd.f32 %v1263_v4, %v6097_v29 }
 0x29d   : >> { %v1277_v53 = vpop.f32.mrf.mxu1  ;;  %v1330_v37 = vpop.f32.mrf.mxu0 }
 0x29e   : >> { %v5135_v12 = vpack.i.bf16 %v1366_v2, %v7305_v18  ;;  %v1331_v17 = vadd.f32 %v1330_v37, %v1258_v35  ;;  %5131 = vrot.lane.b32.xlu0 %v5130_v11, %s5318_s20  ;;  %v7306_v44 = vmax.f32 %v6199_v51, 0.0  ;;  %v1268_v18 = vadd.f32 %v1267_v41, %v6105_v30 }
 0x29f   : >> { %v1281_v60 = vpop.f32.mrf.mxu1  ;;  %v1334_v48 = vpop.f32.mrf.mxu0 }
 0x2a0   : >> { %v1370_v1 = vmax.f32 %v1331_v17, 0.0  ;;  %v6211_v33 = vadd.f32 %v1334_v48, %v1262_v58  ;;  %5136 = vrot.lane.b32.xlu1 %v5135_v12, %s5318_s20  ;;  %v1272_v48 = vadd.f32 %v1271_v9, %v6140_v31 }
 0x2a1   : >> { %v1283_v55 = vpop.f32.mrf.mxu1  ;;  %v1336_v45 = vpop.f32.mrf.mxu0 }
 0x2a2   : >> { %v5140_v35 = vpack.i.bf16 %v1370_v1, %v7306_v44  ;;  %v1337_v2 = vadd.f32 %v1336_v45, %v1264_v21  ;;  %v7307_v4 = vmax.f32 %v6211_v33, 0.0  ;;  %v1274_v44 = vadd.f32 %v1273_v16, %v6140_v31 }
 0x2a3   : >> { %v1285_v11 = vpop.f32.mrf.mxu1  ;;  %v1338_v37 = vpop.f32.mrf.mxu0  ;;  %v1284_v9 = vadd.f32 %v1283_v55, %v6169_v0 }
 0x2a4   : >> { %v1374_v29 = vmax.f32 %v1337_v2, 0.0  ;;  %v6219_v17 = vadd.f32 %v1338_v37, %v1266_v26  ;;  %5141 = vrot.lane.b32.xlu0 %v5140_v35, %s5318_s20  ;;  %v1130_v26 = vadd.f32 %v6144_v57, %v6152_v38 }
 0x2a5   : >> { %v1287_v58 = vpop.f32.mrf.mxu1  ;;  %v1340_v12 = vpop.f32.mrf.mxu0 }
 0x2a6   : >> { %v5145_v7 = vpack.i.bf16 %v1374_v29, %v7307_v4  ;;  %v1341_v1 = vadd.f32 %v1340_v12, %v1268_v18  ;;  %v1377_v30 = vmax.f32 %v6219_v17, 0.0  ;;  %v1276_v18 = vadd.f32 %v1275_v39, %v6152_v38 }
 0x2a7   : >> { %v1344_v45 = vpop.f32.mrf.mxu0  ;;  %v1354_v21 = vpop.f32.mrf.mxu1  ;;  %v1282_v29 = vadd.f32 %v1281_v60, %v6169_v0  ;;  %v6247_v60 = vadd.f32 %v6077_v15, %v1130_v26  ;;  %v1136_v15 = vadd.f32 %v6160_v50, %v6169_v0 }
 0x2a8   : >> { %v1378_v41 = vmax.f32 %v1341_v1, 0.0  ;;  %v6227_v2 = vadd.f32 %v1344_v45, %v1272_v48  ;;  %5146 = vrot.lane.b32.xlu1 %v5145_v7, %s5318_s20  ;;  %v1126_v48 = vadd.f32 %v6131_v3, %v6140_v31  ;;  %v1278_v7 = vadd.f32 %v1277_v53, %v6152_v38 }
 0x2a9   : >> { %v1346_v35 = vpop.f32.mrf.mxu0  ;;  %v1356_v37 = vpop.f32.mrf.mxu1  ;;  %v6241_v4 = vadd.f32 %v1354_v21, %v1282_v29  ;;  %v1140_v3 = vadd.f32 %v6175_v6, %v6177_v8  ;;  %v1288_v31 = vadd.f32 %v1287_v58, %v6177_v8  ;;  %v6275_v29 = vadd.f32 %v6086_v56, %v1136_v15 }
 0x2aa   : >> { %v5150_v16 = vpack.i.bf16 %v1378_v41, %v1377_v30  ;;  %v1347_v12 = vadd.f32 %v1346_v35, %v1274_v44  ;;  %v1357_v1 = vadd.f32 %v1356_v37, %v1284_v9  ;;  %v1381_v55 = vmax.f32 %v6227_v2, 0.0 }
 0x2ab   : >> { %v1348_v45 = vpop.f32.mrf.mxu0  ;;  %v1358_v57 = vpop.f32.mrf.mxu1  ;;  %v1286_v44 = vadd.f32 %v1285_v11, %v6177_v8  ;;  %v6256_v35 = vadd.f32 %v6075_v22, %v1126_v48  ;;  %v1389_v6 = vmax.f32 %v6241_v4, 0.0  ;;  %v6267_v8 = vadd.f32 %v6108_v24, %v1140_v3 }
 0x2ac   : >> { %v1382_v19 = vmax.f32 %v1347_v12, 0.0  ;;  %v6243_v39 = vadd.f32 %v1348_v45, %v1276_v18  ;;  %5151 = vrot.lane.b32.xlu0 %v5150_v16, %s5318_s20  ;;  %v1390_v41 = vmax.f32 %v1357_v1, 0.0 }
 0x2ad   : >> { %v1350_v38 = vpop.f32.mrf.mxu0  ;;  %v1360_v53 = vpop.f32.mrf.mxu1  ;;  %v6262_v37 = vadd.f32 %v1358_v57, %v1286_v44  ;;  %v1379_v11 = vmax.f32 %v6256_v35, 0.0  ;;  %v7309_v24 = vmax.f32 %v6267_v8, 0.0 }
 0x2ae   : >> { %v5155_v21 = vpack.i.bf16 %v1382_v19, %v1381_v55  ;;  %v1351_v9 = vadd.f32 %v1350_v38, %v1278_v7  ;;  %v1361_v26 = vadd.f32 %v1360_v53, %v1288_v31  ;;  %v1385_v58 = vmax.f32 %v6243_v39, 0.0 }
 0x2af   : >> { %v7312_v19 = vmax.f32 %v6247_v60, 0.0  ;;  %v5160_v22 = vpack.i.bf16 %v1390_v41, %v1389_v6  ;;  %v1393_v16 = vmax.f32 %v6262_v37, 0.0  ;;  %v7310_v7 = vmax.f32 %v6275_v29, 0.0 }
 0x2b0   : >> { %v1386_v18 = vmax.f32 %v1351_v9, 0.0  ;;  %5156 = vrot.lane.b32.xlu1 %v5155_v21, %s5318_s20  ;;  %v1394_v50 = vmax.f32 %v1361_v26, 0.0  ;;  %v7402_v26 = vmax.f32 %v6100_v59, 0.0  ;;  %v7404_v59 = vmax.f32 %v6103_v36, 0.0 }
 0x2b1   : >> { %v5165_v48 = vpack.i.bf16 %v7312_v19, %v1379_v11  ;;  %v5180_v56 = vpack.i.bf16 %v7309_v24, %v7310_v7 }
 0x2b2   : >> { %v5170_v0 = vpack.i.bf16 %v1386_v18, %v1385_v58  ;;  %v5175_v12 = vpack.i.bf16 %v1394_v50, %v1393_v16 }
 0x2b4   : >> { %5171 = vrot.lane.b32.xlu0 %v5170_v0, %s5318_s20  ;;  %5161 = vrot.lane.b32.xlu1 %v5160_v22, %s5318_s20 }
 0x2b8   : >> { %5176 = vrot.lane.b32.xlu0 %v5175_v12, %s5318_s20  ;;  %5166 = vrot.lane.b32.xlu1 %v5165_v48, %s5310_s9 }
 0x2bc   : >> { %5181 = vrot.lane.b32.xlu0 %v5180_v56, %s5310_s9  ;;  %5186 = vrot.lane.b32.xlu1 %v6115_v47, %s5318_s20  ;;  %s5319_s9 = smov 56  }
 0x2c0   : >> { %5191 = vrot.lane.b32.xlu0 %v6150_v5, %s5318_s20  ;;  %5196 = vrot.lane.b32.xlu1 %v5165_v48, %s5318_s20  ;;  %v7403_v48 = vmax.f32 %v6192_v14, 0.0  ;;  %v7405_v14 = vmax.f32 %v6199_v51, 0.0  ;;  %v7407_v51 = vmax.f32 %v6211_v33, 0.0 }
 0x2c4   : >> { %5201 = vrot.lane.b32.xlu0 %v5180_v56, %s5318_s20 }
 0x2f6   : >> { %v5107_v1 = vpop.permute.xlu1 %5106 }
 0x2f7   : >> { %v5108_v21 = vunpack.i.l.bf16 %v5107_v1 }
 0x2fa   : >> { %v6301_v57 = vpop.permute.xlu1 %5111 }
 0x2fb   : >> { %v5113_v47 = vunpack.i.l.bf16 %v6301_v57  ;;  %v5114_v0 = vunpack.i.h.bf16 %v6301_v57 }
 0x2fe   : >> { %v5117_v45 = vpop.permute.xlu0 %5116 }
 0x302   : >> { %v6303_v3 = vpop.permute.xlu0 %5121 }
 0x308   : >> { %v6305_v31 = vpop.permute.xlu1 %5126 }
 0x310   : >> { %v6307_v38 = vpop.permute.xlu0 %5131 }
 0x312   : >> { %v5137_v53 = vpop.permute.xlu1 %5136 }
 0x313   : >> { %v5139_v44 = vunpack.i.h.bf16 %v5137_v53  ;;  %v5138_v5 = vunpack.i.l.bf16 %v5137_v53  ;;  %v5109_v53 = vunpack.i.h.bf16 %v5107_v1 }
 0x315   : >> { %v1493_v41 = vsel %vm1491_vm1, %v5113_v47, %v5138_v5  ;;  %v1494_v9 = vsel %vm1491_vm1, %v5138_v5, %v5139_v44 }
 0x316   : >> { %v1564_v15 = vsel %vm553_vm12, %v1494_v9, %v5108_v21  ;;  %v1573_v18 = vmax.f32 %v7402_v26, %v1493_v41  ;;  %v5142_v22 = vpop.permute.xlu0 %5141  ;;  %v5123_v26 = vunpack.i.l.bf16 %v6303_v3 }
 0x317   : >> { %v5144_v50 = vunpack.i.h.bf16 %v5142_v22  ;;  %v5143_v12 = vunpack.i.l.bf16 %v5142_v22  ;;  %v1574_v56 = vmax.f32 %v7403_v48, %v1564_v15  ;;  %v5118_v15 = vunpack.i.l.bf16 %v5117_v45 }
 0x319   : >> { %v1496_v24 = vsel %vm1491_vm1, %v5114_v0, %v5143_v12  ;;  %v1497_v44 = vsel %vm1491_vm1, %v5143_v12, %v5144_v50  ;;  %v4762_v5 = vpack.c.bf16 %v1574_v56, %v1573_v18  ;;  %v7406_v12 = vmax.f32 %v6138_v52, 0.0 }
 0x31a   : >> { %v1565_v21 = vsel %vm553_vm12, %v1497_v44, %v5109_v53  ;;  %v1576_v41 = vmax.f32 %v7404_v59, %v1496_v24  ;;  %v5147_v9 = vpop.permute.xlu1 %5146  ;;  %v5124_v53 = vunpack.i.h.bf16 %v6303_v3  ;;  %v5119_v59 = vunpack.i.h.bf16 %v5117_v45 }
 0x31b   : >> { %v5149_v22 = vunpack.i.h.bf16 %v5147_v9  ;;  %v5148_v7 = vunpack.i.l.bf16 %v5147_v9  ;;  %1685 = vrot.lane.b32.xlu1 %v4762_v5, %s5319_s9  ;;  %v1577_v1 = vmax.f32 %v7405_v14, %v1565_v21  ;;  %v7416_v3 = vmax.f32 %v6124_v49, 0.0 }
 0x31c   : >> { %v7418_v49 = vunpack.i.l.bf16 %v6307_v38 }
 0x31d   : >> { %v1499_v18 = vsel %vm1491_vm1, %v5123_v26, %v5148_v7  ;;  %v1500_v50 = vsel %vm1491_vm1, %v5148_v7, %v5149_v22  ;;  %v4763_v36 = vpack.c.bf16 %v1577_v1, %v1576_v41  ;;  %v7408_v22 = vmax.f32 %v6134_v40, 0.0 }
 0x31e   : >> { %v1566_v24 = vsel %vm553_vm12, %v1500_v50, %v5118_v15  ;;  %v1579_v48 = vmax.f32 %v7406_v12, %v1499_v18  ;;  %v5152_v56 = vpop.permute.xlu0 %5151  ;;  %v5129_v40 = vunpack.i.h.bf16 %v6305_v31 }
 0x31f   : >> { %v5154_v44 = vunpack.i.h.bf16 %v5152_v56  ;;  %v5153_v5 = vunpack.i.l.bf16 %v5152_v56  ;;  %1687 = vrot.lane.b32.xlu0 %v4763_v36, %s5319_s9  ;;  %v1580_v21 = vmax.f32 %v7407_v51, %v1566_v24  ;;  %v5128_v36 = vunpack.i.l.bf16 %v6305_v31 }
 0x321   : >> { %v1502_v7 = vsel %vm1491_vm1, %v5124_v53, %v5153_v5  ;;  %v1503_v41 = vsel %vm1491_vm1, %v5153_v5, %v5154_v44  ;;  %v4764_v9 = vpack.c.bf16 %v1580_v21, %v1579_v48  ;;  %v7311_v44 = vunpack.i.l.bf16 %v6307_v38 }
 0x322   : >> { %v1567_v52 = vsel %vm553_vm12, %v1503_v41, %v5119_v59  ;;  %v1582_v14 = vmax.f32 %v7408_v22, %v1502_v7  ;;  %v5157_v1 = vpop.permute.xlu1 %5156  ;;  %v5134_v5 = vunpack.i.h.bf16 %v6307_v38 }
 0x323   : >> { %1689 = vrot.lane.b32.xlu1 %v4764_v9, %s5319_s9  ;;  %v1583_v33 = vmax.f32 %v1377_v30, %v1567_v52  ;;  %v5158_v15 = vunpack.i.l.bf16 %v5157_v1  ;;  %v5159_v48 = vunpack.i.h.bf16 %v5157_v1 }
 0x325   : >> { %v4765_v45 = vpack.c.bf16 %v1583_v33, %v1582_v14  ;;  %v1505_v17 = vsel %vm1491_vm1, %v5128_v36, %v5158_v15  ;;  %v1506_v22 = vsel %vm1491_vm1, %v5158_v15, %v5159_v48  ;;  %v7409_v14 = vmax.f32 %v6158_v27, 0.0 }
 0x326   : >> { %v5172_v18 = vpop.permute.xlu0 %5171  ;;  %v5162_v50 = vpop.permute.xlu1 %5161  ;;  %v7410_v15 = vmax.f32 %v6167_v63, 0.0  ;;  %v7412_v63 = vmax.f32 %v6190_v13, 0.0 }
 0x327   : >> { %v5173_v24 = vunpack.i.l.bf16 %v5172_v18  ;;  %v5163_v12 = vunpack.i.l.bf16 %v5162_v50  ;;  %1691 = vrot.lane.b32.xlu0 %v4765_v45, %s5319_s9  ;;  %v5174_v56 = vunpack.i.h.bf16 %v5172_v18  ;;  %v5164_v30 = vunpack.i.h.bf16 %v5162_v50 }
 0x328   : >> { %v1585_v1 = vmax.f32 %v7409_v14, %v1505_v17  ;;  %v7414_v14 = vmax.f32 %v6094_v10, 0.0 }
 0x329   : >> { %v1508_v51 = vsel %vm1491_vm1, %v5129_v40, %v5173_v24  ;;  %v1511_v7 = vsel %vm1491_vm1, %v7311_v44, %v5163_v12  ;;  %v1509_v33 = vsel %vm1491_vm1, %v5173_v24, %v5174_v56  ;;  %v1512_v18 = vsel %vm1491_vm1, %v5163_v12, %v5164_v30 }
 0x32a   : >> { %v5177_v21 = vpop.permute.xlu0 %5176  ;;  %v5167_v59 = vpop.permute.xlu1 %5166  ;;  %v1588_v27 = vmax.f32 %v7410_v15, %v1508_v51  ;;  %v7411_v24 = vmax.f32 %v6185_v54, 0.0 }
 0x32b   : >> { %v5178_v41 = vunpack.i.l.bf16 %v5177_v21  ;;  %v5169_v9 = vunpack.i.h.bf16 %v5167_v59  ;;  %v5168_v52 = vunpack.i.l.bf16 %v5167_v59  ;;  %v5179_v45 = vunpack.i.h.bf16 %v5177_v21 }
 0x32c   : >> { %v1591_v48 = vmax.f32 %v7411_v24, %v1511_v7 }
 0x32d   : >> { %v1514_v50 = vsel %vm1491_vm1, %v5134_v5, %v5178_v41  ;;  %v1569_v44 = vsel %vm553_vm12, %v1509_v33, %v5169_v9  ;;  %v1568_v19 = vsel %vm553_vm12, %v1506_v22, %v5168_v52  ;;  %v1515_v22 = vsel %vm1491_vm1, %v5178_v41, %v5179_v45 }
 0x32e   : >> { %v1589_v12 = vmax.f32 %v1385_v58, %v1569_v44  ;;  %v1586_v56 = vmax.f32 %v1381_v55, %v1568_v19  ;;  %v5182_v17 = vpop.permute.xlu0 %5181  ;;  %v5187_v30 = vpop.permute.xlu1 %5186  ;;  %v1594_v51 = vmax.f32 %v7412_v63, %v1514_v50  ;;  %v7413_v44 = vmax.f32 %v6088_v34, 0.0 }
 0x32f   : >> { %v5184_v21 = vunpack.i.h.bf16 %v5182_v17  ;;  %v5183_v59 = vunpack.i.l.bf16 %v5182_v17  ;;  %v5189_v9 = vunpack.i.h.bf16 %v5187_v30  ;;  %v5188_v52 = vunpack.i.l.bf16 %v5187_v30 }
 0x330   : >> { %v4767_v54 = vpack.c.bf16 %v1589_v12, %v1588_v27  ;;  %v4766_v7 = vpack.c.bf16 %v1586_v56, %v1585_v1  ;;  %v7415_v27 = vmax.f32 %v6121_v43, 0.0 }
 0x331   : >> { %v1570_v39 = vsel %vm553_vm12, %v1512_v18, %v5183_v59  ;;  %v1571_v58 = vsel %vm553_vm12, %v1515_v22, %v5184_v21  ;;  %v1492_v2 = vsel %vm1491_vm1, %v5188_v52, %v5113_v47  ;;  %v1495_v55 = vsel %vm1491_vm1, %v5189_v9, %v5114_v0 }
 0x332   : >> { %v1592_v19 = vmax.f32 %v1389_v6, %v1570_v39  ;;  %v1595_v13 = vmax.f32 %v1393_v16, %v1571_v58  ;;  %v1572_v41 = vmax.f32 %v7413_v44, %v1492_v2  ;;  %v1575_v1 = vmax.f32 %v7414_v14, %v1495_v55  ;;  %v5192_v33 = vpop.permute.xlu0 %5191  ;;  %v5197_v45 = vpop.permute.xlu1 %5196  ;;  %1695 = vrot.lane.b32.xlu0 %v4767_v54, %s5319_s9 }
 0x333   : >> { %v5194_v47 = vunpack.i.h.bf16 %v5192_v33  ;;  %v5193_v57 = vunpack.i.l.bf16 %v5192_v33  ;;  %v5199_v18 = vunpack.i.h.bf16 %v5197_v45  ;;  %v5198_v0 = vunpack.i.l.bf16 %v5197_v45  ;;  %1693 = vrot.lane.b32.xlu1 %v4766_v7, %s5319_s9 }
 0x334   : >> { %v4752_v4 = vpack.c.bf16 %v1572_v41, %v1572_v41  ;;  %v4753_v6 = vpack.c.bf16 %v1575_v1, %v1575_v1  ;;  %v4769_v37 = vpack.c.bf16 %v1595_v13, %v1594_v51  ;;  %v4768_v16 = vpack.c.bf16 %v1592_v19, %v1591_v48 }
 0x335   : >> { %v1498_v34 = vsel %vm1491_vm1, %v5193_v57, %v5123_v26  ;;  %v1501_v10 = vsel %vm1491_vm1, %v5194_v47, %v5124_v53  ;;  %v1504_v50 = vsel %vm1491_vm1, %v5198_v0, %v5128_v36  ;;  %v1507_v15 = vsel %vm1491_vm1, %v5199_v18, %v5129_v40 }
 0x336   : >> { %1642 = vst.msk [vmem:[%s1640_s26] sm:$0xf] %vm1641_vm2, %v4752_v4  ;;  %1643 = vst.msk [vmem:[%s1640_s26 + $0x4] sm:$0xf] %vm1641_vm2, %v4753_v6  ;;  %v1578_v26 = vmax.f32 %v7415_v27, %v1498_v34  ;;  %v1581_v24 = vmax.f32 %v7416_v3, %v1501_v10  ;;  %v1584_v53 = vmax.f32 %v1379_v11, %v1504_v50  ;;  %v7417_v36 = vmax.f32 %v6247_v60, 0.0  ;;  %v5202_v31 = vpop.permute.xlu0 %5201 }
 0x337   : >> { %1699 = vrot.lane.b32.xlu0 %v4769_v37, %s5319_s9  ;;  %v5204_v40 = vunpack.i.h.bf16 %v5202_v31  ;;  %v5203_v12 = vunpack.i.l.bf16 %v5202_v31  ;;  %1697 = vrot.lane.b32.xlu1 %v4768_v16, %s5319_s9  ;;  %v7419_v11 = vmax.f32 %v6275_v29, 0.0  ;;  %v7420_v59 = vmax.f32 %v6267_v8, 0.0 }
 0x338   : >> { %v1587_v48 = vmax.f32 %v7417_v36, %v1507_v15  ;;  %v4754_v56 = vpack.c.bf16 %v1578_v26, %v1578_v26  ;;  %v4755_v43 = vpack.c.bf16 %v1581_v24, %v1581_v24  ;;  %v4756_v17 = vpack.c.bf16 %v1584_v53, %v1584_v53  ;;  %v5233_v36 = vld [vmem:[%s7267_s3 + $0x30] ss:$0 sps:$4 sm:$0x33] (%p341_p3)  }
 0x339   : >> { %v1510_v35 = vsel %vm1491_vm1, %v5203_v12, %v7418_v49  ;;  %v1513_v60 = vsel %vm1491_vm1, %v5204_v40, %v5134_v5  ;;  %5050 = vmatprep.subr.msk.bf16.mxu0 (%p341_p3), %vm3280_vm4, %v5233_v36  ;;  %5051 = vmatprep.subr.msk.bf16.mxu1 (%p341_p3), %vm3280_vm4, %v5233_v36  ;;  %v3282_v31 = vsel (%p341_p3), %vm3280_vm4, %v5233_v36, 0 }
 0x33a   : >> { %v4757_v30 = vpack.c.bf16 %v1587_v48, %v1587_v48  ;;  %1644 = vst.msk [vmem:[%s1640_s26 + $0x8] sm:$0xf] %vm1641_vm2, %v4754_v56  ;;  %1645 = vst.msk [vmem:[%s1640_s26 + $0xc] sm:$0xf] %vm1641_vm2, %v4755_v43  ;;  %v1590_v21 = vmax.f32 %v7419_v11, %v1510_v35  ;;  %v1593_v9 = vmax.f32 %v7420_v59, %v1513_v60  ;;  %v5234_v48 = vld [vmem:[%s7267_s3 + $0x28] sm:$0xff] (%p341_p3)   ;;  %4923 = vmatpush3.bf16.msra.mxu0 (%p341_p3), %v3282_v31  ;;  %v5237_v56 = vld [vmem:[%s7267_s3 + $0x20] sm:$0xff] (%p341_p3)  }
 0x33b   : >> { %1646 = vst.msk [vmem:[%s1640_s26 + $0x10] sm:$0xf] %vm1641_vm2, %v4756_v17  ;;  %5043 = vmatpush3.bf16.msra.mxu1 (%p341_p3), %v3282_v31  ;;  %4924 = vmatprep.subr.bf16.mxu0 (%p341_p3), %v5234_v48  ;;  %v5238_v35 = vld [vmem:[%s7267_s3 + $0x18] sm:$0xff] (%p341_p3)  }
 0x33c   : >> { %1647 = vst.msk [vmem:[%s1640_s26 + $0x14] sm:$0xf] %vm1641_vm2, %v4757_v30  ;;  %v4758_v52 = vpack.c.bf16 %v1590_v21, %v1590_v21  ;;  %v4759_v22 = vpack.c.bf16 %v1593_v9, %v1593_v9  ;;  %5037 = vmatprep.subr.bf16.mxu1 (%p341_p3), %v5234_v48  ;;  %v5241_v21 = vld [vmem:[%s7267_s3 + $0x10] sm:$0xff] (%p341_p3)  }
 0x33e   : >> { %1648 = vst.msk [vmem:[%s1640_s26 + $0x18] sm:$0xf] %vm1641_vm2, %v4758_v52  ;;  %1649 = vst.msk [vmem:[%s1640_s26 + $0x1c] sm:$0xf] %vm1641_vm2, %v4759_v22  ;;  %4925 = vmatpush3.bf16.msra.mxu0 (%p341_p3), %v5234_v48 }
 0x33f   : > { %5044 = vmatpush3.bf16.msra.mxu1 (%p341_p3), %v5234_v48  ;;  %4926 = vmatprep.subr.bf16.mxu0 (%p341_p3), %v5237_v56 }
 0x340   : > { %5038 = vmatprep.subr.bf16.mxu1 (%p341_p3), %v5237_v56 }
 0x342   : > { %4927 = vmatpush3.bf16.msra.mxu0 (%p341_p3), %v5237_v56 }
 0x343   : > { %5045 = vmatpush3.bf16.msra.mxu1 (%p341_p3), %v5237_v56  ;;  %4928 = vmatprep.subr.bf16.mxu0 (%p341_p3), %v5238_v35 }
 0x344   : > { %5039 = vmatprep.subr.bf16.mxu1 (%p341_p3), %v5238_v35 }
 0x346   : > { %4929 = vmatpush3.bf16.msra.mxu0 (%p341_p3), %v5238_v35 }
 0x347   : > { %5046 = vmatpush3.bf16.msra.mxu1 (%p341_p3), %v5238_v35  ;;  %4930 = vmatprep.subr.bf16.mxu0 (%p341_p3), %v5241_v21 }
 0x348   : > { %5040 = vmatprep.subr.bf16.mxu1 (%p341_p3), %v5241_v21 }
 0x34a   : > { %4931 = vmatpush3.bf16.msra.mxu0 (%p341_p3), %v5241_v21 }
 0x34b   : > { %5047 = vmatpush3.bf16.msra.mxu1 (%p341_p3), %v5241_v21 }
 0x38d   : >> { %v1686_v38 = vpop.permute.xlu1 %1685 }
 0x38e   : >> { %v1701_v5 = vrot.slane %v1686_v38, 4 }
 0x390   : >> { %v1710_v63 = vsel %vm1709_vm3, %v1686_v38, %v1701_v5  ;;  %v5242_v38 = vld [vmem:[%s7267_s3 + $0x8] sm:$0xff] (%p341_p3)  }
 0x391   : >> { %1730 = vst.msk [vmem:[%s1729_s6] sm:$0xf] %vm1641_vm2, %v1710_v63  ;;  %v1688_v8 = vpop.permute.xlu0 %1687  ;;  %4932 = vmatprep.subr.bf16.mxu0 (%p341_p3), %v5242_v38  ;;  %5041 = vmatprep.subr.bf16.mxu1 (%p341_p3), %v5242_v38 }
 0x392   : >> { %v1702_v29 = vrot.slane %v1688_v8, 4  ;;  %4933 = vmatpush3.bf16.msra.mxu0 (%p341_p3), %v5242_v38  ;;  %5048 = vmatpush3.bf16.msra.mxu1 (%p341_p3), %v5242_v38 }
 0x394   : >> { %v1711_v51 = vsel %vm1709_vm3, %v1688_v8, %v1702_v29  ;;  %v5245_v8 = vld [vmem:[%s7267_s3] sm:$0xff] (%p341_p3)  }
 0x395   : >> { %1731 = vst.msk [vmem:[%s1729_s6 + $0x4] sm:$0xf] %vm1641_vm2, %v1711_v51  ;;  %v1690_v54 = vpop.permute.xlu1 %1689  ;;  %4934 = vmatprep.subr.bf16.mxu0 (%p341_p3), %v5245_v8  ;;  %5042 = vmatprep.subr.bf16.mxu1 (%p341_p3), %v5245_v8 }
 0x396   : >> { %v1703_v7 = vrot.slane %v1690_v54, 4  ;;  %4935 = vmatpush3.bf16.msra.mxu0 (%p341_p3), %v5245_v8  ;;  %5049 = vmatpush3.bf16.msra.mxu1 (%p341_p3), %v5245_v8 }
 0x398   : >> { %v1712_v39 = vsel %vm1709_vm3, %v1690_v54, %v1703_v7 }
 0x399   : >> { %1732 = vst.msk [vmem:[%s1729_s6 + $0x8] sm:$0xf] %vm1641_vm2, %v1712_v39  ;;  %v1692_v58 = vpop.permute.xlu0 %1691 }
 0x39a   : >> { %v1704_v2 = vrot.slane %v1692_v58, 4 }
 0x39c   : >> { %v1713_v55 = vsel %vm1709_vm3, %v1692_v58, %v1704_v2 }
 0x39d   : >> { %1733 = vst.msk [vmem:[%s1729_s6 + $0xc] sm:$0xf] %vm1641_vm2, %v1713_v55 }
 0x3a4   : >> { %v1696_v19 = vpop.permute.xlu0 %1695 }
 0x3a5   : >> { %v1706_v13 = vrot.slane %v1696_v19, 4  ;;  %v1694_v44 = vpop.permute.xlu1 %1693 }
 0x3a6   : >> { %v1705_v41 = vrot.slane %v1694_v44, 4 }
 0x3a7   : >> { %v1715_v14 = vsel %vm1709_vm3, %v1696_v19, %v1706_v13 }
 0x3a8   : >> { %1735 = vst.msk [vmem:[%s1729_s6 + $0x14] sm:$0xf] %vm1641_vm2, %v1715_v14  ;;  %v1714_v1 = vsel %vm1709_vm3, %v1694_v44, %v1705_v41 }
 0x3a9   : >> { %v1700_v33 = vpop.permute.xlu0 %1699  ;;  %1734 = vst.msk [vmem:[%s1729_s6 + $0x10] sm:$0xf] %vm1641_vm2, %v1714_v1  ;;  %v1698_v47 = vpop.permute.xlu1 %1697  ;;  %343 = sbr.rel (!%p341_p3) target bundleno = 53 (0x35), region = 86 }
 0x3aa   : >> { %v1708_v45 = vrot.slane %v1700_v33, 4  ;;  %v1707_v57 = vrot.slane %v1698_v47, 4 }
 0x3ac   : >> { %v1717_v18 = vsel %vm1709_vm3, %v1700_v33, %v1708_v45  ;;  %v1716_v0 = vsel %vm1709_vm3, %v1698_v47, %v1707_v57 }
 0x3ad   : >> { %1737 = vst.msk [vmem:[%s1729_s6 + $0x1c] sm:$0xf] %vm1641_vm2, %v1717_v18  ;;  %1736 = vst.msk [vmem:[%s1729_s6 + $0x18] sm:$0xf] %vm1641_vm2, %v1716_v0 }
 0x3b4   : > { %v6472_v4 = vld [vmem:[#allocation2] sm:$0xf]  ;;  %v6474_v6 = vld [vmem:[#allocation2 + $0x4] sm:$0xf]  ;;  %v6486_v20 = vld [vmem:[#allocation2 + $0xc8] sm:$0xf] }
 0x3b5   : > { %v4389_v37 = vcombine.low %v6472_v4, %v6474_v6  ;;  %v6478_v16 = vld [vmem:[#allocation2 + $0xc0] sm:$0xf]  ;;  %v6480_v34 = vld [vmem:[#allocation2 + $0xc4] sm:$0xf]  ;;  %v6488_v23 = vld [vmem:[#allocation2 + $0xcc] sm:$0xf] }
 0x3b6   : > { %v4413_v10 = vcombine.low %v6478_v16, %v6480_v34  ;;  %v6490_v25 = vld [vmem:[#allocation2 + $0x8] sm:$0xf]  ;;  %v6492_v28 = vld [vmem:[#allocation2 + $0xc] sm:$0xf]  ;;  %v4414_v32 = vcombine.low %v6486_v20, %v6488_v23  ;;  %v6502_v62 = vld [vmem:[#allocation2 + $0xd0] sm:$0xf] }
 0x3b7   : > { %2170 = vrot.lane.b32.xlu1 %v4389_v37, %s5320_s7  ;;  %2074 = vrot.lane.b32.xlu0 %v4389_v37, %s5321_s8  ;;  %v4390_v61 = vcombine.low %v6490_v25, %v6492_v28  ;;  %v6504_v46 = vld [vmem:[#allocation2 + $0xd4] sm:$0xf]  ;;  %v6506_v42 = vld [vmem:[#allocation2 + $0x10] sm:$0xf]  ;;  %v6516_v26 = vld [vmem:[#allocation2 + $0xd8] sm:$0xf] }
 0x3b8   : > { %v6508_v50 = vld [vmem:[#allocation2 + $0x14] sm:$0xf]  ;;  %v4415_v15 = vcombine.low %v6502_v62, %v6504_v46  ;;  %v6518_v3 = vld [vmem:[#allocation2 + $0xdc] sm:$0xf]  ;;  %v6520_v24 = vld [vmem:[#allocation2 + $0x18] sm:$0xf] }
 0x3b9   : > { %v4391_v27 = vcombine.low %v6506_v42, %v6508_v50  ;;  %v6522_v53 = vld [vmem:[#allocation2 + $0x1c] sm:$0xf]  ;;  %v4416_v40 = vcombine.low %v6516_v26, %v6518_v3  ;;  %v6543_v43 = vld [vmem:[#allocation2 + $0xe0] sm:$0xf]  ;;  %v6545_v17 = vld [vmem:[#allocation2 + $0xe4] sm:$0xf] }
 0x3ba   : > { %v4392_v12 = vcombine.low %v6520_v24, %v6522_v53  ;;  %v6547_v30 = vld [vmem:[#allocation2 + $0x20] sm:$0xf]  ;;  %v6549_v49 = vld [vmem:[#allocation2 + $0x24] sm:$0xf]  ;;  %v4417_v60 = vcombine.low %v6543_v43, %v6545_v17  ;;  %v6565_v59 = vld [vmem:[#allocation2 + $0xe8] sm:$0xf] }
 0x3bb   : > { %2218 = vrot.lane.b32.xlu1 %v4413_v10, %s5320_s7  ;;  %2122 = vrot.lane.b32.xlu0 %v4413_v10, %s5321_s8  ;;  %v4393_v11 = vcombine.low %v6547_v30, %v6549_v49  ;;  %v6567_v9 = vld [vmem:[#allocation2 + $0xec] sm:$0xf]  ;;  %v6569_v52 = vld [vmem:[#allocation2 + $0x28] sm:$0xf]  ;;  %v6587_v29 = vld [vmem:[#allocation2 + $0xf0] sm:$0xf] }
 0x3bc   : > { %v6571_v22 = vld [vmem:[#allocation2 + $0x2c] sm:$0xf]  ;;  %v4418_v5 = vcombine.low %v6565_v59, %v6567_v9  ;;  %v6589_v51 = vld [vmem:[#allocation2 + $0xf4] sm:$0xf]  ;;  %v6591_v54 = vld [vmem:[#allocation2 + $0x30] sm:$0xf] }
 0x3bd   : > { %v4394_v63 = vcombine.low %v6569_v52, %v6571_v22  ;;  %v6593_v7 = vld [vmem:[#allocation2 + $0x34] sm:$0xf]  ;;  %v4419_v39 = vcombine.low %v6587_v29, %v6589_v51  ;;  %v6603_v2 = vld [vmem:[#allocation2 + $0xf8] sm:$0xf]  ;;  %v6605_v55 = vld [vmem:[#allocation2 + $0xfc] sm:$0xf] }
 0x3be   : > { %v4395_v58 = vcombine.low %v6591_v54, %v6593_v7  ;;  %v6607_v19 = vld [vmem:[#allocation2 + $0x38] sm:$0xf]  ;;  %v6609_v13 = vld [vmem:[#allocation2 + $0x3c] sm:$0xf]  ;;  %v4420_v44 = vcombine.low %v6603_v2, %v6605_v55  ;;  %v6619_v14 = vld [vmem:[#allocation2 + $0x100] sm:$0xf] }
 0x3bf   : > { %2124 = vrot.lane.b32.xlu1 %v4414_v32, %s5321_s8  ;;  %2076 = vrot.lane.b32.xlu0 %v4390_v61, %s5321_s8  ;;  %v4396_v41 = vcombine.low %v6607_v19, %v6609_v13  ;;  %v6621_v1 = vld [vmem:[#allocation2 + $0x104] sm:$0xf]  ;;  %v6623_v33 = vld [vmem:[#allocation2 + $0x40] sm:$0xf]  ;;  %v6635_v18 = vld [vmem:[#allocation2 + $0x108] sm:$0xf] }
 0x3c0   : > { %v6625_v45 = vld [vmem:[#allocation2 + $0x44] sm:$0xf]  ;;  %v4421_v47 = vcombine.low %v6619_v14, %v6621_v1  ;;  %v6637_v0 = vld [vmem:[#allocation2 + $0x10c] sm:$0xf]  ;;  %v6639_v37 = vld [vmem:[#allocation2 + $0x48] sm:$0xf] }
 0x3c1   : > { %v4397_v57 = vcombine.low %v6623_v33, %v6625_v45  ;;  %v6641_v10 = vld [vmem:[#allocation2 + $0x4c] sm:$0xf]  ;;  %v6655_v36 = vld [vmem:[#allocation2 + $0x50] sm:$0xf]  ;;  %v6657_v48 = vld [vmem:[#allocation2 + $0x54] sm:$0xf] }
 0x3c2   : > { %v6669_v56 = vld [vmem:[#allocation2 + $0x11c] sm:$0xf]  ;;  %v6671_v35 = vld [vmem:[#allocation2 + $0x58] sm:$0xf]  ;;  %v6683_v38 = vld [vmem:[#allocation2 + $0x120] sm:$0xf] }
 0x3c3   : > { %2220 = vrot.lane.b32.xlu1 %v4414_v32, %s5320_s7  ;;  %2172 = vrot.lane.b32.xlu0 %v4390_v61, %s5320_s7  ;;  %v4422_v32 = vcombine.low %v6635_v18, %v6637_v0  ;;  %v4398_v61 = vcombine.low %v6639_v37, %v6641_v10  ;;  %7421 = vst [vmem:[#allocation6_spill] sm:$0xff] %v6671_v35  ;;  %7423 = vst [vmem:[#allocation8_spill] sm:$0xff] %v6683_v38  ;;  %v6689_v8 = vld [vmem:[#allocation2 + $0x64] sm:$0xf] }
 0x3c4   : > { %7426 = vst [vmem:[#allocation11_spill] sm:$0xff] %v6689_v8 }
 0x3c7   : > { %2126 = vrot.lane.b32.xlu1 %v4415_v15, %s5321_s8  ;;  %2078 = vrot.lane.b32.xlu0 %v4391_v27, %s5321_s8 }
 0x3cb   : > { %2222 = vrot.lane.b32.xlu1 %v4415_v15, %s5320_s7  ;;  %2174 = vrot.lane.b32.xlu0 %v4391_v27, %s5320_s7  ;;  %v6651_v15 = vld [vmem:[#allocation2 + $0x110] sm:$0xf]  ;;  %v6653_v27 = vld [vmem:[#allocation2 + $0x114] sm:$0xf] }
 0x3cc   : > { %v4423_v31 = vcombine.low %v6651_v15, %v6653_v27 }
 0x3cf   : > { %2128 = vrot.lane.b32.xlu1 %v4416_v40, %s5321_s8  ;;  %2080 = vrot.lane.b32.xlu0 %v4392_v12, %s5321_s8 }
 0x3d3   : > { %2224 = vrot.lane.b32.xlu1 %v4416_v40, %s5320_s7  ;;  %2176 = vrot.lane.b32.xlu0 %v4392_v12, %s5320_s7  ;;  %v4399_v40 = vcombine.low %v6655_v36, %v6657_v48  ;;  %v6667_v12 = vld [vmem:[#allocation2 + $0x118] sm:$0xf] }
 0x3d7   : > { %2130 = vrot.lane.b32.xlu1 %v4417_v60, %s5321_s8  ;;  %2082 = vrot.lane.b32.xlu0 %v4393_v11, %s5321_s8 }
 0x3db   : > { %2226 = vrot.lane.b32.xlu1 %v4417_v60, %s5320_s7  ;;  %2178 = vrot.lane.b32.xlu0 %v4393_v11, %s5320_s7  ;;  %v6673_v60 = vld [vmem:[#allocation2 + $0x5c] sm:$0xf]  ;;  %v4424_v11 = vcombine.low %v6667_v12, %v6669_v56 }
 0x3dc   : > { %7422 = vst [vmem:[#allocation7_spill] sm:$0xff] %v6673_v60  ;;  %v4400_v21 = vcombine.low %v6671_v35, %v6673_v60 }
 0x3df   : > { %2132 = vrot.lane.b32.xlu1 %v4418_v5, %s5321_s8  ;;  %2084 = vrot.lane.b32.xlu0 %v4394_v63, %s5321_s8 }
 0x3e3   : > { %2228 = vrot.lane.b32.xlu1 %v4418_v5, %s5320_s7  ;;  %2180 = vrot.lane.b32.xlu0 %v4394_v63, %s5320_s7  ;;  %v6685_v5 = vld [vmem:[#allocation2 + $0x124] sm:$0xf]  ;;  %v6687_v63 = vld [vmem:[#allocation2 + $0x60] sm:$0xf] }
 0x3e4   : > { %7424 = vst [vmem:[#allocation9_spill] sm:$0xff] %v6685_v5  ;;  %7425 = vst [vmem:[#allocation10_spill] sm:$0xff] %v6687_v63 }
 0x3e7   : > { %2134 = vrot.lane.b32.xlu1 %v4419_v39, %s5321_s8  ;;  %2086 = vrot.lane.b32.xlu0 %v4395_v58, %s5321_s8 }
 0x3eb   : > { %2230 = vrot.lane.b32.xlu1 %v4419_v39, %s5320_s7  ;;  %2182 = vrot.lane.b32.xlu0 %v4395_v58, %s5320_s7  ;;  %v4425_v39 = vcombine.low %v6683_v38, %v6685_v5  ;;  %v4401_v58 = vcombine.low %v6687_v63, %v6689_v8 }
 0x3ef   : > { %2136 = vrot.lane.b32.xlu1 %v4420_v44, %s5321_s8  ;;  %2088 = vrot.lane.b32.xlu0 %v4396_v41, %s5321_s8 }
 0x3f3   : > { %2232 = vrot.lane.b32.xlu1 %v4420_v44, %s5320_s7  ;;  %2184 = vrot.lane.b32.xlu0 %v4396_v41, %s5320_s7  ;;  %v6699_v44 = vld [vmem:[#allocation2 + $0x128] sm:$0xf]  ;;  %v6701_v41 = vld [vmem:[#allocation2 + $0x12c] sm:$0xf] }
 0x3f4   : > { %7427 = vst [vmem:[#allocation12_spill] sm:$0xff] %v6699_v44  ;;  %7428 = vst [vmem:[#allocation13_spill] sm:$0xff] %v6701_v41 }
 0x3f7   : > { %2138 = vrot.lane.b32.xlu1 %v4421_v47, %s5321_s8  ;;  %2090 = vrot.lane.b32.xlu0 %v4397_v57, %s5321_s8 }
 0x3fb   : > { %2234 = vrot.lane.b32.xlu1 %v4421_v47, %s5320_s7  ;;  %2186 = vrot.lane.b32.xlu0 %v4397_v57, %s5320_s7  ;;  %v6703_v47 = vld [vmem:[#allocation2 + $0x68] sm:$0xf]  ;;  %v6705_v57 = vld [vmem:[#allocation2 + $0x6c] sm:$0xf] }
 0x3fc   : > { %7429 = vst [vmem:[#allocation14_spill] sm:$0xff] %v6703_v47  ;;  %7430 = vst [vmem:[#allocation15_spill] sm:$0xff] %v6705_v57 }
 0x3ff   : > { %2140 = vrot.lane.b32.xlu1 %v4422_v32, %s5321_s8  ;;  %2092 = vrot.lane.b32.xlu0 %v4398_v61, %s5321_s8 }
 0x403   : > { %2236 = vrot.lane.b32.xlu1 %v4422_v32, %s5320_s7  ;;  %2188 = vrot.lane.b32.xlu0 %v4398_v61, %s5320_s7  ;;  %v4426_v32 = vcombine.low %v6699_v44, %v6701_v41  ;;  %v4402_v61 = vcombine.low %v6703_v47, %v6705_v57  ;;  %v6731_v57 = vld [vmem:[#allocation2 + $0x138] sm:$0xf]  ;;  %v6733_v47 = vld [vmem:[#allocation2 + $0x13c] sm:$0xf] }
 0x404   : > { %v6735_v41 = vld [vmem:[#allocation2 + $0x78] sm:$0xf] }
 0x405   : > { %7435 = vst [vmem:[#allocation20_spill] sm:$0xff] %v6735_v41 }
 0x407   : > { %2142 = vrot.lane.b32.xlu1 %v4423_v31, %s5321_s8  ;;  %2094 = vrot.lane.b32.xlu0 %v4399_v40, %s5321_s8 }
 0x40b   : > { %2238 = vrot.lane.b32.xlu1 %v4423_v31, %s5320_s7  ;;  %2190 = vrot.lane.b32.xlu0 %v4399_v40, %s5320_s7  ;;  %v6715_v31 = vld [vmem:[#allocation2 + $0x130] sm:$0xf]  ;;  %v6717_v40 = vld [vmem:[#allocation2 + $0x134] sm:$0xf] }
 0x40c   : > { %7431 = vst [vmem:[#allocation16_spill] sm:$0xff] %v6715_v31  ;;  %7432 = vst [vmem:[#allocation17_spill] sm:$0xff] %v6717_v40 }
 0x40f   : > { %2144 = vrot.lane.b32.xlu1 %v4424_v11, %s5321_s8  ;;  %2096 = vrot.lane.b32.xlu0 %v4400_v21, %s5321_s8 }
 0x413   : > { %2240 = vrot.lane.b32.xlu1 %v4424_v11, %s5320_s7  ;;  %2192 = vrot.lane.b32.xlu0 %v4400_v21, %s5320_s7  ;;  %v6719_v11 = vld [vmem:[#allocation2 + $0x70] sm:$0xf]  ;;  %v6721_v21 = vld [vmem:[#allocation2 + $0x74] sm:$0xf] }
 0x414   : > { %7433 = vst [vmem:[#allocation18_spill] sm:$0xff] %v6719_v11  ;;  %7434 = vst [vmem:[#allocation19_spill] sm:$0xff] %v6721_v21 }
 0x417   : > { %2146 = vrot.lane.b32.xlu1 %v4425_v39, %s5321_s8  ;;  %2098 = vrot.lane.b32.xlu0 %v4401_v58, %s5321_s8 }
 0x41b   : > { %2242 = vrot.lane.b32.xlu1 %v4425_v39, %s5320_s7  ;;  %2194 = vrot.lane.b32.xlu0 %v4401_v58, %s5320_s7  ;;  %v4427_v39 = vcombine.low %v6715_v31, %v6717_v40  ;;  %v4403_v58 = vcombine.low %v6719_v11, %v6721_v21  ;;  %v4428_v21 = vcombine.low %v6731_v57, %v6733_v47 }
 0x41f   : > { %2148 = vrot.lane.b32.xlu1 %v4426_v32, %s5321_s8  ;;  %2100 = vrot.lane.b32.xlu0 %v4402_v61, %s5321_s8 }
 0x423   : > { %2244 = vrot.lane.b32.xlu1 %v4426_v32, %s5320_s7  ;;  %2196 = vrot.lane.b32.xlu0 %v4402_v61, %s5320_s7  ;;  %v6737_v32 = vld [vmem:[#allocation2 + $0x7c] sm:$0xf] }
 0x424   : > { %7436 = vst [vmem:[#allocation21_spill] sm:$0xff] %v6737_v32  ;;  %v4404_v8 = vcombine.low %v6735_v41, %v6737_v32 }
 0x427   : > { %2150 = vrot.lane.b32.xlu1 %v4427_v39, %s5321_s8  ;;  %2102 = vrot.lane.b32.xlu0 %v4403_v58, %s5321_s8 }
 0x429   : > { %v2171_v61 = vpop.permute.xlu1 %2170  ;;  %v2075_v44 = vpop.permute.xlu0 %2074 }
 0x42a   : > { %v2269_v40 = vsel %vm2266_vm5, %v2075_v44, %v2171_v61 }
 0x42b   : > { %v4437_v11 = vcombine.low %v2269_v40, %v2269_v40  ;;  %v4438_v31 = vcombine.high %v2269_v40, %v2269_v40  ;;  %2246 = vrot.lane.b32.xlu1 %v4427_v39, %s5320_s7  ;;  %2198 = vrot.lane.b32.xlu0 %v4403_v58, %s5320_s7  ;;  %v6751_v39 = vld [vmem:[#allocation2 + $0x140] sm:$0xf]  ;;  %v6753_v58 = vld [vmem:[#allocation2 + $0x144] sm:$0xf] }
 0x42c   : > { %7437 = vst [vmem:[#allocation22_spill] sm:$0xff] %v6753_v58 }
 0x42d   : > { %v2219_v63 = vpop.permute.xlu1 %2218  ;;  %v2123_v5 = vpop.permute.xlu0 %2122  ;;  %v2747_v38 = vmax.bf16 %v4437_v11, %v6472_v4  ;;  %v2748_v60 = vmax.bf16 %v4438_v31, %v6474_v6 }
 0x42e   : > { %v2341_v44 = vsel %vm2266_vm5, %v2123_v5, %v2219_v63  ;;  %v6758_v5 = vld [vmem:[#allocation2 + $0x80] sm:$0xf]  ;;  %v6760_v63 = vld [vmem:[#allocation2 + $0x84] sm:$0xf] }
 0x42f   : > { %v4485_v61 = vcombine.low %v2341_v44, %v2341_v44  ;;  %v4486_v35 = vcombine.high %v2341_v44, %v2341_v44  ;;  %2152 = vrot.lane.b32.xlu1 %v4428_v21, %s5321_s8  ;;  %2104 = vrot.lane.b32.xlu0 %v4404_v8, %s5321_s8  ;;  %v4533_v40 = vcombine.low %v2747_v38, %v2748_v60 }
 0x430   : > { %7438 = vst [vmem:[#allocation23_spill] sm:$0xff] %v6758_v5  ;;  %7439 = vst [vmem:[#allocation24_spill] sm:$0xff] %v6760_v63  ;;  %v4429_v38 = vcombine.low %v6751_v39, %v6753_v58  ;;  %v4405_v31 = vcombine.low %v6758_v5, %v6760_v63 }
 0x431   : > { %v2125_v32 = vpop.permute.xlu1 %2124  ;;  %4936 = vmatprep.mubr.msk.bf16.mxu0 %vm537_vm10, %v4533_v40  ;;  %v2077_v41 = vpop.permute.xlu0 %2076  ;;  %v2795_v4 = vmax.bf16 %v4485_v61, %v6478_v16  ;;  %v2796_v6 = vmax.bf16 %v4486_v35, %v6480_v34 }
 0x433   : > { %2248 = vrot.lane.b32.xlu1 %v4428_v21, %s5320_s7  ;;  %2200 = vrot.lane.b32.xlu0 %v4404_v8, %s5320_s7  ;;  %v4557_v60 = vcombine.low %v2795_v4, %v2796_v6  ;;  %v6773_v8 = vld [vmem:[#allocation2 + $0x148] sm:$0xf]  ;;  %v6775_v4 = vld [vmem:[#allocation2 + $0x14c] sm:$0xf] }
 0x434   : > { %v4430_v58 = vcombine.low %v6773_v8, %v6775_v4 }
 0x435   : > { %v2221_v11 = vpop.permute.xlu1 %2220  ;;  %4984 = vmatprep.mubr.msk.bf16.mxu1 %vm537_vm10, %v4557_v60  ;;  %v2173_v16 = vpop.permute.xlu0 %2172 }
 0x436   : > { %v2344_v34 = vsel %vm2266_vm5, %v2125_v32, %v2221_v11  ;;  %v2272_v35 = vsel %vm2266_vm5, %v2077_v41, %v2173_v16 }
 0x437   : > { %v4487_v44 = vcombine.low %v2344_v34, %v2344_v34  ;;  %v4488_v61 = vcombine.high %v2344_v34, %v2344_v34  ;;  %v4439_v21 = vcombine.low %v2272_v35, %v2272_v35  ;;  %v4440_v40 = vcombine.high %v2272_v35, %v2272_v35  ;;  %2154 = vrot.lane.b32.xlu1 %v4429_v38, %s5321_s8  ;;  %v6781_v34 = vld [vmem:[#allocation2 + $0x88] sm:$0xf]  ;;  %v6783_v35 = vld [vmem:[#allocation2 + $0x8c] sm:$0xf] }
 0x438   : > { %2106 = vrot.lane.b32.xlu0 %v4405_v31, %s5321_s8 }
 0x439   : > { %v2797_v6 = vmax.bf16 %v4487_v44, %v6486_v20  ;;  %v2798_v60 = vmax.bf16 %v4488_v61, %v6488_v23  ;;  %v2749_v32 = vmax.bf16 %v4439_v21, %v6490_v25  ;;  %v2750_v41 = vmax.bf16 %v4440_v40, %v6492_v28  ;;  %v2127_v11 = vpop.permute.xlu1 %2126  ;;  %v2079_v16 = vpop.permute.xlu0 %2078 }
 0x43a   : > { %v4406_v20 = vcombine.low %v6781_v34, %v6783_v35 }
 0x43b   : > { %2250 = vrot.lane.b32.xlu1 %v4429_v38, %s5320_s7  ;;  %v4534_v63 = vcombine.low %v2749_v32, %v2750_v41  ;;  %v4558_v5 = vcombine.low %v2797_v6, %v2798_v60  ;;  %v6799_v6 = vld [vmem:[#allocation2 + $0x154] sm:$0xf] }
 0x43c   : > { %2202 = vrot.lane.b32.xlu0 %v4405_v31, %s5320_s7  ;;  %v6797_v31 = vld [vmem:[#allocation2 + $0x150] sm:$0xf] }
 0x43d   : > { %v2223_v23 = vpop.permute.xlu1 %2222  ;;  %4937 = vmatmul.mubr.msk.bf16.vlgmr.msra.gmra.mxu0 %vm537_vm10, %v4534_v63  ;;  %4985 = vmatmul.mubr.msk.bf16.vlgmr.msra.gmra.mxu1 %vm537_vm10, %v4558_v5  ;;  %v2175_v25 = vpop.permute.xlu0 %2174 }
 0x43e   : > { %v2347_v28 = vsel %vm2266_vm5, %v2127_v11, %v2223_v23  ;;  %v2275_v38 = vsel %vm2266_vm5, %v2079_v16, %v2175_v25  ;;  %v6805_v16 = vld [vmem:[#allocation2 + $0x90] sm:$0xf]  ;;  %v6807_v23 = vld [vmem:[#allocation2 + $0x94] sm:$0xf] }
 0x43f   : > { %v4489_v44 = vcombine.low %v2347_v28, %v2347_v28  ;;  %v4490_v61 = vcombine.high %v2347_v28, %v2347_v28  ;;  %v4441_v21 = vcombine.low %v2275_v38, %v2275_v38  ;;  %v4442_v40 = vcombine.high %v2275_v38, %v2275_v38  ;;  %2156 = vrot.lane.b32.xlu1 %v4430_v58, %s5321_s8 }
 0x440   : > { %2108 = vrot.lane.b32.xlu0 %v4406_v20, %s5321_s8  ;;  %v4431_v38 = vcombine.low %v6797_v31, %v6799_v6 }
 0x441   : > { %v2799_v63 = vmax.bf16 %v4489_v44, %v6502_v62  ;;  %v2800_v5 = vmax.bf16 %v4490_v61, %v6504_v46  ;;  %v2751_v60 = vmax.bf16 %v4441_v21, %v6506_v42  ;;  %v2752_v32 = vmax.bf16 %v4442_v40, %v6508_v50  ;;  %v2129_v41 = vpop.permute.xlu1 %2128  ;;  %v2081_v11 = vpop.permute.xlu0 %2080 }
 0x442   : > { %v4407_v62 = vcombine.low %v6805_v16, %v6807_v23 }
 0x443   : > { %2252 = vrot.lane.b32.xlu1 %v4430_v58, %s5320_s7  ;;  %v4535_v25 = vcombine.low %v2751_v60, %v2752_v32  ;;  %v4559_v28 = vcombine.low %v2799_v63, %v2800_v5  ;;  %v6823_v63 = vld [vmem:[#allocation2 + $0x15c] sm:$0xf] }
 0x444   : > { %2204 = vrot.lane.b32.xlu0 %v4406_v20, %s5320_s7  ;;  %v6821_v20 = vld [vmem:[#allocation2 + $0x158] sm:$0xf] }
 0x445   : > { %v2225_v46 = vpop.permute.xlu1 %2224  ;;  %4940 = vmatprep.mubr.msk.bf16.mxu0 %vm537_vm10, %v4535_v25  ;;  %4988 = vmatprep.mubr.msk.bf16.mxu1 %vm537_vm10, %v4559_v28  ;;  %v2177_v42 = vpop.permute.xlu0 %2176  ;;  %v6829_v28 = vld [vmem:[#allocation2 + $0x98] sm:$0xf] }
 0x446   : > { %v2350_v50 = vsel %vm2266_vm5, %v2129_v41, %v2225_v46  ;;  %v2278_v58 = vsel %vm2266_vm5, %v2081_v11, %v2177_v42  ;;  %v6831_v46 = vld [vmem:[#allocation2 + $0x9c] sm:$0xf] }
 0x447   : > { %v4491_v44 = vcombine.low %v2350_v50, %v2350_v50  ;;  %v4492_v61 = vcombine.high %v2350_v50, %v2350_v50  ;;  %v4443_v21 = vcombine.low %v2278_v58, %v2278_v58  ;;  %v4444_v40 = vcombine.high %v2278_v58, %v2278_v58  ;;  %2158 = vrot.lane.b32.xlu1 %v4431_v38, %s5321_s8 }
 0x448   : > { %2110 = vrot.lane.b32.xlu0 %v4407_v62, %s5321_s8  ;;  %v4432_v58 = vcombine.low %v6821_v20, %v6823_v63 }
 0x449   : > { %v2801_v5 = vmax.bf16 %v4491_v44, %v6516_v26  ;;  %v2802_v60 = vmax.bf16 %v4492_v61, %v6518_v3  ;;  %v2753_v32 = vmax.bf16 %v4443_v21, %v6520_v24  ;;  %v2754_v41 = vmax.bf16 %v4444_v40, %v6522_v53  ;;  %v2131_v11 = vpop.permute.xlu1 %2130  ;;  %v2083_v25 = vpop.permute.xlu0 %2082 }
 0x44a   : > { %v4408_v26 = vcombine.low %v6829_v28, %v6831_v46 }
 0x44b   : > { %2254 = vrot.lane.b32.xlu1 %v4431_v38, %s5320_s7  ;;  %v4536_v42 = vcombine.low %v2753_v32, %v2754_v41  ;;  %v4560_v50 = vcombine.low %v2801_v5, %v2802_v60  ;;  %v6847_v5 = vld [vmem:[#allocation2 + $0x164] sm:$0xf] }
 0x44c   : > { %2206 = vrot.lane.b32.xlu0 %v4407_v62, %s5320_s7  ;;  %v6845_v62 = vld [vmem:[#allocation2 + $0x160] sm:$0xf] }
 0x44d   : > { %v2227_v3 = vpop.permute.xlu1 %2226  ;;  %4941 = vmatmul.mubr.msk.bf16.gmra.mxu0 %vm537_vm10, %v4536_v42  ;;  %4989 = vmatmul.mubr.msk.bf16.gmra.mxu1 %vm537_vm10, %v4560_v50  ;;  %v2179_v24 = vpop.permute.xlu0 %2178  ;;  %v6853_v50 = vld [vmem:[#allocation2 + $0xa0] sm:$0xf] }
 0x44e   : > { %v2353_v53 = vsel %vm2266_vm5, %v2131_v11, %v2227_v3  ;;  %v2281_v38 = vsel %vm2266_vm5, %v2083_v25, %v2179_v24  ;;  %v6855_v3 = vld [vmem:[#allocation2 + $0xa4] sm:$0xf] }
 0x44f   : > { %v4493_v44 = vcombine.low %v2353_v53, %v2353_v53  ;;  %v4494_v61 = vcombine.high %v2353_v53, %v2353_v53  ;;  %v4445_v21 = vcombine.low %v2281_v38, %v2281_v38  ;;  %v4446_v40 = vcombine.high %v2281_v38, %v2281_v38  ;;  %2160 = vrot.lane.b32.xlu1 %v4432_v58, %s5321_s8 }
 0x450   : > { %2112 = vrot.lane.b32.xlu0 %v4408_v26, %s5321_s8  ;;  %v4433_v38 = vcombine.low %v6845_v62, %v6847_v5 }
 0x451   : > { %v2803_v60 = vmax.bf16 %v4493_v44, %v6543_v43  ;;  %v2804_v32 = vmax.bf16 %v4494_v61, %v6545_v17  ;;  %v2755_v41 = vmax.bf16 %v4445_v21, %v6547_v30  ;;  %v2756_v11 = vmax.bf16 %v4446_v40, %v6549_v49  ;;  %v2133_v25 = vpop.permute.xlu1 %2132  ;;  %v2085_v42 = vpop.permute.xlu0 %2084 }
 0x452   : > { %v4409_v43 = vcombine.low %v6853_v50, %v6855_v3 }
 0x453   : > { %2256 = vrot.lane.b32.xlu1 %v4432_v58, %s5320_s7  ;;  %v4537_v24 = vcombine.low %v2755_v41, %v2756_v11  ;;  %v4561_v53 = vcombine.low %v2803_v60, %v2804_v32  ;;  %v6871_v60 = vld [vmem:[#allocation2 + $0x16c] sm:$0xf] }
 0x454   : > { %2208 = vrot.lane.b32.xlu0 %v4408_v26, %s5320_s7  ;;  %v6869_v26 = vld [vmem:[#allocation2 + $0x168] sm:$0xf] }
 0x455   : > { %v2229_v17 = vpop.permute.xlu1 %2228  ;;  %4944 = vmatprep.mubr.msk.bf16.mxu0 %vm537_vm10, %v4537_v24  ;;  %4992 = vmatprep.mubr.msk.bf16.mxu1 %vm537_vm10, %v4561_v53  ;;  %v2181_v30 = vpop.permute.xlu0 %2180  ;;  %v6877_v53 = vld [vmem:[#allocation2 + $0xa8] sm:$0xf] }
 0x456   : > { %v2356_v49 = vsel %vm2266_vm5, %v2133_v25, %v2229_v17  ;;  %v2284_v58 = vsel %vm2266_vm5, %v2085_v42, %v2181_v30  ;;  %v6879_v17 = vld [vmem:[#allocation2 + $0xac] sm:$0xf] }
 0x457   : > { %v4495_v44 = vcombine.low %v2356_v49, %v2356_v49  ;;  %v4496_v61 = vcombine.high %v2356_v49, %v2356_v49  ;;  %v4447_v21 = vcombine.low %v2284_v58, %v2284_v58  ;;  %v4448_v40 = vcombine.high %v2284_v58, %v2284_v58  ;;  %2162 = vrot.lane.b32.xlu1 %v4433_v38, %s5321_s8 }
 0x458   : > { %2114 = vrot.lane.b32.xlu0 %v4409_v43, %s5321_s8  ;;  %v4434_v58 = vcombine.low %v6869_v26, %v6871_v60 }
 0x459   : > { %v2805_v32 = vmax.bf16 %v4495_v44, %v6565_v59  ;;  %v2806_v41 = vmax.bf16 %v4496_v61, %v6567_v9  ;;  %v2757_v11 = vmax.bf16 %v4447_v21, %v6569_v52  ;;  %v2758_v25 = vmax.bf16 %v4448_v40, %v6571_v22  ;;  %v2135_v42 = vpop.permute.xlu1 %2134  ;;  %v2087_v24 = vpop.permute.xlu0 %2086 }
 0x45a   : > { %v4410_v59 = vcombine.low %v6877_v53, %v6879_v17 }
 0x45b   : > { %2258 = vrot.lane.b32.xlu1 %v4433_v38, %s5320_s7  ;;  %v4538_v30 = vcombine.low %v2757_v11, %v2758_v25  ;;  %v4562_v49 = vcombine.low %v2805_v32, %v2806_v41  ;;  %v6895_v32 = vld [vmem:[#allocation2 + $0x174] sm:$0xf] }
 0x45c   : > { %2210 = vrot.lane.b32.xlu0 %v4409_v43, %s5320_s7  ;;  %v6893_v43 = vld [vmem:[#allocation2 + $0x170] sm:$0xf] }
 0x45d   : > { %v2231_v9 = vpop.permute.xlu1 %2230  ;;  %4945 = vmatmul.mubr.msk.bf16.gmra.mxu0 %vm537_vm10, %v4538_v30  ;;  %4993 = vmatmul.mubr.msk.bf16.gmra.mxu1 %vm537_vm10, %v4562_v49  ;;  %v2183_v52 = vpop.permute.xlu0 %2182  ;;  %v6901_v49 = vld [vmem:[#allocation2 + $0xb0] sm:$0xf] }
 0x45e   : > { %v2359_v22 = vsel %vm2266_vm5, %v2135_v42, %v2231_v9  ;;  %v2287_v38 = vsel %vm2266_vm5, %v2087_v24, %v2183_v52  ;;  %v6903_v9 = vld [vmem:[#allocation2 + $0xb4] sm:$0xf] }
 0x45f   : > { %v4497_v44 = vcombine.low %v2359_v22, %v2359_v22  ;;  %v4498_v61 = vcombine.high %v2359_v22, %v2359_v22  ;;  %v4449_v21 = vcombine.low %v2287_v38, %v2287_v38  ;;  %v4450_v40 = vcombine.high %v2287_v38, %v2287_v38  ;;  %2164 = vrot.lane.b32.xlu1 %v4434_v58, %s5321_s8 }
 0x460   : > { %2116 = vrot.lane.b32.xlu0 %v4410_v59, %s5321_s8  ;;  %v4435_v38 = vcombine.low %v6893_v43, %v6895_v32 }
 0x461   : > { %v2807_v41 = vmax.bf16 %v4497_v44, %v6587_v29  ;;  %v2808_v11 = vmax.bf16 %v4498_v61, %v6589_v51  ;;  %v2759_v25 = vmax.bf16 %v4449_v21, %v6591_v54  ;;  %v2760_v42 = vmax.bf16 %v4450_v40, %v6593_v7  ;;  %v2137_v24 = vpop.permute.xlu1 %2136  ;;  %v2089_v30 = vpop.permute.xlu0 %2088 }
 0x462   : > { %v4411_v29 = vcombine.low %v6901_v49, %v6903_v9 }
 0x463   : > { %2260 = vrot.lane.b32.xlu1 %v4434_v58, %s5320_s7  ;;  %v4539_v52 = vcombine.low %v2759_v25, %v2760_v42  ;;  %v4563_v22 = vcombine.low %v2807_v41, %v2808_v11  ;;  %v6919_v41 = vld [vmem:[#allocation2 + $0x17c] sm:$0xf] }
 0x464   : > { %2212 = vrot.lane.b32.xlu0 %v4410_v59, %s5320_s7  ;;  %v6917_v59 = vld [vmem:[#allocation2 + $0x178] sm:$0xf] }
 0x465   : > { %v2233_v51 = vpop.permute.xlu1 %2232  ;;  %4948 = vmatprep.mubr.msk.bf16.mxu0 %vm537_vm10, %v4539_v52  ;;  %4996 = vmatprep.mubr.msk.bf16.mxu1 %vm537_vm10, %v4563_v22  ;;  %v2185_v54 = vpop.permute.xlu0 %2184  ;;  %v6925_v22 = vld [vmem:[#allocation2 + $0xb8] sm:$0xf] }
 0x466   : > { %v2362_v7 = vsel %vm2266_vm5, %v2137_v24, %v2233_v51  ;;  %v2290_v58 = vsel %vm2266_vm5, %v2089_v30, %v2185_v54  ;;  %v6927_v51 = vld [vmem:[#allocation2 + $0xbc] sm:$0xf] }
 0x467   : > { %v4499_v44 = vcombine.low %v2362_v7, %v2362_v7  ;;  %v4500_v61 = vcombine.high %v2362_v7, %v2362_v7  ;;  %v4451_v21 = vcombine.low %v2290_v58, %v2290_v58  ;;  %v4452_v40 = vcombine.high %v2290_v58, %v2290_v58  ;;  %2166 = vrot.lane.b32.xlu1 %v4435_v38, %s5321_s8 }
 0x468   : > { %2118 = vrot.lane.b32.xlu0 %v4411_v29, %s5321_s8  ;;  %v4436_v58 = vcombine.low %v6917_v59, %v6919_v41 }
 0x469   : > { %v2809_v11 = vmax.bf16 %v4499_v44, %v6603_v2  ;;  %v2810_v25 = vmax.bf16 %v4500_v61, %v6605_v55  ;;  %v2761_v42 = vmax.bf16 %v4451_v21, %v6607_v19  ;;  %v2762_v24 = vmax.bf16 %v4452_v40, %v6609_v13  ;;  %v2139_v30 = vpop.permute.xlu1 %2138  ;;  %v2091_v52 = vpop.permute.xlu0 %2090 }
 0x46a   : > { %v4412_v2 = vcombine.low %v6925_v22, %v6927_v51 }
 0x46b   : > { %2262 = vrot.lane.b32.xlu1 %v4435_v38, %s5320_s7  ;;  %v4540_v54 = vcombine.low %v2761_v42, %v2762_v24  ;;  %v4564_v7 = vcombine.low %v2809_v11, %v2810_v25 }
 0x46c   : > { %2214 = vrot.lane.b32.xlu0 %v4411_v29, %s5320_s7 }
 0x46d   : > { %v2235_v55 = vpop.permute.xlu1 %2234  ;;  %4949 = vmatmul.mubr.msk.bf16.gmra.mxu0 %vm537_vm10, %v4540_v54  ;;  %4997 = vmatmul.mubr.msk.bf16.gmra.mxu1 %vm537_vm10, %v4564_v7  ;;  %v2187_v19 = vpop.permute.xlu0 %2186 }
 0x46e   : > { %v2365_v13 = vsel %vm2266_vm5, %v2139_v30, %v2235_v55  ;;  %v2293_v38 = vsel %vm2266_vm5, %v2091_v52, %v2187_v19 }
 0x46f   : > { %v4501_v44 = vcombine.low %v2365_v13, %v2365_v13  ;;  %v4502_v61 = vcombine.high %v2365_v13, %v2365_v13  ;;  %v4453_v21 = vcombine.low %v2293_v38, %v2293_v38  ;;  %v4454_v40 = vcombine.high %v2293_v38, %v2293_v38  ;;  %2168 = vrot.lane.b32.xlu1 %v4436_v58, %s5321_s8 }
 0x470   : > { %2120 = vrot.lane.b32.xlu0 %v4412_v2, %s5321_s8 }
 0x471   : > { %v2811_v29 = vmax.bf16 %v4501_v44, %v6619_v14  ;;  %v2812_v11 = vmax.bf16 %v4502_v61, %v6621_v1  ;;  %v2763_v25 = vmax.bf16 %v4453_v21, %v6623_v33  ;;  %v2764_v42 = vmax.bf16 %v4454_v40, %v6625_v45  ;;  %v2141_v24 = vpop.permute.xlu1 %2140  ;;  %v2093_v30 = vpop.permute.xlu0 %2092 }
 0x473   : > { %2264 = vrot.lane.b32.xlu1 %v4436_v58, %s5320_s7  ;;  %v4541_v52 = vcombine.low %v2763_v25, %v2764_v42  ;;  %v4565_v54 = vcombine.low %v2811_v29, %v2812_v11 }
 0x474   : > { %2216 = vrot.lane.b32.xlu0 %v4412_v2, %s5320_s7 }
 0x475   : > { %v2237_v7 = vpop.permute.xlu1 %2236  ;;  %4952 = vmatprep.mubr.msk.bf16.mxu0 %vm537_vm10, %v4541_v52  ;;  %5000 = vmatprep.mubr.msk.bf16.mxu1 %vm537_vm10, %v4565_v54  ;;  %v2189_v14 = vpop.permute.xlu0 %2188 }
 0x476   : > { %v2368_v1 = vsel %vm2266_vm5, %v2141_v24, %v2237_v7  ;;  %v2296_v33 = vsel %vm2266_vm5, %v2093_v30, %v2189_v14 }
 0x477   : > { %v4503_v55 = vcombine.low %v2368_v1, %v2368_v1  ;;  %v4504_v45 = vcombine.high %v2368_v1, %v2368_v1  ;;  %v4455_v19 = vcombine.low %v2296_v33, %v2296_v33  ;;  %v4456_v13 = vcombine.high %v2296_v33, %v2296_v33 }
 0x479   : > { %v2813_v58 = vmax.bf16 %v4503_v55, %v6635_v18  ;;  %v2814_v38 = vmax.bf16 %v4504_v45, %v6637_v0  ;;  %v2765_v2 = vmax.bf16 %v4455_v19, %v6639_v37  ;;  %v2766_v44 = vmax.bf16 %v4456_v13, %v6641_v10  ;;  %v2143_v61 = vpop.permute.xlu1 %2142  ;;  %v2095_v21 = vpop.permute.xlu0 %2094 }
 0x47b   : > { %v4542_v40 = vcombine.low %v2765_v2, %v2766_v44  ;;  %v4566_v29 = vcombine.low %v2813_v58, %v2814_v38  ;;  %v7440_v44 = vld [vmem:[#allocation6_spill] sm:$0xff] }
 0x47d   : > { %v2239_v11 = vpop.permute.xlu1 %2238  ;;  %4953 = vmatmul.mubr.msk.bf16.gmra.mxu0 %vm537_vm10, %v4542_v40  ;;  %5001 = vmatmul.mubr.msk.bf16.gmra.mxu1 %vm537_vm10, %v4566_v29  ;;  %v2191_v25 = vpop.permute.xlu0 %2190 }
 0x47e   : > { %v2371_v42 = vsel %vm2266_vm5, %v2143_v61, %v2239_v11  ;;  %v2299_v18 = vsel %vm2266_vm5, %v2095_v21, %v2191_v25  ;;  %v7441_v21 = vld [vmem:[#allocation7_spill] sm:$0xff] }
 0x47f   : > { %v4505_v24 = vcombine.low %v2371_v42, %v2371_v42  ;;  %v4506_v0 = vcombine.high %v2371_v42, %v2371_v42  ;;  %v4457_v30 = vcombine.low %v2299_v18, %v2299_v18  ;;  %v4458_v37 = vcombine.high %v2299_v18, %v2299_v18 }
 0x481   : > { %v2815_v10 = vmax.bf16 %v4505_v24, %v6651_v15  ;;  %v2816_v52 = vmax.bf16 %v4506_v0, %v6653_v27  ;;  %v2767_v54 = vmax.bf16 %v4457_v30, %v6655_v36  ;;  %v2768_v7 = vmax.bf16 %v4458_v37, %v6657_v48  ;;  %v2145_v14 = vpop.permute.xlu1 %2144  ;;  %v2097_v1 = vpop.permute.xlu0 %2096 }
 0x483   : > { %v4543_v33 = vcombine.low %v2767_v54, %v2768_v7  ;;  %v4567_v55 = vcombine.low %v2815_v10, %v2816_v52  ;;  %v7442_v52 = vld [vmem:[#allocation8_spill] sm:$0xff]  ;;  %v7443_v7 = vld [vmem:[#allocation9_spill] sm:$0xff] }
 0x485   : > { %v2241_v45 = vpop.permute.xlu1 %2240  ;;  %4956 = vmatprep.mubr.msk.bf16.mxu0 %vm537_vm10, %v4543_v33  ;;  %5004 = vmatprep.mubr.msk.bf16.mxu1 %vm537_vm10, %v4567_v55  ;;  %v2193_v19 = vpop.permute.xlu0 %2192  ;;  %v7445_v55 = vld [vmem:[#allocation11_spill] sm:$0xff] }
 0x486   : > { %v2374_v13 = vsel %vm2266_vm5, %v2145_v14, %v2241_v45  ;;  %v2302_v15 = vsel %vm2266_vm5, %v2097_v1, %v2193_v19  ;;  %v7444_v1 = vld [vmem:[#allocation10_spill] sm:$0xff] }
 0x487   : > { %v4507_v58 = vcombine.low %v2374_v13, %v2374_v13  ;;  %v4508_v27 = vcombine.high %v2374_v13, %v2374_v13  ;;  %v4459_v38 = vcombine.low %v2302_v15, %v2302_v15  ;;  %v4460_v36 = vcombine.high %v2302_v15, %v2302_v15 }
 0x489   : > { %v2817_v48 = vmax.bf16 %v4507_v58, %v6667_v12  ;;  %v2818_v2 = vmax.bf16 %v4508_v27, %v6669_v56  ;;  %v2769_v61 = vmax.bf16 %v4459_v38, %v7440_v44  ;;  %v2770_v40 = vmax.bf16 %v4460_v36, %v7441_v21  ;;  %v2147_v29 = vpop.permute.xlu1 %2146  ;;  %v2099_v11 = vpop.permute.xlu0 %2098 }
 0x48b   : > { %v4544_v25 = vcombine.low %v2769_v61, %v2770_v40  ;;  %v4568_v42 = vcombine.low %v2817_v48, %v2818_v2  ;;  %v7446_v40 = vld [vmem:[#allocation12_spill] sm:$0xff] }
 0x48d   : > { %v2243_v18 = vpop.permute.xlu1 %2242  ;;  %4957 = vmatmul.mubr.msk.bf16.gmra.mxu0 %vm537_vm10, %v4544_v25  ;;  %5005 = vmatmul.mubr.msk.bf16.gmra.mxu1 %vm537_vm10, %v4568_v42  ;;  %v2195_v24 = vpop.permute.xlu0 %2194  ;;  %v7448_v42 = vld [vmem:[#allocation14_spill] sm:$0xff] }
 0x48e   : > { %v2377_v0 = vsel %vm2266_vm5, %v2147_v29, %v2243_v18  ;;  %v2305_v12 = vsel %vm2266_vm5, %v2099_v11, %v2195_v24  ;;  %v7447_v11 = vld [vmem:[#allocation13_spill] sm:$0xff]  ;;  %v7449_v24 = vld [vmem:[#allocation15_spill] sm:$0xff] }
 0x48f   : > { %v4509_v30 = vcombine.low %v2377_v0, %v2377_v0  ;;  %v4510_v56 = vcombine.high %v2377_v0, %v2377_v0  ;;  %v4461_v37 = vcombine.low %v2305_v12, %v2305_v12  ;;  %v4462_v10 = vcombine.high %v2305_v12, %v2305_v12 }
 0x491   : > { %v2819_v54 = vmax.bf16 %v4509_v30, %v7442_v52  ;;  %v2820_v14 = vmax.bf16 %v4510_v56, %v7443_v7  ;;  %v2771_v33 = vmax.bf16 %v4461_v37, %v7444_v1  ;;  %v2772_v45 = vmax.bf16 %v4462_v10, %v7445_v55  ;;  %v2149_v19 = vpop.permute.xlu1 %2148  ;;  %v2101_v13 = vpop.permute.xlu0 %2100 }
 0x493   : > { %v4545_v15 = vcombine.low %v2771_v33, %v2772_v45  ;;  %v4569_v58 = vcombine.low %v2819_v54, %v2820_v14  ;;  %v7450_v45 = vld [vmem:[#allocation16_spill] sm:$0xff] }
 0x495   : > { %v2245_v27 = vpop.permute.xlu1 %2244  ;;  %4960 = vmatprep.mubr.msk.bf16.mxu0 %vm537_vm10, %v4545_v15  ;;  %5008 = vmatprep.mubr.msk.bf16.mxu1 %vm537_vm10, %v4569_v58  ;;  %v2197_v38 = vpop.permute.xlu0 %2196  ;;  %v7452_v58 = vld [vmem:[#allocation18_spill] sm:$0xff] }
 0x496   : > { %v2380_v36 = vsel %vm2266_vm5, %v2149_v19, %v2245_v27  ;;  %v2308_v48 = vsel %vm2266_vm5, %v2101_v13, %v2197_v38  ;;  %v7451_v13 = vld [vmem:[#allocation17_spill] sm:$0xff]  ;;  %v7453_v38 = vld [vmem:[#allocation19_spill] sm:$0xff] }
 0x497   : > { %v4511_v2 = vcombine.low %v2380_v36, %v2380_v36  ;;  %v4512_v44 = vcombine.high %v2380_v36, %v2380_v36  ;;  %v4463_v61 = vcombine.low %v2308_v48, %v2308_v48  ;;  %v4464_v21 = vcombine.high %v2308_v48, %v2308_v48 }
 0x499   : > { %v2821_v29 = vmax.bf16 %v4511_v2, %v7446_v40  ;;  %v2822_v25 = vmax.bf16 %v4512_v44, %v7447_v11  ;;  %v2773_v18 = vmax.bf16 %v4463_v61, %v7448_v42  ;;  %v2774_v0 = vmax.bf16 %v4464_v21, %v7449_v24  ;;  %v2151_v12 = vpop.permute.xlu1 %2150  ;;  %v2103_v30 = vpop.permute.xlu0 %2102 }
 0x49b   : > { %v4546_v56 = vcombine.low %v2773_v18, %v2774_v0  ;;  %v4570_v37 = vcombine.low %v2821_v29, %v2822_v25 }
 0x49d   : > { %v2247_v10 = vpop.permute.xlu1 %2246  ;;  %4961 = vmatmul.mubr.msk.bf16.gmra.mxu0 %vm537_vm10, %v4546_v56  ;;  %5009 = vmatmul.mubr.msk.bf16.gmra.mxu1 %vm537_vm10, %v4570_v37  ;;  %v2199_v52 = vpop.permute.xlu0 %2198  ;;  %v7455_v37 = vld [vmem:[#allocation21_spill] sm:$0xff] }
 0x49e   : > { %v2383_v54 = vsel %vm2266_vm5, %v2151_v12, %v2247_v10  ;;  %v2311_v7 = vsel %vm2266_vm5, %v2103_v30, %v2199_v52  ;;  %v7454_v30 = vld [vmem:[#allocation20_spill] sm:$0xff] }
 0x49f   : > { %v4513_v14 = vcombine.low %v2383_v54, %v2383_v54  ;;  %v4514_v1 = vcombine.high %v2383_v54, %v2383_v54  ;;  %v4465_v33 = vcombine.low %v2311_v7, %v2311_v7  ;;  %v4466_v55 = vcombine.high %v2311_v7, %v2311_v7 }
 0x4a1   : > { %v2823_v19 = vmax.bf16 %v4513_v14, %v7450_v45  ;;  %v2824_v15 = vmax.bf16 %v4514_v1, %v7451_v13  ;;  %v2775_v27 = vmax.bf16 %v4465_v33, %v7452_v58  ;;  %v2776_v36 = vmax.bf16 %v4466_v55, %v7453_v38  ;;  %v2153_v48 = vpop.permute.xlu1 %2152  ;;  %v2105_v2 = vpop.permute.xlu0 %2104  ;;  %v7456_v58 = vld [vmem:[#allocation22_spill] sm:$0xff] }
 0x4a3   : > { %v4547_v44 = vcombine.low %v2775_v27, %v2776_v36  ;;  %v4571_v61 = vcombine.low %v2823_v19, %v2824_v15  ;;  %v7457_v36 = vld [vmem:[#allocation23_spill] sm:$0xff] }
 0x4a5   : > { %v2249_v21 = vpop.permute.xlu1 %2248  ;;  %4964 = vmatprep.mubr.msk.bf16.mxu0 %vm537_vm10, %v4547_v44  ;;  %5012 = vmatprep.mubr.msk.bf16.mxu1 %vm537_vm10, %v4571_v61  ;;  %v2201_v40 = vpop.permute.xlu0 %2200 }
 0x4a6   : > { %v2386_v29 = vsel %vm2266_vm5, %v2153_v48, %v2249_v21  ;;  %v2314_v11 = vsel %vm2266_vm5, %v2105_v2, %v2201_v40  ;;  %v7458_v2 = vld [vmem:[#allocation24_spill] sm:$0xff] }
 0x4a7   : > { %v4515_v25 = vcombine.low %v2386_v29, %v2386_v29  ;;  %v4516_v42 = vcombine.high %v2386_v29, %v2386_v29  ;;  %v4467_v18 = vcombine.low %v2314_v11, %v2314_v11  ;;  %v4468_v24 = vcombine.high %v2314_v11, %v2314_v11 }
 0x4a9   : > { %v2825_v0 = vmax.bf16 %v4515_v25, %v6731_v57  ;;  %v2826_v12 = vmax.bf16 %v4516_v42, %v6733_v47  ;;  %v2777_v56 = vmax.bf16 %v4467_v18, %v7454_v30  ;;  %v2778_v10 = vmax.bf16 %v4468_v24, %v7455_v37  ;;  %v2155_v52 = vpop.permute.xlu1 %2154 }
 0x4aa   : > { %v2107_v54 = vpop.permute.xlu0 %2106 }
 0x4ab   : > { %v4548_v7 = vcombine.low %v2777_v56, %v2778_v10  ;;  %v4572_v14 = vcombine.low %v2825_v0, %v2826_v12 }
 0x4ad   : > { %v2251_v1 = vpop.permute.xlu1 %2250  ;;  %4965 = vmatmul.mubr.msk.bf16.gmra.mxu0 %vm537_vm10, %v4548_v7  ;;  %5013 = vmatmul.mubr.msk.bf16.gmra.mxu1 %vm537_vm10, %v4572_v14 }
 0x4ae   : > { %v2389_v33 = vsel %vm2266_vm5, %v2155_v52, %v2251_v1  ;;  %v2203_v55 = vpop.permute.xlu0 %2202 }
 0x4af   : > { %v4517_v45 = vcombine.low %v2389_v33, %v2389_v33  ;;  %v4518_v57 = vcombine.high %v2389_v33, %v2389_v33  ;;  %v2317_v47 = vsel %vm2266_vm5, %v2107_v54, %v2203_v55 }
 0x4b0   : > { %v4469_v19 = vcombine.low %v2317_v47, %v2317_v47  ;;  %v4470_v13 = vcombine.high %v2317_v47, %v2317_v47 }
 0x4b1   : > { %v2827_v15 = vmax.bf16 %v4517_v45, %v6751_v39  ;;  %v2828_v27 = vmax.bf16 %v4518_v57, %v7456_v58  ;;  %v2157_v38 = vpop.permute.xlu1 %2156 }
 0x4b2   : > { %v2779_v48 = vmax.bf16 %v4469_v19, %v7457_v36  ;;  %v2780_v44 = vmax.bf16 %v4470_v13, %v7458_v2  ;;  %v2109_v61 = vpop.permute.xlu0 %2108 }
 0x4b3   : > { %v4573_v21 = vcombine.low %v2827_v15, %v2828_v27 }
 0x4b4   : > { %v4549_v40 = vcombine.low %v2779_v48, %v2780_v44 }
 0x4b5   : > { %v2253_v29 = vpop.permute.xlu1 %2252  ;;  %5016 = vmatprep.mubr.msk.bf16.mxu1 %vm537_vm10, %v4573_v21 }
 0x4b6   : > { %v2392_v11 = vsel %vm2266_vm5, %v2157_v38, %v2253_v29  ;;  %4968 = vmatprep.mubr.msk.bf16.mxu0 %vm537_vm10, %v4549_v40  ;;  %v2205_v25 = vpop.permute.xlu0 %2204 }
 0x4b7   : > { %v4519_v42 = vcombine.low %v2392_v11, %v2392_v11  ;;  %v4520_v39 = vcombine.high %v2392_v11, %v2392_v11  ;;  %v2320_v18 = vsel %vm2266_vm5, %v2109_v61, %v2205_v25 }
 0x4b8   : > { %v4471_v24 = vcombine.low %v2320_v18, %v2320_v18  ;;  %v4472_v0 = vcombine.high %v2320_v18, %v2320_v18 }
 0x4b9   : > { %v2829_v12 = vmax.bf16 %v4519_v42, %v6773_v8  ;;  %v2830_v30 = vmax.bf16 %v4520_v39, %v6775_v4  ;;  %v2159_v56 = vpop.permute.xlu1 %2158 }
 0x4ba   : > { %v2781_v37 = vmax.bf16 %v4471_v24, %v6781_v34  ;;  %v2782_v10 = vmax.bf16 %v4472_v0, %v6783_v35  ;;  %v2111_v52 = vpop.permute.xlu0 %2110 }
 0x4bb   : > { %v4574_v54 = vcombine.low %v2829_v12, %v2830_v30 }
 0x4bc   : > { %v4550_v7 = vcombine.low %v2781_v37, %v2782_v10 }
 0x4bd   : > { %v2255_v14 = vpop.permute.xlu1 %2254  ;;  %5017 = vmatmul.mubr.msk.bf16.gmra.mxu1 %vm537_vm10, %v4574_v54 }
 0x4be   : > { %v2395_v1 = vsel %vm2266_vm5, %v2159_v56, %v2255_v14  ;;  %4969 = vmatmul.mubr.msk.bf16.gmra.mxu0 %vm537_vm10, %v4550_v7  ;;  %v2207_v33 = vpop.permute.xlu0 %2206 }
 0x4bf   : > { %v4521_v55 = vcombine.low %v2395_v1, %v2395_v1  ;;  %v4522_v8 = vcombine.high %v2395_v1, %v2395_v1  ;;  %v2323_v4 = vsel %vm2266_vm5, %v2111_v52, %v2207_v33 }
 0x4c0   : > { %v4473_v45 = vcombine.low %v2323_v4, %v2323_v4  ;;  %v4474_v57 = vcombine.high %v2323_v4, %v2323_v4 }
 0x4c1   : > { %v2831_v34 = vmax.bf16 %v4521_v55, %v6797_v31  ;;  %v2832_v35 = vmax.bf16 %v4522_v8, %v6799_v6  ;;  %v2161_v47 = vpop.permute.xlu1 %2160 }
 0x4c2   : > { %v2783_v19 = vmax.bf16 %v4473_v45, %v6805_v16  ;;  %v2784_v13 = vmax.bf16 %v4474_v57, %v6807_v23  ;;  %v2113_v15 = vpop.permute.xlu0 %2112 }
 0x4c3   : > { %v4575_v58 = vcombine.low %v2831_v34, %v2832_v35 }
 0x4c4   : > { %v4551_v27 = vcombine.low %v2783_v19, %v2784_v13 }
 0x4c5   : > { %v2257_v38 = vpop.permute.xlu1 %2256  ;;  %5020 = vmatprep.mubr.msk.bf16.mxu1 %vm537_vm10, %v4575_v58 }
 0x4c6   : > { %v2398_v36 = vsel %vm2266_vm5, %v2161_v47, %v2257_v38  ;;  %4972 = vmatprep.mubr.msk.bf16.mxu0 %vm537_vm10, %v4551_v27  ;;  %v2209_v48 = vpop.permute.xlu0 %2208 }
 0x4c7   : > { %v4523_v2 = vcombine.low %v2398_v36, %v2398_v36  ;;  %v4524_v31 = vcombine.high %v2398_v36, %v2398_v36  ;;  %v2326_v6 = vsel %vm2266_vm5, %v2113_v15, %v2209_v48 }
 0x4c8   : > { %v4475_v44 = vcombine.low %v2326_v6, %v2326_v6  ;;  %v4476_v61 = vcombine.high %v2326_v6, %v2326_v6 }
 0x4c9   : > { %v2833_v16 = vmax.bf16 %v4523_v2, %v6821_v20  ;;  %v2834_v23 = vmax.bf16 %v4524_v31, %v6823_v63  ;;  %v2163_v21 = vpop.permute.xlu1 %2162 }
 0x4ca   : > { %v2785_v40 = vmax.bf16 %v4475_v44, %v6829_v28  ;;  %v2786_v29 = vmax.bf16 %v4476_v61, %v6831_v46  ;;  %v2115_v11 = vpop.permute.xlu0 %2114 }
 0x4cb   : > { %v4576_v25 = vcombine.low %v2833_v16, %v2834_v23 }
 0x4cc   : > { %v4552_v42 = vcombine.low %v2785_v40, %v2786_v29 }
 0x4cd   : > { %v2259_v39 = vpop.permute.xlu1 %2258  ;;  %5021 = vmatmul.mubr.msk.bf16.gmra.mxu1 %vm537_vm10, %v4576_v25 }
 0x4ce   : > { %v2401_v18 = vsel %vm2266_vm5, %v2163_v21, %v2259_v39  ;;  %4973 = vmatmul.mubr.msk.bf16.gmra.mxu0 %vm537_vm10, %v4552_v42  ;;  %v2211_v24 = vpop.permute.xlu0 %2210 }
 0x4cf   : > { %v4525_v0 = vcombine.low %v2401_v18, %v2401_v18  ;;  %v4526_v20 = vcombine.high %v2401_v18, %v2401_v18  ;;  %v2329_v63 = vsel %vm2266_vm5, %v2115_v11, %v2211_v24 }
 0x4d0   : > { %v4477_v12 = vcombine.low %v2329_v63, %v2329_v63  ;;  %v4478_v30 = vcombine.high %v2329_v63, %v2329_v63 }
 0x4d1   : > { %v2835_v28 = vmax.bf16 %v4525_v0, %v6845_v62  ;;  %v2836_v46 = vmax.bf16 %v4526_v20, %v6847_v5  ;;  %v2165_v56 = vpop.permute.xlu1 %2164 }
 0x4d2   : > { %v2787_v37 = vmax.bf16 %v4477_v12, %v6853_v50  ;;  %v2788_v10 = vmax.bf16 %v4478_v30, %v6855_v3  ;;  %v2117_v52 = vpop.permute.xlu0 %2116 }
 0x4d3   : > { %v4577_v54 = vcombine.low %v2835_v28, %v2836_v46 }
 0x4d4   : > { %v4553_v7 = vcombine.low %v2787_v37, %v2788_v10 }
 0x4d5   : > { %v2261_v14 = vpop.permute.xlu1 %2260  ;;  %5024 = vmatprep.mubr.msk.bf16.mxu1 %vm537_vm10, %v4577_v54 }
 0x4d6   : > { %v2404_v1 = vsel %vm2266_vm5, %v2165_v56, %v2261_v14  ;;  %4976 = vmatprep.mubr.msk.bf16.mxu0 %vm537_vm10, %v4553_v7  ;;  %v2213_v33 = vpop.permute.xlu0 %2212 }
 0x4d7   : > { %v4527_v55 = vcombine.low %v2404_v1, %v2404_v1  ;;  %v4528_v62 = vcombine.high %v2404_v1, %v2404_v1  ;;  %v2332_v5 = vsel %vm2266_vm5, %v2117_v52, %v2213_v33 }
 0x4d8   : > { %v4479_v8 = vcombine.low %v2332_v5, %v2332_v5  ;;  %v4480_v4 = vcombine.high %v2332_v5, %v2332_v5 }
 0x4d9   : > { %v2837_v50 = vmax.bf16 %v4527_v55, %v6869_v26  ;;  %v2838_v3 = vmax.bf16 %v4528_v62, %v6871_v60  ;;  %v2167_v45 = vpop.permute.xlu1 %2166 }
 0x4da   : > { %v2789_v57 = vmax.bf16 %v4479_v8, %v6877_v53  ;;  %v2790_v34 = vmax.bf16 %v4480_v4, %v6879_v17  ;;  %v2119_v35 = vpop.permute.xlu0 %2118 }
 0x4db   : > { %v4578_v47 = vcombine.low %v2837_v50, %v2838_v3 }
 0x4dc   : > { %v4554_v19 = vcombine.low %v2789_v57, %v2790_v34 }
 0x4dd   : > { %v2263_v13 = vpop.permute.xlu1 %2262  ;;  %5025 = vmatmul.mubr.msk.bf16.gmra.mxu1 %vm537_vm10, %v4578_v47 }
 0x4de   : > { %v2407_v15 = vsel %vm2266_vm5, %v2167_v45, %v2263_v13  ;;  %4977 = vmatmul.mubr.msk.bf16.gmra.mxu0 %vm537_vm10, %v4554_v19  ;;  %v2215_v58 = vpop.permute.xlu0 %2214 }
 0x4df   : > { %v4529_v27 = vcombine.low %v2407_v15, %v2407_v15  ;;  %v4530_v26 = vcombine.high %v2407_v15, %v2407_v15  ;;  %v2335_v60 = vsel %vm2266_vm5, %v2119_v35, %v2215_v58 }
 0x4e0   : > { %v4481_v38 = vcombine.low %v2335_v60, %v2335_v60  ;;  %v4482_v36 = vcombine.high %v2335_v60, %v2335_v60 }
 0x4e1   : > { %v2839_v53 = vmax.bf16 %v4529_v27, %v6893_v43  ;;  %v2840_v17 = vmax.bf16 %v4530_v26, %v6895_v32  ;;  %v2169_v48 = vpop.permute.xlu1 %2168 }
 0x4e2   : > { %v2791_v2 = vmax.bf16 %v4481_v38, %v6901_v49  ;;  %v2792_v31 = vmax.bf16 %v4482_v36, %v6903_v9  ;;  %v2121_v6 = vpop.permute.xlu0 %2120 }
 0x4e3   : > { %v4579_v44 = vcombine.low %v2839_v53, %v2840_v17 }
 0x4e4   : > { %v4555_v61 = vcombine.low %v2791_v2, %v2792_v31 }
 0x4e5   : > { %v2265_v16 = vpop.permute.xlu1 %2264  ;;  %5028 = vmatprep.mubr.msk.bf16.mxu1 %vm537_vm10, %v4579_v44 }
 0x4e6   : > { %v2410_v23 = vsel %vm2266_vm5, %v2169_v48, %v2265_v16  ;;  %4980 = vmatprep.mubr.msk.bf16.mxu0 %vm537_vm10, %v4555_v61  ;;  %v2217_v21 = vpop.permute.xlu0 %2216 }
 0x4e7   : > { %v4531_v40 = vcombine.low %v2410_v23, %v2410_v23  ;;  %v4532_v43 = vcombine.high %v2410_v23, %v2410_v23  ;;  %v2338_v32 = vsel %vm2266_vm5, %v2121_v6, %v2217_v21 }
 0x4e8   : > { %v4483_v29 = vcombine.low %v2338_v32, %v2338_v32  ;;  %v4484_v11 = vcombine.high %v2338_v32, %v2338_v32 }
 0x4e9   : > { %v2841_v49 = vmax.bf16 %v4531_v40, %v6917_v59  ;;  %v2842_v9 = vmax.bf16 %v4532_v43, %v6919_v41 }
 0x4ea   : > { %v2793_v25 = vmax.bf16 %v4483_v29, %v6925_v22  ;;  %v2794_v42 = vmax.bf16 %v4484_v11, %v6927_v51 }
 0x4eb   : > { %v4580_v39 = vcombine.low %v2841_v49, %v2842_v9 }
 0x4ec   : > { %v4556_v18 = vcombine.low %v2793_v25, %v2794_v42 }
 0x4ed   : > { %5029 = vmatmul.mubr.msk.bf16.gmra.mxu1 %vm537_vm10, %v4580_v39 }
 0x4ee   : > { %4981 = vmatmul.mubr.msk.bf16.gmra.mxu0 %vm537_vm10, %v4556_v18 }
 0x4fd   : > { %v4938_v24 = vpop.f32.mrf.mxu0  ;;  %v4986_v0 = vpop.f32.mrf.mxu1 }
 0x4fe   : > { %v4772_v20 = vpack.c.bf16 %v4938_v24, %v4938_v24  ;;  %v4820_v59 = vpack.c.bf16 %v4986_v0, %v4986_v0 }
 0x4ff   : > { %v3318_v41 = vpop.f32.mrf.mxu0  ;;  %v3510_v63 = vpop.f32.mrf.mxu1 }
 0x500   : > { %4088 = vst.msk [vmem:[%s5380_s5 + $0x8] sm:$0xf] %vm4085_vm6, %v4772_v20  ;;  %4136 = vst.msk [vmem:[%s5380_s5 + $0xc8] sm:$0xf] %vm4085_vm6, %v4820_v59  ;;  %v4770_v22 = vpack.c.bf16 %v3318_v41, %v3318_v41  ;;  %v4818_v51 = vpack.c.bf16 %v3510_v63, %v3510_v63 }
 0x501   : > { %v4939_v12 = vpop.f32.mrf.mxu0  ;;  %v4987_v30 = vpop.f32.mrf.mxu1 }
 0x502   : > { %4086 = vst.msk [vmem:[%s5380_s5] sm:$0xf] %vm4085_vm6, %v4770_v22  ;;  %4134 = vst.msk [vmem:[%s5380_s5 + $0xc0] sm:$0xf] %vm4085_vm6, %v4818_v51  ;;  %v4773_v28 = vpack.c.bf16 %v4939_v12, %v4939_v12  ;;  %v4821_v46 = vpack.c.bf16 %v4987_v30, %v4987_v30 }
 0x503   : > { %v3321_v56 = vpop.f32.mrf.mxu0  ;;  %v3513_v37 = vpop.f32.mrf.mxu1 }
 0x504   : > { %4089 = vst.msk [vmem:[%s5380_s5 + $0xc] sm:$0xf] %vm4085_vm6, %v4773_v28  ;;  %4137 = vst.msk [vmem:[%s5380_s5 + $0xcc] sm:$0xf] %vm4085_vm6, %v4821_v46  ;;  %v4771_v10 = vpack.c.bf16 %v3321_v56, %v3321_v56  ;;  %v4819_v52 = vpack.c.bf16 %v3513_v37, %v3513_v37 }
 0x506   : > { %4087 = vst.msk [vmem:[%s5380_s5 + $0x4] sm:$0xf] %vm4085_vm6, %v4771_v10  ;;  %4135 = vst.msk [vmem:[%s5380_s5 + $0xc4] sm:$0xf] %vm4085_vm6, %v4819_v52 }
 0x50d   : > { %v4942_v54 = vpop.f32.mrf.mxu0  ;;  %v4990_v7 = vpop.f32.mrf.mxu1 }
 0x50e   : > { %v4776_v14 = vpack.c.bf16 %v4942_v54, %v4942_v54  ;;  %v4824_v1 = vpack.c.bf16 %v4990_v7, %v4990_v7 }
 0x50f   : > { %v3334_v33 = vpop.f32.mrf.mxu0  ;;  %v3526_v55 = vpop.f32.mrf.mxu1 }
 0x510   : > { %4092 = vst.msk [vmem:[%s5380_s5 + $0x18] sm:$0xf] %vm4085_vm6, %v4776_v14  ;;  %4140 = vst.msk [vmem:[%s5380_s5 + $0xd8] sm:$0xf] %vm4085_vm6, %v4824_v1  ;;  %v4774_v62 = vpack.c.bf16 %v3334_v33, %v3334_v33  ;;  %v4822_v5 = vpack.c.bf16 %v3526_v55, %v3526_v55 }
 0x511   : > { %v4943_v8 = vpop.f32.mrf.mxu0  ;;  %v4991_v4 = vpop.f32.mrf.mxu1 }
 0x512   : > { %4090 = vst.msk [vmem:[%s5380_s5 + $0x10] sm:$0xf] %vm4085_vm6, %v4774_v62  ;;  %4138 = vst.msk [vmem:[%s5380_s5 + $0xd0] sm:$0xf] %vm4085_vm6, %v4822_v5  ;;  %v4777_v50 = vpack.c.bf16 %v4943_v8, %v4943_v8  ;;  %v4825_v3 = vpack.c.bf16 %v4991_v4, %v4991_v4 }
 0x513   : > { %v3337_v45 = vpop.f32.mrf.mxu0  ;;  %v3529_v57 = vpop.f32.mrf.mxu1 }
 0x514   : > { %4093 = vst.msk [vmem:[%s5380_s5 + $0x1c] sm:$0xf] %vm4085_vm6, %v4777_v50  ;;  %4141 = vst.msk [vmem:[%s5380_s5 + $0xdc] sm:$0xf] %vm4085_vm6, %v4825_v3  ;;  %v4775_v34 = vpack.c.bf16 %v3337_v45, %v3337_v45  ;;  %v4823_v35 = vpack.c.bf16 %v3529_v57, %v3529_v57 }
 0x516   : > { %4091 = vst.msk [vmem:[%s5380_s5 + $0x14] sm:$0xf] %vm4085_vm6, %v4775_v34  ;;  %4139 = vst.msk [vmem:[%s5380_s5 + $0xd4] sm:$0xf] %vm4085_vm6, %v4823_v35 }
 0x51d   : > { %v4946_v47 = vpop.f32.mrf.mxu0  ;;  %v4994_v19 = vpop.f32.mrf.mxu1 }
 0x51e   : > { %v4780_v13 = vpack.c.bf16 %v4946_v47, %v4946_v47  ;;  %v4828_v15 = vpack.c.bf16 %v4994_v19, %v4994_v19 }
 0x51f   : > { %v3350_v58 = vpop.f32.mrf.mxu0  ;;  %v3542_v27 = vpop.f32.mrf.mxu1 }
 0x520   : > { %4096 = vst.msk [vmem:[%s5380_s5 + $0x28] sm:$0xf] %vm4085_vm6, %v4780_v13  ;;  %4144 = vst.msk [vmem:[%s5380_s5 + $0xe8] sm:$0xf] %vm4085_vm6, %v4828_v15  ;;  %v4778_v26 = vpack.c.bf16 %v3350_v58, %v3350_v58  ;;  %v4826_v60 = vpack.c.bf16 %v3542_v27, %v3542_v27 }
 0x521   : > { %v4947_v38 = vpop.f32.mrf.mxu0  ;;  %v4995_v36 = vpop.f32.mrf.mxu1 }
 0x522   : > { %4094 = vst.msk [vmem:[%s5380_s5 + $0x20] sm:$0xf] %vm4085_vm6, %v4778_v26  ;;  %4142 = vst.msk [vmem:[%s5380_s5 + $0xe0] sm:$0xf] %vm4085_vm6, %v4826_v60  ;;  %v4781_v53 = vpack.c.bf16 %v4947_v38, %v4947_v38  ;;  %v4829_v17 = vpack.c.bf16 %v4995_v36, %v4995_v36 }
 0x523   : > { %v3353_v48 = vpop.f32.mrf.mxu0  ;;  %v3545_v2 = vpop.f32.mrf.mxu1 }
 0x524   : > { %4097 = vst.msk [vmem:[%s5380_s5 + $0x2c] sm:$0xf] %vm4085_vm6, %v4781_v53  ;;  %4145 = vst.msk [vmem:[%s5380_s5 + $0xec] sm:$0xf] %vm4085_vm6, %v4829_v17  ;;  %v4779_v31 = vpack.c.bf16 %v3353_v48, %v3353_v48  ;;  %v4827_v6 = vpack.c.bf16 %v3545_v2, %v3545_v2 }
 0x526   : > { %4095 = vst.msk [vmem:[%s5380_s5 + $0x24] sm:$0xf] %vm4085_vm6, %v4779_v31  ;;  %4143 = vst.msk [vmem:[%s5380_s5 + $0xe4] sm:$0xf] %vm4085_vm6, %v4827_v6 }
 0x52d   : > { %v4950_v44 = vpop.f32.mrf.mxu0  ;;  %v4998_v61 = vpop.f32.mrf.mxu1 }
 0x52e   : > { %v4784_v16 = vpack.c.bf16 %v4950_v44, %v4950_v44  ;;  %v4832_v23 = vpack.c.bf16 %v4998_v61, %v4998_v61 }
 0x52f   : > { %v3366_v21 = vpop.f32.mrf.mxu0  ;;  %v3558_v40 = vpop.f32.mrf.mxu1 }
 0x530   : > { %4100 = vst.msk [vmem:[%s5380_s5 + $0x38] sm:$0xf] %vm4085_vm6, %v4784_v16  ;;  %4148 = vst.msk [vmem:[%s5380_s5 + $0xf8] sm:$0xf] %vm4085_vm6, %v4832_v23  ;;  %v4782_v43 = vpack.c.bf16 %v3366_v21, %v3366_v21  ;;  %v4830_v32 = vpack.c.bf16 %v3558_v40, %v3558_v40 }
 0x531   : > { %v4951_v29 = vpop.f32.mrf.mxu0  ;;  %v4999_v11 = vpop.f32.mrf.mxu1 }
 0x532   : > { %4098 = vst.msk [vmem:[%s5380_s5 + $0x30] sm:$0xf] %vm4085_vm6, %v4782_v43  ;;  %4146 = vst.msk [vmem:[%s5380_s5 + $0xf0] sm:$0xf] %vm4085_vm6, %v4830_v32  ;;  %v4785_v49 = vpack.c.bf16 %v4951_v29, %v4951_v29  ;;  %v4833_v9 = vpack.c.bf16 %v4999_v11, %v4999_v11 }
 0x533   : > { %v3369_v25 = vpop.f32.mrf.mxu0  ;;  %v3561_v42 = vpop.f32.mrf.mxu1 }
 0x534   : > { %4101 = vst.msk [vmem:[%s5380_s5 + $0x3c] sm:$0xf] %vm4085_vm6, %v4785_v49  ;;  %4149 = vst.msk [vmem:[%s5380_s5 + $0xfc] sm:$0xf] %vm4085_vm6, %v4833_v9  ;;  %v4783_v39 = vpack.c.bf16 %v3369_v25, %v3369_v25  ;;  %v4831_v18 = vpack.c.bf16 %v3561_v42, %v3561_v42 }
 0x536   : > { %4099 = vst.msk [vmem:[%s5380_s5 + $0x34] sm:$0xf] %vm4085_vm6, %v4783_v39  ;;  %4147 = vst.msk [vmem:[%s5380_s5 + $0xf4] sm:$0xf] %vm4085_vm6, %v4831_v18 }
 0x53d   : > { %v4954_v24 = vpop.f32.mrf.mxu0  ;;  %v5002_v0 = vpop.f32.mrf.mxu1 }
 0x53e   : > { %v4788_v20 = vpack.c.bf16 %v4954_v24, %v4954_v24  ;;  %v4836_v59 = vpack.c.bf16 %v5002_v0, %v5002_v0 }
 0x53f   : > { %v3382_v41 = vpop.f32.mrf.mxu0  ;;  %v3574_v63 = vpop.f32.mrf.mxu1 }
 0x540   : > { %4104 = vst.msk [vmem:[%s5380_s5 + $0x48] sm:$0xf] %vm4085_vm6, %v4788_v20  ;;  %4152 = vst.msk [vmem:[%s5380_s5 + $0x108] sm:$0xf] %vm4085_vm6, %v4836_v59  ;;  %v4786_v22 = vpack.c.bf16 %v3382_v41, %v3382_v41  ;;  %v4834_v51 = vpack.c.bf16 %v3574_v63, %v3574_v63 }
 0x541   : > { %v4955_v12 = vpop.f32.mrf.mxu0  ;;  %v5003_v30 = vpop.f32.mrf.mxu1 }
 0x542   : > { %4102 = vst.msk [vmem:[%s5380_s5 + $0x40] sm:$0xf] %vm4085_vm6, %v4786_v22  ;;  %4150 = vst.msk [vmem:[%s5380_s5 + $0x100] sm:$0xf] %vm4085_vm6, %v4834_v51  ;;  %v4789_v28 = vpack.c.bf16 %v4955_v12, %v4955_v12  ;;  %v4837_v46 = vpack.c.bf16 %v5003_v30, %v5003_v30 }
 0x543   : > { %v3385_v56 = vpop.f32.mrf.mxu0  ;;  %v3577_v37 = vpop.f32.mrf.mxu1 }
 0x544   : > { %4105 = vst.msk [vmem:[%s5380_s5 + $0x4c] sm:$0xf] %vm4085_vm6, %v4789_v28  ;;  %4153 = vst.msk [vmem:[%s5380_s5 + $0x10c] sm:$0xf] %vm4085_vm6, %v4837_v46  ;;  %v4787_v10 = vpack.c.bf16 %v3385_v56, %v3385_v56  ;;  %v4835_v52 = vpack.c.bf16 %v3577_v37, %v3577_v37 }
 0x546   : > { %4103 = vst.msk [vmem:[%s5380_s5 + $0x44] sm:$0xf] %vm4085_vm6, %v4787_v10  ;;  %4151 = vst.msk [vmem:[%s5380_s5 + $0x104] sm:$0xf] %vm4085_vm6, %v4835_v52 }
 0x54d   : > { %v4958_v54 = vpop.f32.mrf.mxu0  ;;  %v5006_v7 = vpop.f32.mrf.mxu1 }
 0x54e   : > { %v4792_v14 = vpack.c.bf16 %v4958_v54, %v4958_v54  ;;  %v4840_v1 = vpack.c.bf16 %v5006_v7, %v5006_v7 }
 0x54f   : > { %v3398_v33 = vpop.f32.mrf.mxu0  ;;  %v3590_v55 = vpop.f32.mrf.mxu1 }
 0x550   : > { %4108 = vst.msk [vmem:[%s5380_s5 + $0x58] sm:$0xf] %vm4085_vm6, %v4792_v14  ;;  %4156 = vst.msk [vmem:[%s5380_s5 + $0x118] sm:$0xf] %vm4085_vm6, %v4840_v1  ;;  %v4790_v62 = vpack.c.bf16 %v3398_v33, %v3398_v33  ;;  %v4838_v5 = vpack.c.bf16 %v3590_v55, %v3590_v55 }
 0x551   : > { %v4959_v8 = vpop.f32.mrf.mxu0  ;;  %v5007_v4 = vpop.f32.mrf.mxu1 }
 0x552   : > { %4106 = vst.msk [vmem:[%s5380_s5 + $0x50] sm:$0xf] %vm4085_vm6, %v4790_v62  ;;  %4154 = vst.msk [vmem:[%s5380_s5 + $0x110] sm:$0xf] %vm4085_vm6, %v4838_v5  ;;  %v4793_v50 = vpack.c.bf16 %v4959_v8, %v4959_v8  ;;  %v4841_v3 = vpack.c.bf16 %v5007_v4, %v5007_v4 }
 0x553   : > { %v3401_v45 = vpop.f32.mrf.mxu0  ;;  %v3593_v57 = vpop.f32.mrf.mxu1 }
 0x554   : > { %4109 = vst.msk [vmem:[%s5380_s5 + $0x5c] sm:$0xf] %vm4085_vm6, %v4793_v50  ;;  %4157 = vst.msk [vmem:[%s5380_s5 + $0x11c] sm:$0xf] %vm4085_vm6, %v4841_v3  ;;  %v4791_v34 = vpack.c.bf16 %v3401_v45, %v3401_v45  ;;  %v4839_v35 = vpack.c.bf16 %v3593_v57, %v3593_v57 }
 0x556   : > { %4107 = vst.msk [vmem:[%s5380_s5 + $0x54] sm:$0xf] %vm4085_vm6, %v4791_v34  ;;  %4155 = vst.msk [vmem:[%s5380_s5 + $0x114] sm:$0xf] %vm4085_vm6, %v4839_v35 }
 0x55d   : > { %v4962_v47 = vpop.f32.mrf.mxu0  ;;  %v5010_v19 = vpop.f32.mrf.mxu1 }
 0x55e   : > { %v4796_v13 = vpack.c.bf16 %v4962_v47, %v4962_v47  ;;  %v4844_v15 = vpack.c.bf16 %v5010_v19, %v5010_v19 }
 0x55f   : > { %v3414_v58 = vpop.f32.mrf.mxu0  ;;  %v3606_v27 = vpop.f32.mrf.mxu1 }
 0x560   : > { %4112 = vst.msk [vmem:[%s5380_s5 + $0x68] sm:$0xf] %vm4085_vm6, %v4796_v13  ;;  %4160 = vst.msk [vmem:[%s5380_s5 + $0x128] sm:$0xf] %vm4085_vm6, %v4844_v15  ;;  %v4794_v26 = vpack.c.bf16 %v3414_v58, %v3414_v58  ;;  %v4842_v60 = vpack.c.bf16 %v3606_v27, %v3606_v27 }
 0x561   : > { %v4963_v38 = vpop.f32.mrf.mxu0  ;;  %v5011_v36 = vpop.f32.mrf.mxu1 }
 0x562   : > { %4110 = vst.msk [vmem:[%s5380_s5 + $0x60] sm:$0xf] %vm4085_vm6, %v4794_v26  ;;  %4158 = vst.msk [vmem:[%s5380_s5 + $0x120] sm:$0xf] %vm4085_vm6, %v4842_v60  ;;  %v4797_v53 = vpack.c.bf16 %v4963_v38, %v4963_v38  ;;  %v4845_v17 = vpack.c.bf16 %v5011_v36, %v5011_v36 }
 0x563   : > { %v3417_v48 = vpop.f32.mrf.mxu0  ;;  %v3609_v2 = vpop.f32.mrf.mxu1 }
 0x564   : > { %4113 = vst.msk [vmem:[%s5380_s5 + $0x6c] sm:$0xf] %vm4085_vm6, %v4797_v53  ;;  %4161 = vst.msk [vmem:[%s5380_s5 + $0x12c] sm:$0xf] %vm4085_vm6, %v4845_v17  ;;  %v4795_v31 = vpack.c.bf16 %v3417_v48, %v3417_v48  ;;  %v4843_v6 = vpack.c.bf16 %v3609_v2, %v3609_v2 }
 0x566   : > { %4111 = vst.msk [vmem:[%s5380_s5 + $0x64] sm:$0xf] %vm4085_vm6, %v4795_v31  ;;  %4159 = vst.msk [vmem:[%s5380_s5 + $0x124] sm:$0xf] %vm4085_vm6, %v4843_v6 }
 0x56d   : > { %v4966_v44 = vpop.f32.mrf.mxu0  ;;  %v5014_v61 = vpop.f32.mrf.mxu1 }
 0x56e   : > { %v4800_v16 = vpack.c.bf16 %v4966_v44, %v4966_v44  ;;  %v4848_v23 = vpack.c.bf16 %v5014_v61, %v5014_v61 }
 0x56f   : > { %v3430_v21 = vpop.f32.mrf.mxu0  ;;  %v3622_v40 = vpop.f32.mrf.mxu1 }
 0x570   : > { %4116 = vst.msk [vmem:[%s5380_s5 + $0x78] sm:$0xf] %vm4085_vm6, %v4800_v16  ;;  %4164 = vst.msk [vmem:[%s5380_s5 + $0x138] sm:$0xf] %vm4085_vm6, %v4848_v23  ;;  %v4798_v43 = vpack.c.bf16 %v3430_v21, %v3430_v21  ;;  %v4846_v32 = vpack.c.bf16 %v3622_v40, %v3622_v40 }
 0x571   : > { %v4967_v29 = vpop.f32.mrf.mxu0  ;;  %v5015_v11 = vpop.f32.mrf.mxu1 }
 0x572   : > { %4114 = vst.msk [vmem:[%s5380_s5 + $0x70] sm:$0xf] %vm4085_vm6, %v4798_v43  ;;  %4162 = vst.msk [vmem:[%s5380_s5 + $0x130] sm:$0xf] %vm4085_vm6, %v4846_v32  ;;  %v4801_v49 = vpack.c.bf16 %v4967_v29, %v4967_v29  ;;  %v4849_v9 = vpack.c.bf16 %v5015_v11, %v5015_v11 }
 0x573   : > { %v3433_v25 = vpop.f32.mrf.mxu0  ;;  %v3625_v42 = vpop.f32.mrf.mxu1 }
 0x574   : > { %4117 = vst.msk [vmem:[%s5380_s5 + $0x7c] sm:$0xf] %vm4085_vm6, %v4801_v49  ;;  %4165 = vst.msk [vmem:[%s5380_s5 + $0x13c] sm:$0xf] %vm4085_vm6, %v4849_v9  ;;  %v4799_v39 = vpack.c.bf16 %v3433_v25, %v3433_v25  ;;  %v4847_v18 = vpack.c.bf16 %v3625_v42, %v3625_v42 }
 0x576   : > { %4115 = vst.msk [vmem:[%s5380_s5 + $0x74] sm:$0xf] %vm4085_vm6, %v4799_v39  ;;  %4163 = vst.msk [vmem:[%s5380_s5 + $0x134] sm:$0xf] %vm4085_vm6, %v4847_v18 }
 0x57d   : > { %v5018_v24 = vpop.f32.mrf.mxu1 }
 0x57e   : > { %v4970_v0 = vpop.f32.mrf.mxu0  ;;  %v4852_v20 = vpack.c.bf16 %v5018_v24, %v5018_v24 }
 0x57f   : > { %v4804_v59 = vpack.c.bf16 %v4970_v0, %v4970_v0  ;;  %v3638_v41 = vpop.f32.mrf.mxu1 }
 0x580   : > { %4168 = vst.msk [vmem:[%s5380_s5 + $0x148] sm:$0xf] %vm4085_vm6, %v4852_v20  ;;  %v3446_v63 = vpop.f32.mrf.mxu0  ;;  %v4850_v22 = vpack.c.bf16 %v3638_v41, %v3638_v41 }
 0x581   : > { %4120 = vst.msk [vmem:[%s5380_s5 + $0x88] sm:$0xf] %vm4085_vm6, %v4804_v59  ;;  %v4802_v51 = vpack.c.bf16 %v3446_v63, %v3446_v63  ;;  %v5019_v12 = vpop.f32.mrf.mxu1 }
 0x582   : > { %4166 = vst.msk [vmem:[%s5380_s5 + $0x140] sm:$0xf] %vm4085_vm6, %v4850_v22  ;;  %v4971_v30 = vpop.f32.mrf.mxu0  ;;  %v4853_v28 = vpack.c.bf16 %v5019_v12, %v5019_v12 }
 0x583   : > { %4118 = vst.msk [vmem:[%s5380_s5 + $0x80] sm:$0xf] %vm4085_vm6, %v4802_v51  ;;  %v4805_v46 = vpack.c.bf16 %v4971_v30, %v4971_v30  ;;  %v3641_v56 = vpop.f32.mrf.mxu1 }
 0x584   : > { %4169 = vst.msk [vmem:[%s5380_s5 + $0x14c] sm:$0xf] %vm4085_vm6, %v4853_v28  ;;  %v3449_v37 = vpop.f32.mrf.mxu0  ;;  %v4851_v10 = vpack.c.bf16 %v3641_v56, %v3641_v56 }
 0x585   : > { %4121 = vst.msk [vmem:[%s5380_s5 + $0x8c] sm:$0xf] %vm4085_vm6, %v4805_v46  ;;  %v4803_v52 = vpack.c.bf16 %v3449_v37, %v3449_v37 }
 0x586   : > { %4167 = vst.msk [vmem:[%s5380_s5 + $0x144] sm:$0xf] %vm4085_vm6, %v4851_v10 }
 0x587   : > { %4119 = vst.msk [vmem:[%s5380_s5 + $0x84] sm:$0xf] %vm4085_vm6, %v4803_v52 }
 0x58d   : > { %v5022_v54 = vpop.f32.mrf.mxu1 }
 0x58e   : > { %v4974_v7 = vpop.f32.mrf.mxu0  ;;  %v4856_v14 = vpack.c.bf16 %v5022_v54, %v5022_v54 }
 0x58f   : > { %v4808_v1 = vpack.c.bf16 %v4974_v7, %v4974_v7  ;;  %v3654_v33 = vpop.f32.mrf.mxu1 }
 0x590   : > { %4172 = vst.msk [vmem:[%s5380_s5 + $0x158] sm:$0xf] %vm4085_vm6, %v4856_v14  ;;  %v3462_v55 = vpop.f32.mrf.mxu0  ;;  %v4854_v62 = vpack.c.bf16 %v3654_v33, %v3654_v33 }
 0x591   : > { %4124 = vst.msk [vmem:[%s5380_s5 + $0x98] sm:$0xf] %vm4085_vm6, %v4808_v1  ;;  %v4806_v5 = vpack.c.bf16 %v3462_v55, %v3462_v55  ;;  %v5023_v8 = vpop.f32.mrf.mxu1 }
 0x592   : > { %4170 = vst.msk [vmem:[%s5380_s5 + $0x150] sm:$0xf] %vm4085_vm6, %v4854_v62  ;;  %v4975_v4 = vpop.f32.mrf.mxu0  ;;  %v4857_v50 = vpack.c.bf16 %v5023_v8, %v5023_v8 }
 0x593   : > { %4122 = vst.msk [vmem:[%s5380_s5 + $0x90] sm:$0xf] %vm4085_vm6, %v4806_v5  ;;  %v4809_v3 = vpack.c.bf16 %v4975_v4, %v4975_v4  ;;  %v3657_v45 = vpop.f32.mrf.mxu1 }
 0x594   : > { %4173 = vst.msk [vmem:[%s5380_s5 + $0x15c] sm:$0xf] %vm4085_vm6, %v4857_v50  ;;  %v3465_v57 = vpop.f32.mrf.mxu0  ;;  %v4855_v34 = vpack.c.bf16 %v3657_v45, %v3657_v45 }
 0x595   : > { %4125 = vst.msk [vmem:[%s5380_s5 + $0x9c] sm:$0xf] %vm4085_vm6, %v4809_v3  ;;  %v4807_v35 = vpack.c.bf16 %v3465_v57, %v3465_v57 }
 0x596   : > { %4171 = vst.msk [vmem:[%s5380_s5 + $0x154] sm:$0xf] %vm4085_vm6, %v4855_v34 }
 0x597   : > { %4123 = vst.msk [vmem:[%s5380_s5 + $0x94] sm:$0xf] %vm4085_vm6, %v4807_v35 }
 0x59d   : > { %v5026_v47 = vpop.f32.mrf.mxu1 }
 0x59e   : > { %v4978_v19 = vpop.f32.mrf.mxu0  ;;  %v4860_v13 = vpack.c.bf16 %v5026_v47, %v5026_v47 }
 0x59f   : > { %v4812_v15 = vpack.c.bf16 %v4978_v19, %v4978_v19  ;;  %v3670_v58 = vpop.f32.mrf.mxu1 }
 0x5a0   : > { %4176 = vst.msk [vmem:[%s5380_s5 + $0x168] sm:$0xf] %vm4085_vm6, %v4860_v13  ;;  %v3478_v27 = vpop.f32.mrf.mxu0  ;;  %v4858_v26 = vpack.c.bf16 %v3670_v58, %v3670_v58 }
 0x5a1   : > { %4128 = vst.msk [vmem:[%s5380_s5 + $0xa8] sm:$0xf] %vm4085_vm6, %v4812_v15  ;;  %v4810_v60 = vpack.c.bf16 %v3478_v27, %v3478_v27  ;;  %v5027_v38 = vpop.f32.mrf.mxu1 }
 0x5a2   : > { %4174 = vst.msk [vmem:[%s5380_s5 + $0x160] sm:$0xf] %vm4085_vm6, %v4858_v26  ;;  %v4979_v36 = vpop.f32.mrf.mxu0  ;;  %v4861_v53 = vpack.c.bf16 %v5027_v38, %v5027_v38 }
 0x5a3   : > { %4126 = vst.msk [vmem:[%s5380_s5 + $0xa0] sm:$0xf] %vm4085_vm6, %v4810_v60  ;;  %v4813_v17 = vpack.c.bf16 %v4979_v36, %v4979_v36  ;;  %v3673_v48 = vpop.f32.mrf.mxu1 }
 0x5a4   : > { %4177 = vst.msk [vmem:[%s5380_s5 + $0x16c] sm:$0xf] %vm4085_vm6, %v4861_v53  ;;  %v3481_v2 = vpop.f32.mrf.mxu0  ;;  %v4859_v31 = vpack.c.bf16 %v3673_v48, %v3673_v48 }
 0x5a5   : > { %4129 = vst.msk [vmem:[%s5380_s5 + $0xac] sm:$0xf] %vm4085_vm6, %v4813_v17  ;;  %v4811_v6 = vpack.c.bf16 %v3481_v2, %v3481_v2 }
 0x5a6   : > { %4175 = vst.msk [vmem:[%s5380_s5 + $0x164] sm:$0xf] %vm4085_vm6, %v4859_v31 }
 0x5a7   : > { %4127 = vst.msk [vmem:[%s5380_s5 + $0xa4] sm:$0xf] %vm4085_vm6, %v4811_v6 }
 0x5ad   : > { %v5030_v44 = vpop.f32.mrf.mxu1 }
 0x5ae   : > { %v4982_v61 = vpop.f32.mrf.mxu0  ;;  %v4864_v16 = vpack.c.bf16 %v5030_v44, %v5030_v44 }
 0x5af   : > { %v4816_v23 = vpack.c.bf16 %v4982_v61, %v4982_v61  ;;  %v3686_v21 = vpop.f32.mrf.mxu1 }
 0x5b0   : > { %4180 = vst.msk [vmem:[%s5380_s5 + $0x178] sm:$0xf] %vm4085_vm6, %v4864_v16  ;;  %v3494_v40 = vpop.f32.mrf.mxu0  ;;  %v4862_v43 = vpack.c.bf16 %v3686_v21, %v3686_v21 }
 0x5b1   : > { %4132 = vst.msk [vmem:[%s5380_s5 + $0xb8] sm:$0xf] %vm4085_vm6, %v4816_v23  ;;  %v4814_v32 = vpack.c.bf16 %v3494_v40, %v3494_v40  ;;  %v5031_v29 = vpop.f32.mrf.mxu1 }
 0x5b2   : > { %4178 = vst.msk [vmem:[%s5380_s5 + $0x170] sm:$0xf] %vm4085_vm6, %v4862_v43  ;;  %v4983_v11 = vpop.f32.mrf.mxu0  ;;  %v4865_v49 = vpack.c.bf16 %v5031_v29, %v5031_v29 }
 0x5b3   : > { %4130 = vst.msk [vmem:[%s5380_s5 + $0xb0] sm:$0xf] %vm4085_vm6, %v4814_v32  ;;  %v4817_v9 = vpack.c.bf16 %v4983_v11, %v4983_v11  ;;  %v3689_v25 = vpop.f32.mrf.mxu1 }
 0x5b4   : > { %4181 = vst.msk [vmem:[%s5380_s5 + $0x17c] sm:$0xf] %vm4085_vm6, %v4865_v49  ;;  %v3497_v42 = vpop.f32.mrf.mxu0  ;;  %v4863_v39 = vpack.c.bf16 %v3689_v25, %v3689_v25 }
 0x5b5   : > { %4133 = vst.msk [vmem:[%s5380_s5 + $0xbc] sm:$0xf] %vm4085_vm6, %v4817_v9  ;;  %v4815_v18 = vpack.c.bf16 %v3497_v42, %v3497_v42 }
 0x5b6   : > { %4179 = vst.msk [vmem:[%s5380_s5 + $0x174] sm:$0xf] %vm4085_vm6, %v4863_v39 }
 0x5b7   : > { %4131 = vst.msk [vmem:[%s5380_s5 + $0xb4] sm:$0xf] %vm4085_vm6, %v4815_v18 }
 0x5b8 PF: > { %s15_s15 = sadd.s32 1, %s5300_s15  }
 0x5b9   : > { %p12_p4 = scmp.ge.s32.totalorder %s15_s15, 4  }
 0x5bb   :  { %14 = sbr.rel (!%p12_p4) target bundleno = 1 (0x1), region = 97 }
 0x5c0   :  { %4203 = vsyncpa [#allocation4], 1 }
 0x5c1   :  { %4205 = vsyncpa [#allocation4 + $0x1], 1 }

// kernel: plate_reader_forward.3
= control target key start
LH: loop header
LB: loop body
LE: loop exit
PB: predicated region body
PF: predicated region fallthrough
CT: control target
= control target key end

     0   :  { %9 = vsyncpa [#allocation4], 0  ;;  %s7418_s0 = inlined_call_operand.vmem [shape: bf16[2,48,8,200], index: 0, kind: input, shape index: {}]   ;;  %s7419_s1 = inlined_call_operand.hbm [shape: bf16[32,72], index: 1, kind: input, shape index: {}]   ;;  %s7420_s2 = inlined_call_operand.vmem [shape: f32[32,1], index: 2, kind: input, shape index: {}]   ;;  %s7421_s3 = inlined_call_operand.hbm [shape: bf16[200,100], index: 3, kind: input, shape index: {}]   ;;  %s7422_s4 = inlined_call_operand.vmem [shape: bf16[2,768,100], index: 4, kind: output, shape index: {}]  }
   0x1   :  { %10 = vsyncpa [#allocation6], 0  ;;  %s5757_s15 = smov 0  }
   0x2 LB: > { %s5763_s16 = sadd.s32 4294967295, %s5708_s15   ;;  %p4577_p0 = scmp.ge.s32.totalorder %s5708_s15, 1  ;;  %s5708_s15 = sphi %s5757_s15, %s16_s15  }
   0x3   : > { %p136_p1 = scmp.lt.s32.totalorder %s5708_s15, 3  ;;  %s5714_s17 = smov [#allocation3]  }
   0x4   : > { %s148_s18 = sshll.u32 %s5714_s17, 4  ;;  %p5341_p3 = scmp.eq.s32.totalorder %s5763_s16, 0  ;;  %s149_s18 = int_to_ptr.vmem [resolvable:$true] %s148_s18 }
   0x5   : > { %p5767_p2 = pnand %p4577_p0, %p136_p1  ;;  %s5715_s20 = smov [#allocation5]  }
   0x6   : > { %s164_s21 = sshll.u32 %s5715_s20, 4  ;;  %s5649_s23 = scalar_lea.vmem %s149_s18, 256  ;;  %s165_s21 = int_to_ptr.vmem [resolvable:$true] %s164_s21 }
   0x7   : > { %p5334_p4 = pneg %p5767_p2  ;;  %p5650_p7 = scmp.ne.s32.totalorder %s149_s18, %s5649_s23 }
   0x8   : > { %p5657_p10 = scmp.lt.s32.totalorder %s149_s18, %s149_s18  ;;  %p5658_p11 = scmp.lt.s32.totalorder %s5649_s23, %s5649_s23 }
   0x9   : > { %p5776_p5 = pnand %p5341_p3, %p5334_p4 }
   0xa   : > { %p5659_p12 = por %p5658_p11, %p5657_p10 }
   0xb   : > { %p5640_p6 = pneg %p5776_p5 }
   0xd   : > { %p5652_p8 = pnand %p5650_p7, %p5640_p6 }
   0xf   : > { %p5653_p9 = pneg %p5652_p8 }
  0x11   : > { %p5660_p13 = pnand %p5659_p12, %p5653_p9 }
  0x13   : > { %5663 = shalt.err (!%p5660_p13)
}
  0x14   : > { %s5716_s24 = smov 64   ;;  %s5717_s25 = smov 4  }
  0x15   : > { %5337 = dma.hbm_to_vmem [thread:$0]  (!%p5776_p5), %s7419_s1, 256, %s149_s18, [#allocation4], %s5716_s24, %s5716_s24, %s5717_s25  }
  0x16   : > { %s5675_s28 = scalar_lea.vmem %s165_s21, 1600  ;;  %p5683_p7 = scmp.lt.s32.totalorder %s165_s21, %s165_s21 }
  0x17   : > { %p5676_p0 = scmp.ne.s32.totalorder %s165_s21, %s5675_s28  ;;  %p5684_p8 = scmp.lt.s32.totalorder %s5675_s28, %s5675_s28 }
  0x19   : > { %p5678_p1 = pnand %p5676_p0, %p5640_p6  ;;  %p5685_p10 = por %p5684_p8, %p5683_p7 }
  0x1b   : > { %p5679_p4 = pneg %p5678_p1 }
  0x1d   : > { %p5686_p9 = pnand %p5685_p10, %p5679_p4 }
  0x1f   : > { %5689 = shalt.err (!%p5686_p9)
}
  0x20   : > { %5340 = dma.hbm_to_vmem [thread:$0]  (!%p5776_p5), %s7421_s3, 1600, %s165_s21, [#allocation6], %s5716_s24, %s5716_s24, %s5717_s25  }
  0x21   : > { %188 = sbr.rel (%p5767_p2) target bundleno = 1500 (0x5dc), region = 36 }
  0x26   : > { %5699 = dma.done.wait (%p5341_p3), [#allocation4], 256  }
  0x27   : > { %5701 = vsyncadd (%p5341_p3), [#allocation4], 4294967040 }
  0x28   : > { %5703 = dma.done.wait (%p5341_p3), [#allocation6], 1600  }
  0x29   : > { %5705 = vsyncadd (%p5341_p3), [#allocation6], 4294965696  ;;  %p218_p6 = scmp.lt.s32.totalorder %s5763_s16, 1  ;;  %v237_v0 = vlaneseq  ;;  %v5829_v14 = vld [vmem:[#allocation3] sm:$0xf]  ;;  %v5845_v19 = vld [vmem:[%s7420_s2 + $0x8] sm:$0xff] }
  0x2a   : > { %v5831_v15 = vld [vmem:[#allocation3 + $0x4] sm:$0xf]  ;;  %v5833_v16 = vld [vmem:[#allocation3 + $0x8] sm:$0xf]  ;;  %v5835_v17 = vld [vmem:[#allocation3 + $0xc] sm:$0xf] }
  0x2b   : > { %s7461_s16 = smov (!%p218_p6, %s5763_s16), 1  ;;  %v238_v1 = vand.u32 127, %v237_v0  ;;  %v5840_v18 = vld [vmem:[%s7420_s2] sm:$0xff]  ;;  %v5853_v22 = vld [vmem:[%s7420_s2 + $0x10] sm:$0xff]  ;;  %v5858_v23 = vld [vmem:[%s7420_s2 + $0x18] sm:$0xff]  ;;  %s5922_s21 = smov 0  }
  0x2c   : > { %s5311_s5 = smul.u32 384, %s7461_s16 }
  0x2d   : > { %v239_v2 = vadd.s32 128, %v238_v1  ;;  %v240_v3 = vadd.s32 256, %v238_v1  ;;  %v241_v4 = vadd.s32 384, %v238_v1  ;;  %v242_v5 = vadd.s32 512, %v238_v1 }
  0x2e   : > { %v243_v6 = vadd.s32 640, %v238_v1  ;;  %v244_v7 = vadd.s32 768, %v238_v1  ;;  %v5810_v8 = vmul.u32.u64.low 2748779070, %v238_v1  ;;  %v5811_v9 = vmul.u32.u64.high 2748779070, %v238_v1, %v5810_v8  ;;  %s5816_s8 = scalar_lea.vmem %s7418_s0, %s5311_s5  ;;  %s5821_s11 = scalar_lea.vmem %s7422_s4, %s5311_s5 }
  0x2f   : > { %v5823_v10 = vmul.u32.u64.low 2748779070, %v239_v2  ;;  %v5824_v11 = vmul.u32.u64.high 2748779070, %v239_v2, %v5823_v10  ;;  %v5826_v12 = vmul.u32.u64.low 2748779070, %v240_v3  ;;  %v5827_v13 = vmul.u32.u64.high 2748779070, %v240_v3, %v5826_v12 }
  0x30   : > { %v5847_v20 = vmul.u32.u64.low 2748779070, %v241_v4  ;;  %v5848_v21 = vmul.u32.u64.high 2748779070, %v241_v4, %v5847_v20  ;;  %v251_v24 = vshrl.u32 %v5811_v9, 7 }
  0x31   : > { %v5861_v25 = vmul.u32.u64.low 2748779070, %v242_v5  ;;  %v5862_v26 = vmul.u32.u64.high 2748779070, %v242_v5, %v5861_v25  ;;  %v262_v27 = vshrl.u32 %v5824_v11, 7  ;;  %v273_v28 = vshrl.u32 %v5827_v13, 7 }
  0x32   : > { %v5866_v29 = vmul.u32.u64.low 2748779070, %v243_v6  ;;  %v5867_v30 = vmul.u32.u64.high 2748779070, %v243_v6, %v5866_v29  ;;  %v252_v31 = vmul.u32 200, %v251_v24  ;;  %v284_v36 = vshrl.u32 %v5848_v21, 7 }
  0x33   : > { %v5869_v32 = vmul.u32.u64.low 2748779070, %v244_v7  ;;  %v5870_v33 = vmul.u32.u64.high 2748779070, %v244_v7, %v5869_v32  ;;  %v263_v34 = vmul.u32 200, %v262_v27  ;;  %v295_v38 = vshrl.u32 %v5862_v26, 7 }
  0x34   : > { %v274_v35 = vmul.u32 200, %v273_v28  ;;  %v253_v37 = vsub.s32 %v238_v1, %v252_v31  ;;  %v285_v41 = vmul.u32 200, %v284_v36  ;;  %v306_v42 = vshrl.u32 %v5867_v30, 7 }
  0x35   : > { %v264_v39 = vsub.s32 %v239_v2, %v263_v34  ;;  %v296_v43 = vmul.u32 200, %v295_v38  ;;  %v317_v44 = vshrl.u32 %v5870_v33, 7 }
  0x36   : > { %v275_v40 = vsub.s32 %v240_v3, %v274_v35  ;;  %vm322_vm0 = vcmp.ne.s32.totalorder %v253_v37, 0  ;;  %vm329_vm1 = vcmp.lt.s32.totalorder %v253_v37, 0  ;;  %v286_v45 = vsub.s32 %v241_v4, %v285_v41 }
  0x37   : > { %v307_v46 = vmul.u32 200, %v306_v42  ;;  %vm323_vm2 = vcmp.ne.s32.totalorder %v264_v39, 0  ;;  %v297_v47 = vsub.s32 %v242_v5, %v296_v43  ;;  %v318_v48 = vmul.u32 200, %v317_v44  ;;  %vm5876_vm6 = vmand %vm329_vm1, %vm322_vm0 }
  0x38   : > { %vm324_vm3 = vcmp.ne.s32.totalorder %v275_v40, 0  ;;  %vm330_vm4 = vcmp.lt.s32.totalorder %v264_v39, 0  ;;  %vm331_vm5 = vcmp.lt.s32.totalorder %v275_v40, 0  ;;  %vm325_vm7 = vcmp.ne.s32.totalorder %v286_v45, 0 }
  0x39   : > { %v308_v50 = vsub.s32 %v243_v6, %v307_v46  ;;  %vm332_vm8 = vcmp.lt.s32.totalorder %v286_v45, 0  ;;  %vm5880_vm9 = vmand %vm330_vm4, %vm323_vm2  ;;  %v343_v52 = vadd.s32 200, %v253_v37  ;;  %v319_v53 = vsub.s32 %v244_v7, %v318_v48 }
  0x3a   : > { %vm326_vm10 = vcmp.ne.s32.totalorder %v297_v47, 0  ;;  %vm333_vm11 = vcmp.lt.s32.totalorder %v297_v47, 0  ;;  %vm5884_vm12 = vmand %vm331_vm5, %vm324_vm3  ;;  %v344_v55 = vadd.s32 200, %v264_v39  ;;  %v345_v56 = vadd.s32 200, %v275_v40 }
  0x3b   : > { %vm327_vm13 = vcmp.ne.s32.totalorder %v308_v50, 0  ;;  %vm334_vm14 = vcmp.lt.s32.totalorder %v308_v50, 0  ;;  %vm339_vm15 = vmand %vm332_vm8, %vm325_vm7  ;;  %v346_v57 = vadd.s32 200, %v286_v45  ;;  %vm328_vm0 = vcmp.ne.s32.totalorder %v319_v53, 0 }
  0x3c   : > { %vm335_vm1 = vcmp.lt.s32.totalorder %v319_v53, 0  ;;  %vm340_vm2 = vmand %vm333_vm11, %vm326_vm10  ;;  %v347_v58 = vadd.s32 200, %v297_v47  ;;  %v348_v59 = vadd.s32 200, %v308_v50  ;;  %v349_v60 = vadd.s32 200, %v319_v53 }
  0x3d   : > { %vm341_vm4 = vmand %vm334_vm14, %vm327_vm13  ;;  %v350_v61 = vsel %vm5876_vm6, %v343_v52, %v253_v37  ;;  %v351_v62 = vsel %vm5880_vm9, %v344_v55, %v264_v39  ;;  %v352_v63 = vsel %vm5884_vm12, %v345_v56, %v275_v40  ;;  %v353_v0 = vsel %vm339_vm15, %v346_v57, %v286_v45 }
  0x3e   : > { %vm342_vm3 = vmand %vm335_vm1, %vm328_vm0  ;;  %v354_v1 = vsel %vm340_vm2, %v347_v58, %v297_v47  ;;  %v355_v2 = vsel %vm341_vm4, %v348_v59, %v308_v50  ;;  %vm357_vm5 = vcmp.ne.s32.totalorder %v350_v61, 0  ;;  %vm358_vm7 = vcmp.ne.s32.totalorder %v351_v62, 0 }
  0x3f   : > { %v356_v3 = vsel %vm342_vm3, %v349_v60, %v319_v53  ;;  %vm359_vm8 = vcmp.ne.s32.totalorder %v352_v63, 0  ;;  %vm360_vm10 = vcmp.ne.s32.totalorder %v353_v0, 0  ;;  %vm361_vm11 = vcmp.ne.s32.totalorder %v354_v1, 0 }
  0x40   : > { %vm362_vm13 = vcmp.ne.s32.totalorder %v355_v2, 0  ;;  %vm363_vm14 = vcmp.ne.s32.totalorder %v356_v3, 0  ;;  %v5718_v4 = vmov 0.0   ;;  %vm385_vm6 = vcmp.ne.s32.totalorder %v350_v61, 199 }
  0x41   : > { %v4586_v5 = vsel %vm357_vm5, 1.0, %v5718_v4  ;;  %v4587_v6 = vsel %vm358_vm7, 1.0, %v5718_v4  ;;  %v4588_v7 = vsel %vm359_vm8, 1.0, %v5718_v4  ;;  %v4589_v8 = vsel %vm360_vm10, 1.0, %v5718_v4 }
  0x42   : > { %v4590_v9 = vsel %vm361_vm11, 1.0, %v5718_v4  ;;  %v4591_v10 = vsel %vm362_vm13, 1.0, %v5718_v4  ;;  %v4592_v11 = vsel %vm363_vm14, 1.0, %v5718_v4  ;;  %v5894_v12 = vpack.c.bf16 %v4586_v5, %v4586_v5 }
  0x43   : > { %v5896_v13 = vpack.c.bf16 %v4587_v6, %v4587_v6  ;;  %v5898_v20 = vpack.c.bf16 %v4588_v7, %v4588_v7  ;;  %v5900_v21 = vpack.c.bf16 %v4589_v8, %v4589_v8  ;;  %v5902_v24 = vpack.c.bf16 %v4590_v9, %v4590_v9 }
  0x44   : > { %7444 = vst [vmem:[#allocation9_spill] sm:$0xff] %v5894_v12  ;;  %v5904_v25 = vpack.c.bf16 %v4591_v10, %v4591_v10  ;;  %v5906_v26 = vpack.c.bf16 %v4592_v11, %v4592_v11  ;;  %vm386_vm9 = vcmp.ne.s32.totalorder %v351_v62, 199  ;;  %vm387_vm12 = vcmp.ne.s32.totalorder %v352_v63, 199 }
  0x45   : > { %vm388_vm15 = vcmp.ne.s32.totalorder %v353_v0, 199  ;;  %vm389_vm0 = vcmp.ne.s32.totalorder %v354_v1, 199  ;;  %vm390_vm1 = vcmp.ne.s32.totalorder %v355_v2, 199  ;;  %vm391_vm2 = vcmp.ne.s32.totalorder %v356_v3, 199 }
  0x46   : > { %v4593_v27 = vsel %vm385_vm6, 1.0, %v5718_v4  ;;  %v4594_v28 = vsel %vm386_vm9, 1.0, %v5718_v4  ;;  %v4595_v29 = vsel %vm387_vm12, 1.0, %v5718_v4  ;;  %v4596_v30 = vsel %vm388_vm15, 1.0, %v5718_v4 }
  0x47   : > { %v4597_v31 = vsel %vm389_vm0, 1.0, %v5718_v4  ;;  %v4598_v32 = vsel %vm390_vm1, 1.0, %v5718_v4  ;;  %v4599_v33 = vsel %vm391_vm2, 1.0, %v5718_v4  ;;  %v5908_v34 = vpack.c.bf16 %v4593_v27, %v4593_v27 }
  0x48   : > { %v5910_v35 = vpack.c.bf16 %v4594_v28, %v4594_v28  ;;  %v5912_v36 = vpack.c.bf16 %v4595_v29, %v4595_v29  ;;  %v5914_v37 = vpack.c.bf16 %v4596_v30, %v4596_v30  ;;  %v5916_v38 = vpack.c.bf16 %v4597_v31, %v4597_v31 }
  0x49   : > { %v5918_v39 = vpack.c.bf16 %v4598_v32, %v4598_v32  ;;  %v5920_v40 = vpack.c.bf16 %v4599_v33, %v4599_v33 }
  0x4a LB: >> { %s5928_s22 = sshll.u32 %s5712_s21, 2  ;;  %s5719_s5 = smov 72   ;;  %vm639_vm4 = vcmask 1043456   ;;  %vm535_vm3 = vcmask 588800   ;;  %vm546_vm5 = vcmask 130048   ;;  %vm557_vm7 = vcmask 719872   ;;  %s5712_s21 = sphi %s5922_s21, %s418_s21  }
  0x4b   : >> { %v7445_v12 = vld [vmem:[#allocation9_spill] sm:$0xff]  ;;  %p437_p2 = scmp.gt.s32.totalorder %s5928_s22, 0  ;;  %p4609_p3 = scmp.lt.s32.totalorder %s5928_s22, 47  ;;  %vm776_vm8 = vcmask 1039360   ;;  %vm700_vm10 = vcmask 7168   ;;  %vm805_vm11 = vcmask 252928  }
  0x4c   : >> { %p441_p5 = scmp.ge.s32.totalorder %s5928_s22, 0  ;;  %p442_p11 = scmp.lt.s32.totalorder %s5928_s22, 48  ;;  %vm1250_vm13 = vcmask 457728   ;;  %vm1353_vm14 = vcmask 588804   ;;  %vm1390_vm9 = vcmask 916480  }
  0x4d   : >> { %s438_s23 = scalar_select %p437_p2, %s5928_s22, 0  ;;  %vm6389_vm6 = vmor %vm1353_vm14, %vm639_vm4 }
  0x4e   : >> { %p443_p12 = pnand %p442_p11, %p441_p5  ;;  %s453_s24 = sadd.s32 1, %s5928_s22 }
  0x4f   : >> { %s7463_s23 = smov (!%p4609_p3, %s438_s23), 47  ;;  %p454_p13 = scmp.gt.s32.totalorder %s453_s24, 0 }
  0x50   : >> { %s4616_s25 = scalar_select %p443_p12, 0, 1 }
  0x51   : >> { %s5141_s26 = sshll.u32 %s7463_s23, 3  ;;  %p4617_p1 = scmp.lt.s32.totalorder %s453_s24, 47 }
  0x52   : >> { %s447_s27 = scalar_lea.vmem %s5816_s8, %s5141_s26  ;;  %p5451_p0 = scmp.eq.s32.totalorder %s4616_s25, 1 }
  0x53   : >> { %s455_s28 = scalar_select %p454_p13, %s453_s24, 0 }
  0x54   : >> { %s5452_s29 = scalar_select %p5451_p0, 255, 0 }
  0x55   : >> { %p458_p4 = scmp.ge.s32.totalorder %s453_s24, 0  ;;  %p459_p7 = scmp.lt.s32.totalorder %s453_s24, 48 }
  0x56   : >> { %v5453_v41 = vld [vmem:[%s447_s27] sm:%s5452_s29]  ;;  %s470_s30 = sadd.s32 2, %s5928_s22  ;;  %s7465_s28 = smov (!%p4617_p1, %s455_s28), 47 }
  0x57   : >> { %v5938_v42 = vcombine.high %v5453_v41, %v5453_v41  ;;  %v5940_v43 = vcombine.low %v5453_v41, %v5453_v41  ;;  %p460_p8 = pnand %p459_p7, %p458_p4  ;;  %p471_p10 = scmp.gt.s32.totalorder %s470_s30, 0 }
  0x58   : >> { %s5144_s6 = sshll.u32 %s7465_s28, 3  ;;  %p4625_p9 = scmp.lt.s32.totalorder %s470_s30, 47 }
  0x59   : >> { %533 = vrot.lane.b32.xlu1 %v5938_v42, %s5719_s5  ;;  %531 = vrot.lane.b32.xlu0 %v5940_v43, %s5719_s5  ;;  %s464_s7 = scalar_lea.vmem %s5816_s8, %s5144_s6  ;;  %p475_p6 = scmp.ge.s32.totalorder %s470_s30, 0 }
  0x5a   : >> { %s4624_s9 = scalar_select %p460_p8, 0, 1 }
  0x5b   : >> { %s472_s10 = scalar_select %p471_p10, %s470_s30, 0 }
  0x5c   : >> { %p5464_p2 = scmp.eq.s32.totalorder %s4624_s9, 1  ;;  %p476_p3 = scmp.lt.s32.totalorder %s470_s30, 48 }
  0x5d   : >> { %s7467_s10 = smov (!%p4625_p9, %s472_s10), 47  ;;  %s487_s16 = sadd.s32 3, %s5928_s22 }
  0x5e   : >> { %s5465_s12 = scalar_select %p5464_p2, 255, 0 }
  0x5f   : >> { %p477_p5 = pnand %p476_p3, %p475_p6  ;;  %s5147_s13 = sshll.u32 %s7467_s10, 3 }
  0x60   : >> { %v5466_v44 = vld [vmem:[%s464_s7] sm:%s5465_s12]  ;;  %s481_s14 = scalar_lea.vmem %s5816_s8, %s5147_s13  ;;  %p488_p11 = scmp.gt.s32.totalorder %s487_s16, 0 }
  0x61   : >> { %v5949_v45 = vcombine.low %v5466_v44, %v5466_v44  ;;  %s4632_s17 = scalar_select %p477_p5, 0, 1  ;;  %v5953_v46 = vcombine.high %v5466_v44, %v5466_v44 }
  0x62   : >> { %p4633_p12 = scmp.lt.s32.totalorder %s487_s16, 47  ;;  %p492_p0 = scmp.ge.s32.totalorder %s487_s16, 0 }
  0x63   : >> { %571 = vrot.lane.b32.xlu1 %v5949_v45, %s5719_s5  ;;  %p5472_p13 = scmp.eq.s32.totalorder %s4632_s17, 1  ;;  %p493_p1 = scmp.lt.s32.totalorder %s487_s16, 48 }
  0x64   : >> { %s489_s18 = scalar_select %p488_p11, %s487_s16, 0 }
  0x65   : >> { %s5473_s19 = scalar_select %p5472_p13, 255, 0 }
  0x66   : >> { %s7469_s18 = smov (!%p4633_p12, %s489_s18), 47  ;;  %s504_s20 = sadd.s32 4, %s5928_s22 }
  0x67   : >> { %v5474_v47 = vld [vmem:[%s481_s14] sm:%s5473_s19]  ;;  %573 = vrot.lane.b32.xlu1 %v5953_v46, %s5719_s5  ;;  %s5150_s23 = sshll.u32 %s7469_s18, 3  ;;  %p505_p4 = scmp.gt.s32.totalorder %s504_s20, 0 }
  0x68   : >> { %v4655_v48 = vcombine.low %v5474_v47, %v5474_v47  ;;  %p494_p7 = pnand %p493_p1, %p492_p0  ;;  %s498_s24 = scalar_lea.vmem %s5816_s8, %s5150_s23  ;;  %v4656_v49 = vcombine.high %v5474_v47, %v5474_v47 }
  0x69   : >> { %s506_s25 = scalar_select %p505_p4, %s504_s20, 0 }
  0x6a   : >> { %600 = vrot.lane.b32.xlu0 %v4655_v48, %s5719_s5  ;;  %s4640_s26 = scalar_select %p494_p7, 0, 1 }
  0x6b   : >> { %p4641_p8 = scmp.lt.s32.totalorder %s504_s20, 47  ;;  %p509_p10 = scmp.ge.s32.totalorder %s504_s20, 0 }
  0x6c   : >> { %p5490_p9 = scmp.eq.s32.totalorder %s4640_s26, 1  ;;  %p510_p6 = scmp.lt.s32.totalorder %s504_s20, 48 }
  0x6d   : >> { %s7471_s25 = smov (!%p4641_p8, %s506_s25), 47  ;;  %s420_s30 = sadd.s32 4294967295, %s5928_s22 }
  0x6e   : >> { %602 = vrot.lane.b32.xlu0 %v4656_v49, %s5719_s5  ;;  %s5491_s27 = scalar_select %p5490_p9, 255, 0 }
  0x6f   : >> { %p511_p2 = pnand %p510_p6, %p509_p10  ;;  %s5153_s28 = sshll.u32 %s7471_s25, 3 }
  0x70   : >> { %v5492_v50 = vld [vmem:[%s498_s24] sm:%s5491_s27]  ;;  %s515_s29 = scalar_lea.vmem %s5816_s8, %s5153_s28  ;;  %p421_p3 = scmp.gt.s32.totalorder %s420_s30, 0 }
  0x71   : >> { %v4658_v51 = vcombine.high %v5492_v50, %v5492_v50  ;;  %v4657_v52 = vcombine.low %v5492_v50, %v5492_v50  ;;  %s4648_s6 = scalar_select %p511_p2, 0, 1 }
  0x72   : >> { %p4601_p5 = scmp.lt.s32.totalorder %s420_s30, 47  ;;  %s5720_s7 = smov 16  }
  0x73   : >> { %607 = vrot.lane.b32.xlu1 %v4658_v51, %s5720_s7  ;;  %605 = vrot.lane.b32.xlu0 %v4657_v52, %s5720_s7  ;;  %p5503_p11 = scmp.eq.s32.totalorder %s4648_s6, 1  ;;  %p425_p12 = scmp.ge.s32.totalorder %s420_s30, 0 }
  0x74   : >> { %s422_s9 = scalar_select %p421_p3, %s420_s30, 0 }
  0x75   : >> { %s5504_s5 = scalar_select %p5503_p11, 255, 0 }
  0x76   : >> { %s7473_s9 = smov (!%p4601_p5, %s422_s9), 47  ;;  %p426_p13 = scmp.lt.s32.totalorder %s420_s30, 48 }
  0x77   : >> { %578 = vrot.lane.b32.xlu1 %v4656_v49, %s5720_s7  ;;  %576 = vrot.lane.b32.xlu0 %v4655_v48, %s5720_s7  ;;  %v5505_v53 = vld [vmem:[%s515_s29] sm:%s5504_s5]  ;;  %s5138_s22 = sshll.u32 %s7473_s9, 3  ;;  %s5721_s10 = smov 88  }
  0x78   : >> { %v4659_v54 = vcombine.low %v5505_v53, %v5505_v53  ;;  %p427_p0 = pnand %p426_p13, %p425_p12  ;;  %s431_s13 = scalar_lea.vmem %s5816_s8, %s5138_s22  ;;  %v4660_v55 = vcombine.high %v5505_v53, %v5505_v53 }
  0x79   : >> { %s5722_s16 = smov 127   ;;  %s5723_s17 = smov 1  }
  0x7a   : >> { %s4608_s12 = scalar_select %p427_p0, 0, 1 }
  0x7b   : >> { %586 = vrot.lane.b32.xlu1 %v4657_v52, %s5721_s10  ;;  %615 = vrot.lane.b32.xlu0 %v4659_v54, %s5721_s10  ;;  %s5724_s18 = smov 97   ;;  %s5726_s19 = smov 31  }
  0x7c   : >> { %p5516_p1 = scmp.eq.s32.totalorder %s4608_s12, 1  ;;  %s5727_s20 = smov 56  }
  0x7d   : >> { %s5728_s23 = smov 112   ;;  %s4674_s24 = sshll.u32 %s5712_s21, 6 }
  0x7e   : >> { %s5517_s14 = scalar_select %p5516_p1, 255, 0 }
  0x7f   : >> { %544 = vrot.lane.b32.xlu1 %v5953_v46, %s5720_s7  ;;  %542 = vrot.lane.b32.xlu0 %v5949_v45, %s5720_s7  ;;  %s1352_s25 = scalar_lea.vmem [#allocation2], %s4674_s24  ;;  %s5160_s26 = sadd.s32 32, %s4674_s24 }
  0x80   : >> { %v5518_v56 = vld [vmem:[%s431_s13] sm:%s5517_s14]  ;;  %s1399_s27 = sshra.s32 %s5160_s26, 3  ;;  %s418_s21 = sadd.s32 1, %s5712_s21  }
  0x81   : >> { %v4649_v57 = vcombine.low %v5518_v56, %v5518_v56  ;;  %v4650_v60 = vcombine.high %v5518_v56, %v5518_v56  ;;  %s5165_s28 = sshll.u32 %s1399_s27, 3  ;;  %p415_p4 = scmp.ge.s32.totalorder %s418_s21, 12  }
  0x82   : >> { %s1403_s29 = scalar_lea.vmem [#allocation2], %s5165_s28  ;;  %s5730_s21 = smov (%p415_p4), 127   ;;  %vm2225_vm12 = vcmask (%p415_p4), 580608   ;;  %vm4380_vm15 = vcmask (%p415_p4), 814080  }
  0x83   : >> { %617 = vrot.lane.b32.xlu1 %v4660_v55, %s5721_s10  ;;  %553 = vrot.lane.b32.xlu0 %v4655_v48, %s5721_s10  ;;  %v5974_v58 = vsel %vm639_vm4, %v4649_v57, %v5940_v43  ;;  %s5731_s8 = smov (%p415_p4), 71  }
  0x87   : >> { %588 = vrot.lane.b32.xlu0 %v4658_v51, %s5721_s10  ;;  %555 = vrot.lane.b32.xlu1 %v4656_v49, %s5721_s10 }
  0x8b   : >> { %748 = vrot.lane.b32.xlu1 %v5974_v58, %s5722_s16  ;;  %762 = vrot.lane.b32.xlu0 %v5949_v45, %s5722_s16 }
  0x8f   : >> { %672 = vrot.lane.b32.xlu1 %v5974_v58, %s5723_s17  ;;  %686 = vrot.lane.b32.xlu0 %v5949_v45, %s5723_s17 }
  0xcb   : >> { %v534_v59 = vpop.permute.xlu1 %533  ;;  %v532_v61 = vpop.permute.xlu0 %531 }
  0xcc   : >> { %v562_v63 = vsel %vm535_vm3, %v4650_v60, %v532_v61  ;;  %v536_v6 = vsel %vm535_vm3, %v532_v61, %v534_v59 }
  0xd5   : >> { %v572_v62 = vpop.permute.xlu1 %571 }
  0xd6   : >> { %v593_v0 = vsel %vm535_vm3, %v5938_v42, %v572_v62 }
  0xd7   : >> { %v633_v1 = vrot.slane %v593_v0, 4 }
  0xd9   : >> { %v574_v2 = vpop.permute.xlu1 %573  ;;  %v5988_v3 = vsel %vm639_vm4, %v562_v63, %v633_v1 }
  0xda   : >> { %v575_v4 = vsel %vm535_vm3, %v572_v62, %v574_v2  ;;  %v830_v8 = vrot.slane %v5988_v3, 4 }
  0xdb   : >> { %v634_v5 = vrot.slane %v575_v4, 4 }
  0xdc   : >> { %v601_v7 = vpop.permute.xlu0 %600 }
  0xdd   : >> { %v622_v9 = vsel %vm535_vm3, %v5953_v46, %v601_v7  ;;  %v5996_v10 = vsel %vm639_vm4, %v536_v6, %v634_v5 }
  0xde   : >> { %v838_v11 = vrot.slane %v622_v9, 4  ;;  %764 = vrot.lane.b32.xlu1 %v622_v9, %s5722_s16  ;;  %v831_v28 = vrot.slane %v5996_v10, 4 }
  0xe0   : >> { %v603_v27 = vpop.permute.xlu0 %602  ;;  %v6003_v29 = vsel %vm639_vm4, %v830_v8, %v838_v11 }
  0xe1   : >> { %v604_v30 = vsel %vm535_vm3, %v601_v7, %v603_v27 }
  0xe2   : >> { %688 = vrot.lane.b32.xlu1 %v622_v9, %s5723_s17  ;;  %v840_v31 = vrot.slane %v604_v30, 4 }
  0xe4   : >> { %v6010_v32 = vsel %vm639_vm4, %v831_v28, %v840_v31 }
  0xe5   : >> { %v608_v33 = vpop.permute.xlu1 %607  ;;  %v606_v41 = vpop.permute.xlu0 %605 }
  0xe6   : >> { %v609_v44 = vsel %vm546_vm5, %v606_v41, %v608_v33  ;;  %v625_v54 = vsel %vm546_vm5, %v603_v27, %v606_v41 }
  0xe7   : >> { %v842_v60 = vrot.slane %v625_v54, 4 }
  0xe9   : >> { %v579_v42 = vpop.permute.xlu1 %578  ;;  %v577_v43 = vpop.permute.xlu0 %576 }
  0xea   : >> { %v596_v48 = vsel %vm546_vm5, %v574_v2, %v577_v43  ;;  %v580_v50 = vsel %vm546_vm5, %v577_v43, %v579_v42 }
  0xeb   : >> { %v635_v51 = vrot.slane %v596_v48, 4 }
  0xed   : >> { %v587_v46 = vpop.permute.xlu1 %586  ;;  %v616_v47 = vpop.permute.xlu0 %615 }
  0xee   : >> { %v628_v49 = vsel %vm557_vm7, %v609_v44, %v616_v47  ;;  %v599_v55 = vsel %vm557_vm7, %v580_v50, %v587_v46 }
  0xef   : >> { %770 = vrot.lane.b32.xlu1 %v628_v49, %s5722_s16  ;;  %v636_v62 = vrot.slane %v599_v55, 4  ;;  %v844_v5 = vrot.slane %v628_v49, 4 }
  0xf1   : >> { %v545_v52 = vpop.permute.xlu1 %544  ;;  %v543_v53 = vpop.permute.xlu0 %542 }
  0xf2   : >> { %v566_v56 = vsel %vm546_vm5, %v534_v59, %v543_v53  ;;  %v547_v63 = vsel %vm546_vm5, %v543_v53, %v545_v52  ;;  %v5725_v53 = vmov 0  }
  0xf3   : >> { %v6021_v57 = vsel %vm639_vm4, %v566_v56, %v635_v51  ;;  %974 = vmatprep.mubr.bf16.mxu0 %v5725_v53  ;;  %1027 = vmatprep.mubr.bf16.mxu1 %v5725_v53 }
  0xf4   : >> { %v832_v61 = vrot.slane %v6021_v57, 4  ;;  %5379 = vset.pattern.permute.xlu0 %v5725_v53  ;;  %5380 = vset.pattern.permute.xlu1 %v5725_v53 }
  0xf5   : >> { %v618_v0 = vpop.permute.xlu1 %617  ;;  %v554_v1 = vpop.permute.xlu0 %553 }
  0xf6   : >> { %v570_v2 = vsel %vm557_vm7, %v547_v63, %v554_v1  ;;  %661 = vrot.lane.b32.xlu0 %v618_v0, %s5724_s18  ;;  %v6029_v4 = vsel %vm639_vm4, %v832_v61, %v842_v60  ;;  %v619_v42 = vsel %vm557_vm7, %v616_v47, %v618_v0  ;;  %v848_v48 = vrot.slane %v618_v0, 4 }
  0xf7   : >> { %v6032_v59 = vsel %vm639_vm4, %v570_v2, %v636_v62  ;;  %v846_v50 = vrot.slane %v619_v42, 4 }
  0xf8   : >> { %v833_v6 = vrot.slane %v6032_v59, 4 }
  0xf9   : >> { %v589_v7 = vpop.permute.xlu0 %588  ;;  %v556_v9 = vpop.permute.xlu1 %555 }
  0xfa   : >> { %v590_v11 = vsel %vm557_vm7, %v587_v46, %v589_v7  ;;  %v638_v27 = vrot.slane %v589_v7, 4  ;;  %766 = vrot.lane.b32.xlu0 %v604_v30, %s5722_s16  ;;  %v558_v31 = vsel %vm557_vm7, %v554_v1, %v556_v9  ;;  %v6041_v33 = vsel %vm639_vm4, %v833_v6, %v844_v5 }
  0xfb   : >> { %v637_v41 = vrot.slane %v590_v11, 4 }
  0xfc   : >> { %v6045_v43 = vsel %vm639_vm4, %v556_v9, %v638_v27 }
  0xfd   : >> { %v7423_v44 = vrot.slane %v6045_v43, 4  ;;  %659 = vrot.lane.b32.xlu1 %v6045_v43, %s5724_s18  ;;  %v6050_v46 = vsel %vm639_vm4, %v558_v31, %v637_v41 }
  0xfe   : >> { %768 = vrot.lane.b32.xlu0 %v625_v54, %s5722_s16  ;;  %v834_v51 = vrot.slane %v6050_v46, 4 }
  0xff   : >> { %v6057_v47 = vsel %vm639_vm4, %v7423_v44, %v848_v48 }
 0x100   : >> { %v6062_v52 = vsel %vm639_vm4, %v834_v51, %v846_v50 }
 0x101   : >> { %750 = vrot.lane.b32.xlu1 %v5988_v3, %s5722_s16 }
 0x102   : >> { %690 = vrot.lane.b32.xlu0 %v604_v30, %s5723_s17  ;;  %v749_v30 = vpop.permute.xlu1 %748 }
 0x105   : >> { %692 = vrot.lane.b32.xlu1 %v625_v54, %s5723_s17  ;;  %v763_v54 = vpop.permute.xlu0 %762 }
 0x106   : >> { %752 = vrot.lane.b32.xlu0 %v5996_v10, %s5722_s16 }
 0x109   : >> { %754 = vrot.lane.b32.xlu1 %v6021_v57, %s5722_s16  ;;  %v687_v56 = vpop.permute.xlu0 %686 }
 0x10a   : >> { %674 = vrot.lane.b32.xlu0 %v5988_v3, %s5723_s17 }
 0x10d   : >> { %774 = vrot.lane.b32.xlu1 %v618_v0, %s5722_s16 }
 0x10e   : >> { %756 = vrot.lane.b32.xlu0 %v6032_v59, %s5722_s16 }
 0x111   : >> { %678 = vrot.lane.b32.xlu1 %v6021_v57, %s5723_s17 }
 0x112   : >> { %772 = vrot.lane.b32.xlu0 %v619_v42, %s5722_s16 }
 0x115   : >> { %760 = vrot.lane.b32.xlu1 %v6045_v43, %s5722_s16 }
 0x116   : >> { %676 = vrot.lane.b32.xlu0 %v5996_v10, %s5723_s17 }
 0x119   : >> { %694 = vrot.lane.b32.xlu1 %v628_v49, %s5723_s17  ;;  %v673_v49 = vpop.permute.xlu1 %672 }
 0x11a   : >> { %758 = vrot.lane.b32.xlu0 %v6050_v46, %s5722_s16 }
 0x11d   : >> { %801 = vrot.lane.b32.xlu1 %v5974_v58, %s5726_s19 }
 0x11e   : >> { %803 = vrot.lane.b32.xlu0 %v5949_v45, %s5726_s19 }
 0x121   : >> { %682 = vrot.lane.b32.xlu1 %v6050_v46, %s5723_s17 }
 0x122   : >> { %696 = vrot.lane.b32.xlu0 %v619_v42, %s5723_s17 }
 0x125   : >> { %684 = vrot.lane.b32.xlu1 %v6045_v43, %s5723_s17 }
 0x126   : >> { %680 = vrot.lane.b32.xlu0 %v6032_v59, %s5723_s17 }
 0x129   : >> { %892 = vperm.xlu1 %5380, %v5845_v19  }
 0x12a   : >> { %698 = vrot.lane.b32.xlu0 %v618_v0, %s5723_s17 }
 0x12d   : >> { %897 = vperm.xlu1 %5380, %v5853_v22  }
 0x12e   : >> { %887 = vperm.xlu0 %5379, %v5840_v18   ;;  %v5557_v18 = vld [vmem:[#allocation5 + $0x38] sm:$0xff] (%p415_p4)  }
 0x132   : >> { %902 = vperm.xlu0 %5379, %v5858_v23  }
 0x150   : >> { %v765_v55 = vpop.permute.xlu1 %764 }
 0x151   : >> { %v783_v63 = vsel %vm776_vm8, %v763_v54, %v765_v55 }
 0x152   : >> { %v821_v2 = vmul.bf16 %v783_v63, %v5908_v34 }
 0x154   : >> { %v689_v60 = vpop.permute.xlu1 %688  ;;  %v922_v27 = vsel %vm639_vm4, %v821_v2, 0 }
 0x161   : >> { %v771_v1 = vpop.permute.xlu1 %770 }
 0x168   : >> { %v662_v62 = vpop.permute.xlu0 %661 }
 0x16c   : >> { %v767_v0 = vpop.permute.xlu0 %766 }
 0x16d   : >> { %v784_v5 = vsel %vm776_vm8, %v765_v55, %v767_v0 }
 0x16e   : >> { %v822_v7 = vmul.bf16 %v784_v5, %v5910_v35 }
 0x16f   : >> { %v660_v9 = vpop.permute.xlu1 %659 }
 0x170   : >> { %v769_v11 = vpop.permute.xlu0 %768  ;;  %4663 = vmatprep.subr.msk.bf16.mxu0 %vm639_vm4, %v822_v7  ;;  %v707_v7 = vsel %vm700_vm10, %v687_v56, %v689_v60 }
 0x171   : >> { %v785_v31 = vsel %vm776_vm8, %v767_v0, %v769_v11  ;;  %949 = vmatpush1.bf16.msra.mxu0 %v922_v27  ;;  %v786_v41 = vsel %vm776_vm8, %v769_v11, %v771_v1 }
 0x172   : >> { %v823_v42 = vmul.bf16 %v785_v31, %v5912_v36  ;;  %v824_v48 = vmul.bf16 %v786_v41, %v5914_v37 }
 0x173   : >> { %v751_v50 = vpop.permute.xlu1 %750 }
 0x174   : >> { %v691_v54 = vpop.permute.xlu0 %690  ;;  %4666 = vmatprep.subr.msk.bf16.mxu1 %vm639_vm4, %v824_v48  ;;  %v928_v55 = vsel %vm639_vm4, %v823_v42, 0  ;;  %v777_v2 = vsel %vm776_vm8, %v749_v30, %v751_v50  ;;  %v829_v42 = vrot.slane %v5974_v58, 4  ;;  %v742_v48 = vmul.bf16 %v707_v7, %v5896_v13 }
 0x175   : >> { %1002 = vmatpush1.bf16.msra.mxu1 %v928_v55  ;;  %v814_v27 = vmul.bf16 %v777_v2, %v5908_v34  ;;  %v732_v55 = vsel %vm700_vm10, %v662_v62, %v687_v56 }
 0x176   : >> { %v837_v30 = vsel %vm639_vm4, %v829_v42, %v5949_v45  ;;  %v863_v56 = vsel %vm639_vm4, %v742_v48, %v830_v8 }
 0x177   : >> { %v6117_v63 = vpop.permute.xlu1 %692 }
 0x178   : >> { %v753_v0 = vpop.permute.xlu0 %752 }
 0x179   : >> { %v778_v5 = vsel %vm776_vm8, %v751_v50, %v753_v0 }
 0x17a   : >> { %v815_v11 = vmul.bf16 %v778_v5, %v5910_v35  ;;  %v741_v5 = vmul.bf16 %v732_v55, %v7445_v12  ;;  %v5564_v35 = vld [vmem:[#allocation5 + $0x20] sm:$0xff] (%p415_p4)  }
 0x17b   : >> { %v755_v31 = vpop.permute.xlu1 %754 }
 0x17c   : >> { %v675_v41 = vpop.permute.xlu0 %674  ;;  %950 = vmatprep.subr.bf16.mxu0 %v815_v11  ;;  %v779_v2 = vsel %vm776_vm8, %v753_v0, %v755_v31  ;;  %v728_v0 = vsel %vm700_vm10, %v660_v9, %v673_v49  ;;  %v859_v3 = vsel %vm639_vm4, %v741_v5, %v829_v42 }
 0x17d   : >> { %951 = vmatpush1.bf16.msra.mxu0 %v814_v27  ;;  %v701_v11 = vsel %vm700_vm10, %v673_v49, %v675_v41  ;;  %v816_v62 = vmul.bf16 %v779_v2, %v5912_v36  ;;  %v708_v27 = vsel %vm700_vm10, %v689_v60, %v691_v54  ;;  %v734_v49 = vmul.bf16 %v728_v0, %v7445_v12 }
 0x17e   : >> { %952 = vmatprep.subr.bf16.mxu0 %v6003_v29  ;;  %v709_v29 = vsel %vm700_vm10, %v691_v54, %v6117_v63  ;;  %v743_v9 = vmul.bf16 %v708_v27, %v5898_v20 }
 0x17f   : >> { %v775_v50 = vpop.permute.xlu1 %774  ;;  %v744_v8 = vmul.bf16 %v709_v29, %v5900_v21 }
 0x180   : >> { %v757_v44 = vpop.permute.xlu0 %756 }
 0x181   : >> { %v780_v58 = vsel %vm776_vm8, %v755_v31, %v757_v44  ;;  %953 = vmatpush1.bf16.msra.mxu0 %v837_v30  ;;  %v735_v31 = vmul.bf16 %v701_v11, %v5896_v13 }
 0x182   : >> { %v817_v45 = vmul.bf16 %v780_v58, %v5914_v37  ;;  %954 = vmatprep.subr.bf16.mxu0 %v863_v56 }
 0x183   : >> { %v6141_v7 = vpop.permute.xlu1 %678 }
 0x184   : >> { %v773_v55 = vpop.permute.xlu0 %772  ;;  %1003 = vmatprep.subr.bf16.mxu1 %v817_v45 }
 0x185   : >> { %v787_v48 = vsel %vm776_vm8, %v771_v1, %v773_v55  ;;  %v788_v30 = vsel %vm776_vm8, %v773_v55, %v775_v50  ;;  %955 = vmatpush1.bf16.msra.mxu0 %v859_v3  ;;  %1004 = vmatpush1.bf16.msra.mxu1 %v816_v62  ;;  %v6157_v1 = vcombine.low %v5829_v14, %v5831_v15 }
 0x186   : >> { %956 = vmatprep.subr.bf16.mxu0 %v735_v31  ;;  %1005 = vmatprep.subr.bf16.mxu1 %v6029_v4  ;;  %v825_v54 = vmul.bf16 %v787_v48, %v5916_v38  ;;  %v826_v42 = vmul.bf16 %v788_v30, %v5918_v39  ;;  %v871_v4 = vsel %vm639_vm4, %v744_v8, %v832_v61 }
 0x187   : >> { %v761_v60 = vpop.permute.xlu1 %760  ;;  %v4662_v3 = vcombine.low %v5833_v16, %v5835_v17 }
 0x188   : >> { %v677_v5 = vpop.permute.xlu0 %676  ;;  %v934_v57 = vsel %vm639_vm4, %v825_v54, 0 }
 0x189   : >> { %v703_v2 = vsel %vm700_vm10, %v677_v5, %v6141_v7  ;;  %957 = vmatpush1.bf16.msra.mxu0 %v734_v49  ;;  %1006 = vmatpush1.bf16.msra.mxu1 %v6010_v32  ;;  %v702_v58 = vsel %vm700_vm10, %v675_v41, %v677_v5  ;;  %v867_v32 = vsel %vm639_vm4, %v743_v9, %v831_v28 }
 0x18a   : >> { %1007 = vmatprep.subr.bf16.mxu1 %v871_v4  ;;  %4669 = vmatprep.subr.msk.bf16.mxu0 %vm639_vm4, %v826_v42  ;;  %v737_v56 = vmul.bf16 %v703_v2, %v5900_v21  ;;  %v736_v10 = vmul.bf16 %v702_v58, %v5898_v20  ;;  %v7446_v4 = vrot.slane %v6045_v43, 4  ;;  %v5558_v20 = vld [vmem:[#allocation5 + $0x30] sm:$0xff] (%p415_p4)  }
 0x18b   : >> { %v695_v11 = vpop.permute.xlu1 %694 }
 0x18c   : >> { %v759_v29 = vpop.permute.xlu0 %758  ;;  %4664 = vmatmul.mubr.msk.bf16.vlgmr.msra.gmra.mxu0 %vm535_vm3, %v6157_v1 }
 0x18d   : >> { %v781_v61 = vsel %vm776_vm8, %v757_v44, %v759_v29  ;;  %v782_v45 = vsel %vm776_vm8, %v759_v29, %v761_v60  ;;  %1008 = vmatpush1.bf16.msra.mxu1 %v867_v32  ;;  %1055 = vmatpush1.bf16.msra.mxu0 %v934_v57  ;;  %v710_v44 = vsel %vm700_vm10, %v6117_v63, %v695_v11 }
 0x18e   : >> { %v818_v41 = vmul.bf16 %v781_v61, %v5916_v38  ;;  %v819_v62 = vmul.bf16 %v782_v45, %v5918_v39  ;;  %1009 = vmatprep.subr.bf16.mxu1 %v737_v56  ;;  %984 = vmatprep.mubr.bf16.mxu0 %v5725_v53  ;;  %v745_v30 = vmul.bf16 %v710_v44, %v5902_v24 }
 0x18f   : >> { %v802_v0 = vpop.permute.xlu1 %801 }
 0x190   : >> { %v804_v28 = vpop.permute.xlu0 %803  ;;  %1056 = vmatprep.subr.bf16.mxu0 %v819_v62  ;;  %v808_v27 = vsel %vm805_vm11, %v761_v60, %v802_v0  ;;  %v875_v42 = vsel %vm639_vm4, %v745_v30, %v833_v6 }
 0x191   : >> { %v812_v31 = vsel %vm805_vm11, %v775_v50, %v804_v28  ;;  %1010 = vmatpush1.bf16.msra.mxu1 %v736_v10  ;;  %1057 = vmatpush1.bf16.msra.mxu0 %v818_v41  ;;  %v820_v8 = vmul.bf16 %v808_v27, %v5920_v40 }
 0x192   : >> { %v827_v55 = vmul.bf16 %v812_v31, %v5920_v40  ;;  %1058 = vmatprep.subr.bf16.mxu0 %v6062_v52  ;;  %v5565_v40 = vld [vmem:[#allocation5 + $0x18] sm:$0xff] (%p415_p4)  }
 0x193   : >> { %v683_v63 = vpop.permute.xlu1 %682 }
 0x194   : >> { %v697_v48 = vpop.permute.xlu0 %696  ;;  %4667 = vmatmul.mubr.msk.bf16.vlgmr.msra.gmra.mxu1 %vm535_vm3, %v6157_v1  ;;  %5310 = vmatprep.subr.msk.bf16.mxu1 %vm639_vm4, %v827_v55  ;;  %v940_v50 = vsel %vm639_vm4, %v827_v55, 0 }
 0x195   : >> { %v711_v49 = vsel %vm700_vm10, %v695_v11, %v697_v48  ;;  %1059 = vmatpush1.bf16.msra.mxu0 %v6041_v33  ;;  %5271 = vmatpush3.bf16.msra.mxu1 %v940_v50 }
 0x196   : >> { %v746_v52 = vmul.bf16 %v711_v49, %v5904_v25  ;;  %5272 = vmatprep.subr.bf16.mxu1 %v820_v8  ;;  %4665 = vmatmul.mubr.msk.bf16.gmra.mxu0 %vm535_vm3, %v4662_v3 }
 0x197   : >> { %1037 = vmatprep.mubr.bf16.mxu1 %v5725_v53  ;;  %1080 = vmatprep.mubr.bf16.mxu0 %v5725_v53  ;;  %v685_v2 = vpop.permute.xlu1 %684 }
 0x198   : >> { %v681_v60 = vpop.permute.xlu0 %680  ;;  %v879_v9 = vsel %vm639_vm4, %v746_v52, %v834_v51  ;;  %v706_v59 = vsel %vm700_vm10, %v683_v63, %v685_v2 }
 0x199   : >> { %v704_v54 = vsel %vm700_vm10, %v6141_v7, %v681_v60  ;;  %v705_v33 = vsel %vm700_vm10, %v681_v60, %v683_v63  ;;  %1060 = vmatprep.subr.bf16.mxu0 %v879_v9  ;;  %5273 = vmatpush3.bf16.msra.mxu1 %v820_v8  ;;  %v740_v58 = vmul.bf16 %v706_v59, %v5906_v26 }
 0x19a   : >> { %v739_v5 = vmul.bf16 %v705_v33, %v5904_v25  ;;  %1061 = vmatpush1.bf16.msra.mxu0 %v875_v42  ;;  %5274 = vmatprep.subr.bf16.mxu1 %v6057_v47  ;;  %v738_v46 = vmul.bf16 %v704_v54, %v5902_v24  ;;  %v5561_v25 = vld [vmem:[#allocation5 + $0x28] sm:$0xff] (%p415_p4)  }
 0x19c   : >> { %v699_v51 = vpop.permute.xlu0 %698  ;;  %4668 = vmatmul.mubr.msk.bf16.gmra.mxu1 %vm535_vm3, %v4662_v3  ;;  %1062 = vmatprep.subr.bf16.mxu0 %v739_v5 }
 0x19d   : >> { %v712_v7 = vsel %vm700_vm10, %v697_v48, %v699_v51  ;;  %5275 = vmatpush3.bf16.msra.mxu1 %v6057_v47  ;;  %5280 = vmatprep.mubr.msk.bf16.mxu1 %vm535_vm3, %v6157_v1 }
 0x19e   : >> { %v747_v6 = vmul.bf16 %v712_v7, %v5906_v26  ;;  %1063 = vmatpush1.bf16.msra.mxu0 %v738_v46 }
 0x1a0   : >> { %v883_v11 = vsel %vm639_vm4, %v747_v6, %v7446_v4 }
 0x1a1   : >> { %4670 = vmatmul.mubr.msk.bf16.vlgmr.msra.gmra.mxu0 %vm535_vm3, %v6157_v1  ;;  %5276 = vmatprep.subr.bf16.mxu1 %v883_v11 }
 0x1a2   : >> { %5277 = vmatpush3.bf16.msra.mxu1 %v883_v11  ;;  %1090 = vmatprep.mubr.bf16.mxu0 %v5725_v53 }
 0x1a3   : >> { %5278 = vmatprep.subr.bf16.mxu1 %v740_v58 }
 0x1a4   : >> { %v893_v30 = vpop.permute.xlu1 %892 }
 0x1a6   : >> { %5279 = vmatpush3.bf16.msra.mxu1 %v740_v58 }
 0x1a8   : >> { %v898_v46 = vpop.permute.xlu1 %897 }
 0x1a9   : >> { %4671 = vmatmul.mubr.msk.bf16.gmra.mxu0 %vm535_vm3, %v4662_v3  ;;  %5281 = vmatmul.mubr.msk.bf16.vlgmr.msra.gmra.mxu1 %vm535_vm3, %v4662_v3  ;;  %v888_v8 = vpop.permute.xlu0 %887 }
 0x1ad   : >> { %v6252_v59 = vpop.permute.xlu0 %902 }
 0x24c   : >> { %v976_v47 = vpop.f32.mrf.mxu0 }
 0x24e   : >> { %v978_v56 = vpop.f32.mrf.mxu0 }
 0x250   : >> { %v980_v43 = vpop.f32.mrf.mxu0 }
 0x252   : >> { %v6226_v32 = vpop.f32.mrf.mxu0 }
 0x254   : >> { %v1029_v29 = vpop.f32.mrf.mxu1 }
 0x256   : >> { %v6228_v57 = vpop.f32.mrf.mxu1  ;;  %v6230_v61 = vpop.f32.mrf.mxu0 }
 0x258   : >> { %v6232_v1 = vpop.f32.mrf.mxu1  ;;  %v6234_v45 = vpop.f32.mrf.mxu0 }
 0x25a   : >> { %v6236_v53 = vpop.f32.mrf.mxu1  ;;  %v990_v41 = vpop.f32.mrf.mxu0 }
 0x25c   : >> { %v6238_v62 = vpop.f32.mrf.mxu1  ;;  %v6240_v10 = vpop.f32.mrf.mxu0 }
 0x25e   : >> { %v6242_v0 = vpop.f32.mrf.mxu1 }
 0x260   : >> { %v6244_v27 = vpop.f32.mrf.mxu1 }
 0x261   : >> { %v1082_v28 = vpop.f32.mrf.mxu0 }
 0x262   : >> { %v6246_v55 = vpop.f32.mrf.mxu1  ;;  %v6248_v60 = vadd.f32 %v1082_v28, %v888_v8 }
 0x263   : >> { %v1084_v31 = vpop.f32.mrf.mxu0 }
 0x264   : >> { %v1085_v63 = vadd.f32 %v1084_v31, %v888_v8  ;;  %v7425_v6 = vmax.f32 %v6248_v60, 0.0 }
 0x265   : >> { %v1086_v44 = vpop.f32.mrf.mxu0 }
 0x266   : >> { %v6250_v9 = vadd.f32 %v1086_v44, %v893_v30  ;;  %v1155_v42 = vmax.f32 %v1085_v63, 0.0 }
 0x267   : >> { %v1088_v3 = vpop.f32.mrf.mxu0 }
 0x268   : >> { %v1089_v51 = vadd.f32 %v1088_v3, %v893_v30  ;;  %v1161_v4 = vmax.f32 %v6250_v9, 0.0 }
 0x269   : >> { %v1092_v48 = vpop.f32.mrf.mxu0  ;;  %v5282_v50 = vpop.f32.mrf.mxu1 }
 0x26a   : >> { %v6256_v28 = vadd.f32 %v1092_v48, %v898_v46  ;;  %v1144_v63 = vadd.f32 %v5282_v50, %v898_v46  ;;  %v1162_v3 = vmax.f32 %v1089_v51, 0.0  ;;  %v5386_v12 = vpack.i.bf16 %v1161_v4, %v7425_v6 }
 0x26b   : >> { %v1094_v49 = vpop.f32.mrf.mxu0  ;;  %v1135_v52 = vpop.f32.mrf.mxu1  ;;  %v6268_v48 = vadd.f32 %v980_v43, %v893_v30  ;;  %v6274_v51 = vadd.f32 %v978_v56, %v888_v8  ;;  %v6288_v56 = vadd.f32 %v990_v41, %v6252_v59 }
 0x26c   : >> { %v1136_v54 = vadd.f32 %v1135_v52, %v888_v8  ;;  %v1095_v11 = vadd.f32 %v1094_v49, %v898_v46 }
 0x26d   : >> { %v5283_v33 = vpop.f32.mrf.mxu1  ;;  %v1096_v2 = vpop.f32.mrf.mxu0 }
 0x26e   : >> { %v1156_v5 = vmax.f32 %v1136_v54, 0.0  ;;  %v6259_v31 = vadd.f32 %v1096_v2, %v6252_v59  ;;  %v1169_v49 = vmax.f32 %v1095_v11, 0.0  ;;  %v1147_v6 = vadd.f32 %v5283_v33, %v6252_v59 }
 0x26f   : >> { %v1138_v7 = vpop.f32.mrf.mxu1  ;;  %v1098_v52 = vpop.f32.mrf.mxu0  ;;  %v7430_v11 = vmax.f32 %v6268_v48, 0.0 }
 0x270   : >> { %v5381_v58 = vpack.i.bf16 %v1156_v5, %v1155_v42  ;;  %v1139_v44 = vadd.f32 %v1138_v7, %v893_v30  ;;  %v6266_v42 = vadd.f32 %v976_v47, %v888_v8  ;;  %v7434_v5 = vmax.f32 %v6256_v28, 0.0 }
 0x271   : >> { %v7435_v50 = vmax.f32 %v6259_v31, 0.0  ;;  %v1099_v2 = vadd.f32 %v1098_v52, %v6252_v59 }
 0x272   : >> { %5382 = vrot.lane.b32.xlu1 %v5381_v58, %s5727_s20  ;;  %v1163_v54 = vmax.f32 %v1139_v44, 0.0  ;;  %v1170_v58 = vmax.f32 %v1144_v63, 0.0  ;;  %v1030_v44 = vadd.f32 %v1029_v29, %v888_v8  ;;  %v7432_v43 = vmax.f32 %v6266_v42, 0.0 }
 0x273   : >> { %v5406_v52 = vpack.i.bf16 %v7435_v50, %v7434_v5  ;;  %v1176_v63 = vmax.f32 %v1099_v2, 0.0  ;;  %v7431_v29 = vmax.f32 %v6274_v51, 0.0 }
 0x274   : >> { %v5391_v7 = vpack.i.bf16 %v1163_v54, %v1162_v3  ;;  %v5396_v47 = vpack.i.bf16 %v1170_v58, %v1169_v49  ;;  %v1152_v33 = vmax.f32 %v1030_v44, 0.0  ;;  %v1177_v3 = vmax.f32 %v1147_v6, 0.0 }
 0x275   : >> { %v6294_v54 = vadd.f32 %v6228_v57, %v888_v8  ;;  %v6297_v49 = vadd.f32 %v6236_v53, %v893_v30  ;;  %v6306_v6 = vadd.f32 %v6226_v32, %v893_v30  ;;  %v1034_v58 = vadd.f32 %v6232_v1, %v893_v30 }
 0x276   : >> { %5387 = vrot.lane.b32.xlu1 %v5386_v12, %s5727_s20  ;;  %5392 = vrot.lane.b32.xlu0 %v5391_v7, %s5727_s20  ;;  %v6285_v12 = vadd.f32 %v6230_v61, %v898_v46  ;;  %v5401_v61 = vpack.i.bf16 %v7430_v11, %v7432_v43  ;;  %v5411_v41 = vpack.i.bf16 %v1177_v3, %v1176_v63  ;;  %v7427_v7 = vmax.f32 %v6288_v56, 0.0 }
 0x277   : >> { %v5421_v57 = vpack.i.bf16 %v1152_v33, %v7431_v29  ;;  %v1153_v53 = vmax.f32 %v6294_v54, 0.0  ;;  %v1160_v8 = vmax.f32 %v6297_v49, 0.0  ;;  %v6317_v44 = vadd.f32 %v6240_v10, %v6252_v59 }
 0x278   : >> { %v7429_v2 = vmax.f32 %v6285_v12, 0.0  ;;  %v6320_v32 = vadd.f32 %v6242_v0, %v898_v46  ;;  %v6327_v30 = vadd.f32 %v6234_v45, %v898_v46  ;;  %v1159_v63 = vmax.f32 %v1034_v58, 0.0 }
 0x279   : >> { %v7426_v3 = vmax.f32 %v6317_v44, 0.0  ;;  %v1044_v45 = vadd.f32 %v6244_v27, %v6252_v59 }
 0x27a   : >> { %5397 = vrot.lane.b32.xlu1 %v5396_v47, %s5727_s20  ;;  %5407 = vrot.lane.b32.xlu0 %v5406_v52, %s5727_s20  ;;  %v5416_v1 = vpack.i.bf16 %v7427_v7, %v7429_v2  ;;  %v1040_v47 = vadd.f32 %v6238_v62, %v898_v46  ;;  %v7433_v52 = vmax.f32 %v6306_v6, 0.0  ;;  %v5431_v0 = vpack.i.bf16 %v1160_v8, %v1159_v63 }
 0x27b   : >> { %v1167_v33 = vmax.f32 %v6320_v32, 0.0  ;;  %v6341_v62 = vadd.f32 %v6246_v55, %v6252_v59  ;;  %v7428_v46 = vmax.f32 %v6327_v30, 0.0 }
 0x27c   : >> { %v5426_v10 = vpack.i.bf16 %v7433_v52, %v1153_v53  ;;  %v1166_v54 = vmax.f32 %v1040_v47, 0.0 }
 0x27d   : >> { %v5441_v49 = vpack.i.bf16 %v7426_v3, %v1167_v33 }
 0x27e   : >> { %5402 = vrot.lane.b32.xlu1 %v5401_v61, %s5721_s10  ;;  %5412 = vrot.lane.b32.xlu0 %v5411_v41, %s5727_s20  ;;  %v1173_v61 = vmax.f32 %v1044_v45, 0.0  ;;  %v1174_v41 = vmax.f32 %v6341_v62, 0.0  ;;  %v5436_v27 = vpack.i.bf16 %v1166_v54, %v7428_v46 }
 0x280   : >> { %v5446_v55 = vpack.i.bf16 %v1174_v41, %v1173_v61 }
 0x282   : >> { %5422 = vrot.lane.b32.xlu1 %v5421_v57, %s5727_s20  ;;  %5417 = vrot.lane.b32.xlu0 %v5416_v1, %s5721_s10 }
 0x286   : >> { %5432 = vrot.lane.b32.xlu1 %v5431_v0, %s5727_s20  ;;  %5427 = vrot.lane.b32.xlu0 %v5426_v10, %s5727_s20 }
 0x28a   : >> { %5442 = vrot.lane.b32.xlu1 %v5441_v49, %s5727_s20  ;;  %5437 = vrot.lane.b32.xlu0 %v5436_v27, %s5727_s20 }
 0x28e   : >> { %5447 = vrot.lane.b32.xlu0 %v5446_v55, %s5727_s20 }
 0x2e4   : >> { %v5383_v59 = vpop.permute.xlu1 %5382 }
 0x2e5   : >> { %v5385_v47 = vunpack.i.h.bf16 %v5383_v59  ;;  %v5384_v63 = vunpack.i.l.bf16 %v5383_v59 }
 0x2e7   : >> { %v1254_v61 = vsel %vm1250_vm13, %v5384_v63, %v5385_v47 }
 0x2e8   : >> { %v5388_v58 = vpop.permute.xlu1 %5387  ;;  %v5393_v57 = vpop.permute.xlu0 %5392 }
 0x2e9   : >> { %v5389_v32 = vunpack.i.l.bf16 %v5388_v58  ;;  %v5394_v10 = vunpack.i.l.bf16 %v5393_v57  ;;  %v5390_v0 = vunpack.i.h.bf16 %v5388_v58  ;;  %v5395_v62 = vunpack.i.h.bf16 %v5393_v57 }
 0x2eb   : >> { %v1253_v54 = vsel %vm1250_vm13, %v5389_v32, %v5384_v63  ;;  %v1257_v55 = vsel %vm1250_vm13, %v5390_v0, %v5394_v10  ;;  %v1258_v11 = vsel %vm1250_vm13, %v5394_v10, %v5395_v62  ;;  %v7447_v0 = vmax.f32 %v6248_v60, 0.0 }
 0x2ec   : >> { %v5398_v1 = vpop.permute.xlu1 %5397  ;;  %v5408_v45 = vpop.permute.xlu0 %5407  ;;  %v1305_v58 = vmax.f32 %v1153_v53, %v1253_v54  ;;  %v1309_v47 = vmax.f32 %v1160_v8, %v1257_v55  ;;  %v7448_v55 = vmax.f32 %v6259_v31, 0.0  ;;  %v7450_v31 = vmax.f32 %v6306_v6, 0.0 }
 0x2ed   : >> { %v5409_v49 = vunpack.i.l.bf16 %v5408_v45  ;;  %v5399_v3 = vunpack.i.l.bf16 %v5398_v1  ;;  %v5400_v59 = vunpack.i.h.bf16 %v5398_v1  ;;  %v5410_v43 = vunpack.i.h.bf16 %v5408_v45 }
 0x2ef   : >> { %v1261_v5 = vsel %vm1250_vm13, %v5409_v49, %v5399_v3 }
 0x2f0   : >> { %v5403_v27 = vpop.permute.xlu1 %5402  ;;  %v5413_v7 = vpop.permute.xlu0 %5412  ;;  %v1313_v8 = vmax.f32 %v1167_v33, %v1261_v5 }
 0x2f1   : >> { %v5405_v46 = vunpack.i.h.bf16 %v5403_v27  ;;  %v5404_v2 = vunpack.i.l.bf16 %v5403_v27  ;;  %v5414_v29 = vunpack.i.l.bf16 %v5413_v7  ;;  %v5415_v52 = vunpack.i.h.bf16 %v5413_v7 }
 0x2f3   : >> { %v1300_v57 = vsel %vm557_vm7, %v1258_v11, %v5405_v46  ;;  %v1299_v32 = vsel %vm557_vm7, %v1254_v61, %v5404_v2  ;;  %v1265_v1 = vsel %vm1250_vm13, %v5410_v43, %v5414_v29  ;;  %v1262_v2 = vsel %vm1250_vm13, %v5399_v3, %v5400_v59 }
 0x2f4   : >> { %v5423_v50 = vpop.permute.xlu1 %5422  ;;  %v1310_v63 = vmax.f32 %v1161_v4, %v1300_v57  ;;  %v1306_v27 = vmax.f32 %v7447_v0, %v1299_v32  ;;  %v5418_v10 = vpop.permute.xlu0 %5417  ;;  %v1266_v54 = vsel %vm1250_vm13, %v5414_v29, %v5415_v52  ;;  %v1317_v43 = vmax.f32 %v1174_v41, %v1265_v1 }
 0x2f5   : >> { %v5425_v53 = vunpack.i.h.bf16 %v5423_v50  ;;  %v5424_v45 = vunpack.i.l.bf16 %v5423_v50  ;;  %v5420_v7 = vunpack.i.h.bf16 %v5418_v10  ;;  %v5419_v62 = vunpack.i.l.bf16 %v5418_v10 }
 0x2f6   : >> { %v5162_v11 = vpack.c.bf16 %v1310_v63, %v1309_v47  ;;  %v5161_v46 = vpack.c.bf16 %v1306_v27, %v1305_v58  ;;  %v7449_v3 = vmax.f32 %v6256_v28, 0.0  ;;  %v7451_v0 = vmax.f32 %v6266_v42, 0.0 }
 0x2f7   : >> { %v1302_v9 = vsel %vm557_vm7, %v1266_v54, %v5420_v7  ;;  %v1301_v60 = vsel %vm557_vm7, %v1262_v2, %v5419_v62  ;;  %v1251_v5 = vsel %vm1250_vm13, %v5424_v45, %v5425_v53  ;;  %v7452_v1 = vmax.f32 %v6274_v51, 0.0 }
 0x2f8   : >> { %v5433_v4 = vpop.permute.xlu1 %5432  ;;  %1380 = vrot.lane.b32.xlu0 %v5162_v11, %s5728_s23  ;;  %1378 = vrot.lane.b32.xlu1 %v5161_v46, %s5728_s23  ;;  %v5428_v50 = vpop.permute.xlu0 %5427  ;;  %v1318_v58 = vmax.f32 %v7448_v55, %v1302_v9  ;;  %v1314_v29 = vmax.f32 %v7449_v3, %v1301_v60  ;;  %v1303_v27 = vmax.f32 %v7451_v0, %v1251_v5  ;;  %v7453_v45 = vmax.f32 %v6268_v48, 0.0 }
 0x2f9   : >> { %v5435_v49 = vunpack.i.h.bf16 %v5433_v4  ;;  %v5434_v61 = vunpack.i.l.bf16 %v5433_v4  ;;  %v5430_v52 = vunpack.i.h.bf16 %v5428_v50  ;;  %v5429_v33 = vunpack.i.l.bf16 %v5428_v50 }
 0x2fa   : >> { %v5164_v57 = vpack.c.bf16 %v1318_v58, %v1317_v43  ;;  %v5163_v32 = vpack.c.bf16 %v1314_v29, %v1313_v8  ;;  %v7456_v48 = vmax.f32 %v6285_v12, 0.0  ;;  %v7457_v9 = vmax.f32 %v6327_v30, 0.0 }
 0x2fb   : >> { %v1256_v59 = vsel %vm1250_vm13, %v5434_v61, %v5435_v49  ;;  %v1252_v41 = vsel %vm1250_vm13, %v5425_v53, %v5429_v33  ;;  %v1255_v47 = vsel %vm1250_vm13, %v5430_v52, %v5434_v61  ;;  %v7458_v3 = vmax.f32 %v6288_v56, 0.0 }
 0x2fc   : >> { %v1308_v63 = vmax.f32 %v7450_v31, %v1256_v59  ;;  %v5443_v28 = vpop.permute.xlu1 %5442  ;;  %v1304_v10 = vmax.f32 %v7452_v1, %v1252_v41  ;;  %v1307_v7 = vmax.f32 %v7453_v45, %v1255_v47  ;;  %v5438_v62 = vpop.permute.xlu0 %5437  ;;  %1384 = vrot.lane.b32.xlu0 %v5164_v57, %s5728_s23  ;;  %1382 = vrot.lane.b32.xlu1 %v5163_v32, %s5728_s23  ;;  %v7459_v12 = vmax.f32 %v6317_v44, 0.0 }
 0x2fd   : >> { %v5444_v11 = vunpack.i.l.bf16 %v5443_v28  ;;  %v5440_v53 = vunpack.i.h.bf16 %v5438_v62  ;;  %v5439_v46 = vunpack.i.l.bf16 %v5438_v62  ;;  %v5445_v43 = vunpack.i.h.bf16 %v5443_v28 }
 0x2fe   : >> { %v5154_v42 = vpack.c.bf16 %v1304_v10, %v1303_v27  ;;  %v5155_v2 = vpack.c.bf16 %v1308_v63, %v1307_v7  ;;  %v5729_v7 = vmov (%p415_p4), 0  }
 0x2ff   : >> { %v1259_v51 = vsel %vm1250_vm13, %v5439_v46, %v5440_v53  ;;  %v1260_v54 = vsel %vm1250_vm13, %v5440_v53, %v5444_v11  ;;  %3579 = vmatprep.subr.bf16.mxu0 (%p415_p4), %v5729_v7  ;;  %5284 = vmatprep.subr.bf16.mxu1 (%p415_p4), %v5729_v7  ;;  %v5568_v53 = vld [vmem:[#allocation5 + $0x10] sm:$0xff] (%p415_p4)  }
 0x300   : >> { %1355 = vst.msk [vmem:[%s1352_s25] sm:$0xff] %vm6389_vm6, %v5154_v42  ;;  %1356 = vst.msk [vmem:[%s1352_s25 + $0x8] sm:$0xff] %vm6389_vm6, %v5155_v2  ;;  %v1311_v8 = vmax.f32 %v7456_v48, %v1259_v51  ;;  %v1312_v60 = vmax.f32 %v7457_v9, %v1260_v54  ;;  %v5448_v4 = vpop.permute.xlu0 %5447  ;;  %3580 = vmatpush1.bf16.msra.mxu0 (%p415_p4), %v5557_v18  ;;  %5297 = vmatpush1.bf16.msra.mxu1 (%p415_p4), %v5557_v18  ;;  %v5571_v2 = vld [vmem:[#allocation5 + $0x8] sm:$0xff] (%p415_p4)   ;;  %v5572_v9 = vld [vmem:[#allocation5] sm:$0xff] (%p415_p4)  }
 0x301   : >> { %v5450_v50 = vunpack.i.h.bf16 %v5448_v4  ;;  %v5449_v49 = vunpack.i.l.bf16 %v5448_v4  ;;  %3581 = vmatprep.subr.bf16.mxu0 (%p415_p4), %v5729_v7  ;;  %5285 = vmatprep.subr.bf16.mxu1 (%p415_p4), %v5729_v7 }
 0x302   : >> { %v5156_v61 = vpack.c.bf16 %v1312_v60, %v1311_v8  ;;  %v5575_v60 = vld [vmem:[#allocation5 + $0x60] ss:$0 sps:$4 sm:$0xff] (%p415_p4)  }
 0x303   : >> { %v1263_v55 = vsel %vm1250_vm13, %v5445_v43, %v5449_v49  ;;  %v1264_v58 = vsel %vm1250_vm13, %v5449_v49, %v5450_v50  ;;  %v3577_v50 = vsel (%p415_p4), %vm639_vm4, %v5575_v60, 0 }
 0x304   : >> { %1357 = vst.msk [vmem:[%s1352_s25 + $0x10] sm:$0xff] %vm6389_vm6, %v5156_v61  ;;  %v1315_v29 = vmax.f32 %v7458_v3, %v1263_v55  ;;  %v1316_v5 = vmax.f32 %v7459_v12, %v1264_v58  ;;  %3582 = vmatpush1.bf16.msra.mxu0 (%p415_p4), %v5558_v20  ;;  %5298 = vmatpush1.bf16.msra.mxu1 (%p415_p4), %v5558_v20  ;;  %v5578_v55 = vld [vmem:[#allocation5 + $0x58] sm:$0xff] (%p415_p4)  }
 0x305   : > { %3583 = vmatprep.subr.bf16.mxu0 (%p415_p4), %v5729_v7  ;;  %5286 = vmatprep.subr.bf16.mxu1 (%p415_p4), %v5729_v7 }
 0x306   : >> { %v5157_v30 = vpack.c.bf16 %v1316_v5, %v1315_v29  ;;  %v5579_v5 = vld [vmem:[#allocation5 + $0x50] sm:$0xff] (%p415_p4)  }
 0x308   : >> { %1358 = vst.msk [vmem:[%s1352_s25 + $0x18] sm:$0xff] %vm6389_vm6, %v5157_v30  ;;  %3584 = vmatpush1.bf16.msra.mxu0 (%p415_p4), %v5561_v25  ;;  %5299 = vmatpush1.bf16.msra.mxu1 (%p415_p4), %v5561_v25 }
 0x309   : > { %3585 = vmatprep.subr.bf16.mxu0 (%p415_p4), %v5729_v7  ;;  %5287 = vmatprep.subr.bf16.mxu1 (%p415_p4), %v5729_v7 }
 0x30c   : > { %3586 = vmatpush1.bf16.msra.mxu0 (%p415_p4), %v5564_v35  ;;  %5300 = vmatpush1.bf16.msra.mxu1 (%p415_p4), %v5564_v35 }
 0x30d   : > { %3587 = vmatprep.subr.bf16.mxu0 (%p415_p4), %v5729_v7  ;;  %5288 = vmatprep.subr.bf16.mxu1 (%p415_p4), %v5729_v7 }
 0x310   : > { %3588 = vmatpush1.bf16.msra.mxu0 (%p415_p4), %v5565_v40  ;;  %5301 = vmatpush1.bf16.msra.mxu1 (%p415_p4), %v5565_v40 }
 0x311   : > { %3589 = vmatprep.subr.bf16.mxu0 (%p415_p4), %v5729_v7  ;;  %5289 = vmatprep.subr.bf16.mxu1 (%p415_p4), %v5729_v7 }
 0x314   : > { %3590 = vmatpush1.bf16.msra.mxu0 (%p415_p4), %v5568_v53  ;;  %5302 = vmatpush1.bf16.msra.mxu1 (%p415_p4), %v5568_v53 }
 0x315   : > { %3591 = vmatprep.subr.bf16.mxu0 (%p415_p4), %v5729_v7  ;;  %5290 = vmatprep.subr.bf16.mxu1 (%p415_p4), %v5729_v7 }
 0x318   : > { %3592 = vmatpush1.bf16.msra.mxu0 (%p415_p4), %v5571_v2  ;;  %5303 = vmatpush1.bf16.msra.mxu1 (%p415_p4), %v5571_v2 }
 0x319   : > { %3593 = vmatprep.subr.bf16.mxu0 (%p415_p4), %v5729_v7  ;;  %5291 = vmatprep.subr.bf16.mxu1 (%p415_p4), %v5729_v7 }
 0x31c   : > { %3594 = vmatpush1.bf16.msra.mxu0 (%p415_p4), %v5572_v9  ;;  %5304 = vmatpush1.bf16.msra.mxu1 (%p415_p4), %v5572_v9 }
 0x31d   : > { %3601 = vmatprep.subr.bf16.mxu0 (%p415_p4), %v5729_v7  ;;  %5292 = vmatprep.subr.bf16.mxu1 (%p415_p4), %v5729_v7 }
 0x320   : > { %3602 = vmatpush2.bf16.msra.mxu0 (%p415_p4), %v3577_v50  ;;  %5305 = vmatpush2.bf16.msra.mxu1 (%p415_p4), %v3577_v50 }
 0x321   : > { %3603 = vmatprep.subr.bf16.mxu0 (%p415_p4), %v5729_v7  ;;  %5293 = vmatprep.subr.bf16.mxu1 (%p415_p4), %v5729_v7 }
 0x324   : > { %3604 = vmatpush2.bf16.msra.mxu0 (%p415_p4), %v5578_v55  ;;  %5306 = vmatpush2.bf16.msra.mxu1 (%p415_p4), %v5578_v55 }
 0x325   : > { %3605 = vmatprep.subr.bf16.mxu0 (%p415_p4), %v5729_v7  ;;  %5294 = vmatprep.subr.bf16.mxu1 (%p415_p4), %v5729_v7 }
 0x328   : > { %3606 = vmatpush2.bf16.msra.mxu0 (%p415_p4), %v5579_v5  ;;  %5307 = vmatpush2.bf16.msra.mxu1 (%p415_p4), %v5579_v5 }
 0x329   : > { %3607 = vmatprep.subr.bf16.mxu0 (%p415_p4), %v5729_v7  ;;  %5295 = vmatprep.subr.bf16.mxu1 (%p415_p4), %v5729_v7 }
 0x36a   : >> { %v1381_v52 = vpop.permute.xlu0 %1380  ;;  %v1379_v33 = vpop.permute.xlu1 %1378 }
 0x36b   : >> { %v1387_v59 = vrot.slane %v1381_v52, 4  ;;  %v1386_v57 = vrot.slane %v1379_v33, 4 }
 0x36d   : >> { %v1392_v32 = vsel %vm1390_vm9, %v1381_v52, %v1387_v59  ;;  %v1391_v41 = vsel %vm1390_vm9, %v1379_v33, %v1386_v57  ;;  %v5582_v33 = vld [vmem:[#allocation5 + $0x48] sm:$0xff] (%p415_p4)  }
 0x36e   : >> { %1405 = vst.msk [vmem:[%s1403_s29 + $0x8] sm:$0xff] %vm6389_vm6, %v1392_v32  ;;  %1404 = vst.msk [vmem:[%s1403_s29] sm:$0xff] %vm6389_vm6, %v1391_v41  ;;  %v1385_v56 = vpop.permute.xlu0 %1384  ;;  %v1383_v44 = vpop.permute.xlu1 %1382  ;;  %417 = sbr.rel (!%p415_p4) target bundleno = 74 (0x4a), region = 90  ;;  %3608 = vmatpush2.bf16.msra.mxu0 (%p415_p4), %v5582_v33  ;;  %v5585_v32 = vld [vmem:[#allocation5 + $0x40] sm:$0xff] (%p415_p4)   ;;  %5308 = vmatpush2.bf16.msra.mxu1 (%p415_p4), %v5582_v33 }
 0x36f   : >> { %v1389_v47 = vrot.slane %v1385_v56, 4  ;;  %v1388_v31 = vrot.slane %v1383_v44, 4  ;;  %3609 = vmatprep.subr.bf16.mxu0 (%p415_p4), %v5729_v7  ;;  %5296 = vmatprep.subr.bf16.mxu1 (%p415_p4), %v5729_v7 }
 0x371   : >> { %v1394_v63 = vsel %vm1390_vm9, %v1385_v56, %v1389_v47  ;;  %v1393_v28 = vsel %vm1390_vm9, %v1383_v44, %v1388_v31 }
 0x372   : >> { %1407 = vst.msk [vmem:[%s1403_s29 + $0x18] sm:$0xff] %vm6389_vm6, %v1394_v63  ;;  %1406 = vst.msk [vmem:[%s1403_s29 + $0x10] sm:$0xff] %vm6389_vm6, %v1393_v28  ;;  %3610 = vmatpush2.bf16.msra.mxu0 (%p415_p4), %v5585_v32  ;;  %5309 = vmatpush2.bf16.msra.mxu1 (%p415_p4), %v5585_v32 }
 0x379   : > { %v6428_v0 = vld [vmem:[#allocation2 + $0x180] sm:$0xff]  ;;  %v6430_v27 = vld [vmem:[#allocation2 + $0x188] sm:$0xff]  ;;  %v6450_v16 = vld [vmem:[#allocation2 + $0x10] sm:$0xff] }
 0x37a   : > { %v6432_v1 = vld [vmem:[#allocation2] sm:$0xff]  ;;  %v4737_v10 = vcombine.low %v6428_v0, %v6430_v27  ;;  %v6436_v45 = vld [vmem:[#allocation2 + $0x8] sm:$0xff]  ;;  %v4738_v14 = vcombine.high %v6428_v0, %v6430_v27  ;;  %v6452_v17 = vld [vmem:[#allocation2 + $0x18] sm:$0xff] }
 0x37b   : > { %v4689_v62 = vcombine.low %v6432_v1, %v6436_v45  ;;  %v4690_v15 = vcombine.high %v6432_v1, %v6436_v45  ;;  %v4692_v19 = vcombine.high %v6450_v16, %v6452_v17  ;;  %v6457_v22 = vld [vmem:[#allocation2 + $0x190] sm:$0xff]  ;;  %v6459_v23 = vld [vmem:[#allocation2 + $0x198] sm:$0xff]  ;;  %v4691_v13 = vcombine.low %v6450_v16, %v6452_v17  ;;  %v6475_v26 = vld [vmem:[#allocation2 + $0x20] sm:$0xff] }
 0x37c   : > { %1984 = vrot.lane.b32.xlu1 %v4737_v10, %s5730_s21  ;;  %v4740_v21 = vcombine.high %v6457_v22, %v6459_v23  ;;  %v4739_v24 = vcombine.low %v6457_v22, %v6459_v23  ;;  %v6478_v34 = vld [vmem:[#allocation2 + $0x28] sm:$0xff]  ;;  %v6485_v37 = vld [vmem:[#allocation2 + $0x1a0] sm:$0xff]  ;;  %v6504_v46 = vld [vmem:[#allocation2 + $0x30] sm:$0xff] }
 0x37d   : > { %1888 = vrot.lane.b32.xlu0 %v4689_v62, %s5730_s21  ;;  %v4694_v36 = vcombine.high %v6475_v26, %v6478_v34  ;;  %v4693_v38 = vcombine.low %v6475_v26, %v6478_v34  ;;  %v6490_v39 = vld [vmem:[#allocation2 + $0x1a8] sm:$0xff]  ;;  %v6506_v42 = vld [vmem:[#allocation2 + $0x38] sm:$0xff]  ;;  %v6516_v48 = vld [vmem:[#allocation2 + $0x1b0] sm:$0xff] }
 0x37e   : > { %v4742_v11 = vcombine.high %v6485_v37, %v6490_v39  ;;  %v4741_v6 = vcombine.low %v6485_v37, %v6490_v39  ;;  %v4696_v51 = vcombine.high %v6504_v46, %v6506_v42  ;;  %v4695_v54 = vcombine.low %v6504_v46, %v6506_v42  ;;  %v6518_v8 = vld [vmem:[#allocation2 + $0x1b8] sm:$0xff]  ;;  %v6533_v49 = vld [vmem:[#allocation2 + $0x40] sm:$0xff]  ;;  %v6535_v61 = vld [vmem:[#allocation2 + $0x48] sm:$0xff] }
 0x37f   : > { %v4744_v4 = vcombine.high %v6516_v48, %v6518_v8  ;;  %v4743_v43 = vcombine.low %v6516_v48, %v6518_v8  ;;  %v4698_v58 = vcombine.high %v6533_v49, %v6535_v61  ;;  %v4697_v3 = vcombine.low %v6533_v49, %v6535_v61  ;;  %v6545_v29 = vld [vmem:[#allocation2 + $0x1c0] sm:$0xff]  ;;  %v6547_v12 = vld [vmem:[#allocation2 + $0x1c8] sm:$0xff]  ;;  %v6561_v59 = vld [vmem:[#allocation2 + $0x50] sm:$0xff] }
 0x380   : > { %1986 = vrot.lane.b32.xlu1 %v4738_v14, %s5730_s21  ;;  %v4746_v30 = vcombine.high %v6545_v29, %v6547_v12  ;;  %v4745_v52 = vcombine.low %v6545_v29, %v6547_v12  ;;  %v6563_v57 = vld [vmem:[#allocation2 + $0x58] sm:$0xff]  ;;  %v6573_v44 = vld [vmem:[#allocation2 + $0x1d0] sm:$0xff]  ;;  %v6585_v28 = vld [vmem:[#allocation2 + $0x60] sm:$0xff] }
 0x381   : > { %1890 = vrot.lane.b32.xlu0 %v4690_v15, %s5730_s21  ;;  %v4700_v41 = vcombine.high %v6561_v59, %v6563_v57  ;;  %v4699_v56 = vcombine.low %v6561_v59, %v6563_v57  ;;  %v6575_v47 = vld [vmem:[#allocation2 + $0x1d8] sm:$0xff]  ;;  %v6595_v14 = vld [vmem:[#allocation2 + $0x1e0] sm:$0xff]  ;;  %v6597_v15 = vld [vmem:[#allocation2 + $0x1e8] sm:$0xff] }
 0x382   : > { %v4748_v31 = vcombine.high %v6573_v44, %v6575_v47  ;;  %v4747_v63 = vcombine.low %v6573_v44, %v6575_v47  ;;  %v4750_v18 = vcombine.high %v6595_v14, %v6597_v15  ;;  %v6609_v20 = vld [vmem:[#allocation2 + $0x78] sm:$0xff]  ;;  %v6617_v25 = vld [vmem:[#allocation2 + $0x1f0] sm:$0xff]  ;;  %v6629_v40 = vld [vmem:[#allocation2 + $0x80] sm:$0xff] }
 0x383   : > { %v6619_v35 = vld [vmem:[#allocation2 + $0x1f8] sm:$0xff]  ;;  %v6639_v2 = vld [vmem:[#allocation2 + $0x200] sm:$0xff]  ;;  %v6651_v60 = vld [vmem:[#allocation2 + $0x90] sm:$0xff] }
 0x384   : > { %2177 = vrot.lane.b32.xlu1 %v4737_v10, %s5731_s8  ;;  %v6587_v10 = vld [vmem:[#allocation2 + $0x68] sm:$0xff]  ;;  %v6661_v55 = vld [vmem:[#allocation2 + $0x210] sm:$0xff] }
 0x385   : > { %2129 = vrot.lane.b32.xlu0 %v4689_v62, %s5731_s8  ;;  %v4702_v7 = vcombine.high %v6585_v28, %v6587_v10  ;;  %v4701_v62 = vcombine.low %v6585_v28, %v6587_v10 }
 0x388   : > { %1894 = vrot.lane.b32.xlu1 %v4692_v19, %s5730_s21  ;;  %v4749_v19 = vcombine.low %v6595_v14, %v6597_v15 }
 0x389   : > { %1892 = vrot.lane.b32.xlu0 %v4691_v13, %s5730_s21 }
 0x38c   : > { %1990 = vrot.lane.b32.xlu1 %v4740_v21, %s5730_s21 }
 0x38d   : > { %1988 = vrot.lane.b32.xlu0 %v4739_v24, %s5730_s21 }
 0x390   : > { %2179 = vrot.lane.b32.xlu1 %v4739_v24, %s5731_s8 }
 0x391   : > { %2131 = vrot.lane.b32.xlu0 %v4691_v13, %s5731_s8  ;;  %v6607_v13 = vld [vmem:[#allocation2 + $0x70] sm:$0xff] }
 0x392   : > { %v4704_v21 = vcombine.high %v6607_v13, %v6609_v20  ;;  %v4703_v24 = vcombine.low %v6607_v13, %v6609_v20 }
 0x394   : > { %1898 = vrot.lane.b32.xlu1 %v4694_v36, %s5730_s21  ;;  %v4752_v36 = vcombine.high %v6617_v25, %v6619_v35 }
 0x395   : > { %1896 = vrot.lane.b32.xlu0 %v4693_v38, %s5730_s21 }
 0x398   : > { %1994 = vrot.lane.b32.xlu1 %v4742_v11, %s5730_s21  ;;  %v6631_v11 = vld [vmem:[#allocation2 + $0x88] sm:$0xff] }
 0x399   : > { %1992 = vrot.lane.b32.xlu0 %v4741_v6, %s5730_s21  ;;  %v4705_v53 = vcombine.low %v6629_v40, %v6631_v11 }
 0x39c   : > { %2181 = vrot.lane.b32.xlu1 %v4741_v6, %s5731_s8  ;;  %v4706_v6 = vcombine.high %v6629_v40, %v6631_v11 }
 0x39d   : > { %2133 = vrot.lane.b32.xlu0 %v4693_v38, %s5731_s8  ;;  %v4751_v38 = vcombine.low %v6617_v25, %v6619_v35 }
 0x3a0   : > { %1902 = vrot.lane.b32.xlu1 %v4696_v51, %s5730_s21  ;;  %v6641_v51 = vld [vmem:[#allocation2 + $0x208] sm:$0xff] }
 0x3a1   : > { %1900 = vrot.lane.b32.xlu0 %v4695_v54, %s5730_s21  ;;  %v4753_v9 = vcombine.low %v6639_v2, %v6641_v51 }
 0x3a4   : > { %1998 = vrot.lane.b32.xlu1 %v4744_v4, %s5730_s21  ;;  %v6653_v4 = vld [vmem:[#allocation2 + $0x98] sm:$0xff] }
 0x3a5   : > { %1996 = vrot.lane.b32.xlu0 %v4743_v43, %s5730_s21  ;;  %v4707_v50 = vcombine.low %v6651_v60, %v6653_v4 }
 0x3a8   : > { %2183 = vrot.lane.b32.xlu1 %v4743_v43, %s5731_s8  ;;  %v4708_v43 = vcombine.high %v6651_v60, %v6653_v4 }
 0x3a9   : > { %2135 = vrot.lane.b32.xlu0 %v4695_v54, %s5731_s8  ;;  %v4754_v54 = vcombine.high %v6639_v2, %v6641_v51 }
 0x3ac   : > { %1906 = vrot.lane.b32.xlu1 %v4698_v58, %s5730_s21  ;;  %v6663_v58 = vld [vmem:[#allocation2 + $0x218] sm:$0xff] }
 0x3ad   : > { %1904 = vrot.lane.b32.xlu0 %v4697_v3, %s5730_s21  ;;  %v4755_v5 = vcombine.low %v6661_v55, %v6663_v58 }
 0x3b0   : > { %2002 = vrot.lane.b32.xlu1 %v4746_v30, %s5730_s21  ;;  %v6673_v30 = vld [vmem:[#allocation2 + $0xa0] sm:$0xff] }
 0x3b1   : > { %2000 = vrot.lane.b32.xlu0 %v4745_v52, %s5730_s21 }
 0x3b4   : > { %2185 = vrot.lane.b32.xlu1 %v4745_v52, %s5731_s8  ;;  %v6675_v52 = vld [vmem:[#allocation2 + $0xa8] sm:$0xff] }
 0x3b5   : > { %2137 = vrot.lane.b32.xlu0 %v4697_v3, %s5731_s8  ;;  %v4756_v3 = vcombine.high %v6661_v55, %v6663_v58 }
 0x3b8   : > { %1910 = vrot.lane.b32.xlu1 %v4700_v41, %s5730_s21  ;;  %v4710_v41 = vcombine.high %v6673_v30, %v6675_v52 }
 0x3b9   : > { %1908 = vrot.lane.b32.xlu0 %v4699_v56, %s5730_s21 }
 0x3bc   : > { %2006 = vrot.lane.b32.xlu1 %v4748_v31, %s5730_s21  ;;  %v6683_v31 = vld [vmem:[#allocation2 + $0x220] sm:$0xff] }
 0x3bd   : > { %2004 = vrot.lane.b32.xlu0 %v4747_v63, %s5730_s21 }
 0x3c0   : > { %2187 = vrot.lane.b32.xlu1 %v4747_v63, %s5731_s8  ;;  %v6685_v63 = vld [vmem:[#allocation2 + $0x228] sm:$0xff] }
 0x3c1   : > { %2139 = vrot.lane.b32.xlu0 %v4699_v56, %s5731_s8  ;;  %v4709_v56 = vcombine.low %v6673_v30, %v6675_v52 }
 0x3c4   : > { %1914 = vrot.lane.b32.xlu1 %v4702_v7, %s5730_s21 }
 0x3c5   : > { %1912 = vrot.lane.b32.xlu0 %v4701_v62, %s5730_s21 }
 0x3c8   : > { %2010 = vrot.lane.b32.xlu1 %v4750_v18, %s5730_s21  ;;  %v4758_v18 = vcombine.high %v6683_v31, %v6685_v63 }
 0x3c9   : > { %2008 = vrot.lane.b32.xlu0 %v4749_v19, %s5730_s21 }
 0x3cc   : > { %2189 = vrot.lane.b32.xlu1 %v4749_v19, %s5731_s8  ;;  %v4757_v19 = vcombine.low %v6683_v31, %v6685_v63 }
 0x3cd   : > { %2141 = vrot.lane.b32.xlu0 %v4701_v62, %s5731_s8 }
 0x3d0   : > { %1918 = vrot.lane.b32.xlu1 %v4704_v21, %s5730_s21 }
 0x3d1   : > { %1916 = vrot.lane.b32.xlu0 %v4703_v24, %s5730_s21 }
 0x3d4   : > { %2014 = vrot.lane.b32.xlu1 %v4752_v36, %s5730_s21 }
 0x3d5   : > { %2012 = vrot.lane.b32.xlu0 %v4751_v38, %s5730_s21 }
 0x3d8   : > { %2191 = vrot.lane.b32.xlu1 %v4751_v38, %s5731_s8 }
 0x3d9   : > { %2143 = vrot.lane.b32.xlu0 %v4703_v24, %s5731_s8 }
 0x3dc   : > { %1922 = vrot.lane.b32.xlu1 %v4706_v6, %s5730_s21 }
 0x3dd   : > { %1920 = vrot.lane.b32.xlu0 %v4705_v53, %s5730_s21 }
 0x3e0   : > { %2018 = vrot.lane.b32.xlu1 %v4754_v54, %s5730_s21 }
 0x3e1   : > { %2016 = vrot.lane.b32.xlu0 %v4753_v9, %s5730_s21 }
 0x3e4   : > { %2193 = vrot.lane.b32.xlu1 %v4753_v9, %s5731_s8 }
 0x3e5   : > { %2145 = vrot.lane.b32.xlu0 %v4705_v53, %s5731_s8 }
 0x3e8   : > { %1926 = vrot.lane.b32.xlu1 %v4708_v43, %s5730_s21 }
 0x3e9   : > { %1924 = vrot.lane.b32.xlu0 %v4707_v50, %s5730_s21 }
 0x3ec   : > { %2022 = vrot.lane.b32.xlu1 %v4756_v3, %s5730_s21  ;;  %v6699_v3 = vld [vmem:[#allocation2 + $0xb0] sm:$0xff] }
 0x3ed   : > { %2020 = vrot.lane.b32.xlu0 %v4755_v5, %s5730_s21 }
 0x3ee   : > { %v1985_v33 = vpop.permute.xlu1 %1984 }
 0x3ef   : > { %v1889_v32 = vpop.permute.xlu0 %1888 }
 0x3f0   : > { %2195 = vrot.lane.b32.xlu1 %v4755_v5, %s5731_s8  ;;  %v6701_v5 = vld [vmem:[#allocation2 + $0xb8] sm:$0xff] }
 0x3f1   : > { %2147 = vrot.lane.b32.xlu0 %v4707_v50, %s5731_s8 }
 0x3f2   : > { %v1987_v7 = vpop.permute.xlu1 %1986 }
 0x3f3   : > { %v1891_v62 = vpop.permute.xlu0 %1890  ;;  %v2105_v24 = vsel %vm776_vm8, %v1985_v33, %v1987_v7 }
 0x3f4   : > { %1930 = vrot.lane.b32.xlu1 %v4710_v41, %s5730_s21  ;;  %v2081_v6 = vsel %vm776_vm8, %v1889_v32, %v1891_v62 }
 0x3f5   : > { %1928 = vrot.lane.b32.xlu0 %v4709_v56, %s5730_s21 }
 0x3f6   : > { %v2178_v21 = vpop.permute.xlu1 %2177 }
 0x3f7   : > { %v2300_v36 = vsel %vm2225_vm12, %v1987_v7, %v2178_v21  ;;  %v2130_v38 = vpop.permute.xlu0 %2129 }
 0x3f8   : > { %v4833_v53 = vcombine.low %v2105_v24, %v2300_v36  ;;  %v4834_v54 = vcombine.high %v2105_v24, %v2300_v36  ;;  %v2228_v9 = vsel %vm2225_vm12, %v1891_v62, %v2130_v38  ;;  %2026 = vrot.lane.b32.xlu1 %v4758_v18, %s5730_s21  ;;  %v4712_v36 = vcombine.high %v6699_v3, %v6701_v5 }
 0x3f9   : > { %v4785_v43 = vcombine.low %v2081_v6, %v2228_v9  ;;  %v4786_v50 = vcombine.high %v2081_v6, %v2228_v9  ;;  %2024 = vrot.lane.b32.xlu0 %v4757_v19, %s5730_s21 }
 0x3fa   : > { %v1895_v33 = vpop.permute.xlu1 %1894  ;;  %v2850_v41 = vmax.bf16 %v4833_v53, %v6428_v0  ;;  %v2851_v7 = vmax.bf16 %v4834_v54, %v6430_v27  ;;  %v4711_v0 = vcombine.low %v6699_v3, %v6701_v5  ;;  %v6713_v27 = vld [vmem:[#allocation2 + $0x230] sm:$0xff]  ;;  %v6715_v53 = vld [vmem:[#allocation2 + $0x238] sm:$0xff] }
 0x3fb   : > { %v1893_v32 = vpop.permute.xlu0 %1892  ;;  %v2802_v21 = vmax.bf16 %v4785_v43, %v6432_v1  ;;  %v2803_v62 = vmax.bf16 %v4786_v50, %v6436_v45 }
 0x3fc   : > { %2197 = vrot.lane.b32.xlu1 %v4757_v19, %s5731_s8  ;;  %v4930_v18 = vcombine.high %v2850_v41, %v2851_v7  ;;  %v4929_v24 = vcombine.low %v2850_v41, %v2851_v7  ;;  %v4759_v19 = vcombine.low %v6713_v27, %v6715_v53  ;;  %v2082_v41 = vsel %vm776_vm8, %v1893_v32, %v1895_v33 }
 0x3fd   : > { %2149 = vrot.lane.b32.xlu0 %v4709_v56, %s5731_s8  ;;  %v4882_v38 = vcombine.high %v2802_v21, %v2803_v62  ;;  %v4881_v6 = vcombine.low %v2802_v21, %v2803_v62  ;;  %v4760_v56 = vcombine.high %v6713_v27, %v6715_v53 }
 0x3fe   : > { %5014 = vmatprep.mubr.msk.bf16.mxu1 %vm535_vm3, %v4930_v18  ;;  %v1991_v1 = vpop.permute.xlu1 %1990 }
 0x3ff   : > { %4990 = vmatprep.mubr.msk.bf16.mxu0 %vm535_vm3, %v4882_v38  ;;  %v1989_v45 = vpop.permute.xlu0 %1988  ;;  %3804 = vmatmul.mubr.bf16.vlgmr.msra.gmra.mxu1 %v4929_v24  ;;  %v6733_v38 = vld [vmem:[#allocation2 + $0xc8] sm:$0xff] }
 0x400   : > { %3612 = vmatmul.mubr.bf16.vlgmr.msra.gmra.mxu0 %v4881_v6  ;;  %1934 = vrot.lane.b32.xlu1 %v4712_v36, %s5730_s21  ;;  %v2106_v9 = vsel %vm776_vm8, %v1989_v45, %v1991_v1  ;;  %v6731_v36 = vld [vmem:[#allocation2 + $0xc0] sm:$0xff] }
 0x401   : > { %1932 = vrot.lane.b32.xlu0 %v4711_v0, %s5730_s21 }
 0x402   : > { %v2180_v54 = vpop.permute.xlu1 %2179 }
 0x403   : > { %v2303_v43 = vsel %vm2225_vm12, %v1991_v1, %v2180_v54  ;;  %v2132_v50 = vpop.permute.xlu0 %2131 }
 0x404   : > { %v4835_v7 = vcombine.low %v2106_v9, %v2303_v43  ;;  %v4836_v21 = vcombine.high %v2106_v9, %v2303_v43  ;;  %v2231_v62 = vsel %vm2225_vm12, %v1895_v33, %v2132_v50  ;;  %2030 = vrot.lane.b32.xlu1 %v4760_v56, %s5730_s21  ;;  %v4714_v43 = vcombine.high %v6731_v36, %v6733_v38 }
 0x405   : > { %v4787_v18 = vcombine.low %v2082_v41, %v2231_v62  ;;  %v4788_v24 = vcombine.high %v2082_v41, %v2231_v62  ;;  %2028 = vrot.lane.b32.xlu0 %v4759_v19, %s5730_s21 }
 0x406   : > { %v2852_v6 = vmax.bf16 %v4835_v7, %v6457_v22  ;;  %v2853_v1 = vmax.bf16 %v4836_v21, %v6459_v23  ;;  %v1899_v45 = vpop.permute.xlu1 %1898  ;;  %v4713_v22 = vcombine.low %v6731_v36, %v6733_v38  ;;  %v6745_v23 = vld [vmem:[#allocation2 + $0x240] sm:$0xff] }
 0x407   : > { %v2804_v32 = vmax.bf16 %v4787_v18, %v6450_v16  ;;  %v2805_v54 = vmax.bf16 %v4788_v24, %v6452_v17  ;;  %v1897_v33 = vpop.permute.xlu0 %1896  ;;  %v6747_v16 = vld [vmem:[#allocation2 + $0x248] sm:$0xff] }
 0x408   : > { %2199 = vrot.lane.b32.xlu1 %v4759_v19, %s5731_s8  ;;  %v4932_v56 = vcombine.high %v2852_v6, %v2853_v1  ;;  %v4931_v9 = vcombine.low %v2852_v6, %v2853_v1  ;;  %v4761_v7 = vcombine.low %v6745_v23, %v6747_v16  ;;  %v2083_v6 = vsel %vm776_vm8, %v1897_v33, %v1899_v45 }
 0x409   : > { %2151 = vrot.lane.b32.xlu0 %v4711_v0, %s5731_s8  ;;  %v4884_v50 = vcombine.high %v2804_v32, %v2805_v54  ;;  %v4883_v41 = vcombine.low %v2804_v32, %v2805_v54  ;;  %v4762_v0 = vcombine.high %v6745_v23, %v6747_v16 }
 0x40a   : > { %v1995_v17 = vpop.permute.xlu1 %1994  ;;  %5015 = vmatprep.mubr.msk.bf16.mxu1 %vm535_vm3, %v4932_v56 }
 0x40b   : > { %4991 = vmatprep.mubr.msk.bf16.mxu0 %vm535_vm3, %v4884_v50  ;;  %v1993_v19 = vpop.permute.xlu0 %1992  ;;  %3812 = vmatmul.mubr.bf16.gmra.mxu1 %v4931_v9  ;;  %v6765_v50 = vld [vmem:[#allocation2 + $0xd8] sm:$0xff] }
 0x40c   : > { %3620 = vmatmul.mubr.bf16.gmra.mxu0 %v4883_v41  ;;  %1938 = vrot.lane.b32.xlu1 %v4714_v43, %s5730_s21  ;;  %v2107_v62 = vsel %vm776_vm8, %v1993_v19, %v1995_v17  ;;  %v6763_v43 = vld [vmem:[#allocation2 + $0xd0] sm:$0xff] }
 0x40d   : > { %1936 = vrot.lane.b32.xlu0 %v4713_v22, %s5730_s21 }
 0x40e   : > { %v2182_v21 = vpop.permute.xlu1 %2181 }
 0x40f   : > { %v2306_v18 = vsel %vm2225_vm12, %v1995_v17, %v2182_v21  ;;  %v2134_v24 = vpop.permute.xlu0 %2133 }
 0x410   : > { %v4837_v1 = vcombine.low %v2107_v62, %v2306_v18  ;;  %v4838_v32 = vcombine.high %v2107_v62, %v2306_v18  ;;  %v2234_v54 = vsel %vm2225_vm12, %v1899_v45, %v2134_v24  ;;  %2034 = vrot.lane.b32.xlu1 %v4762_v0, %s5730_s21  ;;  %v4716_v18 = vcombine.high %v6763_v43, %v6765_v50 }
 0x411   : > { %v4789_v56 = vcombine.low %v2083_v6, %v2234_v54  ;;  %v4790_v9 = vcombine.high %v2083_v6, %v2234_v54  ;;  %2032 = vrot.lane.b32.xlu0 %v4761_v7, %s5730_s21 }
 0x412   : > { %v2854_v41 = vmax.bf16 %v4837_v1, %v6485_v37  ;;  %v2855_v17 = vmax.bf16 %v4838_v32, %v6490_v39  ;;  %v1903_v19 = vpop.permute.xlu1 %1902  ;;  %v4715_v37 = vcombine.low %v6763_v43, %v6765_v50  ;;  %v6777_v39 = vld [vmem:[#allocation2 + $0x250] sm:$0xff] }
 0x413   : > { %v2806_v33 = vmax.bf16 %v4789_v56, %v6475_v26  ;;  %v2807_v21 = vmax.bf16 %v4790_v9, %v6478_v34  ;;  %v1901_v45 = vpop.permute.xlu0 %1900  ;;  %v6779_v26 = vld [vmem:[#allocation2 + $0x258] sm:$0xff] }
 0x414   : > { %2201 = vrot.lane.b32.xlu1 %v4761_v7, %s5731_s8  ;;  %v4934_v0 = vcombine.high %v2854_v41, %v2855_v17  ;;  %v4933_v62 = vcombine.low %v2854_v41, %v2855_v17  ;;  %v4763_v1 = vcombine.low %v6777_v39, %v6779_v26  ;;  %v2084_v41 = vsel %vm776_vm8, %v1901_v45, %v1903_v19 }
 0x415   : > { %2153 = vrot.lane.b32.xlu0 %v4713_v22, %s5731_s8  ;;  %v4886_v24 = vcombine.high %v2806_v33, %v2807_v21  ;;  %v4885_v6 = vcombine.low %v2806_v33, %v2807_v21  ;;  %v4764_v22 = vcombine.high %v6777_v39, %v6779_v26 }
 0x416   : > { %v1999_v34 = vpop.permute.xlu1 %1998  ;;  %5016 = vmatprep.mubr.msk.bf16.mxu1 %vm535_vm3, %v4934_v0 }
 0x417   : > { %4992 = vmatprep.mubr.msk.bf16.mxu0 %vm535_vm3, %v4886_v24  ;;  %v1997_v7 = vpop.permute.xlu0 %1996  ;;  %3820 = vmatmul.mubr.bf16.gmra.mxu1 %v4933_v62  ;;  %v6797_v24 = vld [vmem:[#allocation2 + $0xe8] sm:$0xff] }
 0x418   : > { %3628 = vmatmul.mubr.bf16.gmra.mxu0 %v4885_v6  ;;  %1942 = vrot.lane.b32.xlu1 %v4716_v18, %s5730_s21  ;;  %v2108_v54 = vsel %vm776_vm8, %v1997_v7, %v1999_v34  ;;  %v6795_v18 = vld [vmem:[#allocation2 + $0xe0] sm:$0xff] }
 0x419   : > { %1940 = vrot.lane.b32.xlu0 %v4715_v37, %s5730_s21 }
 0x41a   : > { %v2184_v32 = vpop.permute.xlu1 %2183 }
 0x41b   : > { %v2309_v56 = vsel %vm2225_vm12, %v1999_v34, %v2184_v32  ;;  %v2136_v9 = vpop.permute.xlu0 %2135 }
 0x41c   : > { %v4839_v17 = vcombine.low %v2108_v54, %v2309_v56  ;;  %v4840_v33 = vcombine.high %v2108_v54, %v2309_v56  ;;  %v2237_v21 = vsel %vm2225_vm12, %v1903_v19, %v2136_v9  ;;  %2038 = vrot.lane.b32.xlu1 %v4764_v22, %s5730_s21  ;;  %v4718_v56 = vcombine.high %v6795_v18, %v6797_v24 }
 0x41d   : > { %v4791_v0 = vcombine.low %v2084_v41, %v2237_v21  ;;  %v4792_v62 = vcombine.high %v2084_v41, %v2237_v21  ;;  %2036 = vrot.lane.b32.xlu0 %v4763_v1, %s5730_s21 }
 0x41e   : > { %v2856_v6 = vmax.bf16 %v4839_v17, %v6516_v48  ;;  %v2857_v34 = vmax.bf16 %v4840_v33, %v6518_v8  ;;  %v1907_v7 = vpop.permute.xlu1 %1906  ;;  %v4717_v48 = vcombine.low %v6795_v18, %v6797_v24  ;;  %v6809_v8 = vld [vmem:[#allocation2 + $0x260] sm:$0xff] }
 0x41f   : > { %v2808_v45 = vmax.bf16 %v4791_v0, %v6504_v46  ;;  %v2809_v32 = vmax.bf16 %v4792_v62, %v6506_v42  ;;  %v1905_v19 = vpop.permute.xlu0 %1904  ;;  %v6811_v46 = vld [vmem:[#allocation2 + $0x268] sm:$0xff] }
 0x420   : > { %2203 = vrot.lane.b32.xlu1 %v4763_v1, %s5731_s8  ;;  %v4936_v22 = vcombine.high %v2856_v6, %v2857_v34  ;;  %v4935_v54 = vcombine.low %v2856_v6, %v2857_v34  ;;  %v4765_v17 = vcombine.low %v6809_v8, %v6811_v46  ;;  %v2085_v6 = vsel %vm776_vm8, %v1905_v19, %v1907_v7 }
 0x421   : > { %2155 = vrot.lane.b32.xlu0 %v4715_v37, %s5731_s8  ;;  %v4888_v9 = vcombine.high %v2808_v45, %v2809_v32  ;;  %v4887_v41 = vcombine.low %v2808_v45, %v2809_v32  ;;  %v4766_v37 = vcombine.high %v6809_v8, %v6811_v46 }
 0x422   : > { %v2003_v42 = vpop.permute.xlu1 %2002  ;;  %5017 = vmatprep.mubr.msk.bf16.mxu1 %vm535_vm3, %v4936_v22 }
 0x423   : > { %4993 = vmatprep.mubr.msk.bf16.mxu0 %vm535_vm3, %v4888_v9  ;;  %v2001_v1 = vpop.permute.xlu0 %2000  ;;  %3828 = vmatmul.mubr.bf16.gmra.mxu1 %v4935_v54  ;;  %v6829_v9 = vld [vmem:[#allocation2 + $0xf8] sm:$0xff] }
 0x424   : > { %3636 = vmatmul.mubr.bf16.gmra.mxu0 %v4887_v41  ;;  %1946 = vrot.lane.b32.xlu1 %v4718_v56, %s5730_s21  ;;  %v2109_v21 = vsel %vm776_vm8, %v2001_v1, %v2003_v42  ;;  %v6827_v56 = vld [vmem:[#allocation2 + $0xf0] sm:$0xff] }
 0x425   : > { %1944 = vrot.lane.b32.xlu0 %v4717_v48, %s5730_s21 }
 0x426   : > { %v2186_v33 = vpop.permute.xlu1 %2185 }
 0x427   : > { %v2312_v0 = vsel %vm2225_vm12, %v2003_v42, %v2186_v33  ;;  %v2138_v62 = vpop.permute.xlu0 %2137 }
 0x428   : > { %v4841_v34 = vcombine.low %v2109_v21, %v2312_v0  ;;  %v4842_v45 = vcombine.high %v2109_v21, %v2312_v0  ;;  %v2240_v32 = vsel %vm2225_vm12, %v1907_v7, %v2138_v62  ;;  %2042 = vrot.lane.b32.xlu1 %v4766_v37, %s5730_s21  ;;  %v4720_v0 = vcombine.high %v6827_v56, %v6829_v9 }
 0x429   : > { %v4793_v22 = vcombine.low %v2085_v6, %v2240_v32  ;;  %v4794_v54 = vcombine.high %v2085_v6, %v2240_v32  ;;  %2040 = vrot.lane.b32.xlu0 %v4765_v17, %s5730_s21 }
 0x42a   : > { %v2858_v41 = vmax.bf16 %v4841_v34, %v6545_v29  ;;  %v2859_v42 = vmax.bf16 %v4842_v45, %v6547_v12  ;;  %v1911_v1 = vpop.permute.xlu1 %1910  ;;  %v4719_v29 = vcombine.low %v6827_v56, %v6829_v9  ;;  %v6841_v12 = vld [vmem:[#allocation2 + $0x270] sm:$0xff] }
 0x42b   : > { %v2810_v19 = vmax.bf16 %v4793_v22, %v6533_v49  ;;  %v2811_v33 = vmax.bf16 %v4794_v54, %v6535_v61  ;;  %v1909_v7 = vpop.permute.xlu0 %1908  ;;  %v6843_v49 = vld [vmem:[#allocation2 + $0x278] sm:$0xff] }
 0x42c   : > { %2205 = vrot.lane.b32.xlu1 %v4765_v17, %s5731_s8  ;;  %v4938_v37 = vcombine.high %v2858_v41, %v2859_v42  ;;  %v4937_v21 = vcombine.low %v2858_v41, %v2859_v42  ;;  %v4767_v34 = vcombine.low %v6841_v12, %v6843_v49  ;;  %v2086_v41 = vsel %vm776_vm8, %v1909_v7, %v1911_v1 }
 0x42d   : > { %2157 = vrot.lane.b32.xlu0 %v4717_v48, %s5731_s8  ;;  %v4890_v62 = vcombine.high %v2810_v19, %v2811_v33  ;;  %v4889_v6 = vcombine.low %v2810_v19, %v2811_v33  ;;  %v4768_v48 = vcombine.high %v6841_v12, %v6843_v49 }
 0x42e   : > { %v2007_v61 = vpop.permute.xlu1 %2006  ;;  %5018 = vmatprep.mubr.msk.bf16.mxu1 %vm535_vm3, %v4938_v37 }
 0x42f   : > { %4994 = vmatprep.mubr.msk.bf16.mxu0 %vm535_vm3, %v4890_v62  ;;  %v2005_v17 = vpop.permute.xlu0 %2004  ;;  %3836 = vmatmul.mubr.bf16.gmra.mxu1 %v4937_v21  ;;  %v6861_v62 = vld [vmem:[#allocation2 + $0x108] sm:$0xff] }
 0x430   : > { %3644 = vmatmul.mubr.bf16.gmra.mxu0 %v4889_v6  ;;  %1950 = vrot.lane.b32.xlu1 %v4720_v0, %s5730_s21  ;;  %v2110_v32 = vsel %vm776_vm8, %v2005_v17, %v2007_v61  ;;  %v6859_v0 = vld [vmem:[#allocation2 + $0x100] sm:$0xff] }
 0x431   : > { %1948 = vrot.lane.b32.xlu0 %v4719_v29, %s5730_s21 }
 0x432   : > { %v2188_v45 = vpop.permute.xlu1 %2187 }
 0x433   : > { %v2315_v22 = vsel %vm2225_vm12, %v2007_v61, %v2188_v45  ;;  %v2140_v54 = vpop.permute.xlu0 %2139 }
 0x434   : > { %v4843_v42 = vcombine.low %v2110_v32, %v2315_v22  ;;  %v4844_v19 = vcombine.high %v2110_v32, %v2315_v22  ;;  %v2243_v33 = vsel %vm2225_vm12, %v1911_v1, %v2140_v54  ;;  %2046 = vrot.lane.b32.xlu1 %v4768_v48, %s5730_s21  ;;  %v4722_v22 = vcombine.high %v6859_v0, %v6861_v62 }
 0x435   : > { %v4795_v37 = vcombine.low %v2086_v41, %v2243_v33  ;;  %v4796_v21 = vcombine.high %v2086_v41, %v2243_v33  ;;  %2044 = vrot.lane.b32.xlu0 %v4767_v34, %s5730_s21 }
 0x436   : > { %v2860_v6 = vmax.bf16 %v4843_v42, %v6573_v44  ;;  %v2861_v61 = vmax.bf16 %v4844_v19, %v6575_v47  ;;  %v1915_v17 = vpop.permute.xlu1 %1914  ;;  %v4721_v44 = vcombine.low %v6859_v0, %v6861_v62  ;;  %v6873_v47 = vld [vmem:[#allocation2 + $0x280] sm:$0xff] }
 0x437   : > { %v2812_v7 = vmax.bf16 %v4795_v37, %v6561_v59  ;;  %v2813_v45 = vmax.bf16 %v4796_v21, %v6563_v57  ;;  %v1913_v1 = vpop.permute.xlu0 %1912  ;;  %v6875_v59 = vld [vmem:[#allocation2 + $0x288] sm:$0xff] }
 0x438   : > { %2207 = vrot.lane.b32.xlu1 %v4767_v34, %s5731_s8  ;;  %v4940_v48 = vcombine.high %v2860_v6, %v2861_v61  ;;  %v4939_v32 = vcombine.low %v2860_v6, %v2861_v61  ;;  %v4769_v42 = vcombine.low %v6873_v47, %v6875_v59  ;;  %v2087_v6 = vsel %vm776_vm8, %v1913_v1, %v1915_v17 }
 0x439   : > { %2159 = vrot.lane.b32.xlu0 %v4719_v29, %s5731_s8  ;;  %v4892_v54 = vcombine.high %v2812_v7, %v2813_v45  ;;  %v4891_v41 = vcombine.low %v2812_v7, %v2813_v45  ;;  %v4770_v29 = vcombine.high %v6873_v47, %v6875_v59 }
 0x43a   : > { %v2011_v57 = vpop.permute.xlu1 %2010  ;;  %5019 = vmatprep.mubr.msk.bf16.mxu1 %vm535_vm3, %v4940_v48 }
 0x43b   : > { %4995 = vmatprep.mubr.msk.bf16.mxu0 %vm535_vm3, %v4892_v54  ;;  %v2009_v34 = vpop.permute.xlu0 %2008  ;;  %3844 = vmatmul.mubr.bf16.gmra.mxu1 %v4939_v32  ;;  %v6893_v54 = vld [vmem:[#allocation2 + $0x118] sm:$0xff] }
 0x43c   : > { %3652 = vmatmul.mubr.bf16.gmra.mxu0 %v4891_v41  ;;  %1954 = vrot.lane.b32.xlu1 %v4722_v22, %s5730_s21  ;;  %v2111_v33 = vsel %vm776_vm8, %v2009_v34, %v2011_v57  ;;  %v6891_v22 = vld [vmem:[#allocation2 + $0x110] sm:$0xff] }
 0x43d   : > { %1952 = vrot.lane.b32.xlu0 %v4721_v44, %s5730_s21 }
 0x43e   : > { %v2190_v19 = vpop.permute.xlu1 %2189 }
 0x43f   : > { %v2318_v37 = vsel %vm2225_vm12, %v2011_v57, %v2190_v19  ;;  %v2142_v21 = vpop.permute.xlu0 %2141 }
 0x440   : > { %v4845_v61 = vcombine.low %v2111_v33, %v2318_v37  ;;  %v4846_v7 = vcombine.high %v2111_v33, %v2318_v37  ;;  %v2246_v45 = vsel %vm2225_vm12, %v1915_v17, %v2142_v21  ;;  %2050 = vrot.lane.b32.xlu1 %v4770_v29, %s5730_s21  ;;  %v4724_v37 = vcombine.high %v6891_v22, %v6893_v54 }
 0x441   : > { %v4797_v48 = vcombine.low %v2087_v6, %v2246_v45  ;;  %v4798_v32 = vcombine.high %v2087_v6, %v2246_v45  ;;  %2048 = vrot.lane.b32.xlu0 %v4769_v42, %s5730_s21 }
 0x442   : > { %v2862_v41 = vmax.bf16 %v4845_v61, %v6595_v14  ;;  %v2863_v57 = vmax.bf16 %v4846_v7, %v6597_v15  ;;  %v1919_v34 = vpop.permute.xlu1 %1918  ;;  %v4723_v14 = vcombine.low %v6891_v22, %v6893_v54  ;;  %v6905_v15 = vld [vmem:[#allocation2 + $0x290] sm:$0xff] }
 0x443   : > { %v2814_v1 = vmax.bf16 %v4797_v48, %v6585_v28  ;;  %v2815_v19 = vmax.bf16 %v4798_v32, %v6587_v10  ;;  %v1917_v17 = vpop.permute.xlu0 %1916  ;;  %v6907_v28 = vld [vmem:[#allocation2 + $0x298] sm:$0xff] }
 0x444   : > { %2209 = vrot.lane.b32.xlu1 %v4769_v42, %s5731_s8  ;;  %v4942_v29 = vcombine.high %v2862_v41, %v2863_v57  ;;  %v4941_v33 = vcombine.low %v2862_v41, %v2863_v57  ;;  %v4771_v61 = vcombine.low %v6905_v15, %v6907_v28  ;;  %v2088_v41 = vsel %vm776_vm8, %v1917_v17, %v1919_v34 }
 0x445   : > { %2161 = vrot.lane.b32.xlu0 %v4721_v44, %s5731_s8  ;;  %v4894_v21 = vcombine.high %v2814_v1, %v2815_v19  ;;  %v4893_v6 = vcombine.low %v2814_v1, %v2815_v19  ;;  %v4772_v44 = vcombine.high %v6905_v15, %v6907_v28 }
 0x446   : > { %v2015_v10 = vpop.permute.xlu1 %2014  ;;  %5020 = vmatprep.mubr.msk.bf16.mxu1 %vm535_vm3, %v4942_v29 }
 0x447   : > { %4996 = vmatprep.mubr.msk.bf16.mxu0 %vm535_vm3, %v4894_v21  ;;  %v2013_v42 = vpop.permute.xlu0 %2012  ;;  %3852 = vmatmul.mubr.bf16.gmra.mxu1 %v4941_v33  ;;  %v6925_v21 = vld [vmem:[#allocation2 + $0x128] sm:$0xff] }
 0x448   : > { %3660 = vmatmul.mubr.bf16.gmra.mxu0 %v4893_v6  ;;  %1958 = vrot.lane.b32.xlu1 %v4724_v37, %s5730_s21  ;;  %v2112_v45 = vsel %vm776_vm8, %v2013_v42, %v2015_v10  ;;  %v6923_v37 = vld [vmem:[#allocation2 + $0x120] sm:$0xff] }
 0x449   : > { %1956 = vrot.lane.b32.xlu0 %v4723_v14, %s5730_s21 }
 0x44a   : > { %v2192_v7 = vpop.permute.xlu1 %2191 }
 0x44b   : > { %v2321_v48 = vsel %vm2225_vm12, %v2015_v10, %v2192_v7  ;;  %v2144_v32 = vpop.permute.xlu0 %2143 }
 0x44c   : > { %v4847_v57 = vcombine.low %v2112_v45, %v2321_v48  ;;  %v4848_v1 = vcombine.high %v2112_v45, %v2321_v48  ;;  %v2249_v19 = vsel %vm2225_vm12, %v1919_v34, %v2144_v32  ;;  %2054 = vrot.lane.b32.xlu1 %v4772_v44, %s5730_s21  ;;  %v4726_v48 = vcombine.high %v6923_v37, %v6925_v21 }
 0x44d   : > { %v4799_v29 = vcombine.low %v2088_v41, %v2249_v19  ;;  %v4800_v33 = vcombine.high %v2088_v41, %v2249_v19  ;;  %2052 = vrot.lane.b32.xlu0 %v4771_v61, %s5730_s21 }
 0x44e   : > { %v2864_v6 = vmax.bf16 %v4847_v57, %v6617_v25  ;;  %v2865_v10 = vmax.bf16 %v4848_v1, %v6619_v35  ;;  %v1923_v42 = vpop.permute.xlu1 %1922  ;;  %v4725_v25 = vcombine.low %v6923_v37, %v6925_v21  ;;  %v6937_v35 = vld [vmem:[#allocation2 + $0x2a0] sm:$0xff] }
 0x44f   : > { %v2816_v17 = vmax.bf16 %v4799_v29, %v6607_v13  ;;  %v2817_v7 = vmax.bf16 %v4800_v33, %v6609_v20  ;;  %v1921_v34 = vpop.permute.xlu0 %1920  ;;  %v6939_v13 = vld [vmem:[#allocation2 + $0x2a8] sm:$0xff] }
 0x450   : > { %2211 = vrot.lane.b32.xlu1 %v4771_v61, %s5731_s8  ;;  %v4944_v44 = vcombine.high %v2864_v6, %v2865_v10  ;;  %v4943_v45 = vcombine.low %v2864_v6, %v2865_v10  ;;  %v4773_v57 = vcombine.low %v6937_v35, %v6939_v13  ;;  %v2089_v6 = vsel %vm776_vm8, %v1921_v34, %v1923_v42 }
 0x451   : > { %2163 = vrot.lane.b32.xlu0 %v4723_v14, %s5731_s8  ;;  %v4896_v32 = vcombine.high %v2816_v17, %v2817_v7  ;;  %v4895_v41 = vcombine.low %v2816_v17, %v2817_v7  ;;  %v4774_v14 = vcombine.high %v6937_v35, %v6939_v13 }
 0x452   : > { %v2019_v20 = vpop.permute.xlu1 %2018  ;;  %5021 = vmatprep.mubr.msk.bf16.mxu1 %vm535_vm3, %v4944_v44 }
 0x453   : > { %4997 = vmatprep.mubr.msk.bf16.mxu0 %vm535_vm3, %v4896_v32  ;;  %v2017_v61 = vpop.permute.xlu0 %2016  ;;  %3860 = vmatmul.mubr.bf16.gmra.mxu1 %v4943_v45  ;;  %v6957_v32 = vld [vmem:[#allocation2 + $0x138] sm:$0xff] }
 0x454   : > { %3668 = vmatmul.mubr.bf16.gmra.mxu0 %v4895_v41  ;;  %1962 = vrot.lane.b32.xlu1 %v4726_v48, %s5730_s21  ;;  %v2113_v19 = vsel %vm776_vm8, %v2017_v61, %v2019_v20  ;;  %v6955_v48 = vld [vmem:[#allocation2 + $0x130] sm:$0xff] }
 0x455   : > { %1960 = vrot.lane.b32.xlu0 %v4725_v25, %s5730_s21 }
 0x456   : > { %v2194_v1 = vpop.permute.xlu1 %2193 }
 0x457   : > { %v2324_v29 = vsel %vm2225_vm12, %v2019_v20, %v2194_v1  ;;  %v2146_v33 = vpop.permute.xlu0 %2145 }
 0x458   : > { %v4849_v10 = vcombine.low %v2113_v19, %v2324_v29  ;;  %v4850_v17 = vcombine.high %v2113_v19, %v2324_v29  ;;  %v2252_v7 = vsel %vm2225_vm12, %v1923_v42, %v2146_v33  ;;  %2058 = vrot.lane.b32.xlu1 %v4774_v14, %s5730_s21  ;;  %v4728_v29 = vcombine.high %v6955_v48, %v6957_v32 }
 0x459   : > { %v4801_v44 = vcombine.low %v2089_v6, %v2252_v7  ;;  %v4802_v45 = vcombine.high %v2089_v6, %v2252_v7  ;;  %2056 = vrot.lane.b32.xlu0 %v4773_v57, %s5730_s21 }
 0x45a   : > { %v2866_v41 = vmax.bf16 %v4849_v10, %v6639_v2  ;;  %v2867_v20 = vmax.bf16 %v4850_v17, %v6641_v51  ;;  %v1927_v61 = vpop.permute.xlu1 %1926  ;;  %v4727_v2 = vcombine.low %v6955_v48, %v6957_v32  ;;  %v6969_v51 = vld [vmem:[#allocation2 + $0x2b0] sm:$0xff] }
 0x45b   : > { %v2818_v34 = vmax.bf16 %v4801_v44, %v6629_v40  ;;  %v2819_v1 = vmax.bf16 %v4802_v45, %v6631_v11  ;;  %v1925_v42 = vpop.permute.xlu0 %1924  ;;  %v6971_v40 = vld [vmem:[#allocation2 + $0x2b8] sm:$0xff] }
 0x45c   : > { %2213 = vrot.lane.b32.xlu1 %v4773_v57, %s5731_s8  ;;  %v4946_v14 = vcombine.high %v2866_v41, %v2867_v20  ;;  %v4945_v19 = vcombine.low %v2866_v41, %v2867_v20  ;;  %v4775_v10 = vcombine.low %v6969_v51, %v6971_v40  ;;  %v2090_v41 = vsel %vm776_vm8, %v1925_v42, %v1927_v61 }
 0x45d   : > { %2165 = vrot.lane.b32.xlu0 %v4725_v25, %s5731_s8  ;;  %v4898_v33 = vcombine.high %v2818_v34, %v2819_v1  ;;  %v4897_v6 = vcombine.low %v2818_v34, %v2819_v1  ;;  %v4776_v25 = vcombine.high %v6969_v51, %v6971_v40 }
 0x45e   : > { %v2023_v11 = vpop.permute.xlu1 %2022  ;;  %5022 = vmatprep.mubr.msk.bf16.mxu1 %vm535_vm3, %v4946_v14 }
 0x45f   : > { %4998 = vmatprep.mubr.msk.bf16.mxu0 %vm535_vm3, %v4898_v33  ;;  %v2021_v57 = vpop.permute.xlu0 %2020  ;;  %3868 = vmatmul.mubr.bf16.gmra.mxu1 %v4945_v19  ;;  %v6989_v33 = vld [vmem:[#allocation2 + $0x148] sm:$0xff] }
 0x460   : > { %3676 = vmatmul.mubr.bf16.gmra.mxu0 %v4897_v6  ;;  %1966 = vrot.lane.b32.xlu1 %v4728_v29, %s5730_s21  ;;  %v2114_v7 = vsel %vm776_vm8, %v2021_v57, %v2023_v11  ;;  %v6987_v29 = vld [vmem:[#allocation2 + $0x140] sm:$0xff] }
 0x461   : > { %1964 = vrot.lane.b32.xlu0 %v4727_v2, %s5730_s21 }
 0x462   : > { %v2196_v17 = vpop.permute.xlu1 %2195 }
 0x463   : > { %v2327_v44 = vsel %vm2225_vm12, %v2023_v11, %v2196_v17  ;;  %v2148_v45 = vpop.permute.xlu0 %2147 }
 0x464   : > { %v4851_v20 = vcombine.low %v2114_v7, %v2327_v44  ;;  %v4852_v34 = vcombine.high %v2114_v7, %v2327_v44  ;;  %v2255_v1 = vsel %vm2225_vm12, %v1927_v61, %v2148_v45  ;;  %2062 = vrot.lane.b32.xlu1 %v4776_v25, %s5730_s21  ;;  %v4730_v44 = vcombine.high %v6987_v29, %v6989_v33 }
 0x465   : > { %v4803_v14 = vcombine.low %v2090_v41, %v2255_v1  ;;  %v4804_v19 = vcombine.high %v2090_v41, %v2255_v1  ;;  %2060 = vrot.lane.b32.xlu0 %v4775_v10, %s5730_s21 }
 0x466   : > { %v2868_v6 = vmax.bf16 %v4851_v20, %v6661_v55  ;;  %v2869_v11 = vmax.bf16 %v4852_v34, %v6663_v58  ;;  %v1931_v57 = vpop.permute.xlu1 %1930  ;;  %v4729_v55 = vcombine.low %v6987_v29, %v6989_v33  ;;  %v7001_v58 = vld [vmem:[#allocation2 + $0x2c0] sm:$0xff] }
 0x467   : > { %v2820_v42 = vmax.bf16 %v4803_v14, %v6651_v60  ;;  %v2821_v17 = vmax.bf16 %v4804_v19, %v6653_v4  ;;  %v1929_v61 = vpop.permute.xlu0 %1928  ;;  %v7003_v60 = vld [vmem:[#allocation2 + $0x2c8] sm:$0xff] }
 0x468   : > { %2215 = vrot.lane.b32.xlu1 %v4775_v10, %s5731_s8  ;;  %v4948_v25 = vcombine.high %v2868_v6, %v2869_v11  ;;  %v4947_v7 = vcombine.low %v2868_v6, %v2869_v11  ;;  %v4777_v20 = vcombine.low %v7001_v58, %v7003_v60  ;;  %v2091_v6 = vsel %vm776_vm8, %v1929_v61, %v1931_v57 }
 0x469   : > { %2167 = vrot.lane.b32.xlu0 %v4727_v2, %s5731_s8  ;;  %v4900_v45 = vcombine.high %v2820_v42, %v2821_v17  ;;  %v4899_v41 = vcombine.low %v2820_v42, %v2821_v17  ;;  %v4778_v2 = vcombine.high %v7001_v58, %v7003_v60 }
 0x46a   : > { %v2027_v4 = vpop.permute.xlu1 %2026  ;;  %5023 = vmatprep.mubr.msk.bf16.mxu1 %vm535_vm3, %v4948_v25 }
 0x46b   : > { %4999 = vmatprep.mubr.msk.bf16.mxu0 %vm535_vm3, %v4900_v45  ;;  %v2025_v10 = vpop.permute.xlu0 %2024  ;;  %3876 = vmatmul.mubr.bf16.gmra.mxu1 %v4947_v7  ;;  %v7021_v45 = vld [vmem:[#allocation2 + $0x158] sm:$0xff] }
 0x46c   : > { %3684 = vmatmul.mubr.bf16.gmra.mxu0 %v4899_v41  ;;  %1970 = vrot.lane.b32.xlu1 %v4730_v44, %s5730_s21  ;;  %v2115_v1 = vsel %vm776_vm8, %v2025_v10, %v2027_v4  ;;  %v7019_v44 = vld [vmem:[#allocation2 + $0x150] sm:$0xff] }
 0x46d   : > { %1968 = vrot.lane.b32.xlu0 %v4729_v55, %s5730_s21 }
 0x46e   : > { %v2198_v34 = vpop.permute.xlu1 %2197 }
 0x46f   : > { %v2330_v14 = vsel %vm2225_vm12, %v2027_v4, %v2198_v34  ;;  %v2150_v19 = vpop.permute.xlu0 %2149 }
 0x470   : > { %v4853_v11 = vcombine.low %v2115_v1, %v2330_v14  ;;  %v4854_v42 = vcombine.high %v2115_v1, %v2330_v14  ;;  %v2258_v17 = vsel %vm2225_vm12, %v1931_v57, %v2150_v19  ;;  %2066 = vrot.lane.b32.xlu1 %v4778_v2, %s5730_s21  ;;  %v4732_v14 = vcombine.high %v7019_v44, %v7021_v45 }
 0x471   : > { %v4805_v25 = vcombine.low %v2091_v6, %v2258_v17  ;;  %v4806_v7 = vcombine.high %v2091_v6, %v2258_v17  ;;  %2064 = vrot.lane.b32.xlu0 %v4777_v20, %s5730_s21 }
 0x472   : > { %v2870_v41 = vmax.bf16 %v4853_v11, %v6683_v31  ;;  %v2871_v4 = vmax.bf16 %v4854_v42, %v6685_v63  ;;  %v1935_v10 = vpop.permute.xlu1 %1934  ;;  %v4731_v31 = vcombine.low %v7019_v44, %v7021_v45  ;;  %v7033_v63 = vld [vmem:[#allocation2 + $0x2d0] sm:$0xff] }
 0x473   : > { %v2822_v61 = vmax.bf16 %v4805_v25, %v6673_v30  ;;  %v2823_v34 = vmax.bf16 %v4806_v7, %v6675_v52  ;;  %v1933_v57 = vpop.permute.xlu0 %1932  ;;  %v7035_v30 = vld [vmem:[#allocation2 + $0x2d8] sm:$0xff] }
 0x474   : > { %2217 = vrot.lane.b32.xlu1 %v4777_v20, %s5731_s8  ;;  %v4950_v2 = vcombine.high %v2870_v41, %v2871_v4  ;;  %v4949_v1 = vcombine.low %v2870_v41, %v2871_v4  ;;  %v4779_v11 = vcombine.low %v7033_v63, %v7035_v30  ;;  %v2092_v41 = vsel %vm776_vm8, %v1933_v57, %v1935_v10 }
 0x475   : > { %2169 = vrot.lane.b32.xlu0 %v4729_v55, %s5731_s8  ;;  %v4902_v19 = vcombine.high %v2822_v61, %v2823_v34  ;;  %v4901_v6 = vcombine.low %v2822_v61, %v2823_v34  ;;  %v4780_v55 = vcombine.high %v7033_v63, %v7035_v30 }
 0x476   : > { %v2031_v52 = vpop.permute.xlu1 %2030  ;;  %5024 = vmatprep.mubr.msk.bf16.mxu1 %vm535_vm3, %v4950_v2 }
 0x477   : > { %5000 = vmatprep.mubr.msk.bf16.mxu0 %vm535_vm3, %v4902_v19  ;;  %v2029_v20 = vpop.permute.xlu0 %2028  ;;  %3884 = vmatmul.mubr.bf16.gmra.mxu1 %v4949_v1  ;;  %v7053_v19 = vld [vmem:[#allocation2 + $0x168] sm:$0xff] }
 0x478   : > { %3692 = vmatmul.mubr.bf16.gmra.mxu0 %v4901_v6  ;;  %1974 = vrot.lane.b32.xlu1 %v4732_v14, %s5730_s21  ;;  %v2116_v17 = vsel %vm776_vm8, %v2029_v20, %v2031_v52  ;;  %v7051_v14 = vld [vmem:[#allocation2 + $0x160] sm:$0xff] }
 0x479   : > { %1972 = vrot.lane.b32.xlu0 %v4731_v31, %s5730_s21 }
 0x47a   : > { %v2200_v42 = vpop.permute.xlu1 %2199 }
 0x47b   : > { %v2333_v25 = vsel %vm2225_vm12, %v2031_v52, %v2200_v42  ;;  %v2152_v7 = vpop.permute.xlu0 %2151 }
 0x47c   : > { %v4855_v4 = vcombine.low %v2116_v17, %v2333_v25  ;;  %v4856_v61 = vcombine.high %v2116_v17, %v2333_v25  ;;  %v2261_v34 = vsel %vm2225_vm12, %v1935_v10, %v2152_v7  ;;  %2070 = vrot.lane.b32.xlu1 %v4780_v55, %s5730_s21  ;;  %v4734_v25 = vcombine.high %v7051_v14, %v7053_v19 }
 0x47d   : > { %v4807_v2 = vcombine.low %v2092_v41, %v2261_v34  ;;  %v4808_v1 = vcombine.high %v2092_v41, %v2261_v34  ;;  %2068 = vrot.lane.b32.xlu0 %v4779_v11, %s5730_s21 }
 0x47e   : > { %v2872_v6 = vmax.bf16 %v4855_v4, %v6713_v27  ;;  %v2873_v52 = vmax.bf16 %v4856_v61, %v6715_v53  ;;  %v1939_v20 = vpop.permute.xlu1 %1938  ;;  %v4733_v27 = vcombine.low %v7051_v14, %v7053_v19  ;;  %v7065_v53 = vld [vmem:[#allocation2 + $0x2e0] sm:$0xff] }
 0x47f   : > { %v2824_v57 = vmax.bf16 %v4807_v2, %v6699_v3  ;;  %v2825_v42 = vmax.bf16 %v4808_v1, %v6701_v5  ;;  %v1937_v10 = vpop.permute.xlu0 %1936  ;;  %v7067_v3 = vld [vmem:[#allocation2 + $0x2e8] sm:$0xff] }
 0x480   : > { %2219 = vrot.lane.b32.xlu1 %v4779_v11, %s5731_s8  ;;  %v4952_v55 = vcombine.high %v2872_v6, %v2873_v52  ;;  %v4951_v17 = vcombine.low %v2872_v6, %v2873_v52  ;;  %v4781_v4 = vcombine.low %v7065_v53, %v7067_v3  ;;  %v2093_v6 = vsel %vm776_vm8, %v1937_v10, %v1939_v20 }
 0x481   : > { %2171 = vrot.lane.b32.xlu0 %v4731_v31, %s5731_s8  ;;  %v4904_v7 = vcombine.high %v2824_v57, %v2825_v42  ;;  %v4903_v41 = vcombine.low %v2824_v57, %v2825_v42  ;;  %v4782_v31 = vcombine.high %v7065_v53, %v7067_v3 }
 0x482   : > { %v2035_v5 = vpop.permute.xlu1 %2034  ;;  %5025 = vmatprep.mubr.msk.bf16.mxu1 %vm535_vm3, %v4952_v55 }
 0x483   : > { %5001 = vmatprep.mubr.msk.bf16.mxu0 %vm535_vm3, %v4904_v7  ;;  %v2033_v11 = vpop.permute.xlu0 %2032  ;;  %3892 = vmatmul.mubr.bf16.gmra.mxu1 %v4951_v17  ;;  %v7085_v7 = vld [vmem:[#allocation2 + $0x178] sm:$0xff] }
 0x484   : > { %3700 = vmatmul.mubr.bf16.gmra.mxu0 %v4903_v41  ;;  %1978 = vrot.lane.b32.xlu1 %v4734_v25, %s5730_s21  ;;  %v2117_v34 = vsel %vm776_vm8, %v2033_v11, %v2035_v5  ;;  %v7083_v25 = vld [vmem:[#allocation2 + $0x170] sm:$0xff] }
 0x485   : > { %1976 = vrot.lane.b32.xlu0 %v4733_v27, %s5730_s21 }
 0x486   : > { %v2202_v61 = vpop.permute.xlu1 %2201 }
 0x487   : > { %v2336_v2 = vsel %vm2225_vm12, %v2035_v5, %v2202_v61  ;;  %v2154_v1 = vpop.permute.xlu0 %2153 }
 0x488   : > { %v4857_v52 = vcombine.low %v2117_v34, %v2336_v2  ;;  %v4858_v57 = vcombine.high %v2117_v34, %v2336_v2  ;;  %v2264_v42 = vsel %vm2225_vm12, %v1939_v20, %v2154_v1  ;;  %2074 = vrot.lane.b32.xlu1 %v4782_v31, %s5730_s21  ;;  %v4736_v2 = vcombine.high %v7083_v25, %v7085_v7 }
 0x489   : > { %v4809_v55 = vcombine.low %v2093_v6, %v2264_v42  ;;  %v4810_v17 = vcombine.high %v2093_v6, %v2264_v42  ;;  %2072 = vrot.lane.b32.xlu0 %v4781_v4, %s5730_s21 }
 0x48a   : > { %v2874_v41 = vmax.bf16 %v4857_v52, %v6745_v23  ;;  %v2875_v5 = vmax.bf16 %v4858_v57, %v6747_v16  ;;  %v1943_v11 = vpop.permute.xlu1 %1942  ;;  %v4735_v23 = vcombine.low %v7083_v25, %v7085_v7  ;;  %v7097_v16 = vld [vmem:[#allocation2 + $0x2f0] sm:$0xff] }
 0x48b   : > { %v2826_v10 = vmax.bf16 %v4809_v55, %v6731_v36  ;;  %v2827_v61 = vmax.bf16 %v4810_v17, %v6733_v38  ;;  %v1941_v20 = vpop.permute.xlu0 %1940  ;;  %v7099_v36 = vld [vmem:[#allocation2 + $0x2f8] sm:$0xff] }
 0x48c   : > { %2221 = vrot.lane.b32.xlu1 %v4781_v4, %s5731_s8  ;;  %v4954_v31 = vcombine.high %v2874_v41, %v2875_v5  ;;  %v4953_v34 = vcombine.low %v2874_v41, %v2875_v5  ;;  %v4783_v52 = vcombine.low %v7097_v16, %v7099_v36  ;;  %v2094_v41 = vsel %vm776_vm8, %v1941_v20, %v1943_v11 }
 0x48d   : > { %2173 = vrot.lane.b32.xlu0 %v4733_v27, %s5731_s8  ;;  %v4906_v1 = vcombine.high %v2826_v10, %v2827_v61  ;;  %v4905_v6 = vcombine.low %v2826_v10, %v2827_v61  ;;  %v4784_v27 = vcombine.high %v7097_v16, %v7099_v36 }
 0x48e   : > { %v2039_v38 = vpop.permute.xlu1 %2038  ;;  %5026 = vmatprep.mubr.msk.bf16.mxu1 %vm535_vm3, %v4954_v31 }
 0x48f   : > { %5002 = vmatprep.mubr.msk.bf16.mxu0 %vm535_vm3, %v4906_v1  ;;  %v2037_v4 = vpop.permute.xlu0 %2036  ;;  %3900 = vmatmul.mubr.bf16.gmra.mxu1 %v4953_v34 }
 0x490   : > { %3708 = vmatmul.mubr.bf16.gmra.mxu0 %v4905_v6  ;;  %1982 = vrot.lane.b32.xlu1 %v4736_v2, %s5730_s21  ;;  %v2118_v42 = vsel %vm776_vm8, %v2037_v4, %v2039_v38 }
 0x491   : > { %1980 = vrot.lane.b32.xlu0 %v4735_v23, %s5730_s21 }
 0x492   : > { %v2204_v57 = vpop.permute.xlu1 %2203 }
 0x493   : > { %v2339_v55 = vsel %vm2225_vm12, %v2039_v38, %v2204_v57  ;;  %v2156_v17 = vpop.permute.xlu0 %2155 }
 0x494   : > { %v4859_v5 = vcombine.low %v2118_v42, %v2339_v55  ;;  %v4860_v10 = vcombine.high %v2118_v42, %v2339_v55  ;;  %v2267_v61 = vsel %vm2225_vm12, %v1943_v11, %v2156_v17  ;;  %2078 = vrot.lane.b32.xlu1 %v4784_v27, %s5730_s21 }
 0x495   : > { %v4811_v31 = vcombine.low %v2094_v41, %v2267_v61  ;;  %v4812_v34 = vcombine.high %v2094_v41, %v2267_v61  ;;  %2076 = vrot.lane.b32.xlu0 %v4783_v52, %s5730_s21 }
 0x496   : > { %v2876_v2 = vmax.bf16 %v4859_v5, %v6777_v39  ;;  %v2877_v1 = vmax.bf16 %v4860_v10, %v6779_v26  ;;  %v1947_v6 = vpop.permute.xlu1 %1946 }
 0x497   : > { %v2828_v38 = vmax.bf16 %v4811_v31, %v6763_v43  ;;  %v2829_v4 = vmax.bf16 %v4812_v34, %v6765_v50  ;;  %v1945_v20 = vpop.permute.xlu0 %1944 }
 0x498   : > { %2223 = vrot.lane.b32.xlu1 %v4783_v52, %s5731_s8  ;;  %v4956_v57 = vcombine.high %v2876_v2, %v2877_v1  ;;  %v4955_v11 = vcombine.low %v2876_v2, %v2877_v1  ;;  %v2095_v17 = vsel %vm776_vm8, %v1945_v20, %v1947_v6 }
 0x499   : > { %2175 = vrot.lane.b32.xlu0 %v4735_v23, %s5731_s8  ;;  %v4908_v27 = vcombine.high %v2828_v38, %v2829_v4  ;;  %v4907_v42 = vcombine.low %v2828_v38, %v2829_v4 }
 0x49a   : > { %v2043_v55 = vpop.permute.xlu1 %2042  ;;  %5027 = vmatprep.mubr.msk.bf16.mxu1 %vm535_vm3, %v4956_v57 }
 0x49b   : > { %5003 = vmatprep.mubr.msk.bf16.mxu0 %vm535_vm3, %v4908_v27  ;;  %v2041_v39 = vpop.permute.xlu0 %2040  ;;  %3908 = vmatmul.mubr.bf16.gmra.mxu1 %v4955_v11 }
 0x49c   : > { %3716 = vmatmul.mubr.bf16.gmra.mxu0 %v4907_v42  ;;  %v2119_v50 = vsel %vm776_vm8, %v2041_v39, %v2043_v55 }
 0x49e   : > { %v2206_v43 = vpop.permute.xlu1 %2205 }
 0x49f   : > { %v2342_v26 = vsel %vm2225_vm12, %v2043_v55, %v2206_v43  ;;  %v2158_v52 = vpop.permute.xlu0 %2157 }
 0x4a0   : > { %v4861_v41 = vcombine.low %v2119_v50, %v2342_v26  ;;  %v4862_v23 = vcombine.high %v2119_v50, %v2342_v26  ;;  %v2270_v5 = vsel %vm2225_vm12, %v1947_v6, %v2158_v52 }
 0x4a1   : > { %v4813_v10 = vcombine.low %v2095_v17, %v2270_v5  ;;  %v4814_v61 = vcombine.high %v2095_v17, %v2270_v5 }
 0x4a2   : > { %v2878_v31 = vmax.bf16 %v4861_v41, %v6809_v8  ;;  %v2879_v34 = vmax.bf16 %v4862_v23, %v6811_v46  ;;  %v1951_v2 = vpop.permute.xlu1 %1950 }
 0x4a3   : > { %v2830_v1 = vmax.bf16 %v4813_v10, %v6795_v18  ;;  %v2831_v38 = vmax.bf16 %v4814_v61, %v6797_v24  ;;  %v1949_v4 = vpop.permute.xlu0 %1948 }
 0x4a4   : > { %v4958_v57 = vcombine.high %v2878_v31, %v2879_v34  ;;  %v4957_v11 = vcombine.low %v2878_v31, %v2879_v34  ;;  %v2096_v24 = vsel %vm776_vm8, %v1949_v4, %v1951_v2 }
 0x4a5   : > { %v4910_v27 = vcombine.high %v2830_v1, %v2831_v38  ;;  %v4909_v20 = vcombine.low %v2830_v1, %v2831_v38 }
 0x4a6   : > { %v2047_v42 = vpop.permute.xlu1 %2046  ;;  %5028 = vmatprep.mubr.msk.bf16.mxu1 %vm535_vm3, %v4958_v57 }
 0x4a7   : > { %5004 = vmatprep.mubr.msk.bf16.mxu0 %vm535_vm3, %v4910_v27  ;;  %v2045_v6 = vpop.permute.xlu0 %2044  ;;  %3916 = vmatmul.mubr.bf16.gmra.mxu1 %v4957_v11 }
 0x4a8   : > { %3724 = vmatmul.mubr.bf16.gmra.mxu0 %v4909_v20  ;;  %v2120_v46 = vsel %vm776_vm8, %v2045_v6, %v2047_v42 }
 0x4aa   : > { %v2208_v8 = vpop.permute.xlu1 %2207 }
 0x4ab   : > { %v2345_v18 = vsel %vm2225_vm12, %v2047_v42, %v2208_v8  ;;  %v2160_v55 = vpop.permute.xlu0 %2159 }
 0x4ac   : > { %v4863_v39 = vcombine.low %v2120_v46, %v2345_v18  ;;  %v4864_v43 = vcombine.high %v2120_v46, %v2345_v18  ;;  %v2273_v50 = vsel %vm2225_vm12, %v1951_v2, %v2160_v55 }
 0x4ad   : > { %v4815_v26 = vcombine.low %v2096_v24, %v2273_v50  ;;  %v4816_v52 = vcombine.high %v2096_v24, %v2273_v50 }
 0x4ae   : > { %v2880_v17 = vmax.bf16 %v4863_v39, %v6841_v12  ;;  %v2881_v41 = vmax.bf16 %v4864_v43, %v6843_v49  ;;  %v1955_v23 = vpop.permute.xlu1 %1954 }
 0x4af   : > { %v2832_v5 = vmax.bf16 %v4815_v26, %v6827_v56  ;;  %v2833_v10 = vmax.bf16 %v4816_v52, %v6829_v9  ;;  %v1953_v61 = vpop.permute.xlu0 %1952 }
 0x4b0   : > { %v4960_v31 = vcombine.high %v2880_v17, %v2881_v41  ;;  %v4959_v34 = vcombine.low %v2880_v17, %v2881_v41  ;;  %v2097_v9 = vsel %vm776_vm8, %v1953_v61, %v1955_v23 }
 0x4b1   : > { %v4912_v1 = vcombine.high %v2832_v5, %v2833_v10  ;;  %v4911_v38 = vcombine.low %v2832_v5, %v2833_v10 }
 0x4b2   : > { %v2051_v4 = vpop.permute.xlu1 %2050  ;;  %5029 = vmatprep.mubr.msk.bf16.mxu1 %vm535_vm3, %v4960_v31 }
 0x4b3   : > { %5005 = vmatprep.mubr.msk.bf16.mxu0 %vm535_vm3, %v4912_v1  ;;  %v2049_v2 = vpop.permute.xlu0 %2048  ;;  %3924 = vmatmul.mubr.bf16.gmra.mxu1 %v4959_v34 }
 0x4b4   : > { %3732 = vmatmul.mubr.bf16.gmra.mxu0 %v4911_v38  ;;  %v2121_v49 = vsel %vm776_vm8, %v2049_v2, %v2051_v4 }
 0x4b6   : > { %v2210_v12 = vpop.permute.xlu1 %2209 }
 0x4b7   : > { %v2348_v56 = vsel %vm2225_vm12, %v2051_v4, %v2210_v12  ;;  %v2162_v57 = vpop.permute.xlu0 %2161 }
 0x4b8   : > { %v4865_v11 = vcombine.low %v2121_v49, %v2348_v56  ;;  %v4866_v27 = vcombine.high %v2121_v49, %v2348_v56  ;;  %v2276_v20 = vsel %vm2225_vm12, %v1955_v23, %v2162_v57 }
 0x4b9   : > { %v4817_v42 = vcombine.low %v2097_v9, %v2276_v20  ;;  %v4818_v6 = vcombine.high %v2097_v9, %v2276_v20 }
 0x4ba   : > { %v2882_v8 = vmax.bf16 %v4865_v11, %v6873_v47  ;;  %v2883_v46 = vmax.bf16 %v4866_v27, %v6875_v59  ;;  %v1959_v18 = vpop.permute.xlu1 %1958 }
 0x4bb   : > { %v2834_v55 = vmax.bf16 %v4817_v42, %v6859_v0  ;;  %v2835_v24 = vmax.bf16 %v4818_v6, %v6861_v62  ;;  %v1957_v39 = vpop.permute.xlu0 %1956 }
 0x4bc   : > { %v4962_v43 = vcombine.high %v2882_v8, %v2883_v46  ;;  %v4961_v50 = vcombine.low %v2882_v8, %v2883_v46  ;;  %v2098_v61 = vsel %vm776_vm8, %v1957_v39, %v1959_v18 }
 0x4bd   : > { %v4914_v26 = vcombine.high %v2834_v55, %v2835_v24  ;;  %v4913_v52 = vcombine.low %v2834_v55, %v2835_v24 }
 0x4be   : > { %v2055_v17 = vpop.permute.xlu1 %2054  ;;  %5030 = vmatprep.mubr.msk.bf16.mxu1 %vm535_vm3, %v4962_v43 }
 0x4bf   : > { %5006 = vmatprep.mubr.msk.bf16.mxu0 %vm535_vm3, %v4914_v26  ;;  %v2053_v47 = vpop.permute.xlu0 %2052  ;;  %v3805_v59 = vpop.f32.mrf.mxu1  ;;  %3932 = vmatmul.mubr.bf16.gmra.mxu1 %v4961_v50 }
 0x4c0   : > { %v3613_v41 = vpop.f32.mrf.mxu0  ;;  %3740 = vmatmul.mubr.bf16.gmra.mxu0 %v4913_v52  ;;  %v5214_v0 = vpack.c.bf16 %v3805_v59, %v3805_v59  ;;  %v2122_v31 = vsel %vm776_vm8, %v2053_v47, %v2055_v17 }
 0x4c1   : > { %v5166_v62 = vpack.c.bf16 %v3613_v41, %v3613_v41  ;;  %v3807_v23 = vpop.f32.mrf.mxu1 }
 0x4c2   : > { %4429 = vst.msk [vmem:[%s5821_s11 + $0xc0] sm:$0xf] %vm4380_vm15, %v5214_v0  ;;  %v3615_v5 = vpop.f32.mrf.mxu0  ;;  %v2212_v10 = vpop.permute.xlu1 %2211 }
 0x4c3   : > { %4381 = vst.msk [vmem:[%s5821_s11] sm:$0xf] %vm4380_vm15, %v5166_v62  ;;  %v2351_v34 = vsel %vm2225_vm12, %v2055_v17, %v2212_v10  ;;  %v2164_v1 = vpop.permute.xlu0 %2163  ;;  %v3808_v38 = vpop.f32.mrf.mxu1 }
 0x4c4   : > { %v4867_v4 = vcombine.low %v2122_v31, %v2351_v34  ;;  %v4868_v2 = vcombine.high %v2122_v31, %v2351_v34  ;;  %v2279_v12 = vsel %vm2225_vm12, %v1959_v18, %v2164_v1  ;;  %v3616_v49 = vpop.f32.mrf.mxu0  ;;  %v5215_v56 = vpack.c.bf16 %v3808_v38, %v3808_v38 }
 0x4c5   : > { %v4819_v57 = vcombine.low %v2098_v61, %v2279_v12  ;;  %v4820_v9 = vcombine.high %v2098_v61, %v2279_v12  ;;  %v5167_v11 = vpack.c.bf16 %v3616_v49, %v3616_v49  ;;  %v3810_v27 = vpop.f32.mrf.mxu1 }
 0x4c6   : > { %v2884_v20 = vmax.bf16 %v4867_v4, %v6905_v15  ;;  %v2885_v42 = vmax.bf16 %v4868_v2, %v6907_v28  ;;  %4430 = vst.msk [vmem:[%s5821_s11 + $0xc4] sm:$0xf] %vm4380_vm15, %v5215_v56  ;;  %v3618_v6 = vpop.f32.mrf.mxu0  ;;  %v1963_v8 = vpop.permute.xlu1 %1962 }
 0x4c7   : > { %v2836_v46 = vmax.bf16 %v4819_v57, %v6891_v22  ;;  %v2837_v55 = vmax.bf16 %v4820_v9, %v6893_v54  ;;  %4382 = vst.msk [vmem:[%s5821_s11 + $0x4] sm:$0xf] %vm4380_vm15, %v5167_v11  ;;  %v1961_v18 = vpop.permute.xlu0 %1960 }
 0x4c8   : > { %v4964_v24 = vcombine.high %v2884_v20, %v2885_v42  ;;  %v4963_v39 = vcombine.low %v2884_v20, %v2885_v42  ;;  %v2099_v41 = vsel %vm776_vm8, %v1961_v18, %v1963_v8 }
 0x4c9   : > { %v4916_v43 = vcombine.high %v2836_v46, %v2837_v55  ;;  %v4915_v50 = vcombine.low %v2836_v46, %v2837_v55 }
 0x4ca   : > { %v2059_v26 = vpop.permute.xlu1 %2058  ;;  %5031 = vmatprep.mubr.msk.bf16.mxu1 %vm535_vm3, %v4964_v24 }
 0x4cb   : > { %5007 = vmatprep.mubr.msk.bf16.mxu0 %vm535_vm3, %v4916_v43  ;;  %v2057_v15 = vpop.permute.xlu0 %2056  ;;  %v3813_v28 = vpop.f32.mrf.mxu1  ;;  %3940 = vmatmul.mubr.bf16.gmra.mxu1 %v4963_v39 }
 0x4cc   : > { %v3621_v22 = vpop.f32.mrf.mxu0  ;;  %3748 = vmatmul.mubr.bf16.gmra.mxu0 %v4915_v50  ;;  %v5216_v54 = vpack.c.bf16 %v3813_v28, %v3813_v28  ;;  %v2123_v0 = vsel %vm776_vm8, %v2057_v15, %v2059_v26 }
 0x4cd   : > { %v5168_v52 = vpack.c.bf16 %v3621_v22, %v3621_v22  ;;  %v3815_v17 = vpop.f32.mrf.mxu1 }
 0x4ce   : > { %4431 = vst.msk [vmem:[%s5821_s11 + $0xc8] sm:$0xf] %vm4380_vm15, %v5216_v54  ;;  %v3623_v47 = vpop.f32.mrf.mxu0  ;;  %v2214_v59 = vpop.permute.xlu1 %2213 }
 0x4cf   : > { %4383 = vst.msk [vmem:[%s5821_s11 + $0x8] sm:$0xf] %vm4380_vm15, %v5168_v52  ;;  %v2354_v62 = vsel %vm2225_vm12, %v2059_v26, %v2214_v59  ;;  %v2166_v23 = vpop.permute.xlu0 %2165  ;;  %v3816_v5 = vpop.f32.mrf.mxu1 }
 0x4d0   : > { %v4869_v10 = vcombine.low %v2123_v0, %v2354_v62  ;;  %v4870_v61 = vcombine.high %v2123_v0, %v2354_v62  ;;  %v2282_v31 = vsel %vm2225_vm12, %v1963_v8, %v2166_v23  ;;  %v3624_v34 = vpop.f32.mrf.mxu0  ;;  %v5217_v1 = vpack.c.bf16 %v3816_v5, %v3816_v5 }
 0x4d1   : > { %v4821_v38 = vcombine.low %v2099_v41, %v2282_v31  ;;  %v4822_v4 = vcombine.high %v2099_v41, %v2282_v31  ;;  %v5169_v2 = vpack.c.bf16 %v3624_v34, %v3624_v34  ;;  %v3818_v12 = vpop.f32.mrf.mxu1 }
 0x4d2   : > { %v2886_v49 = vmax.bf16 %v4869_v10, %v6937_v35  ;;  %v2887_v56 = vmax.bf16 %v4870_v61, %v6939_v13  ;;  %4432 = vst.msk [vmem:[%s5821_s11 + $0xcc] sm:$0xf] %vm4380_vm15, %v5217_v1  ;;  %v3626_v57 = vpop.f32.mrf.mxu0  ;;  %v1967_v9 = vpop.permute.xlu1 %1966 }
 0x4d3   : > { %v2838_v11 = vmax.bf16 %v4821_v38, %v6923_v37  ;;  %v2839_v27 = vmax.bf16 %v4822_v4, %v6925_v21  ;;  %4384 = vst.msk [vmem:[%s5821_s11 + $0xc] sm:$0xf] %vm4380_vm15, %v5169_v2  ;;  %v1965_v20 = vpop.permute.xlu0 %1964 }
 0x4d4   : > { %v4966_v42 = vcombine.high %v2886_v49, %v2887_v56  ;;  %v4965_v6 = vcombine.low %v2886_v49, %v2887_v56  ;;  %v2100_v50 = vsel %vm776_vm8, %v1965_v20, %v1967_v9 }
 0x4d5   : > { %v4918_v8 = vcombine.high %v2838_v11, %v2839_v27  ;;  %v4917_v46 = vcombine.low %v2838_v11, %v2839_v27 }
 0x4d6   : > { %v2063_v55 = vpop.permute.xlu1 %2062  ;;  %5032 = vmatprep.mubr.msk.bf16.mxu1 %vm535_vm3, %v4966_v42 }
 0x4d7   : > { %5008 = vmatprep.mubr.msk.bf16.mxu0 %vm535_vm3, %v4918_v8  ;;  %v2061_v35 = vpop.permute.xlu0 %2060  ;;  %v3821_v13 = vpop.f32.mrf.mxu1  ;;  %3948 = vmatmul.mubr.bf16.gmra.mxu1 %v4965_v6 }
 0x4d8   : > { %v3629_v37 = vpop.f32.mrf.mxu0  ;;  %3756 = vmatmul.mubr.bf16.gmra.mxu0 %v4917_v46  ;;  %v5218_v21 = vpack.c.bf16 %v3821_v13, %v3821_v13  ;;  %v2124_v26 = vsel %vm776_vm8, %v2061_v35, %v2063_v55 }
 0x4d9   : > { %v5170_v18 = vpack.c.bf16 %v3629_v37, %v3629_v37  ;;  %v3823_v24 = vpop.f32.mrf.mxu1 }
 0x4da   : > { %4433 = vst.msk [vmem:[%s5821_s11 + $0xd0] sm:$0xf] %vm4380_vm15, %v5218_v21  ;;  %v3631_v39 = vpop.f32.mrf.mxu0  ;;  %v2216_v43 = vpop.permute.xlu1 %2215 }
 0x4db   : > { %4385 = vst.msk [vmem:[%s5821_s11 + $0x10] sm:$0xf] %vm4380_vm15, %v5170_v18  ;;  %v2357_v15 = vsel %vm2225_vm12, %v2063_v55, %v2216_v43  ;;  %v2168_v28 = vpop.permute.xlu0 %2167  ;;  %v3824_v22 = vpop.f32.mrf.mxu1 }
 0x4dc   : > { %v4871_v54 = vcombine.low %v2124_v26, %v2357_v15  ;;  %v4872_v52 = vcombine.high %v2124_v26, %v2357_v15  ;;  %v2285_v17 = vsel %vm2225_vm12, %v1967_v9, %v2168_v28  ;;  %v3632_v47 = vpop.f32.mrf.mxu0  ;;  %v5219_v59 = vpack.c.bf16 %v3824_v22, %v3824_v22 }
 0x4dd   : > { %v4823_v41 = vcombine.low %v2100_v50, %v2285_v17  ;;  %v4824_v0 = vcombine.high %v2100_v50, %v2285_v17  ;;  %v5171_v62 = vpack.c.bf16 %v3632_v47, %v3632_v47  ;;  %v3826_v23 = vpop.f32.mrf.mxu1 }
 0x4de   : > { %v2888_v5 = vmax.bf16 %v4871_v54, %v6969_v51  ;;  %v2889_v10 = vmax.bf16 %v4872_v52, %v6971_v40  ;;  %4434 = vst.msk [vmem:[%s5821_s11 + $0xd4] sm:$0xf] %vm4380_vm15, %v5219_v59  ;;  %v3634_v61 = vpop.f32.mrf.mxu0  ;;  %v1971_v31 = vpop.permute.xlu1 %1970 }
 0x4df   : > { %v2840_v34 = vmax.bf16 %v4823_v41, %v6955_v48  ;;  %v2841_v1 = vmax.bf16 %v4824_v0, %v6957_v32  ;;  %4386 = vst.msk [vmem:[%s5821_s11 + $0x14] sm:$0xf] %vm4380_vm15, %v5171_v62  ;;  %v1969_v38 = vpop.permute.xlu0 %1968 }
 0x4e0   : > { %v4968_v4 = vcombine.high %v2888_v5, %v2889_v10  ;;  %v4967_v2 = vcombine.low %v2888_v5, %v2889_v10  ;;  %v2101_v20 = vsel %vm776_vm8, %v1969_v38, %v1971_v31 }
 0x4e1   : > { %v4920_v12 = vcombine.high %v2840_v34, %v2841_v1  ;;  %v4919_v49 = vcombine.low %v2840_v34, %v2841_v1 }
 0x4e2   : > { %v2067_v56 = vpop.permute.xlu1 %2066  ;;  %5033 = vmatprep.mubr.msk.bf16.mxu1 %vm535_vm3, %v4968_v4 }
 0x4e3   : > { %5009 = vmatprep.mubr.msk.bf16.mxu0 %vm535_vm3, %v4920_v12  ;;  %v2065_v51 = vpop.permute.xlu0 %2064  ;;  %v3829_v40 = vpop.f32.mrf.mxu1  ;;  %3956 = vmatmul.mubr.bf16.gmra.mxu1 %v4967_v2 }
 0x4e4   : > { %v3637_v48 = vpop.f32.mrf.mxu0  ;;  %3764 = vmatmul.mubr.bf16.gmra.mxu0 %v4919_v49  ;;  %v5220_v32 = vpack.c.bf16 %v3829_v40, %v3829_v40  ;;  %v2125_v42 = vsel %vm776_vm8, %v2065_v51, %v2067_v56 }
 0x4e5   : > { %v5172_v57 = vpack.c.bf16 %v3637_v48, %v3637_v48  ;;  %v3831_v9 = vpop.f32.mrf.mxu1 }
 0x4e6   : > { %4435 = vst.msk [vmem:[%s5821_s11 + $0xd8] sm:$0xf] %vm4380_vm15, %v5220_v32  ;;  %v3639_v11 = vpop.f32.mrf.mxu0  ;;  %v2218_v27 = vpop.permute.xlu1 %2217 }
 0x4e7   : > { %4387 = vst.msk [vmem:[%s5821_s11 + $0x18] sm:$0xf] %vm4380_vm15, %v5172_v57  ;;  %v2360_v6 = vsel %vm2225_vm12, %v2067_v56, %v2218_v27  ;;  %v2170_v8 = vpop.permute.xlu0 %2169  ;;  %v3832_v46 = vpop.f32.mrf.mxu1 }
 0x4e8   : > { %v4873_v55 = vcombine.low %v2125_v42, %v2360_v6  ;;  %v4874_v35 = vcombine.high %v2125_v42, %v2360_v6  ;;  %v2288_v13 = vsel %vm2225_vm12, %v1971_v31, %v2170_v8  ;;  %v3640_v37 = vpop.f32.mrf.mxu0  ;;  %v5221_v21 = vpack.c.bf16 %v3832_v46, %v3832_v46 }
 0x4e9   : > { %v4825_v18 = vcombine.low %v2101_v20, %v2288_v13  ;;  %v4826_v24 = vcombine.high %v2101_v20, %v2288_v13  ;;  %v5173_v39 = vpack.c.bf16 %v3640_v37, %v3640_v37  ;;  %v3834_v43 = vpop.f32.mrf.mxu1 }
 0x4ea   : > { %v2890_v50 = vmax.bf16 %v4873_v55, %v7001_v58  ;;  %v2891_v26 = vmax.bf16 %v4874_v35, %v7003_v60  ;;  %4436 = vst.msk [vmem:[%s5821_s11 + $0xdc] sm:$0xf] %vm4380_vm15, %v5221_v21  ;;  %v3642_v15 = vpop.f32.mrf.mxu0  ;;  %v1975_v28 = vpop.permute.xlu1 %1974 }
 0x4eb   : > { %v2842_v22 = vmax.bf16 %v4825_v18, %v6987_v29  ;;  %v2843_v54 = vmax.bf16 %v4826_v24, %v6989_v33  ;;  %4388 = vst.msk [vmem:[%s5821_s11 + $0x1c] sm:$0xf] %vm4380_vm15, %v5173_v39  ;;  %v1973_v52 = vpop.permute.xlu0 %1972 }
 0x4ec   : > { %v4970_v17 = vcombine.high %v2890_v50, %v2891_v26  ;;  %v4969_v47 = vcombine.low %v2890_v50, %v2891_v26  ;;  %v2102_v61 = vsel %vm776_vm8, %v1973_v52, %v1975_v28 }
 0x4ed   : > { %v4922_v59 = vcombine.high %v2842_v22, %v2843_v54  ;;  %v4921_v41 = vcombine.low %v2842_v22, %v2843_v54 }
 0x4ee   : > { %v2071_v0 = vpop.permute.xlu1 %2070  ;;  %5034 = vmatprep.mubr.msk.bf16.mxu1 %vm535_vm3, %v4970_v17 }
 0x4ef   : > { %5010 = vmatprep.mubr.msk.bf16.mxu0 %vm535_vm3, %v4922_v59  ;;  %v2069_v58 = vpop.permute.xlu0 %2068  ;;  %v3837_v60 = vpop.f32.mrf.mxu1  ;;  %3964 = vmatmul.mubr.bf16.gmra.mxu1 %v4969_v47 }
 0x4f0   : > { %v3645_v29 = vpop.f32.mrf.mxu0  ;;  %3772 = vmatmul.mubr.bf16.gmra.mxu0 %v4921_v41  ;;  %v5222_v33 = vpack.c.bf16 %v3837_v60, %v3837_v60  ;;  %v2126_v31 = vsel %vm776_vm8, %v2069_v58, %v2071_v0 }
 0x4f1   : > { %v5174_v62 = vpack.c.bf16 %v3645_v29, %v3645_v29  ;;  %v3839_v23 = vpop.f32.mrf.mxu1 }
 0x4f2   : > { %4437 = vst.msk [vmem:[%s5821_s11 + $0xe0] sm:$0xf] %vm4380_vm15, %v5222_v33  ;;  %v3647_v5 = vpop.f32.mrf.mxu0  ;;  %v2220_v10 = vpop.permute.xlu1 %2219 }
 0x4f3   : > { %4389 = vst.msk [vmem:[%s5821_s11 + $0x20] sm:$0xf] %vm4380_vm15, %v5174_v62  ;;  %v2363_v34 = vsel %vm2225_vm12, %v2071_v0, %v2220_v10  ;;  %v2172_v1 = vpop.permute.xlu0 %2171  ;;  %v3840_v38 = vpop.f32.mrf.mxu1 }
 0x4f4   : > { %v4875_v4 = vcombine.low %v2126_v31, %v2363_v34  ;;  %v4876_v2 = vcombine.high %v2126_v31, %v2363_v34  ;;  %v2291_v12 = vsel %vm2225_vm12, %v1975_v28, %v2172_v1  ;;  %v3648_v49 = vpop.f32.mrf.mxu0  ;;  %v5223_v56 = vpack.c.bf16 %v3840_v38, %v3840_v38 }
 0x4f5   : > { %v4827_v51 = vcombine.low %v2102_v61, %v2291_v12  ;;  %v4828_v40 = vcombine.high %v2102_v61, %v2291_v12  ;;  %v5175_v48 = vpack.c.bf16 %v3648_v49, %v3648_v49  ;;  %v3842_v32 = vpop.f32.mrf.mxu1 }
 0x4f6   : > { %v2892_v57 = vmax.bf16 %v4875_v4, %v7033_v63  ;;  %v2893_v9 = vmax.bf16 %v4876_v2, %v7035_v30  ;;  %4438 = vst.msk [vmem:[%s5821_s11 + $0xe4] sm:$0xf] %vm4380_vm15, %v5223_v56  ;;  %v3650_v11 = vpop.f32.mrf.mxu0  ;;  %v1979_v27 = vpop.permute.xlu1 %1978 }
 0x4f7   : > { %v2844_v20 = vmax.bf16 %v4827_v51, %v7019_v44  ;;  %v2845_v42 = vmax.bf16 %v4828_v40, %v7021_v45  ;;  %4390 = vst.msk [vmem:[%s5821_s11 + $0x24] sm:$0xf] %vm4380_vm15, %v5175_v48  ;;  %v1977_v6 = vpop.permute.xlu0 %1976 }
 0x4f8   : > { %v4972_v8 = vcombine.high %v2892_v57, %v2893_v9  ;;  %v4971_v46 = vcombine.low %v2892_v57, %v2893_v9  ;;  %v2103_v39 = vsel %vm776_vm8, %v1977_v6, %v1979_v27 }
 0x4f9   : > { %v4924_v55 = vcombine.high %v2844_v20, %v2845_v42  ;;  %v4923_v35 = vcombine.low %v2844_v20, %v2845_v42 }
 0x4fa   : > { %v2075_v13 = vpop.permute.xlu1 %2074  ;;  %5035 = vmatprep.mubr.msk.bf16.mxu1 %vm535_vm3, %v4972_v8 }
 0x4fb   : > { %5011 = vmatprep.mubr.msk.bf16.mxu0 %vm535_vm3, %v4924_v55  ;;  %v2073_v63 = vpop.permute.xlu0 %2072  ;;  %v3845_v30 = vpop.f32.mrf.mxu1  ;;  %3972 = vmatmul.mubr.bf16.gmra.mxu1 %v4971_v46 }
 0x4fc   : > { %v3653_v44 = vpop.f32.mrf.mxu0  ;;  %3780 = vmatmul.mubr.bf16.gmra.mxu0 %v4923_v35  ;;  %v5224_v45 = vpack.c.bf16 %v3845_v30, %v3845_v30  ;;  %v2127_v43 = vsel %vm776_vm8, %v2073_v63, %v2075_v13 }
 0x4fd   : > { %v5176_v37 = vpack.c.bf16 %v3653_v44, %v3653_v44  ;;  %v3847_v21 = vpop.f32.mrf.mxu1 }
 0x4fe   : > { %4439 = vst.msk [vmem:[%s5821_s11 + $0xe8] sm:$0xf] %vm4380_vm15, %v5224_v45  ;;  %v3655_v18 = vpop.f32.mrf.mxu0  ;;  %v2222_v24 = vpop.permute.xlu1 %2221 }
 0x4ff   : > { %4391 = vst.msk [vmem:[%s5821_s11 + $0x28] sm:$0xf] %vm4380_vm15, %v5176_v37  ;;  %v2366_v50 = vsel %vm2225_vm12, %v2075_v13, %v2222_v24  ;;  %v2174_v26 = vpop.permute.xlu0 %2173  ;;  %v3848_v15 = vpop.f32.mrf.mxu1 }
 0x500   : > { %v4877_v28 = vcombine.low %v2127_v43, %v2366_v50  ;;  %v4878_v22 = vcombine.high %v2127_v43, %v2366_v50  ;;  %v2294_v54 = vsel %vm2225_vm12, %v1979_v27, %v2174_v26  ;;  %v3656_v52 = vpop.f32.mrf.mxu0  ;;  %v5225_v17 = vpack.c.bf16 %v3848_v15, %v3848_v15 }
 0x501   : > { %v4829_v47 = vcombine.low %v2103_v39, %v2294_v54  ;;  %v4830_v59 = vcombine.high %v2103_v39, %v2294_v54  ;;  %v5177_v41 = vpack.c.bf16 %v3656_v52, %v3656_v52  ;;  %v3850_v0 = vpop.f32.mrf.mxu1 }
 0x502   : > { %v2894_v58 = vmax.bf16 %v4877_v28, %v7065_v53  ;;  %v2895_v60 = vmax.bf16 %v4878_v22, %v7067_v3  ;;  %4440 = vst.msk [vmem:[%s5821_s11 + $0xec] sm:$0xf] %vm4380_vm15, %v5225_v17  ;;  %v3658_v29 = vpop.f32.mrf.mxu0  ;;  %v1983_v33 = vpop.permute.xlu1 %1982 }
 0x503   : > { %v2846_v62 = vmax.bf16 %v4829_v47, %v7051_v14  ;;  %v2847_v23 = vmax.bf16 %v4830_v59, %v7053_v19  ;;  %4392 = vst.msk [vmem:[%s5821_s11 + $0x2c] sm:$0xf] %vm4380_vm15, %v5177_v41  ;;  %v1981_v5 = vpop.permute.xlu0 %1980 }
 0x504   : > { %v4974_v10 = vcombine.high %v2894_v58, %v2895_v60  ;;  %v4973_v61 = vcombine.low %v2894_v58, %v2895_v60  ;;  %v2104_v49 = vsel %vm776_vm8, %v1981_v5, %v1983_v33 }
 0x505   : > { %v4926_v31 = vcombine.high %v2846_v62, %v2847_v23  ;;  %v4925_v34 = vcombine.low %v2846_v62, %v2847_v23 }
 0x506   : > { %v2079_v1 = vpop.permute.xlu1 %2078  ;;  %5036 = vmatprep.mubr.msk.bf16.mxu1 %vm535_vm3, %v4974_v10 }
 0x507   : > { %5012 = vmatprep.mubr.msk.bf16.mxu0 %vm535_vm3, %v4926_v31  ;;  %v2077_v53 = vpop.permute.xlu0 %2076  ;;  %v3853_v3 = vpop.f32.mrf.mxu1  ;;  %3980 = vmatmul.mubr.bf16.gmra.mxu1 %v4973_v61 }
 0x508   : > { %v3661_v14 = vpop.f32.mrf.mxu0  ;;  %3788 = vmatmul.mubr.bf16.gmra.mxu0 %v4925_v34  ;;  %v5226_v19 = vpack.c.bf16 %v3853_v3, %v3853_v3  ;;  %v2128_v56 = vsel %vm776_vm8, %v2077_v53, %v2079_v1 }
 0x509   : > { %v5178_v38 = vpack.c.bf16 %v3661_v14, %v3661_v14  ;;  %v3855_v4 = vpop.f32.mrf.mxu1 }
 0x50a   : > { %4441 = vst.msk [vmem:[%s5821_s11 + $0xf0] sm:$0xf] %vm4380_vm15, %v5226_v19  ;;  %v3663_v2 = vpop.f32.mrf.mxu0  ;;  %v2224_v12 = vpop.permute.xlu1 %2223 }
 0x50b   : > { %4393 = vst.msk [vmem:[%s5821_s11 + $0x30] sm:$0xf] %vm4380_vm15, %v5178_v38  ;;  %v2369_v51 = vsel %vm2225_vm12, %v2079_v1, %v2224_v12  ;;  %v2176_v40 = vpop.permute.xlu0 %2175  ;;  %v3856_v48 = vpop.f32.mrf.mxu1 }
 0x50c   : > { %v4879_v32 = vcombine.low %v2128_v56, %v2369_v51  ;;  %v4880_v57 = vcombine.high %v2128_v56, %v2369_v51  ;;  %v2297_v9 = vsel %vm2225_vm12, %v1983_v33, %v2176_v40  ;;  %v3664_v11 = vpop.f32.mrf.mxu0  ;;  %v5227_v27 = vpack.c.bf16 %v3856_v48, %v3856_v48 }
 0x50d   : > { %v4831_v20 = vcombine.low %v2104_v49, %v2297_v9  ;;  %v4832_v42 = vcombine.high %v2104_v49, %v2297_v9  ;;  %v5179_v6 = vpack.c.bf16 %v3664_v11, %v3664_v11  ;;  %v3858_v8 = vpop.f32.mrf.mxu1 }
 0x50e   : > { %v2896_v46 = vmax.bf16 %v4879_v32, %v7097_v16  ;;  %v2897_v55 = vmax.bf16 %v4880_v57, %v7099_v36  ;;  %4442 = vst.msk [vmem:[%s5821_s11 + $0xf4] sm:$0xf] %vm4380_vm15, %v5227_v27  ;;  %v3666_v35 = vpop.f32.mrf.mxu0 }
 0x50f   : > { %v2848_v13 = vmax.bf16 %v4831_v20, %v7083_v25  ;;  %v2849_v63 = vmax.bf16 %v4832_v42, %v7085_v7  ;;  %4394 = vst.msk [vmem:[%s5821_s11 + $0x34] sm:$0xf] %vm4380_vm15, %v5179_v6 }
 0x510   : > { %v4976_v30 = vcombine.high %v2896_v46, %v2897_v55  ;;  %v4975_v44 = vcombine.low %v2896_v46, %v2897_v55 }
 0x511   : > { %v4928_v45 = vcombine.high %v2848_v13, %v2849_v63  ;;  %v4927_v37 = vcombine.low %v2848_v13, %v2849_v63 }
 0x512   : > { %5037 = vmatprep.mubr.msk.bf16.mxu1 %vm535_vm3, %v4976_v30 }
 0x513   : > { %5013 = vmatprep.mubr.msk.bf16.mxu0 %vm535_vm3, %v4928_v45  ;;  %v3861_v16 = vpop.f32.mrf.mxu1  ;;  %3988 = vmatmul.mubr.bf16.gmra.mxu1 %v4975_v44 }
 0x514   : > { %v3669_v36 = vpop.f32.mrf.mxu0  ;;  %3796 = vmatmul.mubr.bf16.gmra.mxu0 %v4927_v37  ;;  %v5228_v25 = vpack.c.bf16 %v3861_v16, %v3861_v16 }
 0x515   : > { %v5180_v21 = vpack.c.bf16 %v3669_v36, %v3669_v36  ;;  %v3863_v7 = vpop.f32.mrf.mxu1 }
 0x516   : > { %4443 = vst.msk [vmem:[%s5821_s11 + $0xf8] sm:$0xf] %vm4380_vm15, %v5228_v25  ;;  %v3671_v18 = vpop.f32.mrf.mxu0 }
 0x517   : > { %4395 = vst.msk [vmem:[%s5821_s11 + $0x38] sm:$0xf] %vm4380_vm15, %v5180_v21  ;;  %v3864_v24 = vpop.f32.mrf.mxu1 }
 0x518   : > { %v3672_v39 = vpop.f32.mrf.mxu0  ;;  %v5229_v43 = vpack.c.bf16 %v3864_v24, %v3864_v24 }
 0x519   : > { %v5181_v50 = vpack.c.bf16 %v3672_v39, %v3672_v39  ;;  %v3866_v26 = vpop.f32.mrf.mxu1 }
 0x51a   : > { %4444 = vst.msk [vmem:[%s5821_s11 + $0xfc] sm:$0xf] %vm4380_vm15, %v5229_v43  ;;  %v3674_v15 = vpop.f32.mrf.mxu0 }
 0x51b   : > { %4396 = vst.msk [vmem:[%s5821_s11 + $0x3c] sm:$0xf] %vm4380_vm15, %v5181_v50 }
 0x51f   : > { %v3869_v28 = vpop.f32.mrf.mxu1 }
 0x520   : > { %v3677_v22 = vpop.f32.mrf.mxu0  ;;  %v5230_v54 = vpack.c.bf16 %v3869_v28, %v3869_v28 }
 0x521   : > { %v5182_v52 = vpack.c.bf16 %v3677_v22, %v3677_v22  ;;  %v3871_v17 = vpop.f32.mrf.mxu1 }
 0x522   : > { %4445 = vst.msk [vmem:[%s5821_s11 + $0x100] sm:$0xf] %vm4380_vm15, %v5230_v54  ;;  %v3679_v47 = vpop.f32.mrf.mxu0 }
 0x523   : > { %4397 = vst.msk [vmem:[%s5821_s11 + $0x40] sm:$0xf] %vm4380_vm15, %v5182_v52  ;;  %v3872_v59 = vpop.f32.mrf.mxu1 }
 0x524   : > { %v3680_v41 = vpop.f32.mrf.mxu0  ;;  %v5231_v0 = vpack.c.bf16 %v3872_v59, %v3872_v59 }
 0x525   : > { %v5183_v58 = vpack.c.bf16 %v3680_v41, %v3680_v41  ;;  %v3874_v60 = vpop.f32.mrf.mxu1 }
 0x526   : > { %4446 = vst.msk [vmem:[%s5821_s11 + $0x104] sm:$0xf] %vm4380_vm15, %v5231_v0  ;;  %v3682_v29 = vpop.f32.mrf.mxu0 }
 0x527   : > { %4398 = vst.msk [vmem:[%s5821_s11 + $0x44] sm:$0xf] %vm4380_vm15, %v5183_v58 }
 0x52b   : > { %v3877_v33 = vpop.f32.mrf.mxu1 }
 0x52c   : > { %v3685_v62 = vpop.f32.mrf.mxu0  ;;  %v5232_v23 = vpack.c.bf16 %v3877_v33, %v3877_v33 }
 0x52d   : > { %v5184_v5 = vpack.c.bf16 %v3685_v62, %v3685_v62  ;;  %v3879_v10 = vpop.f32.mrf.mxu1 }
 0x52e   : > { %4447 = vst.msk [vmem:[%s5821_s11 + $0x108] sm:$0xf] %vm4380_vm15, %v5232_v23  ;;  %v3687_v61 = vpop.f32.mrf.mxu0 }
 0x52f   : > { %4399 = vst.msk [vmem:[%s5821_s11 + $0x48] sm:$0xf] %vm4380_vm15, %v5184_v5  ;;  %v3880_v31 = vpop.f32.mrf.mxu1 }
 0x530   : > { %v3688_v34 = vpop.f32.mrf.mxu0  ;;  %v5233_v1 = vpack.c.bf16 %v3880_v31, %v3880_v31 }
 0x531   : > { %v5185_v53 = vpack.c.bf16 %v3688_v34, %v3688_v34  ;;  %v3882_v3 = vpop.f32.mrf.mxu1 }
 0x532   : > { %4448 = vst.msk [vmem:[%s5821_s11 + $0x10c] sm:$0xf] %vm4380_vm15, %v5233_v1  ;;  %v3690_v14 = vpop.f32.mrf.mxu0 }
 0x533   : > { %4400 = vst.msk [vmem:[%s5821_s11 + $0x4c] sm:$0xf] %vm4380_vm15, %v5185_v53 }
 0x537   : > { %v3885_v19 = vpop.f32.mrf.mxu1 }
 0x538   : > { %v3693_v38 = vpop.f32.mrf.mxu0  ;;  %v5234_v4 = vpack.c.bf16 %v3885_v19, %v3885_v19 }
 0x539   : > { %v5186_v2 = vpack.c.bf16 %v3693_v38, %v3693_v38  ;;  %v3887_v12 = vpop.f32.mrf.mxu1 }
 0x53a   : > { %4449 = vst.msk [vmem:[%s5821_s11 + $0x110] sm:$0xf] %vm4380_vm15, %v5234_v4  ;;  %v3695_v49 = vpop.f32.mrf.mxu0 }
 0x53b   : > { %4401 = vst.msk [vmem:[%s5821_s11 + $0x50] sm:$0xf] %vm4380_vm15, %v5186_v2  ;;  %v3888_v56 = vpop.f32.mrf.mxu1 }
 0x53c   : > { %v3696_v51 = vpop.f32.mrf.mxu0  ;;  %v5235_v40 = vpack.c.bf16 %v3888_v56, %v3888_v56 }
 0x53d   : > { %v5187_v48 = vpack.c.bf16 %v3696_v51, %v3696_v51  ;;  %v3890_v32 = vpop.f32.mrf.mxu1 }
 0x53e   : > { %4450 = vst.msk [vmem:[%s5821_s11 + $0x114] sm:$0xf] %vm4380_vm15, %v5235_v40  ;;  %v3698_v57 = vpop.f32.mrf.mxu0 }
 0x53f   : > { %4402 = vst.msk [vmem:[%s5821_s11 + $0x54] sm:$0xf] %vm4380_vm15, %v5187_v48 }
 0x543   : > { %v3893_v9 = vpop.f32.mrf.mxu1 }
 0x544   : > { %v3701_v11 = vpop.f32.mrf.mxu0  ;;  %v5236_v27 = vpack.c.bf16 %v3893_v9, %v3893_v9 }
 0x545   : > { %v5188_v20 = vpack.c.bf16 %v3701_v11, %v3701_v11  ;;  %v3895_v42 = vpop.f32.mrf.mxu1 }
 0x546   : > { %4451 = vst.msk [vmem:[%s5821_s11 + $0x118] sm:$0xf] %vm4380_vm15, %v5236_v27  ;;  %v3703_v6 = vpop.f32.mrf.mxu0 }
 0x547   : > { %4403 = vst.msk [vmem:[%s5821_s11 + $0x58] sm:$0xf] %vm4380_vm15, %v5188_v20  ;;  %v3896_v8 = vpop.f32.mrf.mxu1 }
 0x548   : > { %v3704_v46 = vpop.f32.mrf.mxu0  ;;  %v5237_v55 = vpack.c.bf16 %v3896_v8, %v3896_v8 }
 0x549   : > { %v5189_v35 = vpack.c.bf16 %v3704_v46, %v3704_v46  ;;  %v3898_v13 = vpop.f32.mrf.mxu1 }
 0x54a   : > { %4452 = vst.msk [vmem:[%s5821_s11 + $0x11c] sm:$0xf] %vm4380_vm15, %v5237_v55  ;;  %v3706_v63 = vpop.f32.mrf.mxu0 }
 0x54b   : > { %4404 = vst.msk [vmem:[%s5821_s11 + $0x5c] sm:$0xf] %vm4380_vm15, %v5189_v35 }
 0x54f   : > { %v3901_v30 = vpop.f32.mrf.mxu1 }
 0x550   : > { %v3709_v44 = vpop.f32.mrf.mxu0  ;;  %v5238_v45 = vpack.c.bf16 %v3901_v30, %v3901_v30 }
 0x551   : > { %v5190_v37 = vpack.c.bf16 %v3709_v44, %v3709_v44  ;;  %v3903_v16 = vpop.f32.mrf.mxu1 }
 0x552   : > { %4453 = vst.msk [vmem:[%s5821_s11 + $0x120] sm:$0xf] %vm4380_vm15, %v5238_v45  ;;  %v3711_v36 = vpop.f32.mrf.mxu0 }
 0x553   : > { %4405 = vst.msk [vmem:[%s5821_s11 + $0x60] sm:$0xf] %vm4380_vm15, %v5190_v37  ;;  %v3904_v25 = vpop.f32.mrf.mxu1 }
 0x554   : > { %v3712_v21 = vpop.f32.mrf.mxu0  ;;  %v5239_v7 = vpack.c.bf16 %v3904_v25, %v3904_v25 }
 0x555   : > { %v5191_v18 = vpack.c.bf16 %v3712_v21, %v3712_v21  ;;  %v3906_v24 = vpop.f32.mrf.mxu1 }
 0x556   : > { %4454 = vst.msk [vmem:[%s5821_s11 + $0x124] sm:$0xf] %vm4380_vm15, %v5239_v7  ;;  %v3714_v39 = vpop.f32.mrf.mxu0 }
 0x557   : > { %4406 = vst.msk [vmem:[%s5821_s11 + $0x64] sm:$0xf] %vm4380_vm15, %v5191_v18 }
 0x55b   : > { %v3909_v43 = vpop.f32.mrf.mxu1 }
 0x55c   : > { %v3717_v50 = vpop.f32.mrf.mxu0  ;;  %v5240_v26 = vpack.c.bf16 %v3909_v43, %v3909_v43 }
 0x55d   : > { %v5192_v15 = vpack.c.bf16 %v3717_v50, %v3717_v50  ;;  %v3911_v28 = vpop.f32.mrf.mxu1 }
 0x55e   : > { %4455 = vst.msk [vmem:[%s5821_s11 + $0x128] sm:$0xf] %vm4380_vm15, %v5240_v26  ;;  %v3719_v22 = vpop.f32.mrf.mxu0 }
 0x55f   : > { %4407 = vst.msk [vmem:[%s5821_s11 + $0x68] sm:$0xf] %vm4380_vm15, %v5192_v15  ;;  %v3912_v54 = vpop.f32.mrf.mxu1 }
 0x560   : > { %v3720_v52 = vpop.f32.mrf.mxu0  ;;  %v5241_v17 = vpack.c.bf16 %v3912_v54, %v3912_v54 }
 0x561   : > { %v5193_v47 = vpack.c.bf16 %v3720_v52, %v3720_v52  ;;  %v3914_v59 = vpop.f32.mrf.mxu1 }
 0x562   : > { %4456 = vst.msk [vmem:[%s5821_s11 + $0x12c] sm:$0xf] %vm4380_vm15, %v5241_v17  ;;  %v3722_v41 = vpop.f32.mrf.mxu0 }
 0x563   : > { %4408 = vst.msk [vmem:[%s5821_s11 + $0x6c] sm:$0xf] %vm4380_vm15, %v5193_v47 }
 0x567   : > { %v3917_v0 = vpop.f32.mrf.mxu1 }
 0x568   : > { %v3725_v58 = vpop.f32.mrf.mxu0  ;;  %v5242_v60 = vpack.c.bf16 %v3917_v0, %v3917_v0 }
 0x569   : > { %v5194_v29 = vpack.c.bf16 %v3725_v58, %v3725_v58  ;;  %v3919_v33 = vpop.f32.mrf.mxu1 }
 0x56a   : > { %4457 = vst.msk [vmem:[%s5821_s11 + $0x130] sm:$0xf] %vm4380_vm15, %v5242_v60  ;;  %v3727_v62 = vpop.f32.mrf.mxu0 }
 0x56b   : > { %4409 = vst.msk [vmem:[%s5821_s11 + $0x70] sm:$0xf] %vm4380_vm15, %v5194_v29  ;;  %v3920_v23 = vpop.f32.mrf.mxu1 }
 0x56c   : > { %v3728_v5 = vpop.f32.mrf.mxu0  ;;  %v5243_v10 = vpack.c.bf16 %v3920_v23, %v3920_v23 }
 0x56d   : > { %v5195_v61 = vpack.c.bf16 %v3728_v5, %v3728_v5  ;;  %v3922_v31 = vpop.f32.mrf.mxu1 }
 0x56e   : > { %4458 = vst.msk [vmem:[%s5821_s11 + $0x134] sm:$0xf] %vm4380_vm15, %v5243_v10  ;;  %v3730_v34 = vpop.f32.mrf.mxu0 }
 0x56f   : > { %4410 = vst.msk [vmem:[%s5821_s11 + $0x74] sm:$0xf] %vm4380_vm15, %v5195_v61 }
 0x573   : > { %v3925_v1 = vpop.f32.mrf.mxu1 }
 0x574   : > { %v3733_v53 = vpop.f32.mrf.mxu0  ;;  %v5244_v3 = vpack.c.bf16 %v3925_v1, %v3925_v1 }
 0x575   : > { %v5196_v14 = vpack.c.bf16 %v3733_v53, %v3733_v53  ;;  %v3927_v19 = vpop.f32.mrf.mxu1 }
 0x576   : > { %4459 = vst.msk [vmem:[%s5821_s11 + $0x138] sm:$0xf] %vm4380_vm15, %v5244_v3  ;;  %v3735_v38 = vpop.f32.mrf.mxu0 }
 0x577   : > { %4411 = vst.msk [vmem:[%s5821_s11 + $0x78] sm:$0xf] %vm4380_vm15, %v5196_v14  ;;  %v3928_v4 = vpop.f32.mrf.mxu1 }
 0x578   : > { %v3736_v2 = vpop.f32.mrf.mxu0  ;;  %v5245_v12 = vpack.c.bf16 %v3928_v4, %v3928_v4 }
 0x579   : > { %v5197_v49 = vpack.c.bf16 %v3736_v2, %v3736_v2  ;;  %v3930_v56 = vpop.f32.mrf.mxu1 }
 0x57a   : > { %4460 = vst.msk [vmem:[%s5821_s11 + $0x13c] sm:$0xf] %vm4380_vm15, %v5245_v12  ;;  %v3738_v51 = vpop.f32.mrf.mxu0 }
 0x57b   : > { %4412 = vst.msk [vmem:[%s5821_s11 + $0x7c] sm:$0xf] %vm4380_vm15, %v5197_v49 }
 0x57f   : > { %v3933_v40 = vpop.f32.mrf.mxu1 }
 0x580   : > { %v3741_v48 = vpop.f32.mrf.mxu0  ;;  %v5246_v32 = vpack.c.bf16 %v3933_v40, %v3933_v40 }
 0x581   : > { %v5198_v57 = vpack.c.bf16 %v3741_v48, %v3741_v48  ;;  %v3935_v9 = vpop.f32.mrf.mxu1 }
 0x582   : > { %4461 = vst.msk [vmem:[%s5821_s11 + $0x140] sm:$0xf] %vm4380_vm15, %v5246_v32  ;;  %v3743_v11 = vpop.f32.mrf.mxu0 }
 0x583   : > { %4413 = vst.msk [vmem:[%s5821_s11 + $0x80] sm:$0xf] %vm4380_vm15, %v5198_v57  ;;  %v3936_v27 = vpop.f32.mrf.mxu1 }
 0x584   : > { %v3744_v20 = vpop.f32.mrf.mxu0  ;;  %v5247_v42 = vpack.c.bf16 %v3936_v27, %v3936_v27 }
 0x585   : > { %v5199_v6 = vpack.c.bf16 %v3744_v20, %v3744_v20  ;;  %v3938_v8 = vpop.f32.mrf.mxu1 }
 0x586   : > { %4462 = vst.msk [vmem:[%s5821_s11 + $0x144] sm:$0xf] %vm4380_vm15, %v5247_v42  ;;  %v3746_v46 = vpop.f32.mrf.mxu0 }
 0x587   : > { %4414 = vst.msk [vmem:[%s5821_s11 + $0x84] sm:$0xf] %vm4380_vm15, %v5199_v6 }
 0x58b   : > { %v3941_v55 = vpop.f32.mrf.mxu1 }
 0x58c   : > { %v3749_v35 = vpop.f32.mrf.mxu0  ;;  %v5248_v13 = vpack.c.bf16 %v3941_v55, %v3941_v55 }
 0x58d   : > { %v5200_v63 = vpack.c.bf16 %v3749_v35, %v3749_v35  ;;  %v3943_v30 = vpop.f32.mrf.mxu1 }
 0x58e   : > { %4463 = vst.msk [vmem:[%s5821_s11 + $0x148] sm:$0xf] %vm4380_vm15, %v5248_v13  ;;  %v3751_v44 = vpop.f32.mrf.mxu0 }
 0x58f   : > { %4415 = vst.msk [vmem:[%s5821_s11 + $0x88] sm:$0xf] %vm4380_vm15, %v5200_v63  ;;  %v3944_v45 = vpop.f32.mrf.mxu1 }
 0x590   : > { %v3752_v37 = vpop.f32.mrf.mxu0  ;;  %v5249_v16 = vpack.c.bf16 %v3944_v45, %v3944_v45 }
 0x591   : > { %v5201_v36 = vpack.c.bf16 %v3752_v37, %v3752_v37  ;;  %v3946_v25 = vpop.f32.mrf.mxu1 }
 0x592   : > { %4464 = vst.msk [vmem:[%s5821_s11 + $0x14c] sm:$0xf] %vm4380_vm15, %v5249_v16  ;;  %v3754_v21 = vpop.f32.mrf.mxu0 }
 0x593   : > { %4416 = vst.msk [vmem:[%s5821_s11 + $0x8c] sm:$0xf] %vm4380_vm15, %v5201_v36 }
 0x597   : > { %v3949_v7 = vpop.f32.mrf.mxu1 }
 0x598   : > { %v3757_v18 = vpop.f32.mrf.mxu0  ;;  %v5250_v24 = vpack.c.bf16 %v3949_v7, %v3949_v7 }
 0x599   : > { %v5202_v39 = vpack.c.bf16 %v3757_v18, %v3757_v18  ;;  %v3951_v43 = vpop.f32.mrf.mxu1 }
 0x59a   : > { %4465 = vst.msk [vmem:[%s5821_s11 + $0x150] sm:$0xf] %vm4380_vm15, %v5250_v24  ;;  %v3759_v50 = vpop.f32.mrf.mxu0 }
 0x59b   : > { %4417 = vst.msk [vmem:[%s5821_s11 + $0x90] sm:$0xf] %vm4380_vm15, %v5202_v39  ;;  %v3952_v26 = vpop.f32.mrf.mxu1 }
 0x59c   : > { %v3760_v15 = vpop.f32.mrf.mxu0  ;;  %v5251_v28 = vpack.c.bf16 %v3952_v26, %v3952_v26 }
 0x59d   : > { %v5203_v22 = vpack.c.bf16 %v3760_v15, %v3760_v15  ;;  %v3954_v54 = vpop.f32.mrf.mxu1 }
 0x59e   : > { %4466 = vst.msk [vmem:[%s5821_s11 + $0x154] sm:$0xf] %vm4380_vm15, %v5251_v28  ;;  %v3762_v52 = vpop.f32.mrf.mxu0 }
 0x59f   : > { %4418 = vst.msk [vmem:[%s5821_s11 + $0x94] sm:$0xf] %vm4380_vm15, %v5203_v22 }
 0x5a3   : > { %v3957_v17 = vpop.f32.mrf.mxu1 }
 0x5a4   : > { %v3765_v47 = vpop.f32.mrf.mxu0  ;;  %v5252_v59 = vpack.c.bf16 %v3957_v17, %v3957_v17 }
 0x5a5   : > { %v5204_v41 = vpack.c.bf16 %v3765_v47, %v3765_v47  ;;  %v3959_v0 = vpop.f32.mrf.mxu1 }
 0x5a6   : > { %4467 = vst.msk [vmem:[%s5821_s11 + $0x158] sm:$0xf] %vm4380_vm15, %v5252_v59  ;;  %v3767_v58 = vpop.f32.mrf.mxu0 }
 0x5a7   : > { %4419 = vst.msk [vmem:[%s5821_s11 + $0x98] sm:$0xf] %vm4380_vm15, %v5204_v41  ;;  %v3960_v60 = vpop.f32.mrf.mxu1 }
 0x5a8   : > { %v3768_v29 = vpop.f32.mrf.mxu0  ;;  %v5253_v33 = vpack.c.bf16 %v3960_v60, %v3960_v60 }
 0x5a9   : > { %v5205_v62 = vpack.c.bf16 %v3768_v29, %v3768_v29  ;;  %v3962_v23 = vpop.f32.mrf.mxu1 }
 0x5aa   : > { %4468 = vst.msk [vmem:[%s5821_s11 + $0x15c] sm:$0xf] %vm4380_vm15, %v5253_v33  ;;  %v3770_v5 = vpop.f32.mrf.mxu0 }
 0x5ab   : > { %4420 = vst.msk [vmem:[%s5821_s11 + $0x9c] sm:$0xf] %vm4380_vm15, %v5205_v62 }
 0x5af   : > { %v3965_v10 = vpop.f32.mrf.mxu1 }
 0x5b0   : > { %v3773_v61 = vpop.f32.mrf.mxu0  ;;  %v5254_v31 = vpack.c.bf16 %v3965_v10, %v3965_v10 }
 0x5b1   : > { %v5206_v34 = vpack.c.bf16 %v3773_v61, %v3773_v61  ;;  %v3967_v1 = vpop.f32.mrf.mxu1 }
 0x5b2   : > { %4469 = vst.msk [vmem:[%s5821_s11 + $0x160] sm:$0xf] %vm4380_vm15, %v5254_v31  ;;  %v3775_v53 = vpop.f32.mrf.mxu0 }
 0x5b3   : > { %4421 = vst.msk [vmem:[%s5821_s11 + $0xa0] sm:$0xf] %vm4380_vm15, %v5206_v34  ;;  %v3968_v3 = vpop.f32.mrf.mxu1 }
 0x5b4   : > { %v3776_v14 = vpop.f32.mrf.mxu0  ;;  %v5255_v19 = vpack.c.bf16 %v3968_v3, %v3968_v3 }
 0x5b5   : > { %v5207_v38 = vpack.c.bf16 %v3776_v14, %v3776_v14  ;;  %v3970_v4 = vpop.f32.mrf.mxu1 }
 0x5b6   : > { %4470 = vst.msk [vmem:[%s5821_s11 + $0x164] sm:$0xf] %vm4380_vm15, %v5255_v19  ;;  %v3778_v2 = vpop.f32.mrf.mxu0 }
 0x5b7   : > { %4422 = vst.msk [vmem:[%s5821_s11 + $0xa4] sm:$0xf] %vm4380_vm15, %v5207_v38 }
 0x5bb   : > { %v3973_v12 = vpop.f32.mrf.mxu1 }
 0x5bc   : > { %v3781_v49 = vpop.f32.mrf.mxu0  ;;  %v5256_v56 = vpack.c.bf16 %v3973_v12, %v3973_v12 }
 0x5bd   : > { %v5208_v51 = vpack.c.bf16 %v3781_v49, %v3781_v49  ;;  %v3975_v40 = vpop.f32.mrf.mxu1 }
 0x5be   : > { %4471 = vst.msk [vmem:[%s5821_s11 + $0x168] sm:$0xf] %vm4380_vm15, %v5256_v56  ;;  %v3783_v48 = vpop.f32.mrf.mxu0 }
 0x5bf   : > { %4423 = vst.msk [vmem:[%s5821_s11 + $0xa8] sm:$0xf] %vm4380_vm15, %v5208_v51  ;;  %v3976_v32 = vpop.f32.mrf.mxu1 }
 0x5c0   : > { %v3784_v57 = vpop.f32.mrf.mxu0  ;;  %v5257_v9 = vpack.c.bf16 %v3976_v32, %v3976_v32 }
 0x5c1   : > { %v5209_v11 = vpack.c.bf16 %v3784_v57, %v3784_v57  ;;  %v3978_v27 = vpop.f32.mrf.mxu1 }
 0x5c2   : > { %4472 = vst.msk [vmem:[%s5821_s11 + $0x16c] sm:$0xf] %vm4380_vm15, %v5257_v9  ;;  %v3786_v20 = vpop.f32.mrf.mxu0 }
 0x5c3   : > { %4424 = vst.msk [vmem:[%s5821_s11 + $0xac] sm:$0xf] %vm4380_vm15, %v5209_v11 }
 0x5c7   : > { %v3981_v42 = vpop.f32.mrf.mxu1 }
 0x5c8   : > { %v3789_v6 = vpop.f32.mrf.mxu0  ;;  %v5258_v8 = vpack.c.bf16 %v3981_v42, %v3981_v42 }
 0x5c9   : > { %v5210_v46 = vpack.c.bf16 %v3789_v6, %v3789_v6  ;;  %v3983_v55 = vpop.f32.mrf.mxu1 }
 0x5ca   : > { %4473 = vst.msk [vmem:[%s5821_s11 + $0x170] sm:$0xf] %vm4380_vm15, %v5258_v8  ;;  %v3791_v35 = vpop.f32.mrf.mxu0 }
 0x5cb   : > { %4425 = vst.msk [vmem:[%s5821_s11 + $0xb0] sm:$0xf] %vm4380_vm15, %v5210_v46  ;;  %v3984_v13 = vpop.f32.mrf.mxu1 }
 0x5cc   : > { %v3792_v63 = vpop.f32.mrf.mxu0  ;;  %v5259_v30 = vpack.c.bf16 %v3984_v13, %v3984_v13 }
 0x5cd   : > { %v5211_v44 = vpack.c.bf16 %v3792_v63, %v3792_v63  ;;  %v3986_v45 = vpop.f32.mrf.mxu1 }
 0x5ce   : > { %4474 = vst.msk [vmem:[%s5821_s11 + $0x174] sm:$0xf] %vm4380_vm15, %v5259_v30  ;;  %v3794_v37 = vpop.f32.mrf.mxu0 }
 0x5cf   : > { %4426 = vst.msk [vmem:[%s5821_s11 + $0xb4] sm:$0xf] %vm4380_vm15, %v5211_v44 }
 0x5d3   : > { %v3989_v16 = vpop.f32.mrf.mxu1 }
 0x5d4   : > { %v3797_v36 = vpop.f32.mrf.mxu0  ;;  %v5260_v25 = vpack.c.bf16 %v3989_v16, %v3989_v16 }
 0x5d5   : > { %v5212_v21 = vpack.c.bf16 %v3797_v36, %v3797_v36  ;;  %v3991_v7 = vpop.f32.mrf.mxu1 }
 0x5d6   : > { %4475 = vst.msk [vmem:[%s5821_s11 + $0x178] sm:$0xf] %vm4380_vm15, %v5260_v25  ;;  %v3799_v18 = vpop.f32.mrf.mxu0 }
 0x5d7   : > { %4427 = vst.msk [vmem:[%s5821_s11 + $0xb8] sm:$0xf] %vm4380_vm15, %v5212_v21  ;;  %v3992_v24 = vpop.f32.mrf.mxu1 }
 0x5d8   : > { %v3800_v39 = vpop.f32.mrf.mxu0  ;;  %v5261_v43 = vpack.c.bf16 %v3992_v24, %v3992_v24 }
 0x5d9   : > { %v5213_v50 = vpack.c.bf16 %v3800_v39, %v3800_v39  ;;  %v3994_v26 = vpop.f32.mrf.mxu1 }
 0x5da   : > { %4476 = vst.msk [vmem:[%s5821_s11 + $0x17c] sm:$0xf] %vm4380_vm15, %v5261_v43  ;;  %v3802_v15 = vpop.f32.mrf.mxu0 }
 0x5db   : > { %4428 = vst.msk [vmem:[%s5821_s11 + $0xbc] sm:$0xf] %vm4380_vm15, %v5213_v50 }
 0x5dc PF: > { %s16_s15 = sadd.s32 1, %s5708_s15  }
 0x5dd   : > { %p13_p7 = scmp.ge.s32.totalorder %s16_s15, 4  }
 0x5df   :  { %15 = sbr.rel (!%p13_p7) target bundleno = 2 (0x2), region = 101 }
 0x5e4   :  { %4498 = vsyncpa [#allocation4], 1 }
 0x5e5   :  { %4500 = vsyncpa [#allocation4 + $0x1], 1 }
 0x5e6   :  { %4501 = vsyncpa [#allocation6], 1 }

// kernel: plate_reader_forward.5
= control target key start
LH: loop header
LB: loop body
LE: loop exit
PB: predicated region body
PF: predicated region fallthrough
CT: control target
= control target key end

     0   :  { %10 = vsyncpa [#allocation4], 0  ;;  %s8715_s0 = inlined_call_operand.vmem [shape: bf16[2,38400], index: 0, kind: input, shape index: {}]   ;;  %s8716_s1 = inlined_call_operand.hbm [shape: bf16[38400,128], index: 1, kind: input, shape index: {}]   ;;  %s8717_s2 = inlined_call_operand.hbm [shape: f32[1,128], index: 2, kind: input, shape index: {}]   ;;  %s8718_s3 = inlined_call_operand.vmem [shape: bf16[128,36], index: 3, kind: input, shape index: {}]   ;;  %s8719_s4 = inlined_call_operand.hbm [shape: f32[1,36], index: 4, kind: input, shape index: {}]   ;;  %s8720_s5 = inlined_call_operand.hbm [shape: f32[2,36], index: 5, kind: output, shape index: {}]  }
   0x1   :  { %12 = vsyncpa [#allocation4 + $0x1], 0 }
   0x2   :  { %13 = vsyncpa [#allocation7], 0 }
   0x3   :  { %14 = vsyncpa [#allocation5], 0  ;;  %s7935_s18 = smov 0   ;;  %s7937_s19 = smov 0  }
   0x4   :  { %s7939_s20 = smov 0   ;;  %s7941_s21 = smov 0  }
   0x5 LB: > { %s7954_s22 = sadd.s32 4294967295, %s7893_s21   ;;  %s7957_s23 = sadd.s32 1, %s7893_s21   ;;  %s7893_s21 = sphi %s7941_s21, %s8737_s21   ;;  %s7889_s20 = sphi %s7939_s20, %s8736_s20   ;;  %s7885_s19 = sphi %s7937_s19, %s8735_s19   ;;  %s7881_s18 = sphi %s7935_s18, %s8734_s18  }
   0x6   : > { %s50_s24 = ssub.s32 %s7893_s21, %s7957_s23  ;;  %s53_s25 = sadd.s32 1, %s7889_s20 }
   0x7   : > { %p51_p0 = scmp.eq.s32.totalorder %s50_s24, 0  ;;  %p60_p1 = scmp.ne.s32.totalorder %s7889_s20, %s7885_s19 }
   0x8   : > { %p61_p2 = scmp.eq.s32.totalorder %s7893_s21, 0  ;;  %p66_p3 = scmp.ne.s32.totalorder %s7885_s19, %s7881_s18 }
   0x9   : > { %s7967_s26 = scalar_select %p51_p0, %s7889_s20, %s53_s25  }
   0xa   : > { %p7969_p4 = por %p61_p2, %p60_p1  ;;  %p8721_p5 = scmp.eq.s32.totalorder %s7954_s22, 0 }
   0xb   : > { %p5982_p6 = scmp.ge.s32.totalorder %s7893_s21, 1  ;;  %p161_p7 = scmp.lt.s32.totalorder %s7893_s21, 6 }
   0xc   : > { %p7978_p8 = por %p8721_p5, %p66_p3  ;;  %s7895_s30 = smov [#allocation6]  }
   0xd   : > { %p7983_p10 = pnand %p5982_p6, %p161_p7  ;;  %s174_s6 = sshll.u32 %s7895_s30, 4  ;;  %s175_s6 = int_to_ptr.vmem [resolvable:$true] %s174_s6 }
   0xe   : > { %s8725_s28 = scalar_select %p7978_p8, 1, 0 }
   0xf   : > { %s8726_s29 = scalar_select %p7983_p10, 1, 0 }
  0x10   : > { %p7193_p11 = pneg %p7983_p10  ;;  %p7206_p12 = scmp.lt.s32.totalorder %s7893_s21, 5 }
  0x11   : > { %s7896_s8 = smov [#allocation8]   ;;  %s207_s11 = sand.u32 1, %s7889_s20  }
  0x12   : > { %p7992_p13 = pnand %p7193_p11, %p8721_p5  ;;  %s188_s9 = sshll.u32 %s7896_s8, 4  ;;  %s189_s9 = int_to_ptr.vmem [resolvable:$true] %s188_s9 }
  0x13   : > { %p7998_p0 = pnand %p7206_p12, %p7969_p4  ;;  %s7758_s12 = scalar_lea.vmem %s175_s6, 16 }
  0x14   : > { %p7749_p1 = pneg %p7992_p13  ;;  %p7759_p2 = scmp.ne.s32.totalorder %s175_s6, %s7758_s12 }
  0x15   : > { %s7765_s13 = scalar_lea.vmem %s175_s6, 32  ;;  %p7766_p7 = scmp.lt.s32.totalorder %s175_s6, %s175_s6 }
  0x16   : > { %p7761_p3 = pnand %p7759_p2, %p7749_p1  ;;  %p7767_p11 = scmp.lt.s32.totalorder %s7765_s13, %s7758_s12 }
  0x18   : > { %p7762_p6 = pneg %p7761_p3  ;;  %p7768_p9 = por %p7767_p11, %p7766_p7 }
  0x1a   : > { %p7769_p5 = pnand %p7768_p9, %p7762_p6 }
  0x1c   : > { %7772 = shalt.err (!%p7769_p5)
}
  0x1d   : > { %7196 = dma.hbm_to_vmem [thread:$0]  (!%p7992_p13), %s8717_s2, 16, %s175_s6, [#allocation7]  }
  0x1e   : > { %s7784_s16 = scalar_lea.vmem %s189_s9, 16  ;;  %s7791_s17 = scalar_lea.vmem %s189_s9, 32 }
  0x1f   : > { %p7785_p4 = scmp.ne.s32.totalorder %s189_s9, %s7784_s16  ;;  %p7792_p3 = scmp.lt.s32.totalorder %s189_s9, %s189_s9 }
  0x20   : > { %p7793_p8 = scmp.lt.s32.totalorder %s7791_s17, %s7784_s16 }
  0x21   : > { %p7787_p12 = pnand %p7785_p4, %p7749_p1 }
  0x22   : > { %p7794_p10 = por %p7793_p8, %p7792_p3 }
  0x23   : > { %p7788_p2 = pneg %p7787_p12 }
  0x25   : > { %p7795_p7 = pnand %p7794_p10, %p7788_p2 }
  0x27   : > { %7798 = shalt.err (!%p7795_p7)
}
  0x28   : > { %7199 = dma.hbm_to_vmem [thread:$0]  (!%p7992_p13), %s8719_s4, 16, %s189_s9, [#allocation7]  }
  0x29   : > { %s7177_s25 = smul.u32 3840, %s207_s11  ;;  %s8033_s13 = scalar_lea.sflag [#allocation4], %s207_s11 }
  0x2a   : > { %s6487_s27 = smul.u32 61440, %s7893_s21  ;;  %p7801_p8 = pneg %p7998_p0 }
  0x2b   : > { %s211_s7 = scalar_lea.vmem [#allocation3], %s7177_s25  ;;  %s7804_s15 = scalar_lea.hbm %s8716_s1, 307200 }
  0x2c   : > { %s8027_s8 = scalar_lea.hbm %s8716_s1, %s6487_s27  ;;  %s218_s12 = sshll.u32 %s211_s7, 4  ;;  %s8029_s12 = int_to_ptr.vmem [resolvable:$true] %s218_s12 }
  0x2d   : > { %s7799_s14 = scalar_lea.hbm %s8027_s8, 61440  ;;  %p7805_p13 = scmp.lt.s32.totalorder %s8027_s8, %s8716_s1 }
  0x2e   : > { %p7800_p5 = scmp.ne.s32.totalorder %s8027_s8, %s7799_s14  ;;  %p7806_p1 = scmp.lt.s32.totalorder %s7804_s15, %s7799_s14 }
  0x30   : > { %p7802_p9 = pnand %p7801_p8, %p7800_p5  ;;  %p7807_p6 = por %p7806_p1, %p7805_p13 }
  0x32   : > { %p7803_p10 = pneg %p7802_p9 }
  0x34   : > { %p7808_p11 = pnand %p7807_p6, %p7803_p10 }
  0x36   : > { %7811 = shalt.err (!%p7808_p11)
}
  0x37   : > { %s7812_s11 = scalar_lea.vmem %s8029_s12, 61440  ;;  %s7897_s18 = smov [#allocation3]  }
  0x38   : > { %p7813_p4 = scmp.ne.s32.totalorder %s8029_s12, %s7812_s11  ;;  %s7817_s24 = sshll.u32 %s7897_s18, 4  ;;  %s7818_s24 = int_to_ptr.vmem [resolvable:$false] %s7817_s24 }
  0x39   : > { %s7819_s25 = scalar_lea.vmem %s7818_s24, 122880  ;;  %p7820_p3 = scmp.lt.s32.totalorder %s8029_s12, %s7818_s24 }
  0x3a   : > { %p7815_p12 = pnand %p7813_p4, %p7801_p8  ;;  %p7821_p7 = scmp.lt.s32.totalorder %s7819_s25, %s7812_s11 }
  0x3c   : > { %p7816_p2 = pneg %p7815_p12  ;;  %p7822_p5 = por %p7821_p7, %p7820_p3 }
  0x3e   : > { %p7823_p9 = pnand %p7822_p5, %p7816_p2 }
  0x40   : > { %7826 = shalt.err (!%p7823_p9)
}
  0x41   : > { %s7898_s27 = smov 64   ;;  %s7899_s30 = smov 4  }
  0x42   : > { %7203 = dma.hbm_to_vmem [thread:$0]  (!%p7998_p0), %s8027_s8, 61440, %s8029_s12, %s8033_s13, %s7898_s27, %s7898_s27, %s7899_s30  }
  0x43   : > { %p8729_p8 = scmp.ne.s32.totalorder %s8726_s29, 0 }
  0x44   : > { %s232_s6 = sand.u32 (!%p8729_p8), 1, %s7885_s19   ;;  %p8730_p10 = scmp.ne.s32.totalorder (!%p8729_p8), %s8725_s28, 0 }
  0x45   : > { %230 = sbr.rel (%p8729_p8) target bundleno = 1020 (0x3fc), region = 40  ;;  %s233_s14 = scalar_lea.sflag (!%p8729_p8), [#allocation4], %s232_s6 }
  0x46   : > { %s7178_s7 = smul.u32 (!%p8729_p8), 3840, %s232_s6 }
  0x48   : > { %s8057_s21 = scalar_lea.vmem (!%p8729_p8), [#allocation3], %s7178_s7 }
  0x4a   : > { %7868 = dma.done.wait (%p8730_p10), %s233_s14, 61440  }
  0x4b   : > { %7870 = vsyncadd (%p8730_p10), %s233_s14, 4294905856  ;;  %p8731_p13 = scmp.eq.s32.totalorder %s7954_s22, 0 }
  0x4d   : > { %7872 = dma.done.wait (%p8731_p13), [#allocation7], 32   ;;  %p8732_p0 = pmov %p8731_p13 }
  0x4e   : > { %s270_s29 = smul.u32 60, %s7954_s22  ;;  %p8733_p6 = scmp.ne.s32.totalorder %s7954_s22, 0 }
  0x4f   : > { %7874 = vsyncadd (%p8732_p0), [#allocation7], 4294967264 }
  0x50   : > { %p271_p1 = scmp.lt.s32.totalorder %s270_s29, 299  ;;  %280 = sbr.rel (%p8733_p6) target bundleno = 87 (0x57), region = 56 }
  0x52   : > { %s8739_s29 = smov (!%p271_p1, %s270_s29), 299 }
  0x53   : > { %s8071_s12 = scalar_lea.vmem %s8715_s0, %s8739_s29 }
  0x55   : > { %v7900_v0 = vmov 0.0  }
  0x56   : > { %281 = vst [vmem:[#allocation2] sm:$0x3] %v7900_v0 }
  0x57 PF: > { %v7252_v1 = vld [vmem:[%s8057_s21 + $0x78] sm:$0xff]   ;;  %v7256_v5 = vld [vmem:[%s8057_s21 + $0x70] sm:$0xff]   ;;  %v7260_v9 = vld [vmem:[%s8057_s21 + $0x68] sm:$0xff]   ;;  %v1263_v29 = vlaneseq  ;;  %v7901_v37 = vmov 1966171168   ;;  %p6472_p11 = scmp.ne.s32.totalorder %s7954_s22, 4 }
  0x58   : > { %v7253_v2 = vld [vmem:[%s8057_s21 + $0xf8] sm:$0xff]   ;;  %6488 = vmatprep.subr.bf16.mxu0 %v7252_v1  ;;  %v7257_v6 = vld [vmem:[%s8057_s21 + $0xf0] sm:$0xff]   ;;  %v7261_v10 = vld [vmem:[%s8057_s21 + $0xe8] sm:$0xff]   ;;  %v1261_v38 = vunpack.c.l.s4 %v7901_v37 }
  0x59   : > { %v7254_v3 = vld [vmem:[%s8057_s21 + $0x38] sm:$0xff]   ;;  %6510 = vmatprep.subr.bf16.mxu1 %v7253_v2  ;;  %v7258_v7 = vld [vmem:[%s8057_s21 + $0x30] sm:$0xff]   ;;  %v7262_v11 = vld [vmem:[%s8057_s21 + $0x28] sm:$0xff]   ;;  %v1264_v34 = vshrl.u32 %v1263_v29, 7 }
  0x5a   : > { %v7255_v4 = vld [vmem:[%s8057_s21 + $0xb8] sm:$0xff]   ;;  %6489 = vmatpush3.bf16.msra.mxu0 %v7254_v3  ;;  %v7259_v8 = vld [vmem:[%s8057_s21 + $0xb0] sm:$0xff]   ;;  %v7263_v12 = vld [vmem:[%s8057_s21 + $0xa8] sm:$0xff]   ;;  %v1262_v41 = vunpack.c.0.s8 %v1261_v38 }
  0x5b   : > { %6511 = vmatpush3.bf16.msra.mxu1 %v7255_v4  ;;  %6490 = vmatprep.subr.bf16.mxu0 %v7256_v5  ;;  %v7264_v13 = vld [vmem:[%s8057_s21 + $0x60] sm:$0xff]   ;;  %v7268_v17 = vld [vmem:[%s8057_s21 + $0x58] sm:$0xff]   ;;  %v7272_v21 = vld [vmem:[%s8057_s21 + $0x50] sm:$0xff]  }
  0x5c   : > { %6512 = vmatprep.subr.bf16.mxu1 %v7257_v6  ;;  %v7265_v14 = vld [vmem:[%s8057_s21 + $0xe0] sm:$0xff]   ;;  %v7269_v18 = vld [vmem:[%s8057_s21 + $0xd8] sm:$0xff]   ;;  %v7273_v22 = vld [vmem:[%s8057_s21 + $0xd0] sm:$0xff]   ;;  %v8110_v42 = vsub.s32 %v1262_v41, %v1264_v34 }
  0x5d   : > { %v7266_v15 = vld [vmem:[%s8057_s21 + $0x20] sm:$0xff]   ;;  %v7270_v19 = vld [vmem:[%s8057_s21 + $0x18] sm:$0xff]   ;;  %v7274_v23 = vld [vmem:[%s8057_s21 + $0x10] sm:$0xff]  }
  0x5e   : > { %6491 = vmatpush3.bf16.msra.mxu0 %v7258_v7  ;;  %v7267_v16 = vld [vmem:[%s8057_s21 + $0xa0] sm:$0xff]   ;;  %v7271_v20 = vld [vmem:[%s8057_s21 + $0x98] sm:$0xff]   ;;  %v7275_v24 = vld [vmem:[%s8057_s21 + $0x90] sm:$0xff]  }
  0x5f   : > { %6513 = vmatpush3.bf16.msra.mxu1 %v7259_v8  ;;  %6492 = vmatprep.subr.bf16.mxu0 %v7260_v9  ;;  %v7276_v25 = vld [vmem:[%s8057_s21 + $0x48] sm:$0xff]   ;;  %v7280_v30 = vld [vmem:[%s8057_s21 + $0x40] sm:$0xff]   ;;  %v7285_v36 = vld [vmem:[%s8057_s21 + $0x178] sm:$0xff]  }
  0x60   : > { %6514 = vmatprep.subr.bf16.mxu1 %v7261_v10  ;;  %v7277_v26 = vld [vmem:[%s8057_s21 + $0xc8] sm:$0xff]   ;;  %v7281_v31 = vld [vmem:[%s8057_s21 + $0xc0] sm:$0xff]   ;;  %v7286_v39 = vld [vmem:[%s8057_s21 + $0x1f8] sm:$0xff]  }
  0x61   : > { %v7278_v27 = vld [vmem:[%s8057_s21 + $0x8] sm:$0xff]   ;;  %v7282_v32 = vld [vmem:[%s8057_s21] sm:$0xff]   ;;  %v7287_v48 = vld [vmem:[%s8057_s21 + $0x138] sm:$0xff]  }
  0x62   : > { %6493 = vmatpush3.bf16.msra.mxu0 %v7262_v11  ;;  %v7279_v28 = vld [vmem:[%s8057_s21 + $0x88] sm:$0xff]   ;;  %v7283_v33 = vld [vmem:[%s8057_s21 + $0x80] sm:$0xff]   ;;  %v7288_v50 = vld [vmem:[%s8057_s21 + $0x1b8] sm:$0xff]  }
  0x63   : > { %6515 = vmatpush3.bf16.msra.mxu1 %v7263_v12  ;;  %6494 = vmatprep.subr.bf16.mxu0 %v7264_v13  ;;  %v283_v35 = vld [vmem:[%s8071_s12] sm:$0xff]  ;;  %v7289_v53 = vld [vmem:[%s8057_s21 + $0x170] sm:$0xff]   ;;  %v7293_v59 = vld [vmem:[%s8057_s21 + $0x168] sm:$0xff]  }
  0x64   : > { %6516 = vmatprep.subr.bf16.mxu1 %v7265_v14  ;;  %v1259_v40 = vcombine.high %v283_v35, %v283_v35  ;;  %v1266_v43 = vrot.slane %v283_v35, %v8110_v42  ;;  %v7290_v55 = vld [vmem:[%s8057_s21 + $0x1f0] sm:$0xff]   ;;  %v7294_v60 = vld [vmem:[%s8057_s21 + $0x1e8] sm:$0xff]   ;;  %v7297_v63 = vld [vmem:[%s8057_s21 + $0x160] sm:$0xff]  }
  0x65   : > { %v7291_v56 = vld [vmem:[%s8057_s21 + $0x130] sm:$0xff]   ;;  %v7295_v61 = vld [vmem:[%s8057_s21 + $0x128] sm:$0xff]   ;;  %v7298_v0 = vld [vmem:[%s8057_s21 + $0x1e0] sm:$0xff]  }
  0x66   : > { %6495 = vmatpush3.bf16.msra.mxu0 %v7266_v15  ;;  %v8114_v44 = vrot.slane %v1259_v40, %v8110_v42  ;;  %v1274_v45 = vcombine.high %v1266_v43, %v1266_v43  ;;  %v1282_v46 = vrot.slane %v1266_v43, %v8110_v42  ;;  %v7292_v58 = vld [vmem:[%s8057_s21 + $0x1b0] sm:$0xff]   ;;  %v7296_v62 = vld [vmem:[%s8057_s21 + $0x1a8] sm:$0xff]   ;;  %v7299_v1 = vld [vmem:[%s8057_s21 + $0x120] sm:$0xff]  }
  0x67   : > { %6517 = vmatpush3.bf16.msra.mxu1 %v7267_v16  ;;  %6496 = vmatprep.subr.bf16.mxu0 %v7268_v17  ;;  %v7300_v2 = vld [vmem:[%s8057_s21 + $0x1a0] sm:$0xff]   ;;  %v7301_v3 = vld [vmem:[%s8057_s21 + $0x158] sm:$0xff]   ;;  %v7305_v7 = vld [vmem:[%s8057_s21 + $0x150] sm:$0xff]  }
  0x68   : > { %6518 = vmatprep.subr.bf16.mxu1 %v7269_v18  ;;  %v1275_v47 = vcombine.high %v8114_v44, %v8114_v44  ;;  %v1296_v49 = vrot.slane %v1274_v45, %v8110_v42  ;;  %v1304_v52 = vcombine.high %v1282_v46, %v1282_v46  ;;  %v7302_v4 = vld [vmem:[%s8057_s21 + $0x1d8] sm:$0xff]   ;;  %v7306_v8 = vld [vmem:[%s8057_s21 + $0x1d0] sm:$0xff]   ;;  %v7309_v11 = vld [vmem:[%s8057_s21 + $0x148] sm:$0xff]  }
  0x69   : > { %v7303_v5 = vld [vmem:[%s8057_s21 + $0x118] sm:$0xff]   ;;  %v7307_v9 = vld [vmem:[%s8057_s21 + $0x110] sm:$0xff]   ;;  %v7310_v12 = vld [vmem:[%s8057_s21 + $0x1c8] sm:$0xff]  }
  0x6a   : > { %6497 = vmatpush3.bf16.msra.mxu0 %v7270_v19  ;;  %v1303_v51 = vrot.slane %v1275_v47, %v8110_v42  ;;  %4598 = vmatprep.mubr.bf16.mxu0 %v1296_v49  ;;  %v1306_v54 = vcombine.high %v1296_v49, %v1296_v49  ;;  %v7304_v6 = vld [vmem:[%s8057_s21 + $0x198] sm:$0xff]   ;;  %v7308_v10 = vld [vmem:[%s8057_s21 + $0x190] sm:$0xff]   ;;  %v7311_v13 = vld [vmem:[%s8057_s21 + $0x108] sm:$0xff]   ;;  %v1289_v19 = vrot.slane %v8114_v44, %v8110_v42 }
  0x6b   : > { %6519 = vmatpush3.bf16.msra.mxu1 %v7271_v20  ;;  %6498 = vmatprep.subr.bf16.mxu0 %v7272_v21  ;;  %v7312_v14 = vld [vmem:[%s8057_s21 + $0x188] sm:$0xff]   ;;  %v7313_v15 = vld [vmem:[%s8057_s21 + $0x140] sm:$0xff]   ;;  %v7317_v20 = vld [vmem:[%s8057_s21 + $0x278] sm:$0xff]  }
  0x6c   : > { %6520 = vmatprep.subr.bf16.mxu1 %v7273_v22  ;;  %v1307_v57 = vcombine.high %v1303_v51, %v1303_v51  ;;  %4638 = vmatprep.mubr.bf16.mxu1 %v1306_v54  ;;  %v7314_v16 = vld [vmem:[%s8057_s21 + $0x1c0] sm:$0xff]   ;;  %v7318_v21 = vld [vmem:[%s8057_s21 + $0x2f8] sm:$0xff]   ;;  %v7325_v29 = vld [vmem:[%s8057_s21 + $0x268] sm:$0xff]  }
  0x6d   : > { %v7315_v17 = vld [vmem:[%s8057_s21 + $0x100] sm:$0xff]   ;;  %v7319_v22 = vld [vmem:[%s8057_s21 + $0x238] sm:$0xff]   ;;  %v7337_v41 = vld [vmem:[%s8057_s21 + $0x250] sm:$0xff]  }
  0x6e   : > { %6499 = vmatpush3.bf16.msra.mxu0 %v7274_v23  ;;  %v7316_v18 = vld [vmem:[%s8057_s21 + $0x180] sm:$0xff]   ;;  %v7320_v23 = vld [vmem:[%s8057_s21 + $0x2b8] sm:$0xff]   ;;  %v7338_v43 = vld [vmem:[%s8057_s21 + $0x2d0] sm:$0xff]  }
  0x6f   : > { %6521 = vmatpush3.bf16.msra.mxu1 %v7275_v24  ;;  %6500 = vmatprep.subr.bf16.mxu0 %v7276_v25  ;;  %v1305_v24 = vcombine.high %v1289_v19, %v1289_v19  ;;  %v7321_v25 = vld [vmem:[%s8057_s21 + $0x270] sm:$0xff]   ;;  %v7330_v34 = vld [vmem:[%s8057_s21 + $0x2e0] sm:$0xff]   ;;  %v7333_v37 = vld [vmem:[%s8057_s21 + $0x258] sm:$0xff]  }
  0x70   : > { %6522 = vmatprep.subr.bf16.mxu1 %v7277_v26  ;;  %v7322_v26 = vld [vmem:[%s8057_s21 + $0x2f0] sm:$0xff]   ;;  %v7331_v35 = vld [vmem:[%s8057_s21 + $0x220] sm:$0xff]   ;;  %v7334_v38 = vld [vmem:[%s8057_s21 + $0x2d8] sm:$0xff]  }
  0x71   : > { %v7336_v40 = vld [vmem:[%s8057_s21 + $0x298] sm:$0xff]   ;;  %v7339_v44 = vld [vmem:[%s8057_s21 + $0x210] sm:$0xff]   ;;  %v284_v47 = vld [vmem:[%s8071_s12 + $0x8] sm:$0xff] }
  0x72   : > { %6501 = vmatpush3.bf16.msra.mxu0 %v7278_v27  ;;  %v7323_v27 = vld [vmem:[%s8057_s21 + $0x230] sm:$0xff]   ;;  %v1315_v49 = vrot.slane %v284_v47, %v8110_v42 }
  0x73   : > { %6523 = vmatpush3.bf16.msra.mxu1 %v7279_v28  ;;  %6502 = vmatprep.subr.bf16.mxu0 %v7280_v30  ;;  %v7324_v28 = vld [vmem:[%s8057_s21 + $0x2b0] sm:$0xff]   ;;  %v7326_v30 = vld [vmem:[%s8057_s21 + $0x2e8] sm:$0xff]  }
  0x74   : > { %6524 = vmatprep.subr.bf16.mxu1 %v7281_v31  ;;  %v7327_v31 = vld [vmem:[%s8057_s21 + $0x228] sm:$0xff]   ;;  %v7340_v45 = vld [vmem:[%s8057_s21 + $0x290] sm:$0xff]  }
  0x76   : > { %6503 = vmatpush3.bf16.msra.mxu0 %v7282_v32  ;;  %v7328_v32 = vld [vmem:[%s8057_s21 + $0x2a8] sm:$0xff]  }
  0x77   : > { %6525 = vmatpush3.bf16.msra.mxu1 %v7283_v33  ;;  %6532 = vmatprep.subr.bf16.mxu0 %v7285_v36  ;;  %v7329_v33 = vld [vmem:[%s8057_s21 + $0x260] sm:$0xff]  }
  0x78   : > { %6554 = vmatprep.subr.bf16.mxu1 %v7286_v39  ;;  %v7332_v36 = vld [vmem:[%s8057_s21 + $0x2a0] sm:$0xff]   ;;  %v7335_v39 = vld [vmem:[%s8057_s21 + $0x218] sm:$0xff]  }
  0x79   : > { %4599 = vmatmul.mubr.bf16.vlgmr.msra.gmra.mxu0 %v1282_v46  ;;  %v7341_v46 = vld [vmem:[%s8057_s21 + $0x248] sm:$0xff]  }
  0x7a   : > { %6533 = vmatpush3.bf16.msra.mxu0 %v7287_v48  ;;  %4639 = vmatmul.mubr.bf16.vlgmr.msra.gmra.mxu1 %v1304_v52  ;;  %v7342_v48 = vld [vmem:[%s8057_s21 + $0x2c8] sm:$0xff]  }
  0x7b   : > { %6534 = vmatprep.subr.bf16.mxu0 %v7289_v53  ;;  %6555 = vmatpush3.bf16.msra.mxu1 %v7288_v50  ;;  %v1308_v50 = vcombine.high %v284_v47, %v284_v47  ;;  %v7344_v52 = vld [vmem:[%s8057_s21 + $0x288] sm:$0xff]   ;;  %v1323_v53 = vcombine.high %v1315_v49, %v1315_v49 }
  0x7c   : > { %4678 = vmatprep.mubr.bf16.mxu0 %v1303_v51  ;;  %6556 = vmatprep.subr.bf16.mxu1 %v7290_v55  ;;  %v7343_v51 = vld [vmem:[%s8057_s21 + $0x208] sm:$0xff]   ;;  %v7345_v55 = vld [vmem:[%s8057_s21 + $0x240] sm:$0xff]  }
  0x7d   : > { %4718 = vmatprep.mubr.bf16.mxu1 %v1307_v57  ;;  %v8184_v54 = vrot.slane %v1308_v50, %v8110_v42  ;;  %v1345_v57 = vrot.slane %v1323_v53, %v8110_v42  ;;  %v7392_v47 = vld [vmem:[%s8057_s21 + $0x428] sm:$0xff]   ;;  %v7395_v50 = vld [vmem:[%s8057_s21 + $0x4e0] sm:$0xff]   ;;  %v7398_v53 = vld [vmem:[%s8057_s21 + $0x458] sm:$0xff]  }
  0x7e   : > { %6535 = vmatpush3.bf16.msra.mxu0 %v7291_v56  ;;  %v7346_v56 = vld [vmem:[%s8057_s21 + $0x2c0] sm:$0xff]  }
  0x7f   : > { %6536 = vmatprep.subr.bf16.mxu0 %v7293_v59  ;;  %6557 = vmatpush3.bf16.msra.mxu1 %v7292_v58  ;;  %v1324_v58 = vcombine.high %v8184_v54, %v8184_v54  ;;  %v7347_v59 = vld [vmem:[%s8057_s21 + $0x200] sm:$0xff]  }
  0x80   : > { %6558 = vmatprep.subr.bf16.mxu1 %v7294_v60  ;;  %v7348_v60 = vld [vmem:[%s8057_s21 + $0x280] sm:$0xff]  }
  0x82   : > { %6537 = vmatpush3.bf16.msra.mxu0 %v7295_v61  ;;  %v1355_v61 = vcombine.high %v1345_v57, %v1345_v57 }
  0x83   : > { %6538 = vmatprep.subr.bf16.mxu0 %v7297_v63  ;;  %6559 = vmatpush3.bf16.msra.mxu1 %v7296_v62  ;;  %v1331_v62 = vrot.slane %v1315_v49, %v8110_v42  ;;  %v7349_v63 = vld [vmem:[%s8057_s21 + $0x378] sm:$0xff]   ;;  %v7394_v49 = vld [vmem:[%s8057_s21 + $0x460] sm:$0xff]  }
  0x84   : > { %6560 = vmatprep.subr.bf16.mxu1 %v7298_v0  ;;  %v7350_v0 = vld [vmem:[%s8057_s21 + $0x3f8] sm:$0xff]  }
  0x86   : > { %6539 = vmatpush3.bf16.msra.mxu0 %v7299_v1  ;;  %v1352_v1 = vrot.slane %v1324_v58, %v8110_v42  ;;  %v7403_v58 = vld [vmem:[%s8057_s21 + $0x4d0] sm:$0xff]  }
  0x87   : > { %6540 = vmatprep.subr.bf16.mxu0 %v7301_v3  ;;  %6561 = vmatpush3.bf16.msra.mxu1 %v7300_v2  ;;  %v7351_v2 = vld [vmem:[%s8057_s21 + $0x338] sm:$0xff]  }
  0x88   : > { %6562 = vmatprep.subr.bf16.mxu1 %v7302_v4  ;;  %v7352_v3 = vld [vmem:[%s8057_s21 + $0x3b8] sm:$0xff]   ;;  %v1353_v4 = vcombine.high %v1331_v62, %v1331_v62 }
  0x8a   : > { %6541 = vmatpush3.bf16.msra.mxu0 %v7303_v5  ;;  %v7353_v5 = vld [vmem:[%s8057_s21 + $0x370] sm:$0xff]  }
  0x8b   : > { %6542 = vmatprep.subr.bf16.mxu0 %v7305_v7  ;;  %6563 = vmatpush3.bf16.msra.mxu1 %v7304_v6  ;;  %v7354_v6 = vld [vmem:[%s8057_s21 + $0x3f0] sm:$0xff]   ;;  %v1356_v7 = vcombine.high %v1352_v1, %v1352_v1 }
  0x8c   : > { %6564 = vmatprep.subr.bf16.mxu1 %v7306_v8  ;;  %v7355_v8 = vld [vmem:[%s8057_s21 + $0x330] sm:$0xff]  }
  0x8e   : > { %6543 = vmatpush3.bf16.msra.mxu0 %v7307_v9  ;;  %v7356_v9 = vld [vmem:[%s8057_s21 + $0x3b0] sm:$0xff]  }
  0x8f   : > { %6544 = vmatprep.subr.bf16.mxu0 %v7309_v11  ;;  %6565 = vmatpush3.bf16.msra.mxu1 %v7308_v10  ;;  %v7357_v10 = vld [vmem:[%s8057_s21 + $0x368] sm:$0xff]  }
  0x90   : > { %6566 = vmatprep.subr.bf16.mxu1 %v7310_v12  ;;  %v7358_v11 = vld [vmem:[%s8057_s21 + $0x3e8] sm:$0xff]  }
  0x91   : > { %v7359_v12 = vld [vmem:[%s8057_s21 + $0x328] sm:$0xff]  }
  0x92   : > { %6545 = vmatpush3.bf16.msra.mxu0 %v7311_v13  ;;  %v7360_v13 = vld [vmem:[%s8057_s21 + $0x3a8] sm:$0xff]  }
  0x93   : > { %6546 = vmatprep.subr.bf16.mxu0 %v7313_v15  ;;  %6567 = vmatpush3.bf16.msra.mxu1 %v7312_v14  ;;  %v7361_v14 = vld [vmem:[%s8057_s21 + $0x360] sm:$0xff]  }
  0x94   : > { %6568 = vmatprep.subr.bf16.mxu1 %v7314_v16  ;;  %v7362_v15 = vld [vmem:[%s8057_s21 + $0x3e0] sm:$0xff]  }
  0x95   : > { %v7363_v16 = vld [vmem:[%s8057_s21 + $0x320] sm:$0xff]  }
  0x96   : > { %6547 = vmatpush3.bf16.msra.mxu0 %v7315_v17  ;;  %v7364_v17 = vld [vmem:[%s8057_s21 + $0x3a0] sm:$0xff]  }
  0x97   : > { %6576 = vmatprep.subr.bf16.mxu0 %v7317_v20  ;;  %6569 = vmatpush3.bf16.msra.mxu1 %v7316_v18  ;;  %v7365_v18 = vld [vmem:[%s8057_s21 + $0x358] sm:$0xff]  }
  0x98   : > { %6598 = vmatprep.subr.bf16.mxu1 %v7318_v21  ;;  %v7367_v20 = vld [vmem:[%s8057_s21 + $0x318] sm:$0xff]  }
  0x99   : > { %4679 = vmatmul.mubr.bf16.vlgmr.msra.gmra.mxu0 %v1289_v19  ;;  %v7366_v19 = vld [vmem:[%s8057_s21 + $0x3d8] sm:$0xff]  }
  0x9a   : > { %6577 = vmatpush3.bf16.msra.mxu0 %v7319_v22  ;;  %4719 = vmatmul.mubr.bf16.vlgmr.msra.gmra.mxu1 %v1305_v24  ;;  %v7368_v21 = vld [vmem:[%s8057_s21 + $0x398] sm:$0xff]   ;;  %v7369_v22 = vld [vmem:[%s8057_s21 + $0x350] sm:$0xff]  }
  0x9b   : > { %6578 = vmatprep.subr.bf16.mxu0 %v7321_v25  ;;  %6599 = vmatpush3.bf16.msra.mxu1 %v7320_v23  ;;  %v7370_v23 = vld [vmem:[%s8057_s21 + $0x3d0] sm:$0xff]  }
  0x9c   : > { %6600 = vmatprep.subr.bf16.mxu1 %v7322_v26  ;;  %4758 = vmatprep.mubr.bf16.mxu0 %v1345_v57  ;;  %v7371_v24 = vld [vmem:[%s8057_s21 + $0x310] sm:$0xff]   ;;  %v7373_v26 = vld [vmem:[%s8057_s21 + $0x348] sm:$0xff]  }
  0x9d   : > { %4798 = vmatprep.mubr.bf16.mxu1 %v1355_v61  ;;  %v7372_v25 = vld [vmem:[%s8057_s21 + $0x390] sm:$0xff]   ;;  %v7406_v61 = vld [vmem:[%s8057_s21 + $0x448] sm:$0xff]  }
  0x9e   : > { %6579 = vmatpush3.bf16.msra.mxu0 %v7323_v27  ;;  %v7374_v27 = vld [vmem:[%s8057_s21 + $0x3c8] sm:$0xff]   ;;  %v7402_v57 = vld [vmem:[%s8057_s21 + $0x450] sm:$0xff]  }
  0x9f   : > { %6580 = vmatprep.subr.bf16.mxu0 %v7325_v29  ;;  %6601 = vmatpush3.bf16.msra.mxu1 %v7324_v28  ;;  %v7375_v28 = vld [vmem:[%s8057_s21 + $0x308] sm:$0xff]  }
  0xa0   : > { %6602 = vmatprep.subr.bf16.mxu1 %v7326_v30  ;;  %v7376_v29 = vld [vmem:[%s8057_s21 + $0x388] sm:$0xff]   ;;  %v7377_v30 = vld [vmem:[%s8057_s21 + $0x340] sm:$0xff]  }
  0xa2   : > { %6581 = vmatpush3.bf16.msra.mxu0 %v7327_v31  ;;  %v7378_v31 = vld [vmem:[%s8057_s21 + $0x3c0] sm:$0xff]  }
  0xa3   : > { %6582 = vmatprep.subr.bf16.mxu0 %v7329_v33  ;;  %6603 = vmatpush3.bf16.msra.mxu1 %v7328_v32  ;;  %v7379_v32 = vld [vmem:[%s8057_s21 + $0x300] sm:$0xff]  }
  0xa4   : > { %6604 = vmatprep.subr.bf16.mxu1 %v7330_v34  ;;  %v7380_v33 = vld [vmem:[%s8057_s21 + $0x380] sm:$0xff]   ;;  %v1338_v34 = vrot.slane %v8184_v54, %v8110_v42  ;;  %v7399_v54 = vld [vmem:[%s8057_s21 + $0x4d8] sm:$0xff]  }
  0xa6   : > { %6583 = vmatpush3.bf16.msra.mxu0 %v7331_v35  ;;  %v7382_v35 = vld [vmem:[%s8057_s21 + $0x478] sm:$0xff]  }
  0xa7   : > { %6584 = vmatprep.subr.bf16.mxu0 %v7333_v37  ;;  %6605 = vmatpush3.bf16.msra.mxu1 %v7332_v36  ;;  %v7383_v36 = vld [vmem:[%s8057_s21 + $0x4f8] sm:$0xff]  }
  0xa8   : > { %6606 = vmatprep.subr.bf16.mxu1 %v7334_v38  ;;  %v7384_v37 = vld [vmem:[%s8057_s21 + $0x438] sm:$0xff]  }
  0xa9   : > { %v7385_v38 = vld [vmem:[%s8057_s21 + $0x4b8] sm:$0xff]  }
  0xaa   : > { %6585 = vmatpush3.bf16.msra.mxu0 %v7335_v39  ;;  %v1354_v39 = vcombine.high %v1338_v34, %v1338_v34 }
  0xab   : > { %6586 = vmatprep.subr.bf16.mxu0 %v7337_v41  ;;  %6607 = vmatpush3.bf16.msra.mxu1 %v7336_v40  ;;  %v7386_v40 = vld [vmem:[%s8057_s21 + $0x470] sm:$0xff]  }
  0xac   : > { %6608 = vmatprep.subr.bf16.mxu1 %v7338_v43  ;;  %v7387_v41 = vld [vmem:[%s8057_s21 + $0x4f0] sm:$0xff]  }
  0xad   : > { %v7388_v43 = vld [vmem:[%s8057_s21 + $0x430] sm:$0xff]  }
  0xae   : > { %6587 = vmatpush3.bf16.msra.mxu0 %v7339_v44  ;;  %v7389_v44 = vld [vmem:[%s8057_s21 + $0x4b0] sm:$0xff]  }
  0xaf   : > { %6588 = vmatprep.subr.bf16.mxu0 %v7341_v46  ;;  %6609 = vmatpush3.bf16.msra.mxu1 %v7340_v45  ;;  %v7390_v45 = vld [vmem:[%s8057_s21 + $0x468] sm:$0xff]  }
  0xb0   : > { %6610 = vmatprep.subr.bf16.mxu1 %v7342_v48  ;;  %v7391_v46 = vld [vmem:[%s8057_s21 + $0x4e8] sm:$0xff]  }
  0xb1   : > { %v7393_v48 = vld [vmem:[%s8057_s21 + $0x4a8] sm:$0xff]  }
  0xb2   : > { %6589 = vmatpush3.bf16.msra.mxu0 %v7343_v51  ;;  %v7396_v51 = vld [vmem:[%s8057_s21 + $0x420] sm:$0xff]  }
  0xb3   : > { %6590 = vmatprep.subr.bf16.mxu0 %v7345_v55  ;;  %6611 = vmatpush3.bf16.msra.mxu1 %v7344_v52  ;;  %v7397_v52 = vld [vmem:[%s8057_s21 + $0x4a0] sm:$0xff]   ;;  %v7400_v55 = vld [vmem:[%s8057_s21 + $0x418] sm:$0xff]  }
  0xb4   : > { %6612 = vmatprep.subr.bf16.mxu1 %v7346_v56  ;;  %v7401_v56 = vld [vmem:[%s8057_s21 + $0x498] sm:$0xff]  }
  0xb6   : > { %6591 = vmatpush3.bf16.msra.mxu0 %v7347_v59  ;;  %v7404_v59 = vld [vmem:[%s8057_s21 + $0x410] sm:$0xff]  }
  0xb7   : > { %6620 = vmatprep.subr.bf16.mxu0 %v7349_v63  ;;  %6613 = vmatpush3.bf16.msra.mxu1 %v7348_v60  ;;  %v7405_v60 = vld [vmem:[%s8057_s21 + $0x490] sm:$0xff]   ;;  %v7407_v63 = vld [vmem:[%s8057_s21 + $0x4c8] sm:$0xff]  }
  0xb8   : > { %6642 = vmatprep.subr.bf16.mxu1 %v7350_v0 }
  0xb9   : > { %4759 = vmatmul.mubr.bf16.vlgmr.msra.gmra.mxu0 %v1331_v62  ;;  %v285_v62 = vld [vmem:[%s8071_s12 + $0x10] sm:$0xff] }
  0xba   : > { %6621 = vmatpush3.bf16.msra.mxu0 %v7351_v2  ;;  %4838 = vmatprep.mubr.bf16.mxu0 %v1352_v1  ;;  %v1364_v0 = vrot.slane %v285_v62, %v8110_v42  ;;  %v1357_v1 = vcombine.high %v285_v62, %v285_v62  ;;  %v7408_v2 = vld [vmem:[%s8057_s21 + $0x408] sm:$0xff]  }
  0xbb   : > { %4799 = vmatmul.mubr.bf16.vlgmr.msra.gmra.mxu1 %v1353_v4  ;;  %6622 = vmatprep.subr.bf16.mxu0 %v7353_v5  ;;  %v7457_v62 = vld [vmem:[%s8057_s21 + $0x628] sm:$0xff]  }
  0xbc   : > { %6643 = vmatpush3.bf16.msra.mxu1 %v7352_v3  ;;  %4878 = vmatprep.mubr.bf16.mxu1 %v1356_v7  ;;  %v7409_v3 = vld [vmem:[%s8057_s21 + $0x488] sm:$0xff]   ;;  %v1372_v4 = vcombine.high %v1364_v0, %v1364_v0  ;;  %v8260_v5 = vrot.slane %v1357_v1, %v8110_v42  ;;  %v7411_v7 = vld [vmem:[%s8057_s21 + $0x4c0] sm:$0xff]  }
  0xbd   : > { %6644 = vmatprep.subr.bf16.mxu1 %v7354_v6  ;;  %v7410_v6 = vld [vmem:[%s8057_s21 + $0x440] sm:$0xff]  }
  0xbe   : > { %6623 = vmatpush3.bf16.msra.mxu0 %v7355_v8  ;;  %v1394_v8 = vrot.slane %v1372_v4, %v8110_v42  ;;  %v7460_v1 = vld [vmem:[%s8057_s21 + $0x6e0] sm:$0xff]   ;;  %v7463_v4 = vld [vmem:[%s8057_s21 + $0x658] sm:$0xff]  }
  0xbf   : > { %6624 = vmatprep.subr.bf16.mxu0 %v7357_v10  ;;  %v7412_v10 = vld [vmem:[%s8057_s21 + $0x400] sm:$0xff]  }
  0xc0   : > { %6645 = vmatpush3.bf16.msra.mxu1 %v7356_v9  ;;  %v1373_v9 = vcombine.high %v8260_v5, %v8260_v5 }
  0xc1   : > { %6646 = vmatprep.subr.bf16.mxu1 %v7358_v11  ;;  %v7413_v11 = vld [vmem:[%s8057_s21 + $0x480] sm:$0xff]  }
  0xc2   : > { %6625 = vmatpush3.bf16.msra.mxu0 %v7359_v12  ;;  %v1404_v12 = vcombine.high %v1394_v8, %v1394_v8 }
  0xc3   : > { %6626 = vmatprep.subr.bf16.mxu0 %v7361_v14  ;;  %v7414_v14 = vld [vmem:[%s8057_s21 + $0x578] sm:$0xff]  }
  0xc4   : > { %6647 = vmatpush3.bf16.msra.mxu1 %v7360_v13  ;;  %v1380_v13 = vrot.slane %v1364_v0, %v8110_v42  ;;  %v7459_v0 = vld [vmem:[%s8057_s21 + $0x660] sm:$0xff]  }
  0xc5   : > { %6648 = vmatprep.subr.bf16.mxu1 %v7362_v15  ;;  %v7415_v15 = vld [vmem:[%s8057_s21 + $0x5f8] sm:$0xff]  }
  0xc6   : > { %6627 = vmatpush3.bf16.msra.mxu0 %v7363_v16  ;;  %v1401_v16 = vrot.slane %v1373_v9, %v8110_v42  ;;  %v7468_v9 = vld [vmem:[%s8057_s21 + $0x6d0] sm:$0xff]  }
  0xc7   : > { %6628 = vmatprep.subr.bf16.mxu0 %v7365_v18  ;;  %v7417_v18 = vld [vmem:[%s8057_s21 + $0x5b8] sm:$0xff]  }
  0xc8   : > { %6649 = vmatpush3.bf16.msra.mxu1 %v7364_v17  ;;  %v7416_v17 = vld [vmem:[%s8057_s21 + $0x538] sm:$0xff]  }
  0xc9   : > { %6650 = vmatprep.subr.bf16.mxu1 %v7366_v19  ;;  %v1402_v19 = vcombine.high %v1380_v13, %v1380_v13 }
  0xca   : > { %6629 = vmatpush3.bf16.msra.mxu0 %v7367_v20  ;;  %v7418_v20 = vld [vmem:[%s8057_s21 + $0x570] sm:$0xff]  }
  0xcb   : > { %6630 = vmatprep.subr.bf16.mxu0 %v7369_v22  ;;  %v1405_v22 = vcombine.high %v1401_v16, %v1401_v16 }
  0xcc   : > { %6651 = vmatpush3.bf16.msra.mxu1 %v7368_v21  ;;  %v7419_v21 = vld [vmem:[%s8057_s21 + $0x5f0] sm:$0xff]  }
  0xcd   : > { %6652 = vmatprep.subr.bf16.mxu1 %v7370_v23  ;;  %v7420_v23 = vld [vmem:[%s8057_s21 + $0x530] sm:$0xff]  }
  0xce   : > { %6631 = vmatpush3.bf16.msra.mxu0 %v7371_v24  ;;  %v7421_v24 = vld [vmem:[%s8057_s21 + $0x5b0] sm:$0xff]  }
  0xcf   : > { %6632 = vmatprep.subr.bf16.mxu0 %v7373_v26  ;;  %v7423_v26 = vld [vmem:[%s8057_s21 + $0x5e8] sm:$0xff]  }
  0xd0   : > { %6653 = vmatpush3.bf16.msra.mxu1 %v7372_v25  ;;  %v7422_v25 = vld [vmem:[%s8057_s21 + $0x568] sm:$0xff]  }
  0xd1   : > { %6654 = vmatprep.subr.bf16.mxu1 %v7374_v27  ;;  %v7424_v27 = vld [vmem:[%s8057_s21 + $0x528] sm:$0xff]  }
  0xd2   : > { %6633 = vmatpush3.bf16.msra.mxu0 %v7375_v28  ;;  %v7425_v28 = vld [vmem:[%s8057_s21 + $0x5a8] sm:$0xff]  }
  0xd3   : > { %6634 = vmatprep.subr.bf16.mxu0 %v7377_v30  ;;  %v7427_v30 = vld [vmem:[%s8057_s21 + $0x5e0] sm:$0xff]  }
  0xd4   : > { %6655 = vmatpush3.bf16.msra.mxu1 %v7376_v29  ;;  %v7426_v29 = vld [vmem:[%s8057_s21 + $0x560] sm:$0xff]  }
  0xd5   : > { %6656 = vmatprep.subr.bf16.mxu1 %v7378_v31  ;;  %v7428_v31 = vld [vmem:[%s8057_s21 + $0x520] sm:$0xff]  }
  0xd6   : > { %6635 = vmatpush3.bf16.msra.mxu0 %v7379_v32  ;;  %v7429_v32 = vld [vmem:[%s8057_s21 + $0x5a0] sm:$0xff]  }
  0xd7   : > { %6664 = vmatprep.subr.bf16.mxu0 %v7382_v35  ;;  %v7432_v35 = vld [vmem:[%s8057_s21 + $0x518] sm:$0xff]  }
  0xd8   : > { %6657 = vmatpush3.bf16.msra.mxu1 %v7380_v33  ;;  %v7430_v33 = vld [vmem:[%s8057_s21 + $0x558] sm:$0xff]  }
  0xd9   : > { %4839 = vmatmul.mubr.bf16.vlgmr.msra.gmra.mxu0 %v1338_v34  ;;  %6686 = vmatprep.subr.bf16.mxu1 %v7383_v36  ;;  %v7431_v34 = vld [vmem:[%s8057_s21 + $0x5d8] sm:$0xff]  }
  0xda   : > { %6665 = vmatpush3.bf16.msra.mxu0 %v7384_v37  ;;  %4918 = vmatprep.mubr.bf16.mxu0 %v1394_v8  ;;  %v7433_v36 = vld [vmem:[%s8057_s21 + $0x598] sm:$0xff]   ;;  %v7434_v37 = vld [vmem:[%s8057_s21 + $0x550] sm:$0xff]  }
  0xdb   : > { %4879 = vmatmul.mubr.bf16.vlgmr.msra.gmra.mxu1 %v1354_v39  ;;  %6666 = vmatprep.subr.bf16.mxu0 %v7386_v40  ;;  %v7436_v39 = vld [vmem:[%s8057_s21 + $0x510] sm:$0xff]  }
  0xdc   : > { %6687 = vmatpush3.bf16.msra.mxu1 %v7385_v38  ;;  %4958 = vmatprep.mubr.bf16.mxu1 %v1404_v12  ;;  %v7435_v38 = vld [vmem:[%s8057_s21 + $0x5d0] sm:$0xff]   ;;  %v7471_v12 = vld [vmem:[%s8057_s21 + $0x648] sm:$0xff]  }
  0xdd   : > { %6688 = vmatprep.subr.bf16.mxu1 %v7387_v41  ;;  %v7437_v40 = vld [vmem:[%s8057_s21 + $0x590] sm:$0xff]   ;;  %v7438_v41 = vld [vmem:[%s8057_s21 + $0x548] sm:$0xff]  }
  0xde   : > { %6667 = vmatpush3.bf16.msra.mxu0 %v7388_v43  ;;  %v7439_v43 = vld [vmem:[%s8057_s21 + $0x5c8] sm:$0xff]   ;;  %v7467_v8 = vld [vmem:[%s8057_s21 + $0x650] sm:$0xff]  }
  0xdf   : > { %6668 = vmatprep.subr.bf16.mxu0 %v7390_v45  ;;  %v7441_v45 = vld [vmem:[%s8057_s21 + $0x588] sm:$0xff]  }
  0xe0   : > { %6689 = vmatpush3.bf16.msra.mxu1 %v7389_v44  ;;  %v7440_v44 = vld [vmem:[%s8057_s21 + $0x508] sm:$0xff]  }
  0xe1   : > { %6690 = vmatprep.subr.bf16.mxu1 %v7391_v46  ;;  %v7442_v46 = vld [vmem:[%s8057_s21 + $0x540] sm:$0xff]  }
  0xe2   : > { %6669 = vmatpush3.bf16.msra.mxu0 %v7392_v47  ;;  %v7443_v47 = vld [vmem:[%s8057_s21 + $0x5c0] sm:$0xff]  }
  0xe3   : > { %6670 = vmatprep.subr.bf16.mxu0 %v7394_v49  ;;  %v7445_v49 = vld [vmem:[%s8057_s21 + $0x580] sm:$0xff]  }
  0xe4   : > { %6691 = vmatpush3.bf16.msra.mxu1 %v7393_v48  ;;  %v7444_v48 = vld [vmem:[%s8057_s21 + $0x500] sm:$0xff]  }
  0xe5   : > { %6692 = vmatprep.subr.bf16.mxu1 %v7395_v50  ;;  %v1387_v50 = vrot.slane %v8260_v5, %v8110_v42  ;;  %v7464_v5 = vld [vmem:[%s8057_s21 + $0x6d8] sm:$0xff]  }
  0xe6   : > { %6671 = vmatpush3.bf16.msra.mxu0 %v7396_v51  ;;  %v7447_v51 = vld [vmem:[%s8057_s21 + $0x678] sm:$0xff]  }
  0xe7   : > { %6672 = vmatprep.subr.bf16.mxu0 %v7398_v53  ;;  %v7449_v53 = vld [vmem:[%s8057_s21 + $0x638] sm:$0xff]  }
  0xe8   : > { %6693 = vmatpush3.bf16.msra.mxu1 %v7397_v52  ;;  %v7448_v52 = vld [vmem:[%s8057_s21 + $0x6f8] sm:$0xff]  }
  0xe9   : > { %6694 = vmatprep.subr.bf16.mxu1 %v7399_v54  ;;  %v7450_v54 = vld [vmem:[%s8057_s21 + $0x6b8] sm:$0xff]  }
  0xea   : > { %6673 = vmatpush3.bf16.msra.mxu0 %v7400_v55  ;;  %v1403_v55 = vcombine.high %v1387_v50, %v1387_v50 }
  0xeb   : > { %6674 = vmatprep.subr.bf16.mxu0 %v7402_v57  ;;  %v7452_v57 = vld [vmem:[%s8057_s21 + $0x6f0] sm:$0xff]  }
  0xec   : > { %6695 = vmatpush3.bf16.msra.mxu1 %v7401_v56  ;;  %v7451_v56 = vld [vmem:[%s8057_s21 + $0x670] sm:$0xff]  }
  0xed   : > { %6696 = vmatprep.subr.bf16.mxu1 %v7403_v58  ;;  %v7453_v58 = vld [vmem:[%s8057_s21 + $0x630] sm:$0xff]  }
  0xee   : > { %6675 = vmatpush3.bf16.msra.mxu0 %v7404_v59  ;;  %v7454_v59 = vld [vmem:[%s8057_s21 + $0x6b0] sm:$0xff]  }
  0xef   : > { %6676 = vmatprep.subr.bf16.mxu0 %v7406_v61  ;;  %v7456_v61 = vld [vmem:[%s8057_s21 + $0x6e8] sm:$0xff]  }
  0xf0   : > { %6697 = vmatpush3.bf16.msra.mxu1 %v7405_v60  ;;  %v7455_v60 = vld [vmem:[%s8057_s21 + $0x668] sm:$0xff]  }
  0xf1   : > { %6698 = vmatprep.subr.bf16.mxu1 %v7407_v63  ;;  %v7458_v63 = vld [vmem:[%s8057_s21 + $0x6a8] sm:$0xff]  }
  0xf2   : > { %6677 = vmatpush3.bf16.msra.mxu0 %v7408_v2  ;;  %v7461_v2 = vld [vmem:[%s8057_s21 + $0x620] sm:$0xff]  }
  0xf3   : > { %6678 = vmatprep.subr.bf16.mxu0 %v7410_v6  ;;  %v7465_v6 = vld [vmem:[%s8057_s21 + $0x618] sm:$0xff]  }
  0xf4   : > { %6699 = vmatpush3.bf16.msra.mxu1 %v7409_v3  ;;  %v7462_v3 = vld [vmem:[%s8057_s21 + $0x6a0] sm:$0xff]  }
  0xf5   : > { %6700 = vmatprep.subr.bf16.mxu1 %v7411_v7  ;;  %v7466_v7 = vld [vmem:[%s8057_s21 + $0x698] sm:$0xff]  }
  0xf6   : > { %6679 = vmatpush3.bf16.msra.mxu0 %v7412_v10  ;;  %v7469_v10 = vld [vmem:[%s8057_s21 + $0x610] sm:$0xff]  }
  0xf7   : > { %6708 = vmatprep.subr.bf16.mxu0 %v7414_v14  ;;  %v286_v14 = vld [vmem:[%s8071_s12 + $0x18] sm:$0xff] }
  0xf8   : > { %6701 = vmatpush3.bf16.msra.mxu1 %v7413_v11  ;;  %v7470_v11 = vld [vmem:[%s8057_s21 + $0x690] sm:$0xff]  }
  0xf9   : > { %4919 = vmatmul.mubr.bf16.vlgmr.msra.gmra.mxu0 %v1380_v13  ;;  %6730 = vmatprep.subr.bf16.mxu1 %v7415_v15  ;;  %v7472_v13 = vld [vmem:[%s8057_s21 + $0x6c8] sm:$0xff]  }
  0xfa   : > { %6709 = vmatpush3.bf16.msra.mxu0 %v7416_v17  ;;  %4998 = vmatprep.mubr.bf16.mxu0 %v1401_v16  ;;  %v7473_v15 = vld [vmem:[%s8057_s21 + $0x608] sm:$0xff]   ;;  %v1413_v16 = vrot.slane %v286_v14, %v8110_v42  ;;  %v1406_v17 = vcombine.high %v286_v14, %v286_v14  ;;  %v7513_v14 = vld [vmem:[%s8057_s21 + $0x8f8] sm:$0xff]  }
  0xfb   : > { %4959 = vmatmul.mubr.bf16.vlgmr.msra.gmra.mxu1 %v1402_v19  ;;  %6710 = vmatprep.subr.bf16.mxu0 %v7418_v20  ;;  %v7475_v19 = vld [vmem:[%s8057_s21 + $0x640] sm:$0xff]  }
  0xfc   : > { %6731 = vmatpush3.bf16.msra.mxu1 %v7417_v18  ;;  %5038 = vmatprep.mubr.bf16.mxu1 %v1405_v22  ;;  %v7474_v18 = vld [vmem:[%s8057_s21 + $0x688] sm:$0xff]   ;;  %v1421_v20 = vcombine.high %v1413_v16, %v1413_v16  ;;  %v7476_v22 = vld [vmem:[%s8057_s21 + $0x6c0] sm:$0xff]  }
  0xfd   : > { %6732 = vmatprep.subr.bf16.mxu1 %v7419_v21  ;;  %v8337_v21 = vrot.slane %v1406_v17, %v8110_v42 }
  0xfe   : > { %6711 = vmatpush3.bf16.msra.mxu0 %v7420_v23  ;;  %v7477_v23 = vld [vmem:[%s8057_s21 + $0x600] sm:$0xff]  }
  0xff   : > { %6712 = vmatprep.subr.bf16.mxu0 %v7422_v25  ;;  %v1422_v25 = vcombine.high %v8337_v21, %v8337_v21 }
 0x100   : > { %6733 = vmatpush3.bf16.msra.mxu1 %v7421_v24  ;;  %v1443_v24 = vrot.slane %v1421_v20, %v8110_v42 }
 0x101   : > { %6734 = vmatprep.subr.bf16.mxu1 %v7423_v26  ;;  %v7478_v26 = vld [vmem:[%s8057_s21 + $0x680] sm:$0xff]  }
 0x102   : > { %6713 = vmatpush3.bf16.msra.mxu0 %v7424_v27  ;;  %v1453_v27 = vcombine.high %v1443_v24, %v1443_v24 }
 0x103   : > { %6714 = vmatprep.subr.bf16.mxu0 %v7426_v29  ;;  %v7479_v29 = vld [vmem:[%s8057_s21 + $0x778] sm:$0xff]  }
 0x104   : > { %6735 = vmatpush3.bf16.msra.mxu1 %v7425_v28  ;;  %v1429_v28 = vrot.slane %v1413_v16, %v8110_v42  ;;  %v7515_v16 = vld [vmem:[%s8057_s21 + $0x8b8] sm:$0xff]  }
 0x105   : > { %6736 = vmatprep.subr.bf16.mxu1 %v7427_v30  ;;  %v7480_v30 = vld [vmem:[%s8057_s21 + $0x7f8] sm:$0xff]  }
 0x106   : > { %6715 = vmatpush3.bf16.msra.mxu0 %v7428_v31  ;;  %v1450_v31 = vrot.slane %v1422_v25, %v8110_v42  ;;  %v7520_v25 = vld [vmem:[%s8057_s21 + $0x868] sm:$0xff]  }
 0x107   : > { %6716 = vmatprep.subr.bf16.mxu0 %v7430_v33  ;;  %v7482_v33 = vld [vmem:[%s8057_s21 + $0x7b8] sm:$0xff]  }
 0x108   : > { %6737 = vmatpush3.bf16.msra.mxu1 %v7429_v32  ;;  %v7481_v32 = vld [vmem:[%s8057_s21 + $0x738] sm:$0xff]  }
 0x109   : > { %6738 = vmatprep.subr.bf16.mxu1 %v7431_v34  ;;  %v1451_v34 = vcombine.high %v1429_v28, %v1429_v28 }
 0x10a   : > { %6717 = vmatpush3.bf16.msra.mxu0 %v7432_v35  ;;  %v7483_v35 = vld [vmem:[%s8057_s21 + $0x770] sm:$0xff]  }
 0x10b   : > { %6718 = vmatprep.subr.bf16.mxu0 %v7434_v37  ;;  %v1454_v37 = vcombine.high %v1450_v31, %v1450_v31 }
 0x10c   : > { %6739 = vmatpush3.bf16.msra.mxu1 %v7433_v36  ;;  %v7484_v36 = vld [vmem:[%s8057_s21 + $0x7f0] sm:$0xff]  }
 0x10d   : > { %6740 = vmatprep.subr.bf16.mxu1 %v7435_v38 }
 0x10e   : > { %6719 = vmatpush3.bf16.msra.mxu0 %v7436_v39  ;;  %v7485_v39 = vld [vmem:[%s8057_s21 + $0x730] sm:$0xff]  }
 0x10f   : > { %6720 = vmatprep.subr.bf16.mxu0 %v7438_v41 }
 0x110   : > { %6741 = vmatpush3.bf16.msra.mxu1 %v7437_v40  ;;  %v7486_v40 = vld [vmem:[%s8057_s21 + $0x7b0] sm:$0xff]  }
 0x111   : > { %6742 = vmatprep.subr.bf16.mxu1 %v7439_v43 }
 0x112   : > { %6721 = vmatpush3.bf16.msra.mxu0 %v7440_v44  ;;  %v7487_v44 = vld [vmem:[%s8057_s21 + $0x768] sm:$0xff]  }
 0x113   : > { %6722 = vmatprep.subr.bf16.mxu0 %v7442_v46  ;;  %v7488_v46 = vld [vmem:[%s8057_s21 + $0x7e8] sm:$0xff]  }
 0x114   : > { %6743 = vmatpush3.bf16.msra.mxu1 %v7441_v45 }
 0x115   : > { %6744 = vmatprep.subr.bf16.mxu1 %v7443_v47 }
 0x116   : > { %6723 = vmatpush3.bf16.msra.mxu0 %v7444_v48 }
 0x117   : > { %6752 = vmatprep.subr.bf16.mxu0 %v7447_v51  ;;  %v7490_v51 = vld [vmem:[%s8057_s21 + $0x7a8] sm:$0xff]  }
 0x118   : > { %6745 = vmatpush3.bf16.msra.mxu1 %v7445_v49  ;;  %v7489_v49 = vld [vmem:[%s8057_s21 + $0x728] sm:$0xff]  }
 0x119   : > { %4999 = vmatmul.mubr.bf16.vlgmr.msra.gmra.mxu0 %v1387_v50  ;;  %6774 = vmatprep.subr.bf16.mxu1 %v7448_v52 }
 0x11a   : > { %6753 = vmatpush3.bf16.msra.mxu0 %v7449_v53  ;;  %5078 = vmatprep.mubr.bf16.mxu0 %v1443_v24 }
 0x11b   : > { %5039 = vmatmul.mubr.bf16.vlgmr.msra.gmra.mxu1 %v1403_v55  ;;  %6754 = vmatprep.subr.bf16.mxu0 %v7451_v56  ;;  %v7492_v56 = vld [vmem:[%s8057_s21 + $0x7e0] sm:$0xff]  }
 0x11c   : > { %6775 = vmatpush3.bf16.msra.mxu1 %v7450_v54  ;;  %5118 = vmatprep.mubr.bf16.mxu1 %v1453_v27  ;;  %v7491_v54 = vld [vmem:[%s8057_s21 + $0x760] sm:$0xff]   ;;  %v7521_v27 = vld [vmem:[%s8057_s21 + $0x8e8] sm:$0xff]  }
 0x11d   : > { %6776 = vmatprep.subr.bf16.mxu1 %v7452_v57 }
 0x11e   : > { %6755 = vmatpush3.bf16.msra.mxu0 %v7453_v58  ;;  %v7493_v58 = vld [vmem:[%s8057_s21 + $0x720] sm:$0xff]  }
 0x11f   : > { %6756 = vmatprep.subr.bf16.mxu0 %v7455_v60  ;;  %v7495_v60 = vld [vmem:[%s8057_s21 + $0x758] sm:$0xff]  }
 0x120   : > { %6777 = vmatpush3.bf16.msra.mxu1 %v7454_v59  ;;  %v7494_v59 = vld [vmem:[%s8057_s21 + $0x7a0] sm:$0xff]  }
 0x121   : > { %6778 = vmatprep.subr.bf16.mxu1 %v7456_v61  ;;  %v7496_v61 = vld [vmem:[%s8057_s21 + $0x7d8] sm:$0xff]  }
 0x122   : > { %6757 = vmatpush3.bf16.msra.mxu0 %v7457_v62  ;;  %v7497_v62 = vld [vmem:[%s8057_s21 + $0x718] sm:$0xff]  }
 0x123   : > { %6758 = vmatprep.subr.bf16.mxu0 %v7459_v0  ;;  %v7499_v0 = vld [vmem:[%s8057_s21 + $0x750] sm:$0xff]  }
 0x124   : > { %6779 = vmatpush3.bf16.msra.mxu1 %v7458_v63  ;;  %v7498_v63 = vld [vmem:[%s8057_s21 + $0x798] sm:$0xff]  }
 0x125   : > { %6780 = vmatprep.subr.bf16.mxu1 %v7460_v1  ;;  %v7500_v1 = vld [vmem:[%s8057_s21 + $0x7d0] sm:$0xff]  }
 0x126   : > { %6759 = vmatpush3.bf16.msra.mxu0 %v7461_v2  ;;  %v7501_v2 = vld [vmem:[%s8057_s21 + $0x710] sm:$0xff]  }
 0x127   : > { %6760 = vmatprep.subr.bf16.mxu0 %v7463_v4  ;;  %v7503_v4 = vld [vmem:[%s8057_s21 + $0x748] sm:$0xff]  }
 0x128   : > { %6781 = vmatpush3.bf16.msra.mxu1 %v7462_v3  ;;  %v7502_v3 = vld [vmem:[%s8057_s21 + $0x790] sm:$0xff]  }
 0x129   : > { %6782 = vmatprep.subr.bf16.mxu1 %v7464_v5  ;;  %v7504_v5 = vld [vmem:[%s8057_s21 + $0x7c8] sm:$0xff]  }
 0x12a   : > { %6761 = vmatpush3.bf16.msra.mxu0 %v7465_v6  ;;  %v7505_v6 = vld [vmem:[%s8057_s21 + $0x708] sm:$0xff]  }
 0x12b   : > { %6762 = vmatprep.subr.bf16.mxu0 %v7467_v8  ;;  %v7507_v8 = vld [vmem:[%s8057_s21 + $0x740] sm:$0xff]  }
 0x12c   : > { %6783 = vmatpush3.bf16.msra.mxu1 %v7466_v7  ;;  %v7506_v7 = vld [vmem:[%s8057_s21 + $0x788] sm:$0xff]  }
 0x12d   : > { %6784 = vmatprep.subr.bf16.mxu1 %v7468_v9  ;;  %v7508_v9 = vld [vmem:[%s8057_s21 + $0x7c0] sm:$0xff]  }
 0x12e   : > { %6763 = vmatpush3.bf16.msra.mxu0 %v7469_v10  ;;  %v7509_v10 = vld [vmem:[%s8057_s21 + $0x700] sm:$0xff]  }
 0x12f   : > { %6764 = vmatprep.subr.bf16.mxu0 %v7471_v12  ;;  %v1436_v12 = vrot.slane %v8337_v21, %v8110_v42  ;;  %v7518_v21 = vld [vmem:[%s8057_s21 + $0x830] sm:$0xff]  }
 0x130   : > { %6785 = vmatpush3.bf16.msra.mxu1 %v7470_v11  ;;  %v7510_v11 = vld [vmem:[%s8057_s21 + $0x780] sm:$0xff]  }
 0x131   : > { %6786 = vmatprep.subr.bf16.mxu1 %v7472_v13  ;;  %v7512_v13 = vld [vmem:[%s8057_s21 + $0x878] sm:$0xff]   ;;  %v1452_v17 = vcombine.high %v1436_v12, %v1436_v12 }
 0x132   : > { %6765 = vmatpush3.bf16.msra.mxu0 %v7473_v15  ;;  %v7514_v15 = vld [vmem:[%s8057_s21 + $0x838] sm:$0xff]  }
 0x133   : > { %6766 = vmatprep.subr.bf16.mxu0 %v7475_v19  ;;  %v7517_v19 = vld [vmem:[%s8057_s21 + $0x8f0] sm:$0xff]  }
 0x134   : > { %6787 = vmatpush3.bf16.msra.mxu1 %v7474_v18  ;;  %v7516_v18 = vld [vmem:[%s8057_s21 + $0x870] sm:$0xff]  }
 0x135   : > { %6788 = vmatprep.subr.bf16.mxu1 %v7476_v22  ;;  %v7519_v22 = vld [vmem:[%s8057_s21 + $0x8b0] sm:$0xff]  }
 0x136   : > { %6767 = vmatpush3.bf16.msra.mxu0 %v7477_v23 }
 0x137   : > { %6796 = vmatprep.subr.bf16.mxu0 %v7479_v29 }
 0x138   : > { %6789 = vmatpush3.bf16.msra.mxu1 %v7478_v26 }
 0x139   : > { %v6504_v38 = vpop.f32.mrf.mxu0  ;;  %5079 = vmatmul.mubr.bf16.vlgmr.msra.gmra.mxu0 %v1429_v28  ;;  %6818 = vmatprep.subr.bf16.mxu1 %v7480_v30  ;;  %v7522_v30 = vld [vmem:[%s8057_s21 + $0x828] sm:$0xff]  }
 0x13a   : > { %6797 = vmatpush3.bf16.msra.mxu0 %v7481_v32  ;;  %5158 = vmatprep.mubr.bf16.mxu0 %v1450_v31  ;;  %v6526_v41 = vpop.f32.mrf.mxu1 }
 0x13b   : > { %5119 = vmatmul.mubr.bf16.vlgmr.msra.gmra.mxu1 %v1451_v34  ;;  %v6505_v43 = vpop.f32.mrf.mxu0  ;;  %6798 = vmatprep.subr.bf16.mxu0 %v7483_v35 }
 0x13c   : > { %6819 = vmatpush3.bf16.msra.mxu1 %v7482_v33  ;;  %v6506_v45 = vadd.f32 %v6505_v43, %v6504_v38  ;;  %5198 = vmatprep.mubr.bf16.mxu1 %v1454_v37  ;;  %v6527_v47 = vpop.f32.mrf.mxu1  ;;  %v7523_v33 = vld [vmem:[%s8057_s21 + $0x8a8] sm:$0xff]   ;;  %v7525_v38 = vld [vmem:[%s8057_s21 + $0x8e0] sm:$0xff]   ;;  %v7528_v43 = vld [vmem:[%s8057_s21 + $0x858] sm:$0xff]  }
 0x13d   : > { %v6507_v48 = vpop.f32.mrf.mxu0  ;;  %6820 = vmatprep.subr.bf16.mxu1 %v7484_v36  ;;  %v6528_v50 = vadd.f32 %v6527_v47, %v6526_v41  ;;  %v7524_v36 = vld [vmem:[%s8057_s21 + $0x860] sm:$0xff]   ;;  %v7532_v47 = vld [vmem:[%s8057_s21 + $0x850] sm:$0xff]  }
 0x13e   : > { %6799 = vmatpush3.bf16.msra.mxu0 %v7485_v39  ;;  %v6529_v52 = vpop.f32.mrf.mxu1  ;;  %v7527_v41 = vld [vmem:[%s8057_s21 + $0x8a0] sm:$0xff]   ;;  %v7533_v48 = vld [vmem:[%s8057_s21 + $0x8d0] sm:$0xff]  }
 0x13f   : > { %v6508_v53 = vpop.f32.mrf.mxu0  ;;  %6800 = vmatprep.subr.bf16.mxu0 %v7487_v44  ;;  %v8360_v55 = vadd.f32 %v6528_v50, %v6506_v45  ;;  %v7529_v44 = vld [vmem:[%s8057_s21 + $0x8d8] sm:$0xff]   ;;  %v7535_v50 = vld [vmem:[%s8057_s21 + $0x890] sm:$0xff]   ;;  %v7537_v52 = vld [vmem:[%s8057_s21 + $0x8c8] sm:$0xff]  }
 0x140   : > { %6821 = vmatpush3.bf16.msra.mxu1 %v7486_v40  ;;  %v6530_v57 = vpop.f32.mrf.mxu1  ;;  %v7526_v40 = vld [vmem:[%s8057_s21 + $0x820] sm:$0xff]   ;;  %v7530_v45 = vld [vmem:[%s8057_s21 + $0x818] sm:$0xff]  }
 0x141   : > { %6822 = vmatprep.subr.bf16.mxu1 %v7488_v46  ;;  %v7531_v46 = vld [vmem:[%s8057_s21 + $0x898] sm:$0xff]   ;;  %v7539_v57 = vld [vmem:[%s8057_s21 + $0x888] sm:$0xff]  }
 0x142   : > { %6801 = vmatpush3.bf16.msra.mxu0 %v7489_v49  ;;  %v7534_v49 = vld [vmem:[%s8057_s21 + $0x810] sm:$0xff]   ;;  %v287_v53 = vld [vmem:[%s8071_s12 + $0x20] sm:$0xff] }
 0x143   : > { %6802 = vmatprep.subr.bf16.mxu0 %v7491_v54  ;;  %v7538_v54 = vld [vmem:[%s8057_s21 + $0x808] sm:$0xff]  }
 0x144   : > { %6823 = vmatpush3.bf16.msra.mxu1 %v7490_v51  ;;  %v7536_v51 = vld [vmem:[%s8057_s21 + $0x848] sm:$0xff]  }
 0x145   : > { %6824 = vmatprep.subr.bf16.mxu1 %v7492_v56  ;;  %v1455_v56 = vcombine.high %v287_v53, %v287_v53 }
 0x146   : > { %6803 = vmatpush3.bf16.msra.mxu0 %v7493_v58  ;;  %v7540_v58 = vld [vmem:[%s8057_s21 + $0x840] sm:$0xff]  }
 0x147   : > { %6804 = vmatprep.subr.bf16.mxu0 %v7495_v60  ;;  %v8418_v60 = vrot.slane %v1455_v56, %v8110_v42  ;;  %v7580_v56 = vld [vmem:[%s8057_s21 + $0xab8] sm:$0xff]  }
 0x148   : > { %6825 = vmatpush3.bf16.msra.mxu1 %v7494_v59 }
 0x149   : > { %6826 = vmatprep.subr.bf16.mxu1 %v7496_v61  ;;  %v7541_v61 = vld [vmem:[%s8057_s21 + $0x8c0] sm:$0xff]  }
 0x14a   : > { %6805 = vmatpush3.bf16.msra.mxu0 %v7497_v62  ;;  %v7542_v62 = vld [vmem:[%s8057_s21 + $0x800] sm:$0xff]  }
 0x14b   : > { %6806 = vmatprep.subr.bf16.mxu0 %v7499_v0  ;;  %v1471_v0 = vcombine.high %v8418_v60, %v8418_v60 }
 0x14c   : > { %6827 = vmatpush3.bf16.msra.mxu1 %v7498_v63 }
 0x14d   : > { %6828 = vmatprep.subr.bf16.mxu1 %v7500_v1  ;;  %v7543_v1 = vld [vmem:[%s8057_s21 + $0x880] sm:$0xff]  }
 0x14e   : > { %6807 = vmatpush3.bf16.msra.mxu0 %v7501_v2 }
 0x14f   : > { %6808 = vmatprep.subr.bf16.mxu0 %v7503_v4  ;;  %v7544_v4 = vld [vmem:[%s8057_s21 + $0x978] sm:$0xff]  }
 0x150   : > { %6829 = vmatpush3.bf16.msra.mxu1 %v7502_v3 }
 0x151   : > { %6830 = vmatprep.subr.bf16.mxu1 %v7504_v5  ;;  %v7545_v5 = vld [vmem:[%s8057_s21 + $0x9f8] sm:$0xff]  }
 0x152   : > { %6809 = vmatpush3.bf16.msra.mxu0 %v7505_v6  ;;  %v1499_v6 = vrot.slane %v1471_v0, %v8110_v42 }
 0x153   : > { %6810 = vmatprep.subr.bf16.mxu0 %v7507_v8  ;;  %v7547_v8 = vld [vmem:[%s8057_s21 + $0x9b8] sm:$0xff]  }
 0x154   : > { %6831 = vmatpush3.bf16.msra.mxu1 %v7506_v7  ;;  %v7546_v7 = vld [vmem:[%s8057_s21 + $0x938] sm:$0xff]  }
 0x155   : > { %6832 = vmatprep.subr.bf16.mxu1 %v7508_v9 }
 0x156   : > { %6811 = vmatpush3.bf16.msra.mxu0 %v7509_v10  ;;  %v7548_v10 = vld [vmem:[%s8057_s21 + $0x970] sm:$0xff]  }
 0x157   : > { %6840 = vmatprep.subr.bf16.mxu0 %v7512_v13 }
 0x158   : > { %6833 = vmatpush3.bf16.msra.mxu1 %v7510_v11  ;;  %v7549_v11 = vld [vmem:[%s8057_s21 + $0x9f0] sm:$0xff]  }
 0x159   : > { %v6548_v20 = vpop.f32.mrf.mxu0  ;;  %5159 = vmatmul.mubr.bf16.vlgmr.msra.gmra.mxu0 %v1436_v12  ;;  %6862 = vmatprep.subr.bf16.mxu1 %v7513_v14  ;;  %v1503_v12 = vcombine.high %v1499_v6, %v1499_v6  ;;  %v7550_v14 = vld [vmem:[%s8057_s21 + $0x930] sm:$0xff]  }
 0x15a   : > { %6841 = vmatpush3.bf16.msra.mxu0 %v7514_v15  ;;  %v6570_v23 = vpop.f32.mrf.mxu1  ;;  %v7551_v15 = vld [vmem:[%s8057_s21 + $0x9b0] sm:$0xff]  }
 0x15b   : > { %5199 = vmatmul.mubr.bf16.vlgmr.msra.gmra.mxu1 %v1452_v17  ;;  %v6549_v24 = vpop.f32.mrf.mxu0  ;;  %6842 = vmatprep.subr.bf16.mxu0 %v7516_v18  ;;  %v7552_v18 = vld [vmem:[%s8057_s21 + $0x968] sm:$0xff]  }
 0x15c   : > { %6863 = vmatpush3.bf16.msra.mxu1 %v7515_v16  ;;  %v6550_v26 = vadd.f32 %v6549_v24, %v6548_v20  ;;  %v6571_v28 = vpop.f32.mrf.mxu1  ;;  %v7553_v20 = vld [vmem:[%s8057_s21 + $0x9e8] sm:$0xff]  }
 0x15d   : > { %v6551_v29 = vpop.f32.mrf.mxu0  ;;  %6864 = vmatprep.subr.bf16.mxu1 %v7517_v19  ;;  %v6572_v32 = vadd.f32 %v6571_v28, %v6570_v23  ;;  %v7554_v23 = vld [vmem:[%s8057_s21 + $0x928] sm:$0xff]  }
 0x15e   : > { %v4681_v31 = vadd.f32 %v6550_v26, %v8360_v55  ;;  %6843 = vmatpush3.bf16.msra.mxu0 %v7518_v21  ;;  %v6573_v34 = vpop.f32.mrf.mxu1  ;;  %v1462_v55 = vrot.slane %v287_v53, %v8110_v42  ;;  %v7555_v26 = vld [vmem:[%s8057_s21 + $0x9a8] sm:$0xff]   ;;  %v7556_v29 = vld [vmem:[%s8057_s21 + $0x960] sm:$0xff]   ;;  %v7577_v53 = vld [vmem:[%s8057_s21 + $0xa78] sm:$0xff]  }
 0x15f   : > { %v6552_v35 = vpop.f32.mrf.mxu0  ;;  %6844 = vmatprep.subr.bf16.mxu0 %v7520_v25  ;;  %v7559_v34 = vld [vmem:[%s8057_s21 + $0x9a0] sm:$0xff]  }
 0x160   : > { %v8397_v37 = vadd.f32 %v6572_v32, %v4681_v31  ;;  %6865 = vmatpush3.bf16.msra.mxu1 %v7519_v22  ;;  %v6574_v39 = vpop.f32.mrf.mxu1  ;;  %v1470_v59 = vcombine.high %v1462_v55, %v1462_v55  ;;  %v1478_v3 = vrot.slane %v1462_v55, %v8110_v42  ;;  %v7557_v31 = vld [vmem:[%s8057_s21 + $0x9e0] sm:$0xff]   ;;  %v7560_v35 = vld [vmem:[%s8057_s21 + $0x958] sm:$0xff]  }
 0x161   : > { %6866 = vmatprep.subr.bf16.mxu1 %v7521_v27  ;;  %v7564_v39 = vld [vmem:[%s8057_s21 + $0x950] sm:$0xff]   ;;  %v7579_v55 = vld [vmem:[%s8057_s21 + $0xa38] sm:$0xff]  }
 0x162   : > { %6845 = vmatpush3.bf16.msra.mxu0 %v7522_v30  ;;  %v1492_v63 = vrot.slane %v1470_v59, %v8110_v42  ;;  %v1500_v9 = vcombine.high %v1478_v3, %v1478_v3  ;;  %v7582_v59 = vld [vmem:[%s8057_s21 + $0xaf0] sm:$0xff]  }
 0x163   : > { %6846 = vmatprep.subr.bf16.mxu0 %v7524_v36  ;;  %v7561_v36 = vld [vmem:[%s8057_s21 + $0x9d8] sm:$0xff]  }
 0x164   : > { %6867 = vmatpush3.bf16.msra.mxu1 %v7523_v33  ;;  %5238 = vmatprep.mubr.bf16.mxu0 %v1492_v63  ;;  %v1502_v2 = vcombine.high %v1492_v63, %v1492_v63  ;;  %v7558_v33 = vld [vmem:[%s8057_s21 + $0x920] sm:$0xff]  }
 0x165   : > { %6868 = vmatprep.subr.bf16.mxu1 %v7525_v38  ;;  %v7563_v38 = vld [vmem:[%s8057_s21 + $0x998] sm:$0xff]  }
 0x166   : > { %6847 = vmatpush3.bf16.msra.mxu0 %v7526_v40  ;;  %5278 = vmatprep.mubr.bf16.mxu1 %v1502_v2  ;;  %v7565_v40 = vld [vmem:[%s8057_s21 + $0x9d0] sm:$0xff]  }
 0x167   : > { %6848 = vmatprep.subr.bf16.mxu0 %v7528_v43  ;;  %v7567_v43 = vld [vmem:[%s8057_s21 + $0x990] sm:$0xff]  }
 0x168   : > { %6869 = vmatpush3.bf16.msra.mxu1 %v7527_v41  ;;  %v7566_v41 = vld [vmem:[%s8057_s21 + $0x910] sm:$0xff]  }
 0x169   : > { %6870 = vmatprep.subr.bf16.mxu1 %v7529_v44  ;;  %v7568_v44 = vld [vmem:[%s8057_s21 + $0x948] sm:$0xff]  }
 0x16a   : > { %6849 = vmatpush3.bf16.msra.mxu0 %v7530_v45  ;;  %v7569_v45 = vld [vmem:[%s8057_s21 + $0x9c8] sm:$0xff]  }
 0x16b   : > { %6850 = vmatprep.subr.bf16.mxu0 %v7532_v47  ;;  %v7571_v47 = vld [vmem:[%s8057_s21 + $0x988] sm:$0xff]  }
 0x16c   : > { %6871 = vmatpush3.bf16.msra.mxu1 %v7531_v46  ;;  %v7570_v46 = vld [vmem:[%s8057_s21 + $0x908] sm:$0xff]  }
 0x16d   : > { %6872 = vmatprep.subr.bf16.mxu1 %v7533_v48  ;;  %v7572_v48 = vld [vmem:[%s8057_s21 + $0x940] sm:$0xff]  }
 0x16e   : > { %6851 = vmatpush3.bf16.msra.mxu0 %v7534_v49  ;;  %v7573_v49 = vld [vmem:[%s8057_s21 + $0x9c0] sm:$0xff]  }
 0x16f   : > { %6852 = vmatprep.subr.bf16.mxu0 %v7536_v51  ;;  %v7575_v51 = vld [vmem:[%s8057_s21 + $0x980] sm:$0xff]  }
 0x170   : > { %6873 = vmatpush3.bf16.msra.mxu1 %v7535_v50  ;;  %v7574_v50 = vld [vmem:[%s8057_s21 + $0x900] sm:$0xff]  }
 0x171   : > { %6874 = vmatprep.subr.bf16.mxu1 %v7537_v52  ;;  %v1485_v52 = vrot.slane %v8418_v60, %v8110_v42  ;;  %v7583_v60 = vld [vmem:[%s8057_s21 + $0xa30] sm:$0xff]  }
 0x172   : > { %6853 = vmatpush3.bf16.msra.mxu0 %v7538_v54  ;;  %v7578_v54 = vld [vmem:[%s8057_s21 + $0xaf8] sm:$0xff]  }
 0x173   : > { %6854 = vmatprep.subr.bf16.mxu0 %v7540_v58  ;;  %v7581_v58 = vld [vmem:[%s8057_s21 + $0xa70] sm:$0xff]  }
 0x174   : > { %6875 = vmatpush3.bf16.msra.mxu1 %v7539_v57  ;;  %v1501_v57 = vcombine.high %v1485_v52, %v1485_v52 }
 0x175   : > { %6876 = vmatprep.subr.bf16.mxu1 %v7541_v61 }
 0x176   : > { %6855 = vmatpush3.bf16.msra.mxu0 %v7542_v62  ;;  %v7584_v62 = vld [vmem:[%s8057_s21 + $0xab0] sm:$0xff]  }
 0x177   : > { %6884 = vmatprep.subr.bf16.mxu0 %v7544_v4 }
 0x178   : > { %6877 = vmatpush3.bf16.msra.mxu1 %v7543_v1  ;;  %v7585_v1 = vld [vmem:[%s8057_s21 + $0xa68] sm:$0xff]  }
 0x179   : > { %v6592_v13 = vpop.f32.mrf.mxu0  ;;  %5239 = vmatmul.mubr.bf16.vlgmr.msra.gmra.mxu0 %v1478_v3  ;;  %6906 = vmatprep.subr.bf16.mxu1 %v7545_v5  ;;  %v7586_v3 = vld [vmem:[%s8057_s21 + $0xae8] sm:$0xff]  }
 0x17a   : > { %6885 = vmatpush3.bf16.msra.mxu0 %v7546_v7  ;;  %5318 = vmatprep.mubr.bf16.mxu0 %v1499_v6  ;;  %v7587_v6 = vld [vmem:[%s8057_s21 + $0xa28] sm:$0xff]  }
 0x17b   : > { %v6614_v16 = vpop.f32.mrf.mxu1  ;;  %5279 = vmatmul.mubr.bf16.vlgmr.msra.gmra.mxu1 %v1500_v9  ;;  %v6593_v17 = vpop.f32.mrf.mxu0  ;;  %6886 = vmatprep.subr.bf16.mxu0 %v7548_v10  ;;  %v7588_v9 = vld [vmem:[%s8057_s21 + $0xaa8] sm:$0xff]  }
 0x17c   : > { %6907 = vmatpush3.bf16.msra.mxu1 %v7547_v8  ;;  %v6594_v19 = vadd.f32 %v6593_v17, %v6592_v13  ;;  %5358 = vmatprep.mubr.bf16.mxu1 %v1503_v12  ;;  %v7589_v12 = vld [vmem:[%s8057_s21 + $0xa60] sm:$0xff]  }
 0x17d   : > { %v6615_v21 = vpop.f32.mrf.mxu1  ;;  %v6595_v22 = vpop.f32.mrf.mxu0  ;;  %6908 = vmatprep.subr.bf16.mxu1 %v7549_v11  ;;  %v7592_v17 = vld [vmem:[%s8057_s21 + $0xaa0] sm:$0xff]  }
 0x17e   : > { %v4761_v24 = vadd.f32 %v6594_v19, %v8397_v37  ;;  %v6616_v25 = vadd.f32 %v6615_v21, %v6614_v16  ;;  %6887 = vmatpush3.bf16.msra.mxu0 %v7550_v14  ;;  %v7562_v37 = vld [vmem:[%s8057_s21 + $0x918] sm:$0xff]   ;;  %v7590_v14 = vld [vmem:[%s8057_s21 + $0xae0] sm:$0xff]   ;;  %v7597_v22 = vld [vmem:[%s8057_s21 + $0xa50] sm:$0xff]  }
 0x17f   : > { %v6617_v27 = vpop.f32.mrf.mxu1  ;;  %v6596_v28 = vpop.f32.mrf.mxu0  ;;  %6888 = vmatprep.subr.bf16.mxu0 %v7552_v18  ;;  %v7591_v16 = vld [vmem:[%s8057_s21 + $0xa20] sm:$0xff]   ;;  %v7593_v18 = vld [vmem:[%s8057_s21 + $0xa58] sm:$0xff]  }
 0x180   : > { %v8442_v30 = vadd.f32 %v6616_v25, %v4761_v24  ;;  %6909 = vmatpush3.bf16.msra.mxu1 %v7551_v15  ;;  %v7594_v19 = vld [vmem:[%s8057_s21 + $0xad8] sm:$0xff]   ;;  %v7599_v24 = vld [vmem:[%s8057_s21 + $0xa10] sm:$0xff]   ;;  %v7602_v27 = vld [vmem:[%s8057_s21 + $0xac8] sm:$0xff]  }
 0x181   : > { %v6618_v32 = vpop.f32.mrf.mxu1  ;;  %6910 = vmatprep.subr.bf16.mxu1 %v7553_v20  ;;  %v7595_v20 = vld [vmem:[%s8057_s21 + $0xa18] sm:$0xff]   ;;  %v7600_v25 = vld [vmem:[%s8057_s21 + $0xa90] sm:$0xff]   ;;  %v288_v28 = vld [vmem:[%s8071_s12 + $0x28] sm:$0xff] }
 0x182   : > { %6889 = vmatpush3.bf16.msra.mxu0 %v7554_v23  ;;  %v7596_v21 = vld [vmem:[%s8057_s21 + $0xa98] sm:$0xff]   ;;  %v7598_v23 = vld [vmem:[%s8057_s21 + $0xad0] sm:$0xff]   ;;  %v7604_v32 = vld [vmem:[%s8057_s21 + $0xa88] sm:$0xff]  }
 0x183   : > { %6890 = vmatprep.subr.bf16.mxu0 %v7556_v29  ;;  %v7603_v29 = vld [vmem:[%s8057_s21 + $0xa08] sm:$0xff]  }
 0x184   : > { %6911 = vmatpush3.bf16.msra.mxu1 %v7555_v26  ;;  %v7601_v26 = vld [vmem:[%s8057_s21 + $0xa48] sm:$0xff]  }
 0x185   : > { %6912 = vmatprep.subr.bf16.mxu1 %v7557_v31  ;;  %v1504_v31 = vcombine.high %v288_v28, %v288_v28 }
 0x186   : > { %6891 = vmatpush3.bf16.msra.mxu0 %v7558_v33  ;;  %v7605_v33 = vld [vmem:[%s8057_s21 + $0xa40] sm:$0xff]  }
 0x187   : > { %6892 = vmatprep.subr.bf16.mxu0 %v7560_v35  ;;  %v8500_v35 = vrot.slane %v1504_v31, %v8110_v42  ;;  %v7645_v31 = vld [vmem:[%s8057_s21 + $0xcb8] sm:$0xff]  }
 0x188   : > { %6913 = vmatpush3.bf16.msra.mxu1 %v7559_v34 }
 0x189   : > { %6914 = vmatprep.subr.bf16.mxu1 %v7561_v36  ;;  %v7606_v36 = vld [vmem:[%s8057_s21 + $0xac0] sm:$0xff]  }
 0x18a   : > { %6893 = vmatpush3.bf16.msra.mxu0 %v7562_v37  ;;  %v7607_v37 = vld [vmem:[%s8057_s21 + $0xa00] sm:$0xff]  }
 0x18b   : > { %6894 = vmatprep.subr.bf16.mxu0 %v7564_v39  ;;  %v1520_v39 = vcombine.high %v8500_v35, %v8500_v35 }
 0x18c   : > { %6915 = vmatpush3.bf16.msra.mxu1 %v7563_v38 }
 0x18d   : > { %6916 = vmatprep.subr.bf16.mxu1 %v7565_v40  ;;  %v7608_v40 = vld [vmem:[%s8057_s21 + $0xa80] sm:$0xff]  }
 0x18e   : > { %6895 = vmatpush3.bf16.msra.mxu0 %v7566_v41 }
 0x18f   : > { %6896 = vmatprep.subr.bf16.mxu0 %v7568_v44  ;;  %v7609_v44 = vld [vmem:[%s8057_s21 + $0xb78] sm:$0xff]  }
 0x190   : > { %6917 = vmatpush3.bf16.msra.mxu1 %v7567_v43 }
 0x191   : > { %6918 = vmatprep.subr.bf16.mxu1 %v7569_v45  ;;  %v7610_v45 = vld [vmem:[%s8057_s21 + $0xbf8] sm:$0xff]  }
 0x192   : > { %6897 = vmatpush3.bf16.msra.mxu0 %v7570_v46  ;;  %v1548_v46 = vrot.slane %v1520_v39, %v8110_v42 }
 0x193   : > { %6898 = vmatprep.subr.bf16.mxu0 %v7572_v48  ;;  %v7612_v48 = vld [vmem:[%s8057_s21 + $0xbb8] sm:$0xff]  }
 0x194   : > { %6919 = vmatpush3.bf16.msra.mxu1 %v7571_v47  ;;  %v7611_v47 = vld [vmem:[%s8057_s21 + $0xb38] sm:$0xff]  }
 0x195   : > { %6920 = vmatprep.subr.bf16.mxu1 %v7573_v49 }
 0x196   : > { %6899 = vmatpush3.bf16.msra.mxu0 %v7574_v50  ;;  %v7613_v50 = vld [vmem:[%s8057_s21 + $0xb70] sm:$0xff]  }
 0x197   : > { %6928 = vmatprep.subr.bf16.mxu0 %v7577_v53 }
 0x198   : > { %6921 = vmatpush3.bf16.msra.mxu1 %v7575_v51  ;;  %v7614_v51 = vld [vmem:[%s8057_s21 + $0xbf0] sm:$0xff]  }
 0x199   : > { %v6636_v61 = vpop.f32.mrf.mxu0  ;;  %5319 = vmatmul.mubr.bf16.vlgmr.msra.gmra.mxu0 %v1485_v52  ;;  %6950 = vmatprep.subr.bf16.mxu1 %v7578_v54  ;;  %v1552_v52 = vcombine.high %v1548_v46, %v1548_v46  ;;  %v7615_v54 = vld [vmem:[%s8057_s21 + $0xb30] sm:$0xff]  }
 0x19a   : > { %6929 = vmatpush3.bf16.msra.mxu0 %v7579_v55  ;;  %v7616_v55 = vld [vmem:[%s8057_s21 + $0xbb0] sm:$0xff]  }
 0x19b   : > { %v6658_v63 = vpop.f32.mrf.mxu1  ;;  %5359 = vmatmul.mubr.bf16.vlgmr.msra.gmra.mxu1 %v1501_v57  ;;  %v6637_v0 = vpop.f32.mrf.mxu0  ;;  %6930 = vmatprep.subr.bf16.mxu0 %v7581_v58  ;;  %v7617_v58 = vld [vmem:[%s8057_s21 + $0xb68] sm:$0xff]  }
 0x19c   : > { %6951 = vmatpush3.bf16.msra.mxu1 %v7580_v56  ;;  %v6638_v2 = vadd.f32 %v6637_v0, %v6636_v61  ;;  %v7618_v61 = vld [vmem:[%s8057_s21 + $0xbe8] sm:$0xff]  }
 0x19d   : > { %v6659_v4 = vpop.f32.mrf.mxu1  ;;  %v6639_v5 = vpop.f32.mrf.mxu0  ;;  %6952 = vmatprep.subr.bf16.mxu1 %v7582_v59 }
 0x19e   : > { %v4841_v7 = vadd.f32 %v6638_v2, %v8442_v30  ;;  %v6660_v8 = vadd.f32 %v6659_v4, %v6658_v63  ;;  %6931 = vmatpush3.bf16.msra.mxu0 %v7583_v60  ;;  %v1511_v30 = vrot.slane %v288_v28, %v8110_v42  ;;  %v7619_v63 = vld [vmem:[%s8057_s21 + $0xb28] sm:$0xff]   ;;  %v7621_v5 = vld [vmem:[%s8057_s21 + $0xb60] sm:$0xff]   ;;  %v7642_v28 = vld [vmem:[%s8057_s21 + $0xc78] sm:$0xff]  }
 0x19f   : > { %v6661_v10 = vpop.f32.mrf.mxu1  ;;  %v6640_v11 = vpop.f32.mrf.mxu0  ;;  %6932 = vmatprep.subr.bf16.mxu0 %v7585_v1  ;;  %v7620_v2 = vld [vmem:[%s8057_s21 + $0xba8] sm:$0xff]  }
 0x1a0   : > { %v8479_v13 = vadd.f32 %v6660_v8, %v4841_v7  ;;  %6953 = vmatpush3.bf16.msra.mxu1 %v7584_v62  ;;  %v1519_v34 = vcombine.high %v1511_v30, %v1511_v30  ;;  %v1527_v43 = vrot.slane %v1511_v30, %v8110_v42  ;;  %v7622_v7 = vld [vmem:[%s8057_s21 + $0xbe0] sm:$0xff]   ;;  %v7625_v11 = vld [vmem:[%s8057_s21 + $0xb58] sm:$0xff]  }
 0x1a1   : > { %v6662_v15 = vpop.f32.mrf.mxu1  ;;  %6954 = vmatprep.subr.bf16.mxu1 %v7586_v3  ;;  %v7624_v10 = vld [vmem:[%s8057_s21 + $0xba0] sm:$0xff]   ;;  %v7644_v30 = vld [vmem:[%s8057_s21 + $0xc38] sm:$0xff]  }
 0x1a2   : > { %6933 = vmatpush3.bf16.msra.mxu0 %v7587_v6  ;;  %v1541_v38 = vrot.slane %v1519_v34, %v8110_v42  ;;  %v1549_v49 = vcombine.high %v1527_v43, %v1527_v43  ;;  %v7629_v15 = vld [vmem:[%s8057_s21 + $0xb50] sm:$0xff]  }
 0x1a3   : > { %6934 = vmatprep.subr.bf16.mxu0 %v7589_v12  ;;  %v7626_v12 = vld [vmem:[%s8057_s21 + $0xbd8] sm:$0xff]   ;;  %v7647_v34 = vld [vmem:[%s8057_s21 + $0xcf0] sm:$0xff]  }
 0x1a4   : > { %6955 = vmatpush3.bf16.msra.mxu1 %v7588_v9  ;;  %5398 = vmatprep.mubr.bf16.mxu0 %v1541_v38  ;;  %v1551_v41 = vcombine.high %v1541_v38, %v1541_v38  ;;  %v7623_v9 = vld [vmem:[%s8057_s21 + $0xb20] sm:$0xff]  }
 0x1a5   : > { %6956 = vmatprep.subr.bf16.mxu1 %v7590_v14  ;;  %v7628_v14 = vld [vmem:[%s8057_s21 + $0xb98] sm:$0xff]  }
 0x1a6   : > { %6935 = vmatpush3.bf16.msra.mxu0 %v7591_v16  ;;  %5438 = vmatprep.mubr.bf16.mxu1 %v1551_v41  ;;  %v7630_v16 = vld [vmem:[%s8057_s21 + $0xbd0] sm:$0xff]  }
 0x1a7   : > { %6936 = vmatprep.subr.bf16.mxu0 %v7593_v18  ;;  %v7632_v18 = vld [vmem:[%s8057_s21 + $0xb90] sm:$0xff]  }
 0x1a8   : > { %6957 = vmatpush3.bf16.msra.mxu1 %v7592_v17  ;;  %v7631_v17 = vld [vmem:[%s8057_s21 + $0xb10] sm:$0xff]  }
 0x1a9   : > { %6958 = vmatprep.subr.bf16.mxu1 %v7594_v19  ;;  %v7633_v19 = vld [vmem:[%s8057_s21 + $0xb48] sm:$0xff]  }
 0x1aa   : > { %6937 = vmatpush3.bf16.msra.mxu0 %v7595_v20  ;;  %v7634_v20 = vld [vmem:[%s8057_s21 + $0xbc8] sm:$0xff]  }
 0x1ab   : > { %6938 = vmatprep.subr.bf16.mxu0 %v7597_v22  ;;  %v7636_v22 = vld [vmem:[%s8057_s21 + $0xb88] sm:$0xff]  }
 0x1ac   : > { %6959 = vmatpush3.bf16.msra.mxu1 %v7596_v21  ;;  %v7635_v21 = vld [vmem:[%s8057_s21 + $0xb08] sm:$0xff]  }
 0x1ad   : > { %6960 = vmatprep.subr.bf16.mxu1 %v7598_v23  ;;  %v7637_v23 = vld [vmem:[%s8057_s21 + $0xb40] sm:$0xff]  }
 0x1ae   : > { %6939 = vmatpush3.bf16.msra.mxu0 %v7599_v24  ;;  %v7638_v24 = vld [vmem:[%s8057_s21 + $0xbc0] sm:$0xff]  }
 0x1af   : > { %6940 = vmatprep.subr.bf16.mxu0 %v7601_v26  ;;  %v7640_v26 = vld [vmem:[%s8057_s21 + $0xb80] sm:$0xff]  }
 0x1b0   : > { %6961 = vmatpush3.bf16.msra.mxu1 %v7600_v25  ;;  %v7639_v25 = vld [vmem:[%s8057_s21 + $0xb00] sm:$0xff]  }
 0x1b1   : > { %6962 = vmatprep.subr.bf16.mxu1 %v7602_v27  ;;  %v1534_v27 = vrot.slane %v8500_v35, %v8110_v42  ;;  %v7648_v35 = vld [vmem:[%s8057_s21 + $0xc30] sm:$0xff]  }
 0x1b2   : > { %6941 = vmatpush3.bf16.msra.mxu0 %v7603_v29  ;;  %v7643_v29 = vld [vmem:[%s8057_s21 + $0xcf8] sm:$0xff]  }
 0x1b3   : > { %6942 = vmatprep.subr.bf16.mxu0 %v7605_v33  ;;  %v7646_v33 = vld [vmem:[%s8057_s21 + $0xc70] sm:$0xff]  }
 0x1b4   : > { %6963 = vmatpush3.bf16.msra.mxu1 %v7604_v32  ;;  %v1550_v32 = vcombine.high %v1534_v27, %v1534_v27 }
 0x1b5   : > { %6964 = vmatprep.subr.bf16.mxu1 %v7606_v36 }
 0x1b6   : > { %6943 = vmatpush3.bf16.msra.mxu0 %v7607_v37  ;;  %v7649_v37 = vld [vmem:[%s8057_s21 + $0xcb0] sm:$0xff]  }
 0x1b7   : > { %6972 = vmatprep.subr.bf16.mxu0 %v7609_v44 }
 0x1b8   : > { %6965 = vmatpush3.bf16.msra.mxu1 %v7608_v40  ;;  %v7650_v40 = vld [vmem:[%s8057_s21 + $0xc68] sm:$0xff]  }
 0x1b9   : > { %v6680_v53 = vpop.f32.mrf.mxu0  ;;  %5399 = vmatmul.mubr.bf16.vlgmr.msra.gmra.mxu0 %v1527_v43  ;;  %6994 = vmatprep.subr.bf16.mxu1 %v7610_v45  ;;  %v7651_v43 = vld [vmem:[%s8057_s21 + $0xce8] sm:$0xff]  }
 0x1ba   : > { %6973 = vmatpush3.bf16.msra.mxu0 %v7611_v47  ;;  %5478 = vmatprep.mubr.bf16.mxu0 %v1548_v46  ;;  %v7652_v46 = vld [vmem:[%s8057_s21 + $0xc28] sm:$0xff]  }
 0x1bb   : > { %v6702_v56 = vpop.f32.mrf.mxu1  ;;  %5439 = vmatmul.mubr.bf16.vlgmr.msra.gmra.mxu1 %v1549_v49  ;;  %v6681_v57 = vpop.f32.mrf.mxu0  ;;  %6974 = vmatprep.subr.bf16.mxu0 %v7613_v50  ;;  %v7653_v49 = vld [vmem:[%s8057_s21 + $0xca8] sm:$0xff]  }
 0x1bc   : > { %6995 = vmatpush3.bf16.msra.mxu1 %v7612_v48  ;;  %v6682_v59 = vadd.f32 %v6681_v57, %v6680_v53  ;;  %5518 = vmatprep.mubr.bf16.mxu1 %v1552_v52  ;;  %v7654_v52 = vld [vmem:[%s8057_s21 + $0xc60] sm:$0xff]  }
 0x1bd   : > { %v6703_v60 = vpop.f32.mrf.mxu1  ;;  %v6683_v62 = vpop.f32.mrf.mxu0  ;;  %6996 = vmatprep.subr.bf16.mxu1 %v7614_v51  ;;  %v7657_v57 = vld [vmem:[%s8057_s21 + $0xca0] sm:$0xff]  }
 0x1be   : > { %v4921_v0 = vadd.f32 %v6682_v59, %v8479_v13  ;;  %v6704_v1 = vadd.f32 %v6703_v60, %v6702_v56  ;;  %6975 = vmatpush3.bf16.msra.mxu0 %v7615_v54  ;;  %v7627_v13 = vld [vmem:[%s8057_s21 + $0xb18] sm:$0xff]   ;;  %v7655_v54 = vld [vmem:[%s8057_s21 + $0xce0] sm:$0xff]   ;;  %v7662_v62 = vld [vmem:[%s8057_s21 + $0xc50] sm:$0xff]  }
 0x1bf   : > { %v6705_v3 = vpop.f32.mrf.mxu1  ;;  %v6684_v4 = vpop.f32.mrf.mxu0  ;;  %6976 = vmatprep.subr.bf16.mxu0 %v7617_v58  ;;  %v7656_v56 = vld [vmem:[%s8057_s21 + $0xc20] sm:$0xff]   ;;  %v7658_v58 = vld [vmem:[%s8057_s21 + $0xc58] sm:$0xff]  }
 0x1c0   : > { %v8524_v6 = vadd.f32 %v6704_v1, %v4921_v0  ;;  %6997 = vmatpush3.bf16.msra.mxu1 %v7616_v55  ;;  %v7659_v59 = vld [vmem:[%s8057_s21 + $0xcd8] sm:$0xff]   ;;  %v7664_v0 = vld [vmem:[%s8057_s21 + $0xc10] sm:$0xff]   ;;  %v7667_v3 = vld [vmem:[%s8057_s21 + $0xcc8] sm:$0xff]  }
 0x1c1   : > { %v6706_v8 = vpop.f32.mrf.mxu1  ;;  %6998 = vmatprep.subr.bf16.mxu1 %v7618_v61  ;;  %v7660_v61 = vld [vmem:[%s8057_s21 + $0xc18] sm:$0xff]   ;;  %v7665_v1 = vld [vmem:[%s8057_s21 + $0xc90] sm:$0xff]  }
 0x1c2   : > { %6977 = vmatpush3.bf16.msra.mxu0 %v7619_v63  ;;  %v7661_v60 = vld [vmem:[%s8057_s21 + $0xc98] sm:$0xff]   ;;  %v7663_v63 = vld [vmem:[%s8057_s21 + $0xcd0] sm:$0xff]   ;;  %v7670_v8 = vld [vmem:[%s8057_s21 + $0xc40] sm:$0xff]  }
 0x1c3   : > { %6978 = vmatprep.subr.bf16.mxu0 %v7621_v5  ;;  %v289_v4 = vld [vmem:[%s8071_s12 + $0x30] sm:$0xff] }
 0x1c4   : > { %6999 = vmatpush3.bf16.msra.mxu1 %v7620_v2  ;;  %v7666_v2 = vld [vmem:[%s8057_s21 + $0xc48] sm:$0xff]  }
 0x1c5   : > { %7000 = vmatprep.subr.bf16.mxu1 %v7622_v7  ;;  %v7668_v5 = vld [vmem:[%s8057_s21 + $0xc08] sm:$0xff]   ;;  %v1553_v7 = vcombine.high %v289_v4, %v289_v4 }
 0x1c6   : > { %6979 = vmatpush3.bf16.msra.mxu0 %v7623_v9  ;;  %v7669_v9 = vld [vmem:[%s8057_s21 + $0xc88] sm:$0xff]  }
 0x1c7   : > { %6980 = vmatprep.subr.bf16.mxu0 %v7625_v11  ;;  %v8582_v11 = vrot.slane %v1553_v7, %v8110_v42 }
 0x1c8   : > { %7001 = vmatpush3.bf16.msra.mxu1 %v7624_v10 }
 0x1c9   : > { %7002 = vmatprep.subr.bf16.mxu1 %v7626_v12  ;;  %v7671_v12 = vld [vmem:[%s8057_s21 + $0xcc0] sm:$0xff]  }
 0x1ca   : > { %6981 = vmatpush3.bf16.msra.mxu0 %v7627_v13  ;;  %v7672_v13 = vld [vmem:[%s8057_s21 + $0xc00] sm:$0xff]  }
 0x1cb   : > { %6982 = vmatprep.subr.bf16.mxu0 %v7629_v15  ;;  %v1569_v15 = vcombine.high %v8582_v11, %v8582_v11 }
 0x1cc   : > { %7003 = vmatpush3.bf16.msra.mxu1 %v7628_v14 }
 0x1cd   : > { %7004 = vmatprep.subr.bf16.mxu1 %v7630_v16 }
 0x1ce   : > { %6983 = vmatpush3.bf16.msra.mxu0 %v7631_v17  ;;  %v7674_v17 = vld [vmem:[%s8057_s21 + $0xd78] sm:$0xff]  }
 0x1cf   : > { %6984 = vmatprep.subr.bf16.mxu0 %v7633_v19 }
 0x1d0   : > { %7005 = vmatpush3.bf16.msra.mxu1 %v7632_v18  ;;  %v7673_v18 = vld [vmem:[%s8057_s21 + $0xc80] sm:$0xff]  }
 0x1d1   : > { %7006 = vmatprep.subr.bf16.mxu1 %v7634_v20  ;;  %v1597_v20 = vrot.slane %v1569_v15, %v8110_v42  ;;  %v7715_v15 = vld [vmem:[%s8057_s21 + $0xe68] sm:$0xff]  }
 0x1d2   : > { %6985 = vmatpush3.bf16.msra.mxu0 %v7635_v21  ;;  %v7675_v21 = vld [vmem:[%s8057_s21 + $0xdf8] sm:$0xff]  }
 0x1d3   : > { %6986 = vmatprep.subr.bf16.mxu0 %v7637_v23 }
 0x1d4   : > { %7007 = vmatpush3.bf16.msra.mxu1 %v7636_v22  ;;  %v7676_v22 = vld [vmem:[%s8057_s21 + $0xd38] sm:$0xff]  }
 0x1d5   : > { %7008 = vmatprep.subr.bf16.mxu1 %v7638_v24  ;;  %v7678_v24 = vld [vmem:[%s8057_s21 + $0xd70] sm:$0xff]  }
 0x1d6   : > { %6987 = vmatpush3.bf16.msra.mxu0 %v7639_v25  ;;  %v7677_v25 = vld [vmem:[%s8057_s21 + $0xdb8] sm:$0xff]  }
 0x1d7   : > { %7016 = vmatprep.subr.bf16.mxu0 %v7642_v28  ;;  %v7679_v28 = vld [vmem:[%s8057_s21 + $0xdf0] sm:$0xff]  }
 0x1d8   : > { %7009 = vmatpush3.bf16.msra.mxu1 %v7640_v26  ;;  %v1601_v26 = vcombine.high %v1597_v20, %v1597_v20 }
 0x1d9   : > { %v6724_v36 = vpop.f32.mrf.mxu0  ;;  %5479 = vmatmul.mubr.bf16.vlgmr.msra.gmra.mxu0 %v1534_v27  ;;  %7038 = vmatprep.subr.bf16.mxu1 %v7643_v29  ;;  %v7680_v29 = vld [vmem:[%s8057_s21 + $0xd30] sm:$0xff]  }
 0x1da   : > { %7017 = vmatpush3.bf16.msra.mxu0 %v7644_v30 }
 0x1db   : > { %v6746_v38 = vpop.f32.mrf.mxu1  ;;  %5519 = vmatmul.mubr.bf16.vlgmr.msra.gmra.mxu1 %v1550_v32  ;;  %v6725_v39 = vpop.f32.mrf.mxu0  ;;  %7018 = vmatprep.subr.bf16.mxu0 %v7646_v33  ;;  %v7682_v32 = vld [vmem:[%s8057_s21 + $0xd68] sm:$0xff]  }
 0x1dc   : > { %7039 = vmatpush3.bf16.msra.mxu1 %v7645_v31  ;;  %v6726_v41 = vadd.f32 %v6725_v39, %v6724_v36 }
 0x1dd   : > { %v6747_v44 = vpop.f32.mrf.mxu1  ;;  %v6727_v45 = vpop.f32.mrf.mxu0  ;;  %7040 = vmatprep.subr.bf16.mxu1 %v7647_v34  ;;  %v7681_v34 = vld [vmem:[%s8057_s21 + $0xdb0] sm:$0xff]  }
 0x1de   : > { %v5001_v47 = vadd.f32 %v6726_v41, %v8524_v6  ;;  %v6748_v48 = vadd.f32 %v6747_v44, %v6746_v38  ;;  %7019 = vmatpush3.bf16.msra.mxu0 %v7648_v35  ;;  %v1560_v6 = vrot.slane %v289_v4, %v8110_v42  ;;  %v7686_v44 = vld [vmem:[%s8057_s21 + $0xd60] sm:$0xff]  }
 0x1df   : > { %v6749_v50 = vpop.f32.mrf.mxu1  ;;  %v6728_v51 = vpop.f32.mrf.mxu0  ;;  %7020 = vmatprep.subr.bf16.mxu0 %v7650_v40  ;;  %v7684_v40 = vld [vmem:[%s8057_s21 + $0xd28] sm:$0xff]   ;;  %v7705_v4 = vld [vmem:[%s8057_s21 + $0xd80] sm:$0xff]  }
 0x1e0   : > { %v8561_v53 = vadd.f32 %v6748_v48, %v5001_v47  ;;  %7041 = vmatpush3.bf16.msra.mxu1 %v7649_v37  ;;  %v1568_v10 = vcombine.high %v1560_v6, %v1560_v6  ;;  %v1576_v16 = vrot.slane %v1560_v6, %v8110_v42  ;;  %v7683_v37 = vld [vmem:[%s8057_s21 + $0xde8] sm:$0xff]   ;;  %v7687_v48 = vld [vmem:[%s8057_s21 + $0xde0] sm:$0xff]   ;;  %v7690_v50 = vld [vmem:[%s8057_s21 + $0xd58] sm:$0xff]  }
 0x1e1   : > { %v6750_v55 = vpop.f32.mrf.mxu1  ;;  %7042 = vmatprep.subr.bf16.mxu1 %v7651_v43  ;;  %v7689_v51 = vld [vmem:[%s8057_s21 + $0xda0] sm:$0xff]   ;;  %v7709_v6 = vld [vmem:[%s8057_s21 + $0xe38] sm:$0xff]  }
 0x1e2   : > { %7021 = vmatpush3.bf16.msra.mxu0 %v7652_v46  ;;  %v1590_v14 = vrot.slane %v1568_v10, %v8110_v42  ;;  %v1598_v23 = vcombine.high %v1576_v16, %v1576_v16  ;;  %v7685_v46 = vld [vmem:[%s8057_s21 + $0xda8] sm:$0xff]   ;;  %v7693_v55 = vld [vmem:[%s8057_s21 + $0xd98] sm:$0xff]  }
 0x1e3   : > { %7022 = vmatprep.subr.bf16.mxu0 %v7654_v52  ;;  %v7691_v52 = vld [vmem:[%s8057_s21 + $0xdd8] sm:$0xff]  }
 0x1e4   : > { %7043 = vmatpush3.bf16.msra.mxu1 %v7653_v49  ;;  %5558 = vmatprep.mubr.bf16.mxu0 %v1590_v14  ;;  %v1600_v19 = vcombine.high %v1590_v14, %v1590_v14  ;;  %v7688_v49 = vld [vmem:[%s8057_s21 + $0xd20] sm:$0xff]  }
 0x1e5   : > { %7044 = vmatprep.subr.bf16.mxu1 %v7655_v54  ;;  %v7694_v54 = vld [vmem:[%s8057_s21 + $0xd50] sm:$0xff]  }
 0x1e6   : > { %7023 = vmatpush3.bf16.msra.mxu0 %v7656_v56  ;;  %5598 = vmatprep.mubr.bf16.mxu1 %v1600_v19  ;;  %v7695_v56 = vld [vmem:[%s8057_s21 + $0xdd0] sm:$0xff]  }
 0x1e7   : > { %7024 = vmatprep.subr.bf16.mxu0 %v7658_v58  ;;  %v7698_v58 = vld [vmem:[%s8057_s21 + $0xd48] sm:$0xff]  }
 0x1e8   : > { %7045 = vmatpush3.bf16.msra.mxu1 %v7657_v57  ;;  %v7696_v57 = vld [vmem:[%s8057_s21 + $0xd10] sm:$0xff]  }
 0x1e9   : > { %7046 = vmatprep.subr.bf16.mxu1 %v7659_v59  ;;  %v7697_v59 = vld [vmem:[%s8057_s21 + $0xd90] sm:$0xff]  }
 0x1ea   : > { %7025 = vmatpush3.bf16.msra.mxu0 %v7660_v61  ;;  %v7699_v61 = vld [vmem:[%s8057_s21 + $0xdc8] sm:$0xff]  }
 0x1eb   : > { %7026 = vmatprep.subr.bf16.mxu0 %v7662_v62  ;;  %v7702_v62 = vld [vmem:[%s8057_s21 + $0xd40] sm:$0xff]  }
 0x1ec   : > { %7047 = vmatpush3.bf16.msra.mxu1 %v7661_v60  ;;  %v7700_v60 = vld [vmem:[%s8057_s21 + $0xd08] sm:$0xff]  }
 0x1ed   : > { %7048 = vmatprep.subr.bf16.mxu1 %v7663_v63  ;;  %v7701_v63 = vld [vmem:[%s8057_s21 + $0xd88] sm:$0xff]  }
 0x1ee   : > { %7027 = vmatpush3.bf16.msra.mxu0 %v7664_v0  ;;  %v7703_v0 = vld [vmem:[%s8057_s21 + $0xdc0] sm:$0xff]  }
 0x1ef   : > { %7028 = vmatprep.subr.bf16.mxu0 %v7666_v2  ;;  %v1583_v2 = vrot.slane %v8582_v11, %v8110_v42  ;;  %v7712_v11 = vld [vmem:[%s8057_s21 + $0xef0] sm:$0xff]  }
 0x1f0   : > { %7049 = vmatpush3.bf16.msra.mxu1 %v7665_v1  ;;  %v7704_v1 = vld [vmem:[%s8057_s21 + $0xd00] sm:$0xff]  }
 0x1f1   : > { %7050 = vmatprep.subr.bf16.mxu1 %v7667_v3  ;;  %v7707_v3 = vld [vmem:[%s8057_s21 + $0xe78] sm:$0xff]   ;;  %v1599_v7 = vcombine.high %v1583_v2, %v1583_v2 }
 0x1f2   : > { %7029 = vmatpush3.bf16.msra.mxu0 %v7668_v5  ;;  %v7708_v5 = vld [vmem:[%s8057_s21 + $0xef8] sm:$0xff]  }
 0x1f3   : > { %7030 = vmatprep.subr.bf16.mxu0 %v7670_v8  ;;  %v7711_v8 = vld [vmem:[%s8057_s21 + $0xe70] sm:$0xff]  }
 0x1f4   : > { %7051 = vmatpush3.bf16.msra.mxu1 %v7669_v9  ;;  %v7710_v9 = vld [vmem:[%s8057_s21 + $0xeb8] sm:$0xff]  }
 0x1f5   : > { %7052 = vmatprep.subr.bf16.mxu1 %v7671_v12  ;;  %v7713_v12 = vld [vmem:[%s8057_s21 + $0xe30] sm:$0xff]  }
 0x1f6   : > { %7031 = vmatpush3.bf16.msra.mxu0 %v7672_v13 }
 0x1f7   : > { %7060 = vmatprep.subr.bf16.mxu0 %v7674_v17  ;;  %v7714_v17 = vld [vmem:[%s8057_s21 + $0xeb0] sm:$0xff]  }
 0x1f8   : > { %7053 = vmatpush3.bf16.msra.mxu1 %v7673_v18 }
 0x1f9   : > { %v6768_v27 = vpop.f32.mrf.mxu0  ;;  %5559 = vmatmul.mubr.bf16.vlgmr.msra.gmra.mxu0 %v1576_v16  ;;  %7082 = vmatprep.subr.bf16.mxu1 %v7675_v21 }
 0x1fa   : > { %7061 = vmatpush3.bf16.msra.mxu0 %v7676_v22  ;;  %5638 = vmatprep.mubr.bf16.mxu0 %v1597_v20  ;;  %v7716_v20 = vld [vmem:[%s8057_s21 + $0xee8] sm:$0xff]  }
 0x1fb   : > { %v6790_v30 = vpop.f32.mrf.mxu1  ;;  %5599 = vmatmul.mubr.bf16.vlgmr.msra.gmra.mxu1 %v1598_v23  ;;  %v6769_v31 = vpop.f32.mrf.mxu0  ;;  %7062 = vmatprep.subr.bf16.mxu0 %v7678_v24  ;;  %v7717_v23 = vld [vmem:[%s8057_s21 + $0xe28] sm:$0xff]  }
 0x1fc   : > { %7083 = vmatpush3.bf16.msra.mxu1 %v7677_v25  ;;  %v6770_v33 = vadd.f32 %v6769_v31, %v6768_v27  ;;  %5678 = vmatprep.mubr.bf16.mxu1 %v1601_v26  ;;  %v7719_v26 = vld [vmem:[%s8057_s21 + $0xe60] sm:$0xff]  }
 0x1fd   : > { %v6791_v36 = vpop.f32.mrf.mxu1  ;;  %v6771_v35 = vpop.f32.mrf.mxu0  ;;  %7084 = vmatprep.subr.bf16.mxu1 %v7679_v28  ;;  %v7718_v28 = vld [vmem:[%s8057_s21 + $0xea8] sm:$0xff]   ;;  %v7721_v31 = vld [vmem:[%s8057_s21 + $0xe20] sm:$0xff]  }
 0x1fe   : > { %v5081_v38 = vadd.f32 %v6770_v33, %v8561_v53  ;;  %v6792_v39 = vadd.f32 %v6791_v36, %v6790_v30  ;;  %7063 = vmatpush3.bf16.msra.mxu0 %v7680_v29  ;;  %v7692_v53 = vld [vmem:[%s8057_s21 + $0xd18] sm:$0xff]   ;;  %v7720_v30 = vld [vmem:[%s8057_s21 + $0xee0] sm:$0xff]   ;;  %v7727_v35 = vld [vmem:[%s8057_s21 + $0xe50] sm:$0xff]  }
 0x1ff   : > { %v6793_v41 = vpop.f32.mrf.mxu1  ;;  %v6772_v43 = vpop.f32.mrf.mxu0  ;;  %7064 = vmatprep.subr.bf16.mxu0 %v7682_v32  ;;  %v7723_v32 = vld [vmem:[%s8057_s21 + $0xe58] sm:$0xff]   ;;  %v7722_v33 = vld [vmem:[%s8057_s21 + $0xea0] sm:$0xff]  }
 0x200   : > { %v8605_v45 = vadd.f32 %v6792_v39, %v5081_v38  ;;  %7085 = vmatpush3.bf16.msra.mxu1 %v7681_v34  ;;  %v7724_v34 = vld [vmem:[%s8057_s21 + $0xed8] sm:$0xff]   ;;  %v7728_v38 = vld [vmem:[%s8057_s21 + $0xed0] sm:$0xff]   ;;  %v7732_v43 = vld [vmem:[%s8057_s21 + $0xec8] sm:$0xff]  }
 0x201   : > { %v6794_v47 = vpop.f32.mrf.mxu1  ;;  %7086 = vmatprep.subr.bf16.mxu1 %v7683_v37  ;;  %v7725_v36 = vld [vmem:[%s8057_s21 + $0xe18] sm:$0xff]   ;;  %v7729_v39 = vld [vmem:[%s8057_s21 + $0xe10] sm:$0xff]  }
 0x202   : > { %7065 = vmatpush3.bf16.msra.mxu0 %v7684_v40  ;;  %v7726_v37 = vld [vmem:[%s8057_s21 + $0xe98] sm:$0xff]   ;;  %v7731_v40 = vld [vmem:[%s8057_s21 + $0xe48] sm:$0xff]   ;;  %v7730_v41 = vld [vmem:[%s8057_s21 + $0xe90] sm:$0xff]  }
 0x203   : > { %7066 = vmatprep.subr.bf16.mxu0 %v7686_v44  ;;  %v5991_v44 = vld.sshfl [vmem:[%s8071_s12 + $0x38] sm:$0x33 pattern:$0x75316420]  ;;  %v7735_v47 = vld [vmem:[%s8057_s21 + $0xe40] sm:$0xff]  }
 0x204   : > { %7087 = vmatpush3.bf16.msra.mxu1 %v7685_v46  ;;  %v1609_v46 = vcombine.high %v5991_v44, %v5991_v44 }
 0x205   : > { %7088 = vmatprep.subr.bf16.mxu1 %v7687_v48  ;;  %v7734_v48 = vld [vmem:[%s8057_s21 + $0xe88] sm:$0xff]  }
 0x206   : > { %7067 = vmatpush3.bf16.msra.mxu0 %v7688_v49  ;;  %v1623_v49 = vrot.slane %v1609_v46, %v8110_v42 }
 0x207   : > { %7068 = vmatprep.subr.bf16.mxu0 %v7690_v50  ;;  %v7736_v50 = vld [vmem:[%s8057_s21 + $0xec0] sm:$0xff]  }
 0x208   : > { %7089 = vmatpush3.bf16.msra.mxu1 %v7689_v51  ;;  %v7737_v51 = vld [vmem:[%s8057_s21 + $0xe00] sm:$0xff]  }
 0x209   : > { %7090 = vmatprep.subr.bf16.mxu1 %v7691_v52  ;;  %v1625_v52 = vcombine.high %v1623_v49, %v1623_v49 }
 0x20a   : > { %7069 = vmatpush3.bf16.msra.mxu0 %v7692_v53  ;;  %v1616_v53 = vrot.slane %v5991_v44, %v8110_v42 }
 0x20b   : > { %7070 = vmatprep.subr.bf16.mxu0 %v7694_v54  ;;  %v7738_v54 = vld [vmem:[%s8057_s21 + $0xe80] sm:$0xff]  }
 0x20c   : > { %7091 = vmatpush3.bf16.msra.mxu1 %v7693_v55  ;;  %v1624_v55 = vcombine.high %v1616_v53, %v1616_v53 }
 0x20d   : > { %7092 = vmatprep.subr.bf16.mxu1 %v7695_v56 }
 0x20e   : > { %7071 = vmatpush3.bf16.msra.mxu0 %v7696_v57 }
 0x20f   : > { %7072 = vmatprep.subr.bf16.mxu0 %v7698_v58 }
 0x210   : > { %7093 = vmatpush3.bf16.msra.mxu1 %v7697_v59 }
 0x211   : > { %7094 = vmatprep.subr.bf16.mxu1 %v7699_v61 }
 0x212   : > { %7073 = vmatpush3.bf16.msra.mxu0 %v7700_v60 }
 0x213   : > { %7074 = vmatprep.subr.bf16.mxu0 %v7702_v62 }
 0x214   : > { %7095 = vmatpush3.bf16.msra.mxu1 %v7701_v63 }
 0x215   : > { %7096 = vmatprep.subr.bf16.mxu1 %v7703_v0 }
 0x216   : > { %7075 = vmatpush3.bf16.msra.mxu0 %v7704_v1 }
 0x217   : > { %7104 = vmatprep.subr.bf16.mxu0 %v7707_v3 }
 0x218   : > { %7097 = vmatpush3.bf16.msra.mxu1 %v7705_v4 }
 0x219   : > { %v6812_v10 = vpop.f32.mrf.mxu0  ;;  %5639 = vmatmul.mubr.bf16.vlgmr.msra.gmra.mxu0 %v1583_v2  ;;  %7126 = vmatprep.subr.bf16.mxu1 %v7708_v5 }
 0x21a   : > { %7105 = vmatpush3.bf16.msra.mxu0 %v7709_v6  ;;  %5718 = vmatprep.mubr.bf16.mxu0 %v1623_v49 }
 0x21b   : > { %v6834_v13 = vpop.f32.mrf.mxu1  ;;  %5679 = vmatmul.mubr.bf16.vlgmr.msra.gmra.mxu1 %v1599_v7  ;;  %v6813_v14 = vpop.f32.mrf.mxu0  ;;  %7106 = vmatprep.subr.bf16.mxu0 %v7711_v8 }
 0x21c   : > { %7127 = vmatpush3.bf16.msra.mxu1 %v7710_v9  ;;  %v6814_v16 = vadd.f32 %v6813_v14, %v6812_v10  ;;  %5758 = vmatprep.mubr.bf16.mxu1 %v1625_v52 }
 0x21d   : > { %v6835_v18 = vpop.f32.mrf.mxu1  ;;  %v6815_v19 = vpop.f32.mrf.mxu0  ;;  %7128 = vmatprep.subr.bf16.mxu1 %v7712_v11 }
 0x21e   : > { %v5161_v21 = vadd.f32 %v6814_v16, %v8605_v45  ;;  %v6836_v22 = vadd.f32 %v6835_v18, %v6834_v13  ;;  %7107 = vmatpush3.bf16.msra.mxu0 %v7713_v12  ;;  %v7733_v45 = vld [vmem:[%s8057_s21 + $0xe08] sm:$0xff]  }
 0x21f   : > { %v6837_v24 = vpop.f32.mrf.mxu1  ;;  %v6816_v25 = vpop.f32.mrf.mxu0  ;;  %7108 = vmatprep.subr.bf16.mxu0 %v7715_v15 }
 0x220   : > { %v5201_v27 = vadd.f32 %v6836_v22, %v5161_v21  ;;  %7129 = vmatpush3.bf16.msra.mxu1 %v7714_v17 }
 0x221   : > { %v6838_v29 = vpop.f32.mrf.mxu1  ;;  %7130 = vmatprep.subr.bf16.mxu1 %v7716_v20 }
 0x222   : > { %7109 = vmatpush3.bf16.msra.mxu0 %v7717_v23 }
 0x223   : > { %7110 = vmatprep.subr.bf16.mxu0 %v7719_v26 }
 0x224   : > { %7131 = vmatpush3.bf16.msra.mxu1 %v7718_v28 }
 0x225   : > { %7132 = vmatprep.subr.bf16.mxu1 %v7720_v30 }
 0x226   : > { %7111 = vmatpush3.bf16.msra.mxu0 %v7721_v31 }
 0x227   : > { %7112 = vmatprep.subr.bf16.mxu0 %v7723_v32 }
 0x228   : > { %7133 = vmatpush3.bf16.msra.mxu1 %v7722_v33 }
 0x229   : > { %7134 = vmatprep.subr.bf16.mxu1 %v7724_v34 }
 0x22a   : > { %7113 = vmatpush3.bf16.msra.mxu0 %v7725_v36 }
 0x22b   : > { %7114 = vmatprep.subr.bf16.mxu0 %v7727_v35 }
 0x22c   : > { %7135 = vmatpush3.bf16.msra.mxu1 %v7726_v37 }
 0x22d   : > { %7136 = vmatprep.subr.bf16.mxu1 %v7728_v38 }
 0x22e   : > { %7115 = vmatpush3.bf16.msra.mxu0 %v7729_v39 }
 0x22f   : > { %7116 = vmatprep.subr.bf16.mxu0 %v7731_v40 }
 0x230   : > { %7137 = vmatpush3.bf16.msra.mxu1 %v7730_v41 }
 0x231   : > { %7138 = vmatprep.subr.bf16.mxu1 %v7732_v43 }
 0x232   : > { %7117 = vmatpush3.bf16.msra.mxu0 %v7733_v45 }
 0x233   : > { %7118 = vmatprep.subr.bf16.mxu0 %v7735_v47 }
 0x234   : > { %7139 = vmatpush3.bf16.msra.mxu1 %v7734_v48 }
 0x235   : > { %7140 = vmatprep.subr.bf16.mxu1 %v7736_v50 }
 0x236   : > { %7119 = vmatpush3.bf16.msra.mxu0 %v7737_v51 }
 0x238   : > { %7141 = vmatpush3.bf16.msra.mxu1 %v7738_v54 }
 0x239   : > { %v6856_v56 = vpop.f32.mrf.mxu0  ;;  %5719 = vmatmul.mubr.bf16.vlgmr.msra.gmra.mxu0 %v1616_v53 }
 0x23b   : > { %v6878_v57 = vpop.f32.mrf.mxu1  ;;  %5759 = vmatmul.mubr.bf16.vlgmr.msra.gmra.mxu1 %v1624_v55  ;;  %v6857_v58 = vpop.f32.mrf.mxu0 }
 0x23c   : > { %v6858_v59 = vadd.f32 %v6857_v58, %v6856_v56 }
 0x23d   : > { %v6879_v61 = vpop.f32.mrf.mxu1  ;;  %v6859_v60 = vpop.f32.mrf.mxu0 }
 0x23e   : > { %v5241_v62 = vadd.f32 %v6858_v59, %v5201_v27  ;;  %v6880_v63 = vadd.f32 %v6879_v61, %v6878_v57 }
 0x23f   : > { %v6881_v0 = vpop.f32.mrf.mxu1  ;;  %v6860_v1 = vpop.f32.mrf.mxu0 }
 0x240   : > { %v5281_v42 = vadd.f32 %v6880_v63, %v5241_v62 }
 0x241   : > { %v6882_v2 = vpop.f32.mrf.mxu1 }
 0x259   : > { %v6900_v3 = vpop.f32.mrf.mxu0 }
 0x25b   : > { %v6922_v4 = vpop.f32.mrf.mxu1  ;;  %v6901_v5 = vpop.f32.mrf.mxu0 }
 0x25c   : > { %v6902_v6 = vadd.f32 %v6901_v5, %v6900_v3 }
 0x25d   : > { %v6923_v7 = vpop.f32.mrf.mxu1  ;;  %v6903_v8 = vpop.f32.mrf.mxu0 }
 0x25e   : > { %v5321_v9 = vadd.f32 %v6902_v6, %v5281_v42  ;;  %v6924_v10 = vadd.f32 %v6923_v7, %v6922_v4  ;;  %v282_v7 = vld [vmem:[#allocation2] sm:$0x3] }
 0x25f   : > { %v6925_v11 = vpop.f32.mrf.mxu1  ;;  %v6904_v12 = vpop.f32.mrf.mxu0 }
 0x260   : > { %v5361_v13 = vadd.f32 %v6924_v10, %v5321_v9 }
 0x261   : > { %v6926_v14 = vpop.f32.mrf.mxu1 }
 0x279   : > { %v6944_v15 = vpop.f32.mrf.mxu0 }
 0x27b   : > { %v6966_v16 = vpop.f32.mrf.mxu1  ;;  %v6945_v17 = vpop.f32.mrf.mxu0 }
 0x27c   : > { %v6946_v18 = vadd.f32 %v6945_v17, %v6944_v15 }
 0x27d   : > { %v6967_v19 = vpop.f32.mrf.mxu1  ;;  %v6947_v20 = vpop.f32.mrf.mxu0 }
 0x27e   : > { %v5401_v21 = vadd.f32 %v6946_v18, %v5361_v13  ;;  %v6968_v22 = vadd.f32 %v6967_v19, %v6966_v16 }
 0x27f   : > { %v6969_v23 = vpop.f32.mrf.mxu1  ;;  %v6948_v24 = vpop.f32.mrf.mxu0 }
 0x280   : > { %v5441_v25 = vadd.f32 %v6968_v22, %v5401_v21 }
 0x281   : > { %v6970_v26 = vpop.f32.mrf.mxu1 }
 0x299   : > { %v6988_v27 = vpop.f32.mrf.mxu0 }
 0x29b   : > { %v7010_v28 = vpop.f32.mrf.mxu1  ;;  %v6989_v29 = vpop.f32.mrf.mxu0 }
 0x29c   : > { %v6990_v30 = vadd.f32 %v6989_v29, %v6988_v27 }
 0x29d   : > { %v7011_v31 = vpop.f32.mrf.mxu1  ;;  %v6991_v32 = vpop.f32.mrf.mxu0 }
 0x29e   : > { %v5481_v33 = vadd.f32 %v6990_v30, %v5441_v25  ;;  %v7012_v34 = vadd.f32 %v7011_v31, %v7010_v28 }
 0x29f   : > { %v7013_v36 = vpop.f32.mrf.mxu1  ;;  %v6992_v35 = vpop.f32.mrf.mxu0 }
 0x2a0   : > { %v5521_v37 = vadd.f32 %v7012_v34, %v5481_v33 }
 0x2a1   : > { %v7014_v38 = vpop.f32.mrf.mxu1 }
 0x2b9   : > { %v7032_v39 = vpop.f32.mrf.mxu0 }
 0x2bb   : > { %v7054_v40 = vpop.f32.mrf.mxu1  ;;  %v7033_v41 = vpop.f32.mrf.mxu0 }
 0x2bc   : > { %v7034_v56 = vadd.f32 %v7033_v41, %v7032_v39 }
 0x2bd   : > { %v7055_v43 = vpop.f32.mrf.mxu1  ;;  %v7035_v44 = vpop.f32.mrf.mxu0 }
 0x2be   : > { %v5561_v57 = vadd.f32 %v7034_v56, %v5521_v37  ;;  %v7056_v58 = vadd.f32 %v7055_v43, %v7054_v40 }
 0x2bf   : > { %v7057_v45 = vpop.f32.mrf.mxu1  ;;  %v7036_v46 = vpop.f32.mrf.mxu0 }
 0x2c0   : > { %v5601_v61 = vadd.f32 %v7056_v58, %v5561_v57 }
 0x2c1   : > { %v7058_v47 = vpop.f32.mrf.mxu1 }
 0x2d9   : > { %v7076_v48 = vpop.f32.mrf.mxu0 }
 0x2db   : > { %v7098_v49 = vpop.f32.mrf.mxu1  ;;  %v7077_v50 = vpop.f32.mrf.mxu0 }
 0x2dc   : > { %v7078_v59 = vadd.f32 %v7077_v50, %v7076_v48 }
 0x2dd   : > { %v7099_v51 = vpop.f32.mrf.mxu1  ;;  %v7079_v52 = vpop.f32.mrf.mxu0 }
 0x2de   : > { %v5641_v60 = vadd.f32 %v7078_v59, %v5601_v61  ;;  %v7100_v62 = vadd.f32 %v7099_v51, %v7098_v49 }
 0x2df   : > { %v7101_v53 = vpop.f32.mrf.mxu1  ;;  %v7080_v54 = vpop.f32.mrf.mxu0 }
 0x2e0   : > { %v5681_v42 = vadd.f32 %v7100_v62, %v5641_v60 }
 0x2e1   : > { %v7102_v55 = vpop.f32.mrf.mxu1 }
 0x2f9   : > { %v7120_v63 = vpop.f32.mrf.mxu0 }
 0x2fb   : > { %v7142_v0 = vpop.f32.mrf.mxu1  ;;  %v7121_v1 = vpop.f32.mrf.mxu0 }
 0x2fc   : > { %v7122_v2 = vadd.f32 %v7121_v1, %v7120_v63 }
 0x2fd   : > { %v7143_v3 = vpop.f32.mrf.mxu1  ;;  %v7123_v4 = vpop.f32.mrf.mxu0 }
 0x2fe   : > { %v5721_v5 = vadd.f32 %v7122_v2, %v5681_v42  ;;  %v7144_v6 = vadd.f32 %v7143_v3, %v7142_v0 }
 0x2ff   : > { %v7145_v8 = vpop.f32.mrf.mxu1  ;;  %v7124_v9 = vpop.f32.mrf.mxu0 }
 0x300   : > { %v5761_v10 = vadd.f32 %v7144_v6, %v5721_v5  ;;  %5771 = sbr.rel (%p6472_p11) target bundleno = 1005 (0x3ed), region = 60 }
 0x301   : > { %v7146_v11 = vpop.f32.mrf.mxu1 }
 0x302   : > { %v5766_v12 = vadd.f32 %v5761_v10, %v282_v7 }
 0x304   : > { %5767 = vst [vmem:[#allocation2] sm:$0x3] %v5766_v12 }
 0x305   : > { %v7739_v13 = vld [vmem:[%s8718_s3 + $0x38] sm:$0xff]   ;;  %v7902_v14 = vmov 0.0   ;;  %v7740_v15 = vld [vmem:[%s8718_s3 + $0x30] sm:$0xff]   ;;  %vm7903_vm0 = vmmov 0   ;;  %v7741_v16 = vld [vmem:[%s8718_s3 + $0x28] sm:$0xff]   ;;  %vm5894_vm1 = vcmask 287744  }
 0x306   : > { %7157 = vmatprep.subr.bf16.mxu0 %v7902_v14  ;;  %7173 = vmatprep.mubr.msk.bf16.mxu0 %vm7903_vm0, %v7902_v14  ;;  %v7742_v17 = vld [vmem:[%s8718_s3 + $0x20] sm:$0xff]   ;;  %v7743_v18 = vld [vmem:[%s8718_s3 + $0x18] sm:$0xff]   ;;  %v7744_v19 = vld [vmem:[%s8718_s3 + $0x10] sm:$0xff]  }
 0x307   : > { %7158 = vmatpush3.bf16.msra.mxu0 %v7739_v13  ;;  %v6473_v21 = vld [vmem:[#allocation6] ss:$0 sm:$0xff]  ;;  %v7745_v23 = vld [vmem:[%s8718_s3 + $0x8] sm:$0xff]   ;;  %v6474_v27 = vld [vmem:[#allocation8] ss:$0 sm:$0xff] }
 0x308   : > { %7159 = vmatprep.subr.bf16.mxu0 %v7902_v14  ;;  %v7746_v25 = vld [vmem:[%s8718_s3] sm:$0xff]  }
 0x30b   : > { %7160 = vmatpush3.bf16.msra.mxu0 %v7740_v15  ;;  %v5772_v20 = vld [vmem:[#allocation2] sm:$0x3] }
 0x30c   : > { %7161 = vmatprep.subr.bf16.mxu0 %v7902_v14  ;;  %v5780_v22 = vadd.f32 %v6473_v21, %v5772_v20 }
 0x30e   : > { %v5781_v24 = vmax.f32 %v5780_v22, 0.0 }
 0x30f   : > { %7162 = vmatpush3.bf16.msra.mxu0 %v7741_v16 }
 0x310   : > { %7163 = vmatprep.subr.bf16.mxu0 %v7902_v14  ;;  %v5782_v26 = vpack.c.bf16 %v5781_v24, %v5781_v24 }
 0x313   : > { %7164 = vmatpush3.bf16.msra.mxu0 %v7742_v17 }
 0x314   : > { %7165 = vmatprep.subr.bf16.mxu0 %v7902_v14 }
 0x317   : > { %7166 = vmatpush3.bf16.msra.mxu0 %v7743_v18 }
 0x318   : > { %7167 = vmatprep.subr.bf16.mxu0 %v7902_v14 }
 0x31b   : > { %7168 = vmatpush3.bf16.msra.mxu0 %v7744_v19 }
 0x31c   : > { %7169 = vmatprep.subr.bf16.mxu0 %v7902_v14 }
 0x31f   : > { %7170 = vmatpush3.bf16.msra.mxu0 %v7745_v23 }
 0x320   : > { %7171 = vmatprep.subr.bf16.mxu0 %v7902_v14 }
 0x323   : > { %7172 = vmatpush3.bf16.msra.mxu0 %v7746_v25 }
 0x326   : > { %7174 = vmatmul.mubr.bf16.vlgmr.msra.gmra.mxu0 %v5782_v26 }
 0x3e6   : > { %v5888_v28 = vpop.f32.mrf.mxu0 }
 0x3e7   : > { %v5889_v29 = vadd.f32 %v6474_v27, %v5888_v28 }
 0x3e8   : > { %v7175_v30 = vpop.f32.mrf.mxu0 }
 0x3e9   : > { %5895 = vst.msk [vmem:[#allocation9] sm:$0x3] %vm5894_vm1, %v5889_v29 }
 0x3ea   : > { %v5891_v31 = vpop.f32.mrf.mxu0 }
 0x3ec   : > { %v7176_v32 = vpop.f32.mrf.mxu0 }
 0x3ed PF: > { %p7209_p4 = scmp.eq.s32.totalorder %s7954_s22, 4  ;;  %s7904_s29 = smov [#allocation9]  }
 0x3ee   : > { %s5903_s10 = sshll.u32 %s7904_s29, 4  ;;  %s5904_s10 = int_to_ptr.vmem [resolvable:$true] %s5903_s10 }
 0x3ef   : > { %s7827_s8 = scalar_lea.vmem %s5904_s10, 32  ;;  %p7834_p7 = scmp.lt.s32.totalorder %s5904_s10, %s5904_s10 }
 0x3f0   : > { %p7828_p12 = scmp.ne.s32.totalorder %s5904_s10, %s7827_s8  ;;  %p7835_p5 = scmp.lt.s32.totalorder %s7827_s8, %s7827_s8 }
 0x3f2   : > { %p7829_p2 = pnand %p7828_p12, %p7209_p4  ;;  %p7836_p9 = por %p7835_p5, %p7834_p7 }
 0x3f4   : > { %p7830_p3 = pneg %p7829_p2 }
 0x3f6   : > { %p7837_p8 = pnand %p7836_p9, %p7830_p3 }
 0x3f8   : > { %7840 = shalt.err (!%p7837_p8)
}
 0x3f9   : > { %7190 = dma.vmem_to_hbm [thread:$0]  (%p7209_p4), %s5904_s10, 32, %s8720_s5, [#allocation5]  }
 0x3fa   : > { %7876 = dma.done.wait (%p7209_p4), [#allocation5], 32  }
 0x3fb   : > { %7878 = vsyncadd (%p7209_p4), [#allocation5], 4294967264 }
 0x3fc PF: > { %p17_p10 = scmp.ge.s32.totalorder %s7957_s23, 7   ;;  %s8734_s18 = smov %s7885_s19 }
 0x3fd   : > { %s8735_s19 = smov %s7889_s20  ;;  %s8736_s20 = smov %s7967_s26 }
 0x3fe   : > { %s8737_s21 = smov %s7957_s23  ;;  %19 = sbr.rel (!%p17_p10) target bundleno = 5 (0x5), region = 96 }
 0x403   :  { %5916 = vsyncpa [#allocation4], 1 }
 0x404   :  { %5918 = vsyncpa [#allocation4 + $0x1], 1 }
 0x405   :  { %5919 = vsyncpa [#allocation7], 1 }
 0x406   :  { %5920 = vsyncpa [#allocation5], 1 }
 0x407   :  { %5922 = vsyncpa [#allocation5 + $0x1], 1 }

</bundles_post_ra>
